<compile_context>
chip_gen: v6e
topology: v6e:2x2x1
jax: 0.10.0
libtpu: 0.0.40
codegen_flags: <defaults>
</compile_context>

<pallas_src>
import functools
import math

import jax
import jax.numpy as jnp
from jax import lax
from jax.experimental import pallas as pl
from jax.experimental.pallas import tpu as pltpu

LN_EPS = 1e-5  # torch.nn.LayerNorm default eps


def _layernorm(x, gamma, beta):
    """fp32 LayerNorm over the last axis; gamma/beta broadcast (1, C)."""
    mu = jnp.mean(x, axis=-1, keepdims=True)
    var = jnp.mean(jnp.square(x - mu), axis=-1, keepdims=True)
    return (x - mu) * lax.rsqrt(var + LN_EPS) * gamma + beta


def _gelu_tanh(x):
    """tanh-approx GELU (transcendental goes to the EUP slot)."""
    c = math.sqrt(2.0 / math.pi)
    return 0.5 * x * (1.0 + jnp.tanh(c * (x + 0.044715 * x * x * x)))


def transformer_stack_kernel(n_head, n_layer, t_seq,
                             x_ref, mask_ref,
                             ln1_g_ref, ln1_b_ref, wqkv_ref, wp_ref, bp_ref,
                             ln2_g_ref, ln2_b_ref, w1_ref, b1_ref,
                             w2_ref, b2_ref, lnf_g_ref, lnf_b_ref,
                             o_ref, carry_ref):
    """One (batch_block, layer) grid step: x += sa(ln1(x)); x += ffwd(ln2(x)).

    Residual stream is carried in VMEM scratch across the layer axis; the
    final LayerNorm output (bf16) is written to o_ref on the last layer only.
    """
    layer = pl.program_id(1)
    R, C = carry_ref.shape            # R = rows per block = (B/batch_blocks)*T
    T = t_seq
    H = n_head
    hs = C // H
    nb = R // T                        # batch elements inside this block

    @pl.when(layer == 0)
    def _():
        carry_ref[...] = x_ref[...]    # seed the residual stream (fp32)

    x = carry_ref[...]                 # (R, C) fp32

    # ---------------- attention sub-block: x + proj(MHA(ln1(x))) -------------
    xn = _layernorm(x, ln1_g_ref[0], ln1_b_ref[0])
    # fused qkv projection, rows-tall matmul; attention scale pre-folded into
    # the q columns of wqkv at init.
    qkv = jnp.dot(xn.astype(jnp.bfloat16), wqkv_ref[0],
                  preferred_element_type=jnp.float32)        # (R, 3C)
    qkv = qkv.astype(jnp.bfloat16)

    mask = mask_ref[...]                                     # (T, T) additive fp32

    # static unrolled loop over (batch-in-block, head): 2-D lane slices only,
    # no (T, H, hs) intermediates, no swapaxes.
    attn_rows = []
    for b in range(nb):
        r0 = b * T
        head_outs = []
        for h in range(H):
            c0 = h * hs
            qh = qkv[r0:r0 + T, 0 * C + c0:0 * C + c0 + hs]  # (T, hs) bf16
            kh = qkv[r0:r0 + T, 1 * C + c0:1 * C + c0 + hs]
            vh = qkv[r0:r0 + T, 2 * C + c0:2 * C + c0 + hs]
            # q @ k^T without explicit transpose (contract last dims), fp32 acc
            s = lax.dot_general(qh, kh, (((1,), (1,)), ((), ())),
                                preferred_element_type=jnp.float32)  # (T, T)
            s = s + mask                                     # additive causal mask
            m = jnp.max(s, axis=-1, keepdims=True)
            e = jnp.exp(s - m)
            p = e * pl.reciprocal(jnp.sum(e, axis=-1, keepdims=True), approx=True)
            oh = jnp.dot(p.astype(jnp.bfloat16), vh,
                         preferred_element_type=jnp.float32)  # (T, hs)
            head_outs.append(oh.astype(jnp.bfloat16))
        attn_rows.append(jnp.concatenate(head_outs, axis=-1))  # (T, C)
    attn = attn_rows[0] if nb == 1 else jnp.concatenate(attn_rows, axis=0)

    proj = jnp.dot(attn, wp_ref[0],
                   preferred_element_type=jnp.float32) + bp_ref[0]
    x = x + proj                                             # residual

    # ---------------- feed-forward sub-block: x + W2(gelu(W1 ln2(x))) --------
    xn2 = _layernorm(x, ln2_g_ref[0], ln2_b_ref[0])
    h1 = jnp.dot(xn2.astype(jnp.bfloat16), w1_ref[0],
                 preferred_element_type=jnp.float32) + b1_ref[0]
    h1 = _gelu_tanh(h1)
    y = jnp.dot(h1.astype(jnp.bfloat16), w2_ref[0],
                preferred_element_type=jnp.float32) + b2_ref[0]
    x = x + y                                                # residual

    @pl.when(layer < n_layer - 1)
    def _():
        carry_ref[...] = x                                   # carry to next layer

    @pl.when(layer == n_layer - 1)
    def _():
        # fused final LayerNorm; bf16 output feeds lm_head directly
        o_ref[...] = _layernorm(x, lnf_g_ref[...], lnf_b_ref[...]).astype(o_ref.dtype)


def lm_head_kernel(x_ref, w_ref, b_ref, o_ref):
    """Pure (tm, C) x (C, tn) matmul + bias; LN already done in the stack."""
    o_ref[...] = (jnp.dot(x_ref[...], w_ref[...],
                          preferred_element_type=jnp.float32) + b_ref[...])


def run_transformer_stack(x2d, mask, stack, lnf_g, lnf_b, *,
                          T, n_head, n_layer, batch_blocks):
    M, C = x2d.shape                      # M = B * T
    rows = M // batch_blocks

    def wmap(bb, l):                      # per-layer weight blocks
        return (l, 0, 0)

    def xmap(bb, l):                      # activation block, constant across layers
        return (bb, 0)

    def cmap(bb, l):                      # shared constants (mask, lnf), DMA'd once
        return (0, 0)

    in_specs = [
        pl.BlockSpec((rows, C), xmap),             # x (seed of residual stream)
        pl.BlockSpec((T, T), cmap),                # additive causal mask
        pl.BlockSpec((1, 1, C), wmap),             # ln1_g
        pl.BlockSpec((1, 1, C), wmap),             # ln1_b
        pl.BlockSpec((1, C, 3 * C), wmap),         # wqkv (bf16, q cols pre-scaled)
        pl.BlockSpec((1, C, C), wmap),             # wp   (bf16)
        pl.BlockSpec((1, 1, C), wmap),             # bp
        pl.BlockSpec((1, 1, C), wmap),             # ln2_g
        pl.BlockSpec((1, 1, C), wmap),             # ln2_b
        pl.BlockSpec((1, C, 4 * C), wmap),         # w1   (bf16)
        pl.BlockSpec((1, 1, 4 * C), wmap),         # b1
        pl.BlockSpec((1, 4 * C, C), wmap),         # w2   (bf16)
        pl.BlockSpec((1, 1, C), wmap),             # b2
        pl.BlockSpec((1, C), cmap),                # lnf_g
        pl.BlockSpec((1, C), cmap),                # lnf_b
    ]
    # NOTE(v7x): at C ~>= 1024 re-derive the per-layer weight VMEM plan for the
    # 64 MiB budget (e.g. tile the 4C FFN dim); at these sizes it is < 2 MiB.
    return pl.pallas_call(
        functools.partial(transformer_stack_kernel, n_head, n_layer, T),
        out_shape=jax.ShapeDtypeStruct((M, C), jnp.bfloat16),
        grid=(batch_blocks, n_layer),
        in_specs=in_specs,
        out_specs=pl.BlockSpec((rows, C), xmap),
        scratch_shapes=[pltpu.VMEM((rows, C), jnp.float32)],   # residual carry
        compiler_params=pltpu.CompilerParams(
            dimension_semantics=("parallel", "arbitrary"),
            vmem_limit_bytes=32 * 1024 * 1024),
    )(x2d, mask, stack['ln1_g'], stack['ln1_b'], stack['wqkv'], stack['wp'],
      stack['bp'], stack['ln2_g'], stack['ln2_b'], stack['w1'], stack['b1'],
      stack['w2'], stack['b2'], lnf_g, lnf_b)


def run_lm_head(x2d, wlm, blm, *, tm=None, tn=None):
    M, C = x2d.shape
    Vp = wlm.shape[1]
    if tn is None:
        tn = min(512, Vp)                 # wide, lane-dense output tiles
    assert Vp % tn == 0
    if tm is None:
        tm = 256 if M % 256 == 0 else 128
    Mp = ((M + tm - 1) // tm) * tm
    if Mp != M:
        x2d = jnp.pad(x2d, ((0, Mp - M), (0, 0)))
    grid = (Mp // tm, Vp // tn)
    out = pl.pallas_call(
        lm_head_kernel,
        out_shape=jax.ShapeDtypeStruct((Mp, Vp), jnp.float32),
        grid=grid,
        in_specs=[
            pl.BlockSpec((tm, C), lambda i, j: (i, 0)),     # x rows (bf16)
            pl.BlockSpec((C, tn), lambda i, j: (0, j)),     # lm_head W (bf16)
            pl.BlockSpec((1, tn), lambda i, j: (0, j)),     # lm_head bias
        ],
        out_specs=pl.BlockSpec((tm, tn), lambda i, j: (i, j)),
        compiler_params=pltpu.CompilerParams(
            dimension_semantics=("parallel", "parallel"),
            vmem_limit_bytes=32 * 1024 * 1024),
    )(x2d, wlm, blm)
    return out[:M]


def init_params(key, vocab_size, n_embd, n_head, n_layer, block_size):
    del n_head  # shapes only depend on n_embd (heads are stacked along lanes)
    C = n_embd
    tn_target = 512
    Vp = ((vocab_size + 127) // 128) * 128           # lane-pad the vocab axis
    if Vp > tn_target:
        Vp = ((vocab_size + tn_target - 1) // tn_target) * tn_target
    k_tok, k_pos, k_lm, k_qkv, k_wp, k_w1, k_w2 = jax.random.split(key, 7)

    def nrm(k, shape, scale=0.02):
        return scale * jax.random.normal(k, shape, jnp.float32)

    # fold the n_embd**-0.5 attention scale of the reference into the q columns
    wqkv = nrm(k_qkv, (n_layer, C, 3 * C))
    wqkv = wqkv.at[:, :, :C].multiply(C ** -0.5)
    wqkv = wqkv.astype(jnp.bfloat16)

    wlm = jnp.zeros((C, Vp), jnp.bfloat16)
    wlm = wlm.at[:, :vocab_size].set(nrm(k_lm, (C, vocab_size)).astype(jnp.bfloat16))

    return {
        'tok_emb': nrm(k_tok, (vocab_size, C)),
        'pos_emb': nrm(k_pos, (block_size, C)),
        'lnf_g': jnp.ones((1, C), jnp.float32),
        'lnf_b': jnp.zeros((1, C), jnp.float32),
        'wlm': wlm,                                  # (C, Vp) bf16, pre-transposed
        'blm': jnp.zeros((1, Vp), jnp.float32),
        'stack': {
            # per-layer weights stacked along a leading layer dim,
            # matmul weights pre-transposed to (in, out) and stored bf16
            'ln1_g': jnp.ones((n_layer, 1, C), jnp.float32),
            'ln1_b': jnp.zeros((n_layer, 1, C), jnp.float32),
            'wqkv':  wqkv,
            'wp':    nrm(k_wp, (n_layer, C, C)).astype(jnp.bfloat16),
            'bp':    jnp.zeros((n_layer, 1, C), jnp.float32),
            'ln2_g': jnp.ones((n_layer, 1, C), jnp.float32),
            'ln2_b': jnp.zeros((n_layer, 1, C), jnp.float32),
            'w1':    nrm(k_w1, (n_layer, C, 4 * C)).astype(jnp.bfloat16),
            'b1':    jnp.zeros((n_layer, 1, 4 * C), jnp.float32),
            'w2':    nrm(k_w2, (n_layer, 4 * C, C)).astype(jnp.bfloat16),
            'b2':    jnp.zeros((n_layer, 1, C), jnp.float32),
        },
    }


def bigram_forward(params, idx, *, n_head, n_layer, vocab_size):
    """forward(idx, target=None) -> logits (B, T, vocab_size); loss is None."""
    B, T = idx.shape
    C = params['tok_emb'].shape[1]
    # Embedding gather + positional add stay as (cheap) XLA glue.
    tok = jnp.take(params['tok_emb'], idx, axis=0)            # (B, T, C)
    pos = params['pos_emb'][:T][None, :, :]                   # (1, T, C)
    x2d = (tok + pos).astype(jnp.float32).reshape(B * T, C)   # batch folded into rows

    # additive causal mask, built once and shared by every (batch, layer) step
    r = jnp.arange(T)
    mask = jnp.where(r[None, :] <= r[:, None], 0.0, -1e30).astype(jnp.float32)

    # one row-block by default (128-row matmuls, weights fetched once/layer);
    # split into two "parallel" blocks for v7x's two TCs when rows stay >= 128.
    batch_blocks = 2 if (B % 2 == 0 and (B // 2) * T >= 128) else 1

    xn = run_transformer_stack(x2d, mask, params['stack'], params['lnf_g'],
                               params['lnf_b'], T=T, n_head=n_head,
                               n_layer=n_layer, batch_blocks=batch_blocks)
    logits = run_lm_head(xn, params['wlm'], params['blm'])
    return logits.reshape(B, T, -1)[..., :vocab_size]
    # TODO(synk): cross-entropy loss path (target is not None) and the
    # autoregressive generate() sampling loop are not kerneled; only the
    # target=None forward is implemented.


if __name__ == "__main__":
    # Small, lane-aligned shapes consistent with the module (scaled-down
    # hyperparams: n_embd multiple of 128, n_head divides n_embd).
    vocab_size, n_embd, n_head, n_layer, block_size = 65, 128, 4, 2, 64
    B, T = 2, 64

    key = jax.random.PRNGKey(0)
    pkey, ikey = jax.random.split(key)
    params = init_params(pkey, vocab_size, n_embd, n_head, n_layer, block_size)
    idx = jax.random.randint(ikey, (B, T), 0, vocab_size, dtype=jnp.int32)

    fwd = jax.jit(functools.partial(bigram_forward, n_head=n_head,
                                    n_layer=n_layer, vocab_size=vocab_size))
    logits = fwd(params, idx)
    logits = jax.block_until_ready(logits)

    assert logits.shape == (B, T, vocab_size), logits.shape
    assert bool(jnp.all(jnp.isfinite(logits)))
    print("KERNEL_OK")
</pallas_src>

<mosaic_0001>
module attributes {stable_mosaic.version = 11 : i64} {
  func.func @lm_head_kernel(%arg0: i32, %arg1: i32, %arg2: memref<128x128xbf16, #tpu.memory_space<vmem>>, %arg3: memref<128x128xbf16, #tpu.memory_space<vmem>>, %arg4: memref<1x128xf32, #tpu.memory_space<vmem>>, %arg5: memref<128x128xf32, #tpu.memory_space<vmem>>) attributes {dimension_semantics = [#tpu.dimension_semantics<parallel>, #tpu.dimension_semantics<parallel>], iteration_bounds = array<i64: 1, 1>, scalar_prefetch = 0 : i64, scratch_operands = 0 : i64, tpu.core_type = #tpu.core_type<tc>, window_params = [{transform_indices = @transform_0, window_bounds = array<i64: 128, 128>}, {transform_indices = @transform_1, window_bounds = array<i64: 128, 128>}, {transform_indices = @transform_2, window_bounds = array<i64: 1, 128>}, {transform_indices = @transform_3, window_bounds = array<i64: 128, 128>}]} {
    %c0 = arith.constant 0 : index
    %c0_0 = arith.constant 0 : index
    %0 = vector.load %arg2[%c0, %c0_0] : memref<128x128xbf16, #tpu.memory_space<vmem>>, vector<128x128xbf16>
    %c0_1 = arith.constant 0 : index
    %c0_2 = arith.constant 0 : index
    %1 = vector.load %arg3[%c0_1, %c0_2] : memref<128x128xbf16, #tpu.memory_space<vmem>>, vector<128x128xbf16>
    %cst = arith.constant dense<0.000000e+00> : vector<128x128xf32>
    %2 = tpu.matmul %0, %1, %cst {dimension_numbers = #tpu.dot_dimension_numbers<[1], [0], [0], [1], [0, 0, 1, 1], [], []>} : vector<128x128xbf16>, vector<128x128xbf16>, vector<128x128xf32> -> vector<128x128xf32>
    %c0_3 = arith.constant 0 : index
    %c0_4 = arith.constant 0 : index
    %3 = vector.load %arg4[%c0_3, %c0_4] : memref<1x128xf32, #tpu.memory_space<vmem>>, vector<1x128xf32>
    %4 = vector.broadcast %3 : vector<1x128xf32> to vector<128x128xf32>
    %5 = arith.addf %2, %4 : vector<128x128xf32>
    %c0_5 = arith.constant 0 : index
    %c0_6 = arith.constant 0 : index
    %6 = vector.load %arg5[%c0_5, %c0_6] : memref<128x128xf32, #tpu.memory_space<vmem>>, vector<128x128xf32>
    tpu.vector_store %arg5[%c0_5, %c0_6], %5 {strides = array<i32>} : memref<128x128xf32, #tpu.memory_space<vmem>>, vector<128x128xf32>,
    return
  }
  func.func @transform_0(%arg0: i32, %arg1: i32) -> (i32, i32) {
    %c0_i32 = arith.constant 0 : i32
    %c0_i32_0 = arith.constant 0 : i32
    return %arg0, %c0_i32 : i32, i32
  }
  func.func @transform_1(%arg0: i32, %arg1: i32) -> (i32, i32) {
    %c0_i32 = arith.constant 0 : i32
    %c0_i32_0 = arith.constant 0 : i32
    return %c0_i32, %arg1 : i32, i32
  }
  func.func @transform_2(%arg0: i32, %arg1: i32) -> (i32, i32) {
    %c0_i32 = arith.constant 0 : i32
    %c0_i32_0 = arith.constant 0 : i32
    return %c0_i32, %arg1 : i32, i32
  }
  func.func @transform_3(%arg0: i32, %arg1: i32) -> (i32, i32) {
    %c0_i32 = arith.constant 0 : i32
    return %arg0, %arg1 : i32, i32
  }
}

module attributes {stable_mosaic.version = 11 : i64} {
  func.func @transformer_stack_kernel(%arg0: i32, %arg1: i32, %arg2: memref<128x128xf32, #tpu.memory_space<vmem>>, %arg3: memref<64x64xf32, #tpu.memory_space<vmem>>, %arg4: memref<1x1x128xf32, #tpu.memory_space<vmem>>, %arg5: memref<1x1x128xf32, #tpu.memory_space<vmem>>, %arg6: memref<1x128x384xbf16, #tpu.memory_space<vmem>>, %arg7: memref<1x128x128xbf16, #tpu.memory_space<vmem>>, %arg8: memref<1x1x128xf32, #tpu.memory_space<vmem>>, %arg9: memref<1x1x128xf32, #tpu.memory_space<vmem>>, %arg10: memref<1x1x128xf32, #tpu.memory_space<vmem>>, %arg11: memref<1x128x512xbf16, #tpu.memory_space<vmem>>, %arg12: memref<1x1x512xf32, #tpu.memory_space<vmem>>, %arg13: memref<1x512x128xbf16, #tpu.memory_space<vmem>>, %arg14: memref<1x1x128xf32, #tpu.memory_space<vmem>>, %arg15: memref<1x128xf32, #tpu.memory_space<vmem>>, %arg16: memref<1x128xf32, #tpu.memory_space<vmem>>, %arg17: memref<128x128xbf16, #tpu.memory_space<vmem>>, %arg18: memref<128x128xf32, #tpu.memory_space<vmem>>) attributes {dimension_semantics = [#tpu.dimension_semantics<parallel>, #tpu.dimension_semantics<arbitrary>], iteration_bounds = array<i64: 1, 2>, scalar_prefetch = 0 : i64, scratch_operands = 1 : i64, tpu.core_type = #tpu.core_type<tc>, window_params = [{transform_indices = @transform_0, window_bounds = array<i64: 128, 128>}, {pipeline_mode = #tpu.pipeline_mode<synchronous>, transform_indices = @transform_1, window_bounds = array<i64: 64, 64>}, {transform_indices = @transform_2, window_bounds = array<i64: 1, 1, 128>}, {transform_indices = @transform_3, window_bounds = array<i64: 1, 1, 128>}, {transform_indices = @transform_4, window_bounds = array<i64: 1, 128, 384>}, {transform_indices = @transform_5, window_bounds = array<i64: 1, 128, 128>}, {transform_indices = @transform_6, window_bounds = array<i64: 1, 1, 128>}, {transform_indices = @transform_7, window_bounds = array<i64: 1, 1, 128>}, {transform_indices = @transform_8, window_bounds = array<i64: 1, 1, 128>}, {transform_indices = @transform_9, window_bounds = array<i64: 1, 128, 512>}, {transform_indices = @transform_10, window_bounds = array<i64: 1, 1, 512>}, {transform_indices = @transform_11, window_bounds = array<i64: 1, 512, 128>}, {transform_indices = @transform_12, window_bounds = array<i64: 1, 1, 128>}, {pipeline_mode = #tpu.pipeline_mode<synchronous>, transform_indices = @transform_13, window_bounds = array<i64: 1, 128>}, {pipeline_mode = #tpu.pipeline_mode<synchronous>, transform_indices = @transform_14, window_bounds = array<i64: 1, 128>}, {transform_indices = @transform_15, window_bounds = array<i64: 128, 128>}]} {
    %c0_i32 = arith.constant 0 : i32
    %0 = arith.cmpi eq, %arg1, %c0_i32 : i32
    %1 = arith.extui %0 : i1 to i32
    %c0_i32_0 = arith.constant 0 : i32
    %2 = arith.cmpi ne, %1, %c0_i32_0 : i32
    scf.if %2 {
      %c0_89 = arith.constant 0 : index
      %c0_90 = arith.constant 0 : index
      %253 = vector.load %arg2[%c0_89, %c0_90] : memref<128x128xf32, #tpu.memory_space<vmem>>, vector<128x128xf32>
      %c0_91 = arith.constant 0 : index
      %c0_92 = arith.constant 0 : index
      %254 = vector.load %arg18[%c0_91, %c0_92] : memref<128x128xf32, #tpu.memory_space<vmem>>, vector<128x128xf32>
      tpu.vector_store %arg18[%c0_91, %c0_92], %253 {strides = array<i32>} : memref<128x128xf32, #tpu.memory_space<vmem>>, vector<128x128xf32>,
    } else {
    }
    %c0 = arith.constant 0 : index
    %c0_1 = arith.constant 0 : index
    %3 = vector.load %arg18[%c0, %c0_1] : memref<128x128xf32, #tpu.memory_space<vmem>>, vector<128x128xf32>
    %c0_2 = arith.constant 0 : index
    %c0_3 = arith.constant 0 : index
    %c0_4 = arith.constant 0 : index
    %4 = vector.load %arg4[%c0_2, %c0_3, %c0_4] : memref<1x1x128xf32, #tpu.memory_space<vmem>>, vector<1x1x128xf32>
    %5 = vector.shape_cast %4 : vector<1x1x128xf32> to vector<1x128xf32>
    %c0_5 = arith.constant 0 : index
    %c0_6 = arith.constant 0 : index
    %c0_7 = arith.constant 0 : index
    %6 = vector.load %arg5[%c0_5, %c0_6, %c0_7] : memref<1x1x128xf32, #tpu.memory_space<vmem>>, vector<1x1x128xf32>
    %7 = vector.shape_cast %6 : vector<1x1x128xf32> to vector<1x128xf32>
    %cst = arith.constant dense<0.000000e+00> : vector<128xf32>
    %8 = vector.multi_reduction <add>, %3, %cst [1] : vector<128x128xf32> to vector<128xf32>
    %9 = vector.shape_cast %8 : vector<128xf32> to vector<128x1xf32>
    %cst_8 = arith.constant 1.280000e+02 : f32
    %10 = vector.broadcast %cst_8 : f32 to vector<128x1xf32>
    %11 = arith.divf %9, %10 : vector<128x1xf32>
    %12 = vector.broadcast %11 : vector<128x1xf32> to vector<128x128xf32>
    %13 = arith.subf %3, %12 : vector<128x128xf32>
    %14 = arith.mulf %13, %13 : vector<128x128xf32>
    %cst_9 = arith.constant dense<0.000000e+00> : vector<128xf32>
    %15 = vector.multi_reduction <add>, %14, %cst_9 [1] : vector<128x128xf32> to vector<128xf32>
    %16 = vector.shape_cast %15 : vector<128xf32> to vector<128x1xf32>
    %cst_10 = arith.constant 1.280000e+02 : f32
    %17 = vector.broadcast %cst_10 : f32 to vector<128x1xf32>
    %18 = arith.divf %16, %17 : vector<128x1xf32>
    %19 = vector.broadcast %11 : vector<128x1xf32> to vector<128x128xf32>
    %20 = arith.subf %3, %19 : vector<128x128xf32>
    %cst_11 = arith.constant 9.99999974E-6 : f32
    %21 = vector.broadcast %cst_11 : f32 to vector<128x1xf32>
    %22 = arith.addf %18, %21 : vector<128x1xf32>
    %23 = math.rsqrt %22 : vector<128x1xf32>
    %24 = vector.broadcast %23 : vector<128x1xf32> to vector<128x128xf32>
    %25 = arith.mulf %20, %24 : vector<128x128xf32>
    %26 = vector.broadcast %5 : vector<1x128xf32> to vector<128x128xf32>
    %27 = arith.mulf %25, %26 : vector<128x128xf32>
    %28 = vector.broadcast %7 : vector<1x128xf32> to vector<128x128xf32>
    %29 = arith.addf %27, %28 : vector<128x128xf32>
    %30 = arith.truncf %29 : vector<128x128xf32> to vector<128x128xbf16>
    %c0_12 = arith.constant 0 : index
    %c0_13 = arith.constant 0 : index
    %c0_14 = arith.constant 0 : index
    %31 = vector.load %arg6[%c0_12, %c0_13, %c0_14] : memref<1x128x384xbf16, #tpu.memory_space<vmem>>, vector<1x128x384xbf16>
    %32 = vector.shape_cast %31 : vector<1x128x384xbf16> to vector<128x384xbf16>
    %cst_15 = arith.constant dense<0.000000e+00> : vector<128x384xf32>
    %33 = tpu.matmul %30, %32, %cst_15 {dimension_numbers = #tpu.dot_dimension_numbers<[1], [0], [0], [1], [0, 0, 1, 1], [], []>} : vector<128x128xbf16>, vector<128x384xbf16>, vector<128x384xf32> -> vector<128x384xf32>
    %34 = arith.truncf %33 : vector<128x384xf32> to vector<128x384xbf16>
    %c0_16 = arith.constant 0 : index
    %c0_17 = arith.constant 0 : index
    %35 = vector.load %arg3[%c0_16, %c0_17] : memref<64x64xf32, #tpu.memory_space<vmem>>, vector<64x64xf32>
    %36 = vector.extract_strided_slice %34 {offsets = [0, 0], sizes = [64, 32], strides = [1, 1]} : vector<128x384xbf16> to vector<64x32xbf16>
    %37 = vector.extract_strided_slice %34 {offsets = [0, 128], sizes = [64, 32], strides = [1, 1]} : vector<128x384xbf16> to vector<64x32xbf16>
    %38 = vector.extract_strided_slice %34 {offsets = [0, 256], sizes = [64, 32], strides = [1, 1]} : vector<128x384xbf16> to vector<64x32xbf16>
    %cst_18 = arith.constant dense<0.000000e+00> : vector<64x64xf32>
    %39 = tpu.matmul %36, %37, %cst_18 {dimension_numbers = #tpu.dot_dimension_numbers<[1], [1], [0], [0], [0, 0, 1, 0], [], []>} : vector<64x32xbf16>, vector<64x32xbf16>, vector<64x64xf32> -> vector<64x64xf32>
    %40 = arith.addf %39, %35 : vector<64x64xf32>
    %cst_19 = arith.constant dense<0xFF800000> : vector<64xf32>
    %41 = vector.multi_reduction <maximumf>, %40, %cst_19 [1] : vector<64x64xf32> to vector<64xf32>
    %42 = vector.shape_cast %41 : vector<64xf32> to vector<64x1xf32>
    %43 = vector.broadcast %42 : vector<64x1xf32> to vector<64x64xf32>
    %44 = arith.subf %40, %43 : vector<64x64xf32>
    %45 = math.exp %44 : vector<64x64xf32>
    %cst_20 = arith.constant dense<0.000000e+00> : vector<64xf32>
    %46 = vector.multi_reduction <add>, %45, %cst_20 [1] : vector<64x64xf32> to vector<64xf32>
    %47 = vector.shape_cast %46 : vector<64xf32> to vector<64x1xf32>
    %48 = tpu.reciprocal %47 {approx = true} : vector<64x1xf32> -> vector<64x1xf32>
    %49 = vector.broadcast %48 : vector<64x1xf32> to vector<64x64xf32>
    %50 = arith.mulf %45, %49 : vector<64x64xf32>
    %51 = arith.truncf %50 : vector<64x64xf32> to vector<64x64xbf16>
    %cst_21 = arith.constant dense<0.000000e+00> : vector<64x32xf32>
    %52 = tpu.matmul %51, %38, %cst_21 {dimension_numbers = #tpu.dot_dimension_numbers<[1], [0], [0], [1], [0, 0, 1, 1], [], []>} : vector<64x64xbf16>, vector<64x32xbf16>, vector<64x32xf32> -> vector<64x32xf32>
    %53 = arith.truncf %52 : vector<64x32xf32> to vector<64x32xbf16>
    %54 = vector.extract_strided_slice %34 {offsets = [0, 32], sizes = [64, 32], strides = [1, 1]} : vector<128x384xbf16> to vector<64x32xbf16>
    %55 = vector.extract_strided_slice %34 {offsets = [0, 160], sizes = [64, 32], strides = [1, 1]} : vector<128x384xbf16> to vector<64x32xbf16>
    %56 = vector.extract_strided_slice %34 {offsets = [0, 288], sizes = [64, 32], strides = [1, 1]} : vector<128x384xbf16> to vector<64x32xbf16>
    %cst_22 = arith.constant dense<0.000000e+00> : vector<64x64xf32>
    %57 = tpu.matmul %54, %55, %cst_22 {dimension_numbers = #tpu.dot_dimension_numbers<[1], [1], [0], [0], [0, 0, 1, 0], [], []>} : vector<64x32xbf16>, vector<64x32xbf16>, vector<64x64xf32> -> vector<64x64xf32>
    %58 = arith.addf %57, %35 : vector<64x64xf32>
    %cst_23 = arith.constant dense<0xFF800000> : vector<64xf32>
    %59 = vector.multi_reduction <maximumf>, %58, %cst_23 [1] : vector<64x64xf32> to vector<64xf32>
    %60 = vector.shape_cast %59 : vector<64xf32> to vector<64x1xf32>
    %61 = vector.broadcast %60 : vector<64x1xf32> to vector<64x64xf32>
    %62 = arith.subf %58, %61 : vector<64x64xf32>
    %63 = math.exp %62 : vector<64x64xf32>
    %cst_24 = arith.constant dense<0.000000e+00> : vector<64xf32>
    %64 = vector.multi_reduction <add>, %63, %cst_24 [1] : vector<64x64xf32> to vector<64xf32>
    %65 = vector.shape_cast %64 : vector<64xf32> to vector<64x1xf32>
    %66 = tpu.reciprocal %65 {approx = true} : vector<64x1xf32> -> vector<64x1xf32>
    %67 = vector.broadcast %66 : vector<64x1xf32> to vector<64x64xf32>
    %68 = arith.mulf %63, %67 : vector<64x64xf32>
    %69 = arith.truncf %68 : vector<64x64xf32> to vector<64x64xbf16>
    %cst_25 = arith.constant dense<0.000000e+00> : vector<64x32xf32>
    %70 = tpu.matmul %69, %56, %cst_25 {dimension_numbers = #tpu.dot_dimension_numbers<[1], [0], [0], [1], [0, 0, 1, 1], [], []>} : vector<64x64xbf16>, vector<64x32xbf16>, vector<64x32xf32> -> vector<64x32xf32>
    %71 = arith.truncf %70 : vector<64x32xf32> to vector<64x32xbf16>
    %72 = vector.extract_strided_slice %34 {offsets = [0, 64], sizes = [64, 32], strides = [1, 1]} : vector<128x384xbf16> to vector<64x32xbf16>
    %73 = vector.extract_strided_slice %34 {offsets = [0, 192], sizes = [64, 32], strides = [1, 1]} : vector<128x384xbf16> to vector<64x32xbf16>
    %74 = vector.extract_strided_slice %34 {offsets = [0, 320], sizes = [64, 32], strides = [1, 1]} : vector<128x384xbf16> to vector<64x32xbf16>
    %cst_26 = arith.constant dense<0.000000e+00> : vector<64x64xf32>
    %75 = tpu.matmul %72, %73, %cst_26 {dimension_numbers = #tpu.dot_dimension_numbers<[1], [1], [0], [0], [0, 0, 1, 0], [], []>} : vector<64x32xbf16>, vector<64x32xbf16>, vector<64x64xf32> -> vector<64x64xf32>
    %76 = arith.addf %75, %35 : vector<64x64xf32>
    %cst_27 = arith.constant dense<0xFF800000> : vector<64xf32>
    %77 = vector.multi_reduction <maximumf>, %76, %cst_27 [1] : vector<64x64xf32> to vector<64xf32>
    %78 = vector.shape_cast %77 : vector<64xf32> to vector<64x1xf32>
    %79 = vector.broadcast %78 : vector<64x1xf32> to vector<64x64xf32>
    %80 = arith.subf %76, %79 : vector<64x64xf32>
    %81 = math.exp %80 : vector<64x64xf32>
    %cst_28 = arith.constant dense<0.000000e+00> : vector<64xf32>
    %82 = vector.multi_reduction <add>, %81, %cst_28 [1] : vector<64x64xf32> to vector<64xf32>
    %83 = vector.shape_cast %82 : vector<64xf32> to vector<64x1xf32>
    %84 = tpu.reciprocal %83 {approx = true} : vector<64x1xf32> -> vector<64x1xf32>
    %85 = vector.broadcast %84 : vector<64x1xf32> to vector<64x64xf32>
    %86 = arith.mulf %81, %85 : vector<64x64xf32>
    %87 = arith.truncf %86 : vector<64x64xf32> to vector<64x64xbf16>
    %cst_29 = arith.constant dense<0.000000e+00> : vector<64x32xf32>
    %88 = tpu.matmul %87, %74, %cst_29 {dimension_numbers = #tpu.dot_dimension_numbers<[1], [0], [0], [1], [0, 0, 1, 1], [], []>} : vector<64x64xbf16>, vector<64x32xbf16>, vector<64x32xf32> -> vector<64x32xf32>
    %89 = arith.truncf %88 : vector<64x32xf32> to vector<64x32xbf16>
    %90 = vector.extract_strided_slice %34 {offsets = [0, 96], sizes = [64, 32], strides = [1, 1]} : vector<128x384xbf16> to vector<64x32xbf16>
    %91 = vector.extract_strided_slice %34 {offsets = [0, 224], sizes = [64, 32], strides = [1, 1]} : vector<128x384xbf16> to vector<64x32xbf16>
    %92 = vector.extract_strided_slice %34 {offsets = [0, 352], sizes = [64, 32], strides = [1, 1]} : vector<128x384xbf16> to vector<64x32xbf16>
    %cst_30 = arith.constant dense<0.000000e+00> : vector<64x64xf32>
    %93 = tpu.matmul %90, %91, %cst_30 {dimension_numbers = #tpu.dot_dimension_numbers<[1], [1], [0], [0], [0, 0, 1, 0], [], []>} : vector<64x32xbf16>, vector<64x32xbf16>, vector<64x64xf32> -> vector<64x64xf32>
    %94 = arith.addf %93, %35 : vector<64x64xf32>
    %cst_31 = arith.constant dense<0xFF800000> : vector<64xf32>
    %95 = vector.multi_reduction <maximumf>, %94, %cst_31 [1] : vector<64x64xf32> to vector<64xf32>
    %96 = vector.shape_cast %95 : vector<64xf32> to vector<64x1xf32>
    %97 = vector.broadcast %96 : vector<64x1xf32> to vector<64x64xf32>
    %98 = arith.subf %94, %97 : vector<64x64xf32>
    %99 = math.exp %98 : vector<64x64xf32>
    %cst_32 = arith.constant dense<0.000000e+00> : vector<64xf32>
    %100 = vector.multi_reduction <add>, %99, %cst_32 [1] : vector<64x64xf32> to vector<64xf32>
    %101 = vector.shape_cast %100 : vector<64xf32> to vector<64x1xf32>
    %102 = tpu.reciprocal %101 {approx = true} : vector<64x1xf32> -> vector<64x1xf32>
    %103 = vector.broadcast %102 : vector<64x1xf32> to vector<64x64xf32>
    %104 = arith.mulf %99, %103 : vector<64x64xf32>
    %105 = arith.truncf %104 : vector<64x64xf32> to vector<64x64xbf16>
    %cst_33 = arith.constant dense<0.000000e+00> : vector<64x32xf32>
    %106 = tpu.matmul %105, %92, %cst_33 {dimension_numbers = #tpu.dot_dimension_numbers<[1], [0], [0], [1], [0, 0, 1, 1], [], []>} : vector<64x64xbf16>, vector<64x32xbf16>, vector<64x32xf32> -> vector<64x32xf32>
    %107 = arith.truncf %106 : vector<64x32xf32> to vector<64x32xbf16>
    %108 = tpu.concatenate %53, %71, %89, %107 in 1 : vector<64x32xbf16>, vector<64x32xbf16>, vector<64x32xbf16>, vector<64x32xbf16> -> vector<64x128xbf16>
    %109 = vector.extract_strided_slice %34 {offsets = [64, 0], sizes = [64, 32], strides = [1, 1]} : vector<128x384xbf16> to vector<64x32xbf16>
    %110 = vector.extract_strided_slice %34 {offsets = [64, 128], sizes = [64, 32], strides = [1, 1]} : vector<128x384xbf16> to vector<64x32xbf16>
    %111 = vector.extract_strided_slice %34 {offsets = [64, 256], sizes = [64, 32], strides = [1, 1]} : vector<128x384xbf16> to vector<64x32xbf16>
    %cst_34 = arith.constant dense<0.000000e+00> : vector<64x64xf32>
    %112 = tpu.matmul %109, %110, %cst_34 {dimension_numbers = #tpu.dot_dimension_numbers<[1], [1], [0], [0], [0, 0, 1, 0], [], []>} : vector<64x32xbf16>, vector<64x32xbf16>, vector<64x64xf32> -> vector<64x64xf32>
    %113 = arith.addf %112, %35 : vector<64x64xf32>
    %cst_35 = arith.constant dense<0xFF800000> : vector<64xf32>
    %114 = vector.multi_reduction <maximumf>, %113, %cst_35 [1] : vector<64x64xf32> to vector<64xf32>
    %115 = vector.shape_cast %114 : vector<64xf32> to vector<64x1xf32>
    %116 = vector.broadcast %115 : vector<64x1xf32> to vector<64x64xf32>
    %117 = arith.subf %113, %116 : vector<64x64xf32>
    %118 = math.exp %117 : vector<64x64xf32>
    %cst_36 = arith.constant dense<0.000000e+00> : vector<64xf32>
    %119 = vector.multi_reduction <add>, %118, %cst_36 [1] : vector<64x64xf32> to vector<64xf32>
    %120 = vector.shape_cast %119 : vector<64xf32> to vector<64x1xf32>
    %121 = tpu.reciprocal %120 {approx = true} : vector<64x1xf32> -> vector<64x1xf32>
    %122 = vector.broadcast %121 : vector<64x1xf32> to vector<64x64xf32>
    %123 = arith.mulf %118, %122 : vector<64x64xf32>
    %124 = arith.truncf %123 : vector<64x64xf32> to vector<64x64xbf16>
    %cst_37 = arith.constant dense<0.000000e+00> : vector<64x32xf32>
    %125 = tpu.matmul %124, %111, %cst_37 {dimension_numbers = #tpu.dot_dimension_numbers<[1], [0], [0], [1], [0, 0, 1, 1], [], []>} : vector<64x64xbf16>, vector<64x32xbf16>, vector<64x32xf32> -> vector<64x32xf32>
    %126 = arith.truncf %125 : vector<64x32xf32> to vector<64x32xbf16>
    %127 = vector.extract_strided_slice %34 {offsets = [64, 32], sizes = [64, 32], strides = [1, 1]} : vector<128x384xbf16> to vector<64x32xbf16>
    %128 = vector.extract_strided_slice %34 {offsets = [64, 160], sizes = [64, 32], strides = [1, 1]} : vector<128x384xbf16> to vector<64x32xbf16>
    %129 = vector.extract_strided_slice %34 {offsets = [64, 288], sizes = [64, 32], strides = [1, 1]} : vector<128x384xbf16> to vector<64x32xbf16>
    %cst_38 = arith.constant dense<0.000000e+00> : vector<64x64xf32>
    %130 = tpu.matmul %127, %128, %cst_38 {dimension_numbers = #tpu.dot_dimension_numbers<[1], [1], [0], [0], [0, 0, 1, 0], [], []>} : vector<64x32xbf16>, vector<64x32xbf16>, vector<64x64xf32> -> vector<64x64xf32>
    %131 = arith.addf %130, %35 : vector<64x64xf32>
    %cst_39 = arith.constant dense<0xFF800000> : vector<64xf32>
    %132 = vector.multi_reduction <maximumf>, %131, %cst_39 [1] : vector<64x64xf32> to vector<64xf32>
    %133 = vector.shape_cast %132 : vector<64xf32> to vector<64x1xf32>
    %134 = vector.broadcast %133 : vector<64x1xf32> to vector<64x64xf32>
    %135 = arith.subf %131, %134 : vector<64x64xf32>
    %136 = math.exp %135 : vector<64x64xf32>
    %cst_40 = arith.constant dense<0.000000e+00> : vector<64xf32>
    %137 = vector.multi_reduction <add>, %136, %cst_40 [1] : vector<64x64xf32> to vector<64xf32>
    %138 = vector.shape_cast %137 : vector<64xf32> to vector<64x1xf32>
    %139 = tpu.reciprocal %138 {approx = true} : vector<64x1xf32> -> vector<64x1xf32>
    %140 = vector.broadcast %139 : vector<64x1xf32> to vector<64x64xf32>
    %141 = arith.mulf %136, %140 : vector<64x64xf32>
    %142 = arith.truncf %141 : vector<64x64xf32> to vector<64x64xbf16>
    %cst_41 = arith.constant dense<0.000000e+00> : vector<64x32xf32>
    %143 = tpu.matmul %142, %129, %cst_41 {dimension_numbers = #tpu.dot_dimension_numbers<[1], [0], [0], [1], [0, 0, 1, 1], [], []>} : vector<64x64xbf16>, vector<64x32xbf16>, vector<64x32xf32> -> vector<64x32xf32>
    %144 = arith.truncf %143 : vector<64x32xf32> to vector<64x32xbf16>
    %145 = vector.extract_strided_slice %34 {offsets = [64, 64], sizes = [64, 32], strides = [1, 1]} : vector<128x384xbf16> to vector<64x32xbf16>
    %146 = vector.extract_strided_slice %34 {offsets = [64, 192], sizes = [64, 32], strides = [1, 1]} : vector<128x384xbf16> to vector<64x32xbf16>
    %147 = vector.extract_strided_slice %34 {offsets = [64, 320], sizes = [64, 32], strides = [1, 1]} : vector<128x384xbf16> to vector<64x32xbf16>
    %cst_42 = arith.constant dense<0.000000e+00> : vector<64x64xf32>
    %148 = tpu.matmul %145, %146, %cst_42 {dimension_numbers = #tpu.dot_dimension_numbers<[1], [1], [0], [0], [0, 0, 1, 0], [], []>} : vector<64x32xbf16>, vector<64x32xbf16>, vector<64x64xf32> -> vector<64x64xf32>
    %149 = arith.addf %148, %35 : vector<64x64xf32>
    %cst_43 = arith.constant dense<0xFF800000> : vector<64xf32>
    %150 = vector.multi_reduction <maximumf>, %149, %cst_43 [1] : vector<64x64xf32> to vector<64xf32>
    %151 = vector.shape_cast %150 : vector<64xf32> to vector<64x1xf32>
    %152 = vector.broadcast %151 : vector<64x1xf32> to vector<64x64xf32>
    %153 = arith.subf %149, %152 : vector<64x64xf32>
    %154 = math.exp %153 : vector<64x64xf32>
    %cst_44 = arith.constant dense<0.000000e+00> : vector<64xf32>
    %155 = vector.multi_reduction <add>, %154, %cst_44 [1] : vector<64x64xf32> to vector<64xf32>
    %156 = vector.shape_cast %155 : vector<64xf32> to vector<64x1xf32>
    %157 = tpu.reciprocal %156 {approx = true} : vector<64x1xf32> -> vector<64x1xf32>
    %158 = vector.broadcast %157 : vector<64x1xf32> to vector<64x64xf32>
    %159 = arith.mulf %154, %158 : vector<64x64xf32>
    %160 = arith.truncf %159 : vector<64x64xf32> to vector<64x64xbf16>
    %cst_45 = arith.constant dense<0.000000e+00> : vector<64x32xf32>
    %161 = tpu.matmul %160, %147, %cst_45 {dimension_numbers = #tpu.dot_dimension_numbers<[1], [0], [0], [1], [0, 0, 1, 1], [], []>} : vector<64x64xbf16>, vector<64x32xbf16>, vector<64x32xf32> -> vector<64x32xf32>
    %162 = arith.truncf %161 : vector<64x32xf32> to vector<64x32xbf16>
    %163 = vector.extract_strided_slice %34 {offsets = [64, 96], sizes = [64, 32], strides = [1, 1]} : vector<128x384xbf16> to vector<64x32xbf16>
    %164 = vector.extract_strided_slice %34 {offsets = [64, 224], sizes = [64, 32], strides = [1, 1]} : vector<128x384xbf16> to vector<64x32xbf16>
    %165 = vector.extract_strided_slice %34 {offsets = [64, 352], sizes = [64, 32], strides = [1, 1]} : vector<128x384xbf16> to vector<64x32xbf16>
    %cst_46 = arith.constant dense<0.000000e+00> : vector<64x64xf32>
    %166 = tpu.matmul %163, %164, %cst_46 {dimension_numbers = #tpu.dot_dimension_numbers<[1], [1], [0], [0], [0, 0, 1, 0], [], []>} : vector<64x32xbf16>, vector<64x32xbf16>, vector<64x64xf32> -> vector<64x64xf32>
    %167 = arith.addf %166, %35 : vector<64x64xf32>
    %cst_47 = arith.constant dense<0xFF800000> : vector<64xf32>
    %168 = vector.multi_reduction <maximumf>, %167, %cst_47 [1] : vector<64x64xf32> to vector<64xf32>
    %169 = vector.shape_cast %168 : vector<64xf32> to vector<64x1xf32>
    %170 = vector.broadcast %169 : vector<64x1xf32> to vector<64x64xf32>
    %171 = arith.subf %167, %170 : vector<64x64xf32>
    %172 = math.exp %171 : vector<64x64xf32>
    %cst_48 = arith.constant dense<0.000000e+00> : vector<64xf32>
    %173 = vector.multi_reduction <add>, %172, %cst_48 [1] : vector<64x64xf32> to vector<64xf32>
    %174 = vector.shape_cast %173 : vector<64xf32> to vector<64x1xf32>
    %175 = tpu.reciprocal %174 {approx = true} : vector<64x1xf32> -> vector<64x1xf32>
    %176 = vector.broadcast %175 : vector<64x1xf32> to vector<64x64xf32>
    %177 = arith.mulf %172, %176 : vector<64x64xf32>
    %178 = arith.truncf %177 : vector<64x64xf32> to vector<64x64xbf16>
    %cst_49 = arith.constant dense<0.000000e+00> : vector<64x32xf32>
    %179 = tpu.matmul %178, %165, %cst_49 {dimension_numbers = #tpu.dot_dimension_numbers<[1], [0], [0], [1], [0, 0, 1, 1], [], []>} : vector<64x64xbf16>, vector<64x32xbf16>, vector<64x32xf32> -> vector<64x32xf32>
    %180 = arith.truncf %179 : vector<64x32xf32> to vector<64x32xbf16>
    %181 = tpu.concatenate %126, %144, %162, %180 in 1 : vector<64x32xbf16>, vector<64x32xbf16>, vector<64x32xbf16>, vector<64x32xbf16> -> vector<64x128xbf16>
    %182 = tpu.concatenate %108, %181 in 0 : vector<64x128xbf16>, vector<64x128xbf16> -> vector<128x128xbf16>
    %c0_50 = arith.constant 0 : index
    %c0_51 = arith.constant 0 : index
    %c0_52 = arith.constant 0 : index
    %183 = vector.load %arg7[%c0_50, %c0_51, %c0_52] : memref<1x128x128xbf16, #tpu.memory_space<vmem>>, vector<1x128x128xbf16>
    %184 = vector.shape_cast %183 : vector<1x128x128xbf16> to vector<128x128xbf16>
    %cst_53 = arith.constant dense<0.000000e+00> : vector<128x128xf32>
    %185 = tpu.matmul %182, %184, %cst_53 {dimension_numbers = #tpu.dot_dimension_numbers<[1], [0], [0], [1], [0, 0, 1, 1], [], []>} : vector<128x128xbf16>, vector<128x128xbf16>, vector<128x128xf32> -> vector<128x128xf32>
    %c0_54 = arith.constant 0 : index
    %c0_55 = arith.constant 0 : index
    %c0_56 = arith.constant 0 : index
    %186 = vector.load %arg8[%c0_54, %c0_55, %c0_56] : memref<1x1x128xf32, #tpu.memory_space<vmem>>, vector<1x1x128xf32>
    %187 = vector.shape_cast %186 : vector<1x1x128xf32> to vector<1x128xf32>
    %188 = vector.broadcast %187 : vector<1x128xf32> to vector<128x128xf32>
    %189 = arith.addf %185, %188 : vector<128x128xf32>
    %190 = arith.addf %3, %189 : vector<128x128xf32>
    %c0_57 = arith.constant 0 : index
    %c0_58 = arith.constant 0 : index
    %c0_59 = arith.constant 0 : index
    %191 = vector.load %arg9[%c0_57, %c0_58, %c0_59] : memref<1x1x128xf32, #tpu.memory_space<vmem>>, vector<1x1x128xf32>
    %192 = vector.shape_cast %191 : vector<1x1x128xf32> to vector<1x128xf32>
    %c0_60 = arith.constant 0 : index
    %c0_61 = arith.constant 0 : index
    %c0_62 = arith.constant 0 : index
    %193 = vector.load %arg10[%c0_60, %c0_61, %c0_62] : memref<1x1x128xf32, #tpu.memory_space<vmem>>, vector<1x1x128xf32>
    %194 = vector.shape_cast %193 : vector<1x1x128xf32> to vector<1x128xf32>
    %cst_63 = arith.constant dense<0.000000e+00> : vector<128xf32>
    %195 = vector.multi_reduction <add>, %190, %cst_63 [1] : vector<128x128xf32> to vector<128xf32>
    %196 = vector.shape_cast %195 : vector<128xf32> to vector<128x1xf32>
    %cst_64 = arith.constant 1.280000e+02 : f32
    %197 = vector.broadcast %cst_64 : f32 to vector<128x1xf32>
    %198 = arith.divf %196, %197 : vector<128x1xf32>
    %199 = vector.broadcast %198 : vector<128x1xf32> to vector<128x128xf32>
    %200 = arith.subf %190, %199 : vector<128x128xf32>
    %201 = arith.mulf %200, %200 : vector<128x128xf32>
    %cst_65 = arith.constant dense<0.000000e+00> : vector<128xf32>
    %202 = vector.multi_reduction <add>, %201, %cst_65 [1] : vector<128x128xf32> to vector<128xf32>
    %203 = vector.shape_cast %202 : vector<128xf32> to vector<128x1xf32>
    %cst_66 = arith.constant 1.280000e+02 : f32
    %204 = vector.broadcast %cst_66 : f32 to vector<128x1xf32>
    %205 = arith.divf %203, %204 : vector<128x1xf32>
    %206 = vector.broadcast %198 : vector<128x1xf32> to vector<128x128xf32>
    %207 = arith.subf %190, %206 : vector<128x128xf32>
    %cst_67 = arith.constant 9.99999974E-6 : f32
    %208 = vector.broadcast %cst_67 : f32 to vector<128x1xf32>
    %209 = arith.addf %205, %208 : vector<128x1xf32>
    %210 = math.rsqrt %209 : vector<128x1xf32>
    %211 = vector.broadcast %210 : vector<128x1xf32> to vector<128x128xf32>
    %212 = arith.mulf %207, %211 : vector<128x128xf32>
    %213 = vector.broadcast %192 : vector<1x128xf32> to vector<128x128xf32>
    %214 = arith.mulf %212, %213 : vector<128x128xf32>
    %215 = vector.broadcast %194 : vector<1x128xf32> to vector<128x128xf32>
    %216 = arith.addf %214, %215 : vector<128x128xf32>
    %217 = arith.truncf %216 : vector<128x128xf32> to vector<128x128xbf16>
    %c0_68 = arith.constant 0 : index
    %c0_69 = arith.constant 0 : index
    %c0_70 = arith.constant 0 : index
    %218 = vector.load %arg11[%c0_68, %c0_69, %c0_70] : memref<1x128x512xbf16, #tpu.memory_space<vmem>>, vector<1x128x512xbf16>
    %219 = vector.shape_cast %218 : vector<1x128x512xbf16> to vector<128x512xbf16>
    %cst_71 = arith.constant dense<0.000000e+00> : vector<128x512xf32>
    %220 = tpu.matmul %217, %219, %cst_71 {dimension_numbers = #tpu.dot_dimension_numbers<[1], [0], [0], [1], [0, 0, 1, 1], [], []>} : vector<128x128xbf16>, vector<128x512xbf16>, vector<128x512xf32> -> vector<128x512xf32>
    %c0_72 = arith.constant 0 : index
    %c0_73 = arith.constant 0 : index
    %c0_74 = arith.constant 0 : index
    %221 = vector.load %arg12[%c0_72, %c0_73, %c0_74] : memref<1x1x512xf32, #tpu.memory_space<vmem>>, vector<1x1x512xf32>
    %222 = vector.shape_cast %221 : vector<1x1x512xf32> to vector<1x512xf32>
    %223 = vector.broadcast %222 : vector<1x512xf32> to vector<128x512xf32>
    %224 = arith.addf %220, %223 : vector<128x512xf32>
    %cst_75 = arith.constant 5.000000e-01 : f32
    %225 = vector.broadcast %cst_75 : f32 to vector<128x512xf32>
    %226 = arith.mulf %225, %224 : vector<128x512xf32>
    %cst_76 = arith.constant 4.471500e-02 : f32
    %227 = vector.broadcast %cst_76 : f32 to vector<128x512xf32>
    %228 = arith.mulf %227, %224 : vector<128x512xf32>
    %229 = arith.mulf %228, %224 : vector<128x512xf32>
    %230 = arith.mulf %229, %224 : vector<128x512xf32>
    %231 = arith.addf %224, %230 : vector<128x512xf32>
    %cst_77 = arith.constant 0.797884583 : f32
    %232 = vector.broadcast %cst_77 : f32 to vector<128x512xf32>
    %233 = arith.mulf %232, %231 : vector<128x512xf32>
    %234 = math.tanh %233 : vector<128x512xf32>
    %cst_78 = arith.constant 1.000000e+00 : f32
    %235 = vector.broadcast %cst_78 : f32 to vector<128x512xf32>
    %236 = arith.addf %235, %234 : vector<128x512xf32>
    %237 = arith.mulf %226, %236 : vector<128x512xf32>
    %238 = arith.truncf %237 : vector<128x512xf32> to vector<128x512xbf16>
    %c0_79 = arith.constant 0 : index
    %c0_80 = arith.constant 0 : index
    %c0_81 = arith.constant 0 : index
    %239 = vector.load %arg13[%c0_79, %c0_80, %c0_81] : memref<1x512x128xbf16, #tpu.memory_space<vmem>>, vector<1x512x128xbf16>
    %240 = vector.shape_cast %239 : vector<1x512x128xbf16> to vector<512x128xbf16>
    %cst_82 = arith.constant dense<0.000000e+00> : vector<128x128xf32>
    %241 = tpu.matmul %238, %240, %cst_82 {dimension_numbers = #tpu.dot_dimension_numbers<[1], [0], [0], [1], [0, 0, 1, 1], [], []>} : vector<128x512xbf16>, vector<512x128xbf16>, vector<128x128xf32> -> vector<128x128xf32>
    %c0_83 = arith.constant 0 : index
    %c0_84 = arith.constant 0 : index
    %c0_85 = arith.constant 0 : index
    %242 = vector.load %arg14[%c0_83, %c0_84, %c0_85] : memref<1x1x128xf32, #tpu.memory_space<vmem>>, vector<1x1x128xf32>
    %243 = vector.shape_cast %242 : vector<1x1x128xf32> to vector<1x128xf32>
    %244 = vector.broadcast %243 : vector<1x128xf32> to vector<128x128xf32>
    %245 = arith.addf %241, %244 : vector<128x128xf32>
    %246 = arith.addf %190, %245 : vector<128x128xf32>
    %c1_i32 = arith.constant 1 : i32
    %247 = arith.cmpi slt, %arg1, %c1_i32 : i32
    %248 = arith.extui %247 : i1 to i32
    %c0_i32_86 = arith.constant 0 : i32
    %249 = arith.cmpi ne, %248, %c0_i32_86 : i32
    scf.if %249 {
      %c0_89 = arith.constant 0 : index
      %c0_90 = arith.constant 0 : index
      %253 = vector.load %arg18[%c0_89, %c0_90] : memref<128x128xf32, #tpu.memory_space<vmem>>, vector<128x128xf32>
      tpu.vector_store %arg18[%c0_89, %c0_90], %246 {strides = array<i32>} : memref<128x128xf32, #tpu.memory_space<vmem>>, vector<128x128xf32>,
    } else {
    }
    %c1_i32_87 = arith.constant 1 : i32
    %250 = arith.cmpi eq, %arg1, %c1_i32_87 : i32
    %251 = arith.extui %250 : i1 to i32
    %c0_i32_88 = arith.constant 0 : i32
    %252 = arith.cmpi ne, %251, %c0_i32_88 : i32
    scf.if %252 {
      %c0_89 = arith.constant 0 : index
      %c0_90 = arith.constant 0 : index
      %253 = vector.load %arg15[%c0_89, %c0_90] : memref<1x128xf32, #tpu.memory_space<vmem>>, vector<1x128xf32>
      %c0_91 = arith.constant 0 : index
      %c0_92 = arith.constant 0 : index
      %254 = vector.load %arg16[%c0_91, %c0_92] : memref<1x128xf32, #tpu.memory_space<vmem>>, vector<1x128xf32>
      %cst_93 = arith.constant dense<0.000000e+00> : vector<128xf32>
      %255 = vector.multi_reduction <add>, %246, %cst_93 [1] : vector<128x128xf32> to vector<128xf32>
      %256 = vector.shape_cast %255 : vector<128xf32> to vector<128x1xf32>
      %cst_94 = arith.constant 1.280000e+02 : f32
      %257 = vector.broadcast %cst_94 : f32 to vector<128x1xf32>
      %258 = arith.divf %256, %257 : vector<128x1xf32>
      %259 = vector.broadcast %258 : vector<128x1xf32> to vector<128x128xf32>
      %260 = arith.subf %246, %259 : vector<128x128xf32>
      %261 = arith.mulf %260, %260 : vector<128x128xf32>
      %cst_95 = arith.constant dense<0.000000e+00> : vector<128xf32>
      %262 = vector.multi_reduction <add>, %261, %cst_95 [1] : vector<128x128xf32> to vector<128xf32>
      %263 = vector.shape_cast %262 : vector<128xf32> to vector<128x1xf32>
      %cst_96 = arith.constant 1.280000e+02 : f32
      %264 = vector.broadcast %cst_96 : f32 to vector<128x1xf32>
      %265 = arith.divf %263, %264 : vector<128x1xf32>
      %266 = vector.broadcast %258 : vector<128x1xf32> to vector<128x128xf32>
      %267 = arith.subf %246, %266 : vector<128x128xf32>
      %cst_97 = arith.constant 9.99999974E-6 : f32
      %268 = vector.broadcast %cst_97 : f32 to vector<128x1xf32>
      %269 = arith.addf %265, %268 : vector<128x1xf32>
      %270 = math.rsqrt %269 : vector<128x1xf32>
      %271 = vector.broadcast %270 : vector<128x1xf32> to vector<128x128xf32>
      %272 = arith.mulf %267, %271 : vector<128x128xf32>
      %273 = vector.broadcast %253 : vector<1x128xf32> to vector<128x128xf32>
      %274 = arith.mulf %272, %273 : vector<128x128xf32>
      %275 = vector.broadcast %254 : vector<1x128xf32> to vector<128x128xf32>
      %276 = arith.addf %274, %275 : vector<128x128xf32>
      %277 = arith.truncf %276 : vector<128x128xf32> to vector<128x128xbf16>
      %c0_98 = arith.constant 0 : index
      %c0_99 = arith.constant 0 : index
      %278 = vector.load %arg17[%c0_98, %c0_99] : memref<128x128xbf16, #tpu.memory_space<vmem>>, vector<128x128xbf16>
      tpu.vector_store %arg17[%c0_98, %c0_99], %277 {strides = array<i32>} : memref<128x128xbf16, #tpu.memory_space<vmem>>, vector<128x128xbf16>,
    } else {
    }
    return
  }
  func.func @transform_0(%arg0: i32, %arg1: i32) -> (i32, i32) {
    %c0_i32 = arith.constant 0 : i32
    %c0_i32_0 = arith.constant 0 : i32
    return %arg0, %c0_i32 : i32, i32
  }
  func.func @transform_1(%arg0: i32, %arg1: i32) -> (i32, i32) {
    %c0_i32 = arith.constant 0 : i32
    %c0_i32_0 = arith.constant 0 : i32
    %c0_i32_1 = arith.constant 0 : i32
    return %c0_i32, %c0_i32_0 : i32, i32
  }
  func.func @transform_2(%arg0: i32, %arg1: i32) -> (i32, i32, i32) {
    %c0_i32 = arith.constant 0 : i32
    %c0_i32_0 = arith.constant 0 : i32
    %c0_i32_1 = arith.constant 0 : i32
    return %arg1, %c0_i32, %c0_i32_0 : i32, i32, i32
  }
  func.func @transform_3(%arg0: i32, %arg1: i32) -> (i32, i32, i32) {
    %c0_i32 = arith.constant 0 : i32
    %c0_i32_0 = arith.constant 0 : i32
    %c0_i32_1 = arith.constant 0 : i32
    return %arg1, %c0_i32, %c0_i32_0 : i32, i32, i32
  }
  func.func @transform_4(%arg0: i32, %arg1: i32) -> (i32, i32, i32) {
    %c0_i32 = arith.constant 0 : i32
    %c0_i32_0 = arith.constant 0 : i32
    %c0_i32_1 = arith.constant 0 : i32
    return %arg1, %c0_i32, %c0_i32_0 : i32, i32, i32
  }
  func.func @transform_5(%arg0: i32, %arg1: i32) -> (i32, i32, i32) {
    %c0_i32 = arith.constant 0 : i32
    %c0_i32_0 = arith.constant 0 : i32
    %c0_i32_1 = arith.constant 0 : i32
    return %arg1, %c0_i32, %c0_i32_0 : i32, i32, i32
  }
  func.func @transform_6(%arg0: i32, %arg1: i32) -> (i32, i32, i32) {
    %c0_i32 = arith.constant 0 : i32
    %c0_i32_0 = arith.constant 0 : i32
    %c0_i32_1 = arith.constant 0 : i32
    return %arg1, %c0_i32, %c0_i32_0 : i32, i32, i32
  }
  func.func @transform_7(%arg0: i32, %arg1: i32) -> (i32, i32, i32) {
    %c0_i32 = arith.constant 0 : i32
    %c0_i32_0 = arith.constant 0 : i32
    %c0_i32_1 = arith.constant 0 : i32
    return %arg1, %c0_i32, %c0_i32_0 : i32, i32, i32
  }
  func.func @transform_8(%arg0: i32, %arg1: i32) -> (i32, i32, i32) {
    %c0_i32 = arith.constant 0 : i32
    %c0_i32_0 = arith.constant 0 : i32
    %c0_i32_1 = arith.constant 0 : i32
    return %arg1, %c0_i32, %c0_i32_0 : i32, i32, i32
  }
  func.func @transform_9(%arg0: i32, %arg1: i32) -> (i32, i32, i32) {
    %c0_i32 = arith.constant 0 : i32
    %c0_i32_0 = arith.constant 0 : i32
    %c0_i32_1 = arith.constant 0 : i32
    return %arg1, %c0_i32, %c0_i32_0 : i32, i32, i32
  }
  func.func @transform_10(%arg0: i32, %arg1: i32) -> (i32, i32, i32) {
    %c0_i32 = arith.constant 0 : i32
    %c0_i32_0 = arith.constant 0 : i32
    %c0_i32_1 = arith.constant 0 : i32
    return %arg1, %c0_i32, %c0_i32_0 : i32, i32, i32
  }
  func.func @transform_11(%arg0: i32, %arg1: i32) -> (i32, i32, i32) {
    %c0_i32 = arith.constant 0 : i32
    %c0_i32_0 = arith.constant 0 : i32
    %c0_i32_1 = arith.constant 0 : i32
    return %arg1, %c0_i32, %c0_i32_0 : i32, i32, i32
  }
  func.func @transform_12(%arg0: i32, %arg1: i32) -> (i32, i32, i32) {
    %c0_i32 = arith.constant 0 : i32
    %c0_i32_0 = arith.constant 0 : i32
    %c0_i32_1 = arith.constant 0 : i32
    return %arg1, %c0_i32, %c0_i32_0 : i32, i32, i32
  }
  func.func @transform_13(%arg0: i32, %arg1: i32) -> (i32, i32) {
    %c0_i32 = arith.constant 0 : i32
    %c0_i32_0 = arith.constant 0 : i32
    %c0_i32_1 = arith.constant 0 : i32
    return %c0_i32, %c0_i32_0 : i32, i32
  }
  func.func @transform_14(%arg0: i32, %arg1: i32) -> (i32, i32) {
    %c0_i32 = arith.constant 0 : i32
    %c0_i32_0 = arith.constant 0 : i32
    %c0_i32_1 = arith.constant 0 : i32
    return %c0_i32, %c0_i32_0 : i32, i32
  }
  func.func @transform_15(%arg0: i32, %arg1: i32) -> (i32, i32) {
    %c0_i32 = arith.constant 0 : i32
    %c0_i32_0 = arith.constant 0 : i32
    return %arg0, %c0_i32 : i32, i32
  }
}

</mosaic_0001>

<bundles_post_ra>
// kernel: bigram_forward.3
= control target key start
LH: loop header
LB: loop body
LE: loop exit
PB: predicated region body
PF: predicated region fallthrough
CT: control target
= control target key end

     0   :  { %s479_s0 = inlined_call_operand.vmem [shape: bf16[128,128], index: 0, kind: input, shape index: {}]   ;;  %s480_s1 = inlined_call_operand.vmem [shape: bf16[128,128], index: 1, kind: input, shape index: {}]   ;;  %s481_s2 = inlined_call_operand.vmem [shape: f32[1,128], index: 2, kind: input, shape index: {}]   ;;  %s482_s3 = inlined_call_operand.hbm [shape: f32[128,128], index: 3, kind: output, shape index: {}]  }
   0x1   :  { %v364_v0 = vld [vmem:[%s480_s1 + $0x38] sm:$0xff]   ;;  %v365_v1 = vld [vmem:[%s480_s1 + $0x30] sm:$0xff]   ;;  %v366_v2 = vld [vmem:[%s480_s1 + $0x28] sm:$0xff]  }
   0x2   :  { %313 = vmatprep.subr.bf16.mxu0 %v364_v0  ;;  %345 = vmatprep.subr.bf16.mxu1 %v364_v0  ;;  %v367_v3 = vld [vmem:[%s480_s1 + $0x20] sm:$0xff]   ;;  %v368_v6 = vld [vmem:[%s480_s1 + $0x18] sm:$0xff]   ;;  %v369_v7 = vld [vmem:[%s480_s1 + $0x10] sm:$0xff]  }
   0x3   :  { %314 = vmatpush3.bf16.msra.mxu0 %v364_v0  ;;  %353 = vmatpush3.bf16.msra.mxu1 %v364_v0  ;;  %v372_v4 = vld [vmem:[%s479_s0] sm:$0xff]  }
   0x4   :  { %315 = vmatprep.subr.bf16.mxu0 %v365_v1  ;;  %346 = vmatprep.subr.bf16.mxu1 %v365_v1  ;;  %v373_v5 = vld [vmem:[%s479_s0 + $0x20] sm:$0xff]  }
   0x5   :  { %329 = vmatprep.mubr.bf16.mxu0 %v372_v4  ;;  %337 = vmatprep.mubr.bf16.mxu1 %v373_v5 }
   0x7   :  { %316 = vmatpush3.bf16.msra.mxu0 %v365_v1  ;;  %354 = vmatpush3.bf16.msra.mxu1 %v365_v1 }
   0x8   :  { %317 = vmatprep.subr.bf16.mxu0 %v366_v2  ;;  %347 = vmatprep.subr.bf16.mxu1 %v366_v2 }
   0xb   :  { %318 = vmatpush3.bf16.msra.mxu0 %v366_v2  ;;  %355 = vmatpush3.bf16.msra.mxu1 %v366_v2 }
   0xc   :  { %319 = vmatprep.subr.bf16.mxu0 %v367_v3  ;;  %348 = vmatprep.subr.bf16.mxu1 %v367_v3 }
   0xf   :  { %320 = vmatpush3.bf16.msra.mxu0 %v367_v3  ;;  %356 = vmatpush3.bf16.msra.mxu1 %v367_v3 }
  0x10   :  { %321 = vmatprep.subr.bf16.mxu0 %v368_v6  ;;  %349 = vmatprep.subr.bf16.mxu1 %v368_v6 }
  0x11   :  { %8 = vsyncpa [#allocation3], 0  ;;  %v370_v8 = vld [vmem:[%s480_s1 + $0x8] sm:$0xff]   ;;  %v371_v9 = vld [vmem:[%s480_s1] sm:$0xff]  }
  0x12   :  { %v374_v10 = vld [vmem:[%s479_s0 + $0x8] sm:$0xff]   ;;  %v376_v12 = vld [vmem:[%s479_s0 + $0x10] sm:$0xff]   ;;  %v378_v14 = vld [vmem:[%s479_s0 + $0x18] sm:$0xff]  }
  0x13   :  { %322 = vmatpush3.bf16.msra.mxu0 %v368_v6  ;;  %357 = vmatpush3.bf16.msra.mxu1 %v368_v6  ;;  %v375_v11 = vld [vmem:[%s479_s0 + $0x28] sm:$0xff]   ;;  %v377_v13 = vld [vmem:[%s479_s0 + $0x30] sm:$0xff]   ;;  %v379_v15 = vld [vmem:[%s479_s0 + $0x38] sm:$0xff]   ;;  %s402_s0 = smov [#allocation2]  }
  0x14   :  { %323 = vmatprep.subr.bf16.mxu0 %v369_v7  ;;  %350 = vmatprep.subr.bf16.mxu1 %v369_v7  ;;  %v280_v16 = vld [vmem:[%s481_s2] ss:$0 sm:$0xff]  ;;  %s269_s2 = sshll.u32 %s402_s0, 4  ;;  %s270_s2 = int_to_ptr.vmem [resolvable:$true] %s269_s2 }
  0x15   :  { %s380_s18 = scalar_lea.vmem %s270_s2, 2048  ;;  %p385_p1 = scmp.lt.s32.totalorder %s270_s2, %s270_s2 }
  0x16   :  { %p381_p0 = scmp.ne.s32.totalorder %s270_s2, %s380_s18  ;;  %p386_p2 = scmp.lt.s32.totalorder %s380_s18, %s380_s18 }
  0x17   :  { %324 = vmatpush3.bf16.msra.mxu0 %v369_v7  ;;  %358 = vmatpush3.bf16.msra.mxu1 %v369_v7 }
  0x18   :  { %325 = vmatprep.subr.bf16.mxu0 %v370_v8  ;;  %351 = vmatprep.subr.bf16.mxu1 %v370_v8  ;;  %p387_p3 = por %p386_p2, %p385_p1 }
  0x1a   :  { %p388_p4 = pnand %p387_p3, %p381_p0 }
  0x1b   :  { %326 = vmatpush3.bf16.msra.mxu0 %v370_v8  ;;  %359 = vmatpush3.bf16.msra.mxu1 %v370_v8 }
  0x1c   :  { %327 = vmatprep.subr.bf16.mxu0 %v371_v9  ;;  %352 = vmatprep.subr.bf16.mxu1 %v371_v9 }
  0x1f   :  { %328 = vmatpush3.bf16.msra.mxu0 %v371_v9  ;;  %360 = vmatpush3.bf16.msra.mxu1 %v371_v9 }
  0x22   :  { %330 = vmatmul.mubr.bf16.vlgmr.msra.gmra.mxu0 %v374_v10  ;;  %338 = vmatmul.mubr.bf16.vlgmr.msra.gmra.mxu1 %v375_v11 }
  0x23   :  { %333 = vmatprep.mubr.bf16.mxu0 %v376_v12  ;;  %341 = vmatprep.mubr.bf16.mxu1 %v377_v13 }
  0x2a   :  { %334 = vmatmul.mubr.bf16.gmra.mxu0 %v378_v14  ;;  %342 = vmatmul.mubr.bf16.gmra.mxu1 %v379_v15 }
  0xe2   :  { %v331_v17 = vpop.f32.mrf.mxu0  ;;  %v339_v18 = vpop.f32.mrf.mxu1 }
  0xe3   :  { %v194_v19 = vadd.f32 %v331_v17, %v280_v16  ;;  %v226_v20 = vadd.f32 %v339_v18, %v280_v16 }
  0xe4   :  { %v185_v21 = vpop.f32.mrf.mxu0  ;;  %v217_v22 = vpop.f32.mrf.mxu1 }
  0xe5   :  { %250 = vst [vmem:[#allocation2 + $0x10] sm:$0xff] %v194_v19  ;;  %258 = vst [vmem:[#allocation2 + $0x50] sm:$0xff] %v226_v20  ;;  %v186_v23 = vadd.f32 %v280_v16, %v185_v21  ;;  %v218_v24 = vadd.f32 %v280_v16, %v217_v22 }
  0xe6   :  { %v332_v25 = vpop.f32.mrf.mxu0  ;;  %v340_v26 = vpop.f32.mrf.mxu1 }
  0xe7   :  { %248 = vst [vmem:[#allocation2] sm:$0xff] %v186_v23  ;;  %256 = vst [vmem:[#allocation2 + $0x40] sm:$0xff] %v218_v24  ;;  %v197_v27 = vadd.f32 %v332_v25, %v280_v16  ;;  %v229_v28 = vadd.f32 %v340_v26, %v280_v16 }
  0xe8   :  { %v188_v29 = vpop.f32.mrf.mxu0  ;;  %v220_v30 = vpop.f32.mrf.mxu1 }
  0xe9   :  { %251 = vst [vmem:[#allocation2 + $0x18] sm:$0xff] %v197_v27  ;;  %259 = vst [vmem:[#allocation2 + $0x58] sm:$0xff] %v229_v28  ;;  %v189_v31 = vadd.f32 %v280_v16, %v188_v29  ;;  %v221_v32 = vadd.f32 %v280_v16, %v220_v30 }
  0xea   :  { %v335_v33 = vpop.f32.mrf.mxu0  ;;  %v343_v34 = vpop.f32.mrf.mxu1 }
  0xeb   :  { %249 = vst [vmem:[#allocation2 + $0x8] sm:$0xff] %v189_v31  ;;  %257 = vst [vmem:[#allocation2 + $0x48] sm:$0xff] %v221_v32  ;;  %v210_v35 = vadd.f32 %v335_v33, %v280_v16  ;;  %v242_v36 = vadd.f32 %v343_v34, %v280_v16 }
  0xec   :  { %v201_v37 = vpop.f32.mrf.mxu0  ;;  %v233_v38 = vpop.f32.mrf.mxu1 }
  0xed   :  { %254 = vst [vmem:[#allocation2 + $0x30] sm:$0xff] %v210_v35  ;;  %262 = vst [vmem:[#allocation2 + $0x70] sm:$0xff] %v242_v36  ;;  %v202_v39 = vadd.f32 %v280_v16, %v201_v37  ;;  %v234_v40 = vadd.f32 %v280_v16, %v233_v38 }
  0xee   :  { %v336_v41 = vpop.f32.mrf.mxu0  ;;  %v344_v42 = vpop.f32.mrf.mxu1 }
  0xef   :  { %252 = vst [vmem:[#allocation2 + $0x20] sm:$0xff] %v202_v39  ;;  %260 = vst [vmem:[#allocation2 + $0x60] sm:$0xff] %v234_v40  ;;  %v213_v43 = vadd.f32 %v336_v41, %v280_v16  ;;  %v245_v44 = vadd.f32 %v344_v42, %v280_v16 }
  0xf0   :  { %v204_v45 = vpop.f32.mrf.mxu0  ;;  %v236_v46 = vpop.f32.mrf.mxu1 }
  0xf1   :  { %255 = vst [vmem:[#allocation2 + $0x38] sm:$0xff] %v213_v43  ;;  %263 = vst [vmem:[#allocation2 + $0x78] sm:$0xff] %v245_v44  ;;  %v205_v47 = vadd.f32 %v280_v16, %v204_v45  ;;  %v237_v48 = vadd.f32 %v280_v16, %v236_v46 }
  0xf3   :  { %253 = vst [vmem:[#allocation2 + $0x28] sm:$0xff] %v205_v47  ;;  %261 = vst [vmem:[#allocation2 + $0x68] sm:$0xff] %v237_v48 }
  0xf4   :  { %391 = shalt.err (!%p388_p4)
}
  0xf5   :  { %s403_s19 = smov 128   ;;  %s404_s20 = smov 8  }
  0xf6   :  { %275 = dma.vmem_to_hbm [thread:$0]  %s270_s2, 2048, %s482_s3, [#allocation3], %s403_s19, %s403_s19, %s404_s20  }
  0xf7   :  { %400 = dma.done.wait [#allocation3], 2048  }
  0xf8   :  { %401 = vsyncadd [#allocation3], 4294965248 }
  0xf9   :  { %279 = vsyncpa [#allocation3], 1 }

// kernel: bigram_forward.2
= control target key start
LH: loop header
LB: loop body
LE: loop exit
PB: predicated region body
PF: predicated region fallthrough
CT: control target
= control target key end

     0   :  { %s7919_s18 = smov 0   ;;  %s7921_s19 = smov 0   ;;  %s10843_s0 = inlined_call_operand.vmem [shape: f32[128,128], index: 0, kind: input, shape index: {}]   ;;  %s10844_s1 = inlined_call_operand.vmem [shape: f32[64,64], index: 1, kind: input, shape index: {}]   ;;  %s10845_s2 = inlined_call_operand.vmem [shape: f32[2,1,128], index: 2, kind: input, shape index: {}]   ;;  %s10846_s3 = inlined_call_operand.vmem [shape: f32[2,1,128], index: 3, kind: input, shape index: {}]   ;;  %s10847_s4 = inlined_call_operand.vmem [shape: bf16[2,128,384], index: 4, kind: input, shape index: {}]   ;;  %s10848_s5 = inlined_call_operand.vmem [shape: bf16[2,128,128], index: 5, kind: input, shape index: {}]   ;;  %s10849_s6 = inlined_call_operand.vmem [shape: f32[2,1,128], index: 6, kind: input, shape index: {}]   ;;  %s10850_s7 = inlined_call_operand.vmem [shape: f32[2,1,128], index: 7, kind: input, shape index: {}]   ;;  %s10851_s8 = inlined_call_operand.vmem [shape: f32[2,1,128], index: 8, kind: input, shape index: {}]   ;;  %s10852_s9 = inlined_call_operand.vmem [shape: bf16[2,128,512], index: 9, kind: input, shape index: {}]   ;;  %s10853_s10 = inlined_call_operand.vmem [shape: f32[2,1,512], index: 10, kind: input, shape index: {}]   ;;  %s10854_s11 = inlined_call_operand.vmem [shape: bf16[2,512,128], index: 11, kind: input, shape index: {}]   ;;  %s10855_s12 = inlined_call_operand.vmem [shape: f32[2,1,128], index: 12, kind: input, shape index: {}]   ;;  %s10856_s13 = inlined_call_operand.vmem [shape: f32[1,128], index: 13, kind: input, shape index: {}]   ;;  %s10857_s14 = inlined_call_operand.vmem [shape: f32[1,128], index: 14, kind: input, shape index: {}]   ;;  %s10858_s15 = inlined_call_operand.vmem [shape: bf16[128,128], index: 15, kind: output, shape index: {}]  }
   0x1   :  { %10933 = sst [smem:[#allocation34_spill]] %s10844_s1  ;;  %s7923_s20 = smov 0  }
   0x2   :  { %10934 = sst [smem:[#allocation35_spill]] %s10848_s5 }
   0x3   :  { %10935 = sst [smem:[#allocation36_spill]] %s10856_s13 }
   0x4   :  { %10936 = sst [smem:[#allocation37_spill]] %s10857_s14 }
   0x5   :  { %10937 = sst [smem:[#allocation38_spill]] %s10858_s15 }
   0x6 LB: > { %10938 = sst [smem:[#allocation3_spill]] %s7829_s19  ;;  %s34_s21 = sadd.s32 1, %s7829_s19  ;;  %s7833_s20 = sphi %s7923_s20, %s25_s20   ;;  %s7829_s19 = sphi %s7921_s19, %s11104_s19   ;;  %s7825_s18 = sphi %s7919_s18, %s11103_s18  }
   0x7   : > { %10939 = sst [smem:[#allocation4_spill]] %s7833_s20  ;;  %p6248_p0 = scmp.ge.s32.totalorder %s7833_s20, 1 }
   0x8   : > { %p35_p1 = scmp.ge.s32.totalorder %s34_s21, 2  ;;  %p547_p2 = scmp.lt.s32.totalorder %s7833_s20, 3 }
   0xa   : > { %s11106_s21 = smov (%p35_p1, %s34_s21), 0  ;;  %p548_p3 = pnand %p6248_p0, %p547_p2 }
   0xb   : > { %10940 = sst [smem:[#allocation5_spill]] %s11106_s21 }
   0xc   : > { %551 = sbr.rel (%p548_p3) target bundleno = 5254 (0x1486), region = 80 }
  0x11   : > { %p643_p4 = scmp.lt.s32.totalorder %s7825_s18, 1  ;;  %s10941_s5 = sld [smem:[#allocation35_spill]] }
  0x12   : > { %p6257_p5 = scmp.ne.s32.totalorder %s7825_s18, 0 }
  0x13   : > { %s7941_s22 = scalar_select %p643_p4, %s7825_s18, 1 }
  0x15   : > { %s7154_s29 = smul.u32 192, %s7941_s22  ;;  %s6448_s30 = sshll.u32 %s7941_s22, 6 }
  0x16   : > { %s664_s26 = scalar_lea.vmem %s10850_s7, %s7941_s22  ;;  %s6449_s16 = sshll.u32 %s7941_s22, 8 }
  0x17   : > { %s7956_s23 = scalar_lea.vmem %s10941_s5, %s6448_s30  ;;  %s7965_s14 = scalar_lea.vmem %s10847_s4, %s7154_s29 }
  0x18   : > { %s7979_s5 = scalar_lea.vmem %s10852_s9, %s6449_s16  ;;  %s6254_s21 = sshll.u32 %s7941_s22, 2 }
  0x19   : > { %s7985_s15 = scalar_lea.vmem %s10853_s10, %s6254_s21  ;;  %s7990_s13 = scalar_lea.vmem %s10854_s11, %s6449_s16 }
  0x1a   : > { %s684_s27 = scalar_lea.vmem %s10855_s12, %s7941_s22  ;;  %695 = sbr.rel (%p6257_p5) target bundleno = 40 (0x28), region = 84 }
  0x1f   : > { %v696_v0 = vld [vmem:[%s10843_s0] sm:$0xff]  ;;  %v697_v1 = vld [vmem:[%s10843_s0 + $0x8] sm:$0xff]  ;;  %v698_v2 = vld [vmem:[%s10843_s0 + $0x10] sm:$0xff] }
  0x20   : > { %712 = vst [vmem:[#allocation2 + $0x30] sm:$0xff] %v696_v0  ;;  %713 = vst [vmem:[#allocation2] sm:$0xff] %v697_v1  ;;  %v699_v3 = vld [vmem:[%s10843_s0 + $0x18] sm:$0xff]  ;;  %v700_v4 = vld [vmem:[%s10843_s0 + $0x20] sm:$0xff] }
  0x21   : > { %714 = vst [vmem:[#allocation2 + $0x58] sm:$0xff] %v698_v2  ;;  %v701_v5 = vld [vmem:[%s10843_s0 + $0x28] sm:$0xff]  ;;  %715 = vst [vmem:[#allocation2 + $0x18] sm:$0xff] %v699_v3  ;;  %v702_v6 = vld [vmem:[%s10843_s0 + $0x30] sm:$0xff] }
  0x22   : > { %716 = vst [vmem:[#allocation2 + $0x50] sm:$0xff] %v700_v4  ;;  %717 = vst [vmem:[#allocation2 + $0x68] sm:$0xff] %v701_v5  ;;  %v703_v7 = vld [vmem:[%s10843_s0 + $0x38] sm:$0xff]  ;;  %v704_v8 = vld [vmem:[%s10843_s0 + $0x40] sm:$0xff] }
  0x23   : > { %718 = vst [vmem:[#allocation2 + $0x8] sm:$0xff] %v702_v6  ;;  %719 = vst [vmem:[#allocation2 + $0x48] sm:$0xff] %v703_v7  ;;  %v705_v9 = vld [vmem:[%s10843_s0 + $0x48] sm:$0xff]  ;;  %v706_v10 = vld [vmem:[%s10843_s0 + $0x50] sm:$0xff] }
  0x24   : > { %720 = vst [vmem:[#allocation2 + $0x40] sm:$0xff] %v704_v8  ;;  %v707_v11 = vld [vmem:[%s10843_s0 + $0x58] sm:$0xff]  ;;  %721 = vst [vmem:[#allocation2 + $0x20] sm:$0xff] %v705_v9  ;;  %v708_v12 = vld [vmem:[%s10843_s0 + $0x60] sm:$0xff] }
  0x25   : > { %722 = vst [vmem:[#allocation2 + $0x10] sm:$0xff] %v706_v10  ;;  %723 = vst [vmem:[#allocation2 + $0x38] sm:$0xff] %v707_v11  ;;  %v709_v13 = vld [vmem:[%s10843_s0 + $0x68] sm:$0xff]  ;;  %v710_v14 = vld [vmem:[%s10843_s0 + $0x70] sm:$0xff] }
  0x26   : > { %724 = vst [vmem:[#allocation2 + $0x60] sm:$0xff] %v708_v12  ;;  %725 = vst [vmem:[#allocation2 + $0x70] sm:$0xff] %v709_v13  ;;  %v711_v15 = vld [vmem:[%s10843_s0 + $0x78] sm:$0xff] }
  0x27   : > { %726 = vst [vmem:[#allocation2 + $0x78] sm:$0xff] %v710_v14  ;;  %727 = vst [vmem:[#allocation2 + $0x28] sm:$0xff] %v711_v15 }
  0x28 PF: > { %v728_v16 = vld [vmem:[#allocation2 + $0x30] sm:$0xff]  ;;  %v730_v17 = vld [vmem:[#allocation2 + $0x58] sm:$0xff]  ;;  %v729_v18 = vld [vmem:[#allocation2] sm:$0xff]  ;;  %s10942_s30 = scalar_lea.vmem %s10845_s2, %s7941_s22  ;;  %s10943_s19 = scalar_lea.vmem %s10846_s3, %s7941_s22  ;;  %vm1377_vm0 = vcmask 261120   ;;  %vm1467_vm1 = vcmask 523264   ;;  %vm2579_vm2 = vcmask 785408  }
  0x29   : > { %746 = vadd.xlane.f32.xlu0 %v728_v16  ;;  %750 = vadd.xlane.f32.xlu1 %v730_v17  ;;  %v731_v19 = vld [vmem:[#allocation2 + $0x18] sm:$0xff]  ;;  %v732_v20 = vld [vmem:[#allocation2 + $0x50] sm:$0xff]  ;;  %v733_v21 = vld [vmem:[#allocation2 + $0x68] sm:$0xff]  ;;  %s7836_s21 = smov 96   ;;  %s7837_s24 = smov 64  }
  0x2a   : > { %v734_v22 = vld [vmem:[#allocation2 + $0x8] sm:$0xff]  ;;  %v7186_v57 = vld [vmem:[%s7965_s14 + $0x94] ss:$12 sps:$4 sm:$0xff]   ;;  %v7188_v58 = vld [vmem:[%s7965_s14 + $0xb0] ss:$12 sps:$4 sm:$0xff]   ;;  %s10960_s29 = sld [smem:[#allocation34_spill]]  ;;  %s11065_s20 = scalar_lea.vmem %s10851_s8, %s7941_s22 }
  0x2b   : > { %v735_v23 = vld [vmem:[#allocation2 + $0x48] sm:$0xff]  ;;  %v7189_v59 = vld [vmem:[%s7965_s14 + $0x90] ss:$12 sps:$4 sm:$0xff]   ;;  %v8082_v61 = vld [vmem:[#allocation2 + $0x40] sm:$0xff]  ;;  %6802 = vmatprep.subr.bf16.mxu1 %v7188_v58  ;;  %s7838_s17 = smov 32   ;;  %p6424_p6 = scmp.ge.s32.totalorder %s7825_s18, 1 }
  0x2c   : > { %v7183_v24 = vld [vmem:[%s7965_s14 + $0xac] ss:$12 sps:$4 sm:$0xff]   ;;  %v7185_v25 = vld [vmem:[%s7965_s14 + $0xa8] ss:$12 sps:$4 sm:$0xff]   ;;  %6803 = vmatpush3.bf16.msra.mxu1 %v7188_v58  ;;  %v8088_v1 = vld [vmem:[#allocation2 + $0x20] sm:$0xff] }
  0x2d   : > { %748 = vadd.xlane.f32.xlu0 %v729_v18  ;;  %752 = vadd.xlane.f32.xlu1 %v731_v19  ;;  %v7190_v62 = vld [vmem:[%s7965_s14 + $0x7c] ss:$12 sps:$4 sm:$0xff]   ;;  %v7192_v63 = vld [vmem:[%s7965_s14 + $0x98] ss:$12 sps:$4 sm:$0xff]   ;;  %v8090_v2 = vld [vmem:[#allocation2 + $0x10] sm:$0xff] }
  0x2e   : > { %1135 = vmatprep.subr.bf16.mxu0 %v7183_v24  ;;  %v7193_v0 = vld [vmem:[%s7965_s14 + $0x78] ss:$12 sps:$4 sm:$0xff]   ;;  %6804 = vmatprep.subr.bf16.mxu1 %v7192_v63  ;;  %v7196_v4 = vld [vmem:[%s7965_s14 + $0x80] ss:$12 sps:$4 sm:$0xff]   ;;  %v7200_v9 = vld [vmem:[%s7965_s14 + $0x68] ss:$12 sps:$4 sm:$0xff]  }
  0x2f   : > { %1136 = vmatpush1.bf16.msra.mxu0 %v7185_v25  ;;  %v7194_v3 = vld [vmem:[%s7965_s14 + $0x64] ss:$12 sps:$4 sm:$0xff]   ;;  %v7197_v5 = vld [vmem:[%s7965_s14 + $0x60] ss:$12 sps:$4 sm:$0xff]   ;;  %v8097_v6 = vld [vmem:[#allocation2 + $0x38] sm:$0xff] }
  0x30   : > { %1137 = vmatprep.subr.bf16.mxu0 %v7186_v57  ;;  %6805 = vmatpush3.bf16.msra.mxu1 %v7192_v63  ;;  %v8099_v7 = vld [vmem:[#allocation2 + $0x60] sm:$0xff]  ;;  %v7198_v8 = vld [vmem:[%s7965_s14 + $0x4c] ss:$12 sps:$4 sm:$0xff]   ;;  %v7201_v10 = vld [vmem:[%s7965_s14 + $0x48] ss:$12 sps:$4 sm:$0xff]  }
  0x31   : > { %754 = vadd.xlane.f32.xlu0 %v732_v20  ;;  %756 = vadd.xlane.f32.xlu1 %v733_v21  ;;  %v8106_v11 = vld [vmem:[#allocation2 + $0x70] sm:$0xff]  ;;  %v8108_v12 = vld [vmem:[#allocation2 + $0x78] sm:$0xff] }
  0x32   : > { %6806 = vmatprep.subr.bf16.mxu1 %v7196_v4  ;;  %v7202_v13 = vld [vmem:[%s7965_s14 + $0x34] ss:$12 sps:$4 sm:$0xff]   ;;  %v7204_v14 = vld [vmem:[%s7965_s14 + $0x50] ss:$12 sps:$4 sm:$0xff]  }
  0x33   : > { %1138 = vmatpush1.bf16.msra.mxu0 %v7189_v59  ;;  %v7205_v15 = vld [vmem:[%s7965_s14 + $0x30] ss:$12 sps:$4 sm:$0xff]   ;;  %v7214_v24 = vld [vmem:[%s7965_s14 + $0x8] ss:$12 sps:$4 sm:$0xff]  }
  0x34   : > { %1139 = vmatprep.subr.bf16.mxu0 %v7190_v62  ;;  %6807 = vmatpush3.bf16.msra.mxu1 %v7196_v4 }
  0x35   : > { %758 = vadd.xlane.f32.xlu0 %v734_v22  ;;  %760 = vadd.xlane.f32.xlu1 %v735_v23 }
  0x36   : > { %6808 = vmatprep.subr.bf16.mxu1 %v7200_v9 }
  0x37   : > { %1140 = vmatpush1.bf16.msra.mxu0 %v7193_v0 }
  0x38   : > { %1141 = vmatprep.subr.bf16.mxu0 %v7194_v3  ;;  %6809 = vmatpush3.bf16.msra.mxu1 %v7200_v9 }
  0x39   : > { %6810 = vmatprep.subr.bf16.mxu1 %v7204_v14 }
  0x3b   : > { %1142 = vmatpush1.bf16.msra.mxu0 %v7197_v5 }
  0x3c   : > { %1143 = vmatprep.subr.bf16.mxu0 %v7198_v8  ;;  %6811 = vmatpush3.bf16.msra.mxu1 %v7204_v14 }
  0x3f   : > { %1144 = vmatpush1.bf16.msra.mxu0 %v7201_v10 }
  0x40   : > { %1145 = vmatprep.subr.bf16.mxu0 %v7202_v13 }
  0x43   : > { %1146 = vmatpush1.bf16.msra.mxu0 %v7205_v15 }
  0xb2   : > { %v747_v26 = vpop.xlane.xlu0 %746  ;;  %v751_v27 = vpop.xlane.xlu1 %750 }
  0xb3   : > { %v779_v28 = vmul.f32 0.0078125, %v747_v26  ;;  %v781_v29 = vmul.f32 0.0078125, %v751_v27 }
  0xb5   : > { %v8047_v30 = vsub.f32 %v728_v16, %v779_v28  ;;  %v8049_v31 = vsub.f32 %v730_v17, %v781_v29  ;;  %v8115_v16 = vld [vmem:[#allocation2 + $0x28] sm:$0xff] }
  0xb6   : > { %v749_v32 = vpop.xlane.xlu0 %748  ;;  %v753_v33 = vpop.xlane.xlu1 %752  ;;  %v7206_v17 = vld [vmem:[%s7965_s14 + $0x1c] ss:$12 sps:$4 sm:$0xff]  }
  0xb7   : > { %v780_v34 = vmul.f32 0.0078125, %v749_v32  ;;  %v811_v35 = vmul.f32 %v8047_v30, %v8047_v30  ;;  %v782_v36 = vmul.f32 0.0078125, %v753_v33  ;;  %v813_v37 = vmul.f32 %v8049_v31, %v8049_v31  ;;  %1147 = vmatprep.subr.bf16.mxu0 %v7206_v17 }
  0xb9   : > { %827 = vadd.xlane.f32.xlu0 %v811_v35  ;;  %v8055_v38 = vsub.f32 %v729_v18, %v780_v34  ;;  %v8057_v39 = vsub.f32 %v731_v19, %v782_v36  ;;  %v7208_v18 = vld [vmem:[%s7965_s14 + $0x38] ss:$12 sps:$4 sm:$0xff]  }
  0xba   : > { %v755_v40 = vpop.xlane.xlu0 %754  ;;  %v757_v41 = vpop.xlane.xlu1 %756  ;;  %v7209_v19 = vld [vmem:[%s7965_s14 + $0x18] ss:$12 sps:$4 sm:$0xff]   ;;  %6812 = vmatprep.subr.bf16.mxu1 %v7208_v18 }
  0xbb   : > { %v783_v42 = vmul.f32 0.0078125, %v755_v40  ;;  %v812_v43 = vmul.f32 %v8055_v38, %v8055_v38  ;;  %v784_v44 = vmul.f32 0.0078125, %v757_v41  ;;  %v814_v45 = vmul.f32 %v8057_v39, %v8057_v39  ;;  %1148 = vmatpush1.bf16.msra.mxu0 %v7209_v19  ;;  %6813 = vmatpush3.bf16.msra.mxu1 %v7208_v18 }
  0xbd   : > { %831 = vadd.xlane.f32.xlu0 %v813_v37  ;;  %829 = vadd.xlane.f32.xlu1 %v812_v43  ;;  %v8063_v46 = vsub.f32 %v732_v20, %v783_v42  ;;  %v8065_v47 = vsub.f32 %v733_v21, %v784_v44  ;;  %v7210_v20 = vld [vmem:[%s7965_s14 + $0x4] ss:$12 sps:$4 sm:$0xff]   ;;  %v7212_v21 = vld [vmem:[%s7965_s14 + $0x20] ss:$12 sps:$4 sm:$0xff]  }
  0xbe   : > { %v759_v48 = vpop.xlane.xlu0 %758  ;;  %v761_v49 = vpop.xlane.xlu1 %760  ;;  %1149 = vmatprep.subr.bf16.mxu0 %v7210_v20  ;;  %6814 = vmatprep.subr.bf16.mxu1 %v7212_v21 }
  0xbf   : > { %v785_v50 = vmul.f32 0.0078125, %v759_v48  ;;  %v815_v51 = vmul.f32 %v8063_v46, %v8063_v46  ;;  %v786_v52 = vmul.f32 0.0078125, %v761_v49  ;;  %v816_v53 = vmul.f32 %v8065_v47, %v8065_v47  ;;  %6815 = vmatpush3.bf16.msra.mxu1 %v7212_v21 }
  0xc0   : > { %6816 = vmatprep.subr.bf16.mxu1 %v7214_v24 }
  0xc1   : > { %833 = vadd.xlane.f32.xlu1 %v814_v45  ;;  %835 = vadd.xlane.f32.xlu0 %v815_v51  ;;  %v8071_v54 = vsub.f32 %v734_v22, %v785_v50  ;;  %v8073_v55 = vsub.f32 %v735_v23, %v786_v52  ;;  %v10863_v22 = vmov 0   ;;  %v7213_v23 = vld [vmem:[%s7965_s14] ss:$12 sps:$4 sm:$0xff]  }
  0xc2   : > { %1167 = vmatprep.mubr.bf16.mxu0 %v10863_v22  ;;  %1150 = vmatpush1.bf16.msra.mxu0 %v7213_v23 }
  0xc3   : > { %v817_v56 = vmul.f32 %v8071_v54, %v8071_v54  ;;  %v818_v60 = vmul.f32 %v8073_v55, %v8073_v55  ;;  %6817 = vmatpush3.bf16.msra.mxu1 %v7214_v24 }
  0xc5   : > { %837 = vadd.xlane.f32.xlu1 %v816_v53  ;;  %839 = vadd.xlane.f32.xlu0 %v817_v56 }
  0xc9   : > { %841 = vadd.xlane.f32.xlu1 %v818_v60  ;;  %762 = vadd.xlane.f32.xlu0 %v8082_v61  ;;  %v8131_v60 = vld [vmem:[%s10942_s30] ss:$0 sm:$0xff] }
  0xcd   : > { %764 = vadd.xlane.f32.xlu1 %v8088_v1  ;;  %766 = vadd.xlane.f32.xlu0 %v8090_v2 }
  0xd1   : > { %768 = vadd.xlane.f32.xlu1 %v8097_v6  ;;  %770 = vadd.xlane.f32.xlu0 %v8099_v7 }
  0xd5   : > { %772 = vadd.xlane.f32.xlu1 %v8106_v11  ;;  %774 = vadd.xlane.f32.xlu0 %v8108_v12 }
  0xd9   : > { %776 = vadd.xlane.f32.xlu1 %v8115_v16 }
 0x142   : > { %v828_v25 = vpop.xlane.xlu0 %827 }
 0x143   : > { %v859_v26 = vmul.f32 0.0078125, %v828_v25 }
 0x145   : > { %v875_v27 = vadd.f32 1e-05, %v859_v26 }
 0x146   : > { %v830_v28 = vpop.xlane.xlu1 %829  ;;  %v832_v29 = vpop.xlane.xlu0 %831 }
 0x147   : > { %7303 = vrsqrt.f32 %v875_v27  ;;  %v860_v32 = vmul.f32 0.0078125, %v830_v28  ;;  %v861_v33 = vmul.f32 0.0078125, %v832_v29 }
 0x149   : > { %v876_v34 = vadd.f32 1e-05, %v860_v32  ;;  %v877_v35 = vadd.f32 1e-05, %v861_v33 }
 0x14a   : > { %v834_v36 = vpop.xlane.xlu1 %833  ;;  %v836_v37 = vpop.xlane.xlu0 %835 }
 0x14b   : > { %7305 = vrsqrt.f32 %v876_v34  ;;  %v862_v40 = vmul.f32 0.0078125, %v834_v36  ;;  %v863_v41 = vmul.f32 0.0078125, %v836_v37 }
 0x14c   : > { %7307 = vrsqrt.f32 %v877_v35 }
 0x14d   : > { %v878_v42 = vadd.f32 1e-05, %v862_v40  ;;  %v879_v43 = vadd.f32 1e-05, %v863_v41 }
 0x14e   : > { %v838_v44 = vpop.xlane.xlu1 %837  ;;  %v840_v45 = vpop.xlane.xlu0 %839 }
 0x14f   : > { %7309 = vrsqrt.f32 %v878_v42  ;;  %v864_v48 = vmul.f32 0.0078125, %v838_v44  ;;  %v865_v49 = vmul.f32 0.0078125, %v840_v45 }
 0x150   : > { %7311 = vrsqrt.f32 %v879_v43 }
 0x151   : > { %v880_v50 = vadd.f32 1e-05, %v864_v48  ;;  %v881_v51 = vadd.f32 1e-05, %v865_v49 }
 0x152   : > { %v842_v52 = vpop.xlane.xlu1 %841  ;;  %v763_v53 = vpop.xlane.xlu0 %762 }
 0x153   : > { %7313 = vrsqrt.f32 %v880_v50  ;;  %v866_v56 = vmul.f32 0.0078125, %v842_v52  ;;  %v787_v57 = vmul.f32 0.0078125, %v763_v53 }
 0x154   : > { %v7304_v58 = vpop.eup %7303  ;;  %7315 = vrsqrt.f32 %v881_v51 }
 0x155   : > { %v882_v59 = vadd.f32 1e-05, %v866_v56  ;;  %v907_v62 = vmul.f32 %v7304_v58, %v8047_v30  ;;  %v8135_v63 = vsub.f32 %v8082_v61, %v787_v57  ;;  %v8145_v30 = vld [vmem:[%s10943_s19] ss:$0 sm:$0xff]  ;;  %s11036_s19 = scalar_lea.vmem %s10849_s6, %s7941_s22 }
 0x156   : > { %v765_v0 = vpop.xlane.xlu1 %764  ;;  %v767_v3 = vpop.xlane.xlu0 %766 }
 0x157   : > { %7317 = vrsqrt.f32 %v882_v59  ;;  %v788_v4 = vmul.f32 0.0078125, %v765_v0  ;;  %v819_v5 = vmul.f32 %v8135_v63, %v8135_v63  ;;  %v929_v9 = vmul.f32 %v8131_v60, %v907_v62 }
 0x158   : > { %v7306_v8 = vpop.eup %7305  ;;  %v789_v10 = vmul.f32 0.0078125, %v767_v3 }
 0x159   : > { %v7308_v13 = vpop.eup %7307  ;;  %v908_v61 = vmul.f32 %v7306_v8, %v8055_v38  ;;  %v8149_v14 = vsub.f32 %v8088_v1, %v788_v4  ;;  %843 = vadd.xlane.f32.xlu0 %v819_v5  ;;  %v951_v38 = vadd.f32 %v8145_v30, %v929_v9 }
 0x15a   : > { %v909_v15 = vmul.f32 %v7308_v13, %v8049_v31  ;;  %v769_v17 = vpop.xlane.xlu1 %768  ;;  %v8153_v18 = vsub.f32 %v8090_v2, %v789_v10  ;;  %v771_v19 = vpop.xlane.xlu0 %770 }
 0x15b   : > { %v930_v20 = vmul.f32 %v8131_v60, %v908_v61  ;;  %v820_v21 = vmul.f32 %v8149_v14, %v8149_v14  ;;  %v790_v23 = vmul.f32 0.0078125, %v769_v17  ;;  %v791_v24 = vmul.f32 0.0078125, %v771_v19 }
 0x15c   : > { %v7310_v25 = vpop.eup %7309  ;;  %v931_v1 = vmul.f32 %v8131_v60, %v909_v15  ;;  %v821_v31 = vmul.f32 %v8153_v18, %v8153_v18 }
 0x15d   : > { %v7312_v26 = vpop.eup %7311  ;;  %v952_v2 = vadd.f32 %v8145_v30, %v930_v20  ;;  %v910_v27 = vmul.f32 %v7310_v25, %v8057_v39  ;;  %845 = vadd.xlane.f32.xlu1 %v820_v21  ;;  %v8165_v28 = vsub.f32 %v8097_v6, %v790_v23  ;;  %v8168_v29 = vsub.f32 %v8099_v7, %v791_v24 }
 0x15e   : > { %v911_v32 = vmul.f32 %v7312_v26, %v8063_v46  ;;  %847 = vadd.xlane.f32.xlu0 %v821_v31  ;;  %v773_v33 = vpop.xlane.xlu1 %772  ;;  %v775_v34 = vpop.xlane.xlu0 %774  ;;  %v953_v41 = vadd.f32 %v8145_v30, %v931_v1 }
 0x15f   : > { %v967_v35 = vpack.c.bf16 %v952_v2, %v951_v38  ;;  %v932_v36 = vmul.f32 %v8131_v60, %v910_v27  ;;  %v822_v37 = vmul.f32 %v8165_v28, %v8165_v28  ;;  %v792_v40 = vmul.f32 0.0078125, %v773_v33 }
 0x160   : > { %v7314_v39 = vpop.eup %7313  ;;  %v933_v6 = vmul.f32 %v8131_v60, %v911_v32  ;;  %v823_v7 = vmul.f32 %v8168_v29, %v8168_v29  ;;  %v793_v42 = vmul.f32 0.0078125, %v775_v34 }
 0x161   : > { %v7316_v46 = vpop.eup %7315  ;;  %1168 = vmatmul.mubr.bf16.vlgmr.msra.gmra.mxu0 %v967_v35  ;;  %6818 = vmatprep.mubr.bf16.mxu1 %v967_v35  ;;  %v954_v43 = vadd.f32 %v8145_v30, %v932_v36  ;;  %v912_v44 = vmul.f32 %v7314_v39, %v8065_v47  ;;  %v8181_v45 = vsub.f32 %v8106_v11, %v792_v40 }
 0x162   : > { %1177 = vmatprep.mubr.bf16.mxu0 %v10863_v22  ;;  %v913_v48 = vmul.f32 %v7316_v46, %v8071_v54  ;;  %849 = vadd.xlane.f32.xlu1 %v822_v37  ;;  %v777_v49 = vpop.xlane.xlu1 %776  ;;  %v8186_v50 = vsub.f32 %v8108_v12, %v793_v42  ;;  %v955_v11 = vadd.f32 %v8145_v30, %v933_v6 }
 0x163   : > { %v968_v51 = vpack.c.bf16 %v954_v43, %v953_v41  ;;  %v934_v52 = vmul.f32 %v8131_v60, %v912_v44  ;;  %v824_v53 = vmul.f32 %v8181_v45, %v8181_v45  ;;  %851 = vadd.xlane.f32.xlu0 %v823_v7  ;;  %v794_v47 = vmul.f32 0.0078125, %v777_v49 }
 0x164   : > { %v7318_v56 = vpop.eup %7317  ;;  %v825_v57 = vmul.f32 %v8186_v50, %v8186_v50  ;;  %v935_v58 = vmul.f32 %v8131_v60, %v913_v48 }
 0x165   : > { %6819 = vmatmul.mubr.bf16.vlgmr.msra.gmra.mxu1 %v968_v51  ;;  %v956_v54 = vadd.f32 %v8145_v30, %v934_v52  ;;  %v914_v12 = vmul.f32 %v7318_v56, %v8073_v55  ;;  %v8198_v59 = vsub.f32 %v8115_v16, %v794_v47 }
 0x166   : > { %853 = vadd.xlane.f32.xlu1 %v824_v53  ;;  %v957_v4 = vadd.f32 %v8145_v30, %v935_v58 }
 0x167   : > { %v969_v62 = vpack.c.bf16 %v956_v54, %v955_v11  ;;  %v936_v0 = vmul.f32 %v8131_v60, %v914_v12  ;;  %v826_v3 = vmul.f32 %v8198_v59, %v8198_v59  ;;  %855 = vadd.xlane.f32.xlu0 %v825_v57 }
 0x169   : > { %1178 = vmatmul.mubr.bf16.gmra.mxu0 %v968_v51  ;;  %6822 = vmatprep.mubr.bf16.mxu1 %v969_v62  ;;  %v958_v5 = vadd.f32 %v8145_v30, %v936_v0 }
 0x16a   : > { %1187 = vmatprep.mubr.bf16.mxu0 %v10863_v22  ;;  %857 = vadd.xlane.f32.xlu1 %v826_v3 }
 0x16b   : > { %v970_v55 = vpack.c.bf16 %v958_v5, %v957_v4 }
 0x16d   : > { %6823 = vmatmul.mubr.bf16.gmra.mxu1 %v970_v55 }
 0x171   : > { %1188 = vmatmul.mubr.bf16.gmra.mxu0 %v969_v62 }
 0x172   : > { %1197 = vmatprep.mubr.bf16.mxu0 %v10863_v22 }
 0x179   : > { %1198 = vmatmul.mubr.bf16.gmra.mxu0 %v970_v55 }
 0x17a   : > { %1207 = vmatprep.mubr.bf16.mxu0 %v10863_v22 }
 0x1e2   : > { %v844_v16 = vpop.xlane.xlu0 %843 }
 0x1e3   : > { %v867_v8 = vmul.f32 0.0078125, %v844_v16 }
 0x1e5   : > { %v883_v9 = vadd.f32 1e-05, %v867_v8 }
 0x1e6   : > { %v846_v10 = vpop.xlane.xlu1 %845 }
 0x1e7   : > { %v868_v13 = vmul.f32 0.0078125, %v846_v10  ;;  %7319 = vrsqrt.f32 %v883_v9  ;;  %v848_v61 = vpop.xlane.xlu0 %847 }
 0x1e8   : > { %v869_v15 = vmul.f32 0.0078125, %v848_v61 }
 0x1e9   : > { %v884_v17 = vadd.f32 1e-05, %v868_v13 }
 0x1ea   : > { %v885_v19 = vadd.f32 1e-05, %v869_v15 }
 0x1eb   : > { %7321 = vrsqrt.f32 %v884_v17  ;;  %v850_v20 = vpop.xlane.xlu1 %849 }
 0x1ec   : > { %v870_v21 = vmul.f32 0.0078125, %v850_v20  ;;  %7323 = vrsqrt.f32 %v885_v19  ;;  %v852_v23 = vpop.xlane.xlu0 %851 }
 0x1ed   : > { %v871_v24 = vmul.f32 0.0078125, %v852_v23 }
 0x1ee   : > { %v886_v25 = vadd.f32 1e-05, %v870_v21 }
 0x1ef   : > { %v854_v38 = vpop.xlane.xlu1 %853  ;;  %v887_v1 = vadd.f32 1e-05, %v871_v24 }
 0x1f0   : > { %7325 = vrsqrt.f32 %v886_v25  ;;  %v872_v31 = vmul.f32 0.0078125, %v854_v38  ;;  %v856_v26 = vpop.xlane.xlu0 %855 }
 0x1f1   : > { %7327 = vrsqrt.f32 %v887_v1  ;;  %v873_v2 = vmul.f32 0.0078125, %v856_v26 }
 0x1f2   : > { %v888_v27 = vadd.f32 1e-05, %v872_v31 }
 0x1f3   : > { %v858_v32 = vpop.xlane.xlu1 %857  ;;  %v889_v33 = vadd.f32 1e-05, %v873_v2 }
 0x1f4   : > { %v7320_v34 = vpop.eup %7319  ;;  %7329 = vrsqrt.f32 %v888_v27  ;;  %v874_v35 = vmul.f32 0.0078125, %v858_v32 }
 0x1f5   : > { %7331 = vrsqrt.f32 %v889_v33  ;;  %v915_v36 = vmul.f32 %v7320_v34, %v8135_v63 }
 0x1f6   : > { %v890_v37 = vadd.f32 1e-05, %v874_v35 }
 0x1f7   : > { %v937_v40 = vmul.f32 %v8131_v60, %v915_v36 }
 0x1f8   : > { %v7322_v39 = vpop.eup %7321  ;;  %7333 = vrsqrt.f32 %v890_v37 }
 0x1f9   : > { %v7324_v41 = vpop.eup %7323  ;;  %v916_v6 = vmul.f32 %v7322_v39, %v8149_v14  ;;  %v959_v46 = vadd.f32 %v8145_v30, %v937_v40 }
 0x1fa   : > { %v917_v7 = vmul.f32 %v7324_v41, %v8153_v18 }
 0x1fb   : > { %v938_v42 = vmul.f32 %v8131_v60, %v916_v6 }
 0x1fc   : > { %v939_v43 = vmul.f32 %v8131_v60, %v917_v7 }
 0x1fd   : > { %v7326_v44 = vpop.eup %7325  ;;  %v960_v48 = vadd.f32 %v8145_v30, %v938_v42 }
 0x1fe   : > { %v7328_v63 = vpop.eup %7327  ;;  %v918_v49 = vmul.f32 %v7326_v44, %v8165_v28  ;;  %v961_v14 = vadd.f32 %v8145_v30, %v939_v43 }
 0x1ff   : > { %v971_v51 = vpack.c.bf16 %v960_v48, %v959_v46  ;;  %v919_v52 = vmul.f32 %v7328_v63, %v8168_v29 }
 0x200   : > { %v940_v53 = vmul.f32 %v8131_v60, %v918_v49 }
 0x201   : > { %v7330_v18 = vpop.eup %7329  ;;  %1208 = vmatmul.mubr.bf16.gmra.mxu0 %v971_v51  ;;  %6826 = vmatprep.mubr.bf16.mxu1 %v971_v51  ;;  %v941_v47 = vmul.f32 %v8131_v60, %v919_v52 }
 0x202   : > { %v7332_v56 = vpop.eup %7331  ;;  %1217 = vmatprep.mubr.bf16.mxu0 %v10863_v22  ;;  %v962_v11 = vadd.f32 %v8145_v30, %v940_v53  ;;  %v920_v57 = vmul.f32 %v7330_v18, %v8181_v45 }
 0x203   : > { %v921_v28 = vmul.f32 %v7332_v56, %v8186_v50  ;;  %v963_v12 = vadd.f32 %v8145_v30, %v941_v47 }
 0x204   : > { %v972_v54 = vpack.c.bf16 %v962_v11, %v961_v14  ;;  %v942_v29 = vmul.f32 %v8131_v60, %v920_v57 }
 0x205   : > { %v7334_v58 = vpop.eup %7333  ;;  %v943_v62 = vmul.f32 %v8131_v60, %v921_v28 }
 0x206   : > { %v964_v0 = vadd.f32 %v8145_v30, %v942_v29  ;;  %6827 = vmatmul.mubr.bf16.gmra.mxu1 %v972_v54  ;;  %v922_v3 = vmul.f32 %v7334_v58, %v8198_v59 }
 0x207   : > { %v965_v45 = vadd.f32 %v8145_v30, %v943_v62 }
 0x208   : > { %v973_v4 = vpack.c.bf16 %v964_v0, %v963_v12  ;;  %v944_v5 = vmul.f32 %v8131_v60, %v922_v3 }
 0x209   : > { %1218 = vmatmul.mubr.bf16.gmra.mxu0 %v972_v54 }
 0x20a   : > { %1227 = vmatprep.mubr.bf16.mxu0 %v10863_v22  ;;  %6830 = vmatprep.mubr.bf16.mxu1 %v973_v4  ;;  %v966_v50 = vadd.f32 %v8145_v30, %v944_v5 }
 0x20c   : > { %v974_v55 = vpack.c.bf16 %v966_v50, %v965_v45 }
 0x20e   : > { %6831 = vmatmul.mubr.bf16.gmra.mxu1 %v974_v55 }
 0x211   : > { %1228 = vmatmul.mubr.bf16.gmra.mxu0 %v973_v4 }
 0x212   : > { %1237 = vmatprep.mubr.bf16.mxu0 %v10863_v22 }
 0x219   : > { %1238 = vmatmul.mubr.bf16.gmra.mxu0 %v974_v55 }
 0x221   : > { %v1169_v16 = vpop.f32.mrf.mxu0 }
 0x223   : > { %v1171_v8 = vpop.f32.mrf.mxu0 }
 0x225   : > { %v1173_v59 = vpop.f32.mrf.mxu0  ;;  %v6820_v38 = vpop.f32.mrf.mxu1 }
 0x226   : > { %v8235_v9 = vpack.c.bf16 %v1173_v59, %v1169_v16 }
 0x227   : > { %v1175_v60 = vpop.f32.mrf.mxu0  ;;  %v1282_v27 = vpop.f32.mrf.mxu1 }
 0x228   : > { %6842 = vmatprep.mubr.msk.bf16.mxu1 %vm1377_vm0, %v8235_v9  ;;  %v8247_v26 = vpack.c.bf16 %v1175_v60, %v1171_v8 }
 0x229   : > { %v1179_v10 = vpop.f32.mrf.mxu0  ;;  %v6821_v33 = vpop.f32.mrf.mxu1 }
 0x22a   : > { %v1391_v43 = vsel %vm1377_vm0, %v8247_v26, 0  ;;  %v8310_v48 = vpack.c.bf16 %v6821_v33, %v6820_v38 }
 0x22b   : > { %v1181_v13 = vpop.f32.mrf.mxu0  ;;  %v1285_v34 = vpop.f32.mrf.mxu1 }
 0x22c   : > { %v8321_v63 = vpack.c.bf16 %v1285_v34, %v1282_v27 }
 0x22d   : > { %v1183_v61 = vpop.f32.mrf.mxu0  ;;  %v6824_v40 = vpop.f32.mrf.mxu1 }
 0x22e   : > { %v8265_v35 = vpack.c.bf16 %v1183_v61, %v1179_v10  ;;  %10945 = vst [vmem:[#allocation7_spill] sm:$0xff] %v8321_v63 }
 0x22f   : > { %v1185_v30 = vpop.f32.mrf.mxu0  ;;  %v1298_v39 = vpop.f32.mrf.mxu1 }
 0x230   : > { %v8243_v25 = vpack.c.bf16 %v1185_v30, %v1181_v13 }
 0x231   : > { %v1189_v15 = vpop.f32.mrf.mxu0  ;;  %v6825_v7 = vpop.f32.mrf.mxu1 }
 0x232   : > { %v1394_v6 = vsel %vm1377_vm0, %v8243_v25, 0  ;;  %v8295_v46 = vpack.c.bf16 %v6825_v7, %v6824_v40 }
 0x233   : > { %v1191_v17 = vpop.f32.mrf.mxu0  ;;  %v1301_v42 = vpop.f32.mrf.mxu1 }
 0x234   : > { %v8303_v44 = vpack.c.bf16 %v1301_v42, %v1298_v39 }
 0x235   : > { %v1193_v19 = vpop.f32.mrf.mxu0 }
 0x236   : > { %v8273_v37 = vpack.c.bf16 %v1193_v19, %v1189_v15  ;;  %10944 = vst [vmem:[#allocation6_spill] sm:$0xff] %v8303_v44 }
 0x237   : > { %v1195_v20 = vpop.f32.mrf.mxu0 }
 0x238   : > { %v8239_v21 = vpack.c.bf16 %v1195_v20, %v1191_v17 }
 0x239   : > { %v1199_v23 = vpop.f32.mrf.mxu0 }
 0x23a   : > { %1661 = vrot.lane.b32.xlu1 %v8239_v21, %s7836_s21  ;;  %v1397_v36 = vsel %vm1377_vm0, %v8239_v21, 0 }
 0x23b   : > { %v1201_v24 = vpop.f32.mrf.mxu0 }
 0x23d   : > { %v1203_v1 = vpop.f32.mrf.mxu0 }
 0x23e   : > { %1659 = vrot.lane.b32.xlu1 %v8243_v25, %s7836_s21  ;;  %v8281_v41 = vpack.c.bf16 %v1203_v1, %v1199_v23 }
 0x23f   : > { %v1205_v31 = vpop.f32.mrf.mxu0 }
 0x240   : > { %v8249_v2 = vpack.c.bf16 %v1205_v31, %v1201_v24 }
 0x242   : > { %1657 = vrot.lane.b32.xlu1 %v8247_v26, %s7836_s21  ;;  %7122 = vmatprep.subr.msk.bf16.mxu1 %vm1377_vm0, %v8249_v2  ;;  %v1400_v32 = vsel %vm1377_vm0, %v8249_v2, 0 }
 0x243   : > { %1663 = vrot.lane.b32.xlu0 %v8249_v2, %s7836_s21  ;;  %6835 = vmatpush3.bf16.xpose.msra.mxu1 %v1400_v32 }
 0x244   : > { %7123 = vmatprep.subr.msk.bf16.mxu1 %vm1377_vm0, %v8239_v21 }
 0x246   : > { %1957 = vrot.lane.b32.xlu1 %v8249_v2, %s7837_s24 }
 0x247   : > { %1645 = vrot.lane.b32.xlu0 %v8235_v9, %s7836_s21 }
 0x24a   : > { %1955 = vrot.lane.b32.xlu1 %v8239_v21, %s7837_s24 }
 0x24b   : > { %1647 = vrot.lane.b32.xlu0 %v8265_v35, %s7836_s21  ;;  %6837 = vmatpush3.bf16.xpose.msra.mxu1 %v1397_v36 }
 0x24c   : > { %7124 = vmatprep.subr.msk.bf16.mxu1 %vm1377_vm0, %v8243_v25 }
 0x24e   : > { %1649 = vrot.lane.b32.xlu1 %v8273_v37, %s7836_s21 }
 0x24f   : > { %1953 = vrot.lane.b32.xlu0 %v8243_v25, %s7837_s24 }
 0x252   : > { %1951 = vrot.lane.b32.xlu1 %v8247_v26, %s7837_s24 }
 0x253   : > { %1651 = vrot.lane.b32.xlu0 %v8281_v41, %s7836_s21  ;;  %6839 = vmatpush3.bf16.xpose.msra.mxu1 %v1394_v6 }
 0x254   : > { %7125 = vmatprep.subr.msk.bf16.mxu1 %vm1377_vm0, %v8247_v26 }
 0x256   : > { %1945 = vrot.lane.b32.xlu1 %v8265_v35, %s7837_s24 }
 0x257   : > { %1943 = vrot.lane.b32.xlu0 %v8235_v9, %s7837_s24 }
 0x25a   : > { %1949 = vrot.lane.b32.xlu1 %v8281_v41, %s7837_s24 }
 0x25b   : > { %1947 = vrot.lane.b32.xlu0 %v8273_v37, %s7837_s24  ;;  %6841 = vmatpush3.bf16.xpose.msra.mxu1 %v1391_v43 }
 0x25c   : > { %6850 = vmatprep.subr.bf16.mxu1 %v8295_v46 }
 0x25e   : > { %1854 = vrot.lane.b32.xlu1 %v8303_v44, %s7836_s21 }
 0x25f   : > { %1856 = vrot.lane.b32.xlu0 %v8295_v46, %s7836_s21 }
 0x262   : > { %2144 = vrot.lane.b32.xlu1 %v8303_v44, %s7837_s24  ;;  %6843 = vmatmul.mubr.msk.bf16.vlgmr.msra.gmra.mxu1 %vm1377_vm0, %v8265_v35 }
 0x263   : > { %1852 = vrot.lane.b32.xlu0 %v8310_v48, %s7836_s21  ;;  %6846 = vmatprep.mubr.msk.bf16.mxu1 %vm1377_vm0, %v8273_v37 }
 0x264   : > { %6851 = vmatpush3.bf16.msra.mxu1 %v8295_v46 }
 0x265   : > { %6852 = vmatprep.subr.bf16.mxu1 %v8303_v44 }
 0x267   : > { %1850 = vrot.lane.b32.xlu0 %v8321_v63, %s7836_s21 }
 0x268   : > { %6853 = vmatpush3.bf16.msra.mxu1 %v8303_v44 }
 0x269   : > { %6854 = vmatprep.subr.bf16.mxu1 %v8310_v48 }
 0x26a   : > { %6847 = vmatmul.mubr.msk.bf16.gmra.mxu1 %vm1377_vm0, %v8281_v41 }
 0x26b   : > { %2146 = vrot.lane.b32.xlu0 %v8295_v46, %s7837_s24 }
 0x26c   : > { %6855 = vmatpush3.bf16.msra.mxu1 %v8310_v48 }
 0x26d   : > { %6856 = vmatprep.subr.bf16.mxu1 %v8321_v63 }
 0x270   : > { %6857 = vmatpush3.bf16.msra.mxu1 %v8321_v63 }
 0x2ac   : > { %v1662_v52 = vpop.permute.xlu1 %1661 }
 0x2ad   : > { %v1684_v47 = vsel %vm1377_vm0, %v1662_v52, 0 }
 0x2b0   : > { %v1660_v18 = vpop.permute.xlu1 %1659 }
 0x2b1   : > { %v1681_v12 = vsel %vm1377_vm0, %v1660_v18, 0 }
 0x2b4   : > { %v1658_v28 = vpop.permute.xlu1 %1657 }
 0x2b5   : > { %v1664_v49 = vpop.permute.xlu0 %1663  ;;  %v1678_v60 = vsel %vm1377_vm0, %v1658_v28, 0 }
 0x2b6   : > { %7126 = vmatprep.subr.msk.bf16.mxu0 %vm1377_vm0, %v1664_v49  ;;  %v1687_v51 = vsel %vm1377_vm0, %v1664_v49, 0 }
 0x2b7   : > { %6867 = vmatpush3.bf16.xpose.msra.mxu0 %v1687_v51 }
 0x2b8   : > { %7127 = vmatprep.subr.msk.bf16.mxu0 %vm1377_vm0, %v1662_v52  ;;  %v1958_v5 = vpop.permute.xlu1 %1957 }
 0x2b9   : > { %v1646_v53 = vpop.permute.xlu0 %1645  ;;  %v1981_v38 = vsel %vm1377_vm0, %v1958_v5, 0 }
 0x2ba   : > { %6874 = vmatprep.mubr.msk.bf16.mxu0 %vm1377_vm0, %v1646_v53 }
 0x2bc   : > { %v1956_v61 = vpop.permute.xlu1 %1955 }
 0x2bd   : > { %v1648_v14 = vpop.permute.xlu0 %1647  ;;  %v1978_v27 = vsel %vm1377_vm0, %v1956_v61, 0 }
 0x2bf   : > { %6869 = vmatpush3.bf16.xpose.msra.mxu0 %v1684_v47 }
 0x2c0   : > { %7128 = vmatprep.subr.msk.bf16.mxu0 %vm1377_vm0, %v1660_v18  ;;  %v1650_v24 = vpop.permute.xlu1 %1649 }
 0x2c1   : > { %v1954_v56 = vpop.permute.xlu0 %1953  ;;  %v8341_v11 = vpop.f32.mrf.mxu0 }
 0x2c2   : > { %v1975_v34 = vsel %vm1377_vm0, %v1954_v56, 0 }
 0x2c3   : > { %v8343_v57 = vpop.f32.mrf.mxu0 }
 0x2c4   : > { %v1952_v36 = vpop.permute.xlu1 %1951 }
 0x2c5   : > { %v1652_v54 = vpop.permute.xlu0 %1651  ;;  %v1213_v29 = vpop.f32.mrf.mxu0  ;;  %v1972_v7 = vsel %vm1377_vm0, %v1952_v36, 0 }
 0x2c6   : > { %v6828_v58 = vpop.f32.mrf.mxu1  ;;  %v8390_v52 = vpack.c.bf16 %v1213_v29, %v8341_v11  ;;  %v8429_v29 = vld [vmem:[%s10960_s29 + $0x10] sm:$0xff] }
 0x2c7   : > { %6871 = vmatpush3.bf16.xpose.msra.mxu0 %v1681_v12  ;;  %v8346_v62 = vpop.f32.mrf.mxu0 }
 0x2c8   : > { %7129 = vmatprep.subr.msk.bf16.mxu0 %vm1377_vm0, %v1658_v28  ;;  %v8349_v0 = vpop.f32.mrf.mxu1  ;;  %v1946_v42 = vpop.permute.xlu1 %1945  ;;  %10953 = vst [vmem:[#allocation15_spill] sm:$0xff] %v8390_v52  ;;  %v8403_v18 = vpack.c.bf16 %v8346_v62, %v8343_v57 }
 0x2c9   : > { %10946 = vst [vmem:[#allocation8_spill] sm:$0xff] %v8349_v0  ;;  %v1944_v3 = vpop.permute.xlu0 %1943  ;;  %v8351_v4 = vpop.f32.mrf.mxu0 }
 0x2ca   : > { %v6829_v45 = vpop.f32.mrf.mxu1  ;;  %10955 = vst [vmem:[#allocation17_spill] sm:$0xff] %v8403_v18 }
 0x2cb   : > { %v1221_v50 = vpop.f32.mrf.mxu0  ;;  %v8353_v55 = vpack.c.bf16 %v6829_v45, %v6828_v58  ;;  %v8434_v58 = vld [vmem:[%s10960_s29] sm:$0xff]  ;;  %v8447_v45 = vld [vmem:[%s10960_s29 + $0x18] sm:$0xff] }
 0x2cc   : > { %v8355_v16 = vpop.f32.mrf.mxu1  ;;  %v1950_v51 = vpop.permute.xlu1 %1949 }
 0x2cd   : > { %10947 = vst [vmem:[#allocation9_spill] sm:$0xff] %v8353_v55  ;;  %10948 = vst [vmem:[#allocation10_spill] sm:$0xff] %v8355_v16  ;;  %v1948_v8 = vpop.permute.xlu0 %1947  ;;  %v1223_v59 = vpop.f32.mrf.mxu0 }
 0x2ce   : > { %v6832_v10 = vpop.f32.mrf.mxu1  ;;  %v8412_v11 = vpack.c.bf16 %v1223_v59, %v8351_v4 }
 0x2cf   : > { %6873 = vmatpush3.bf16.xpose.msra.mxu0 %v1678_v60  ;;  %v1225_v13 = vpop.f32.mrf.mxu0 }
 0x2d0   : > { %7130 = vmatprep.subr.msk.bf16.mxu0 %vm1377_vm0, %v1958_v5  ;;  %v8359_v30 = vpop.f32.mrf.mxu1  ;;  %v8392_v53 = vpack.c.bf16 %v1225_v13, %v1221_v50  ;;  %10956 = vst [vmem:[#allocation18_spill] sm:$0xff] %v8412_v11 }
 0x2d1   : > { %10949 = vst [vmem:[#allocation11_spill] sm:$0xff] %v8359_v30  ;;  %v8361_v15 = vpop.permute.xlu0 %1856  ;;  %v1229_v17 = vpop.f32.mrf.mxu0 }
 0x2d2   : > { %6882 = vmatprep.subr.bf16.mxu1 %v8361_v15  ;;  %v6833_v19 = vpop.f32.mrf.mxu1  ;;  %10954 = vst [vmem:[#allocation16_spill] sm:$0xff] %v8392_v53  ;;  %v2608_v47 = vsel %vm1377_vm0, %v8392_v53, 0 }
 0x2d3   : > { %v1231_v20 = vpop.f32.mrf.mxu0  ;;  %v8364_v23 = vpack.c.bf16 %v6833_v19, %v6832_v10 }
 0x2d5   : > { %10950 = vst [vmem:[#allocation12_spill] sm:$0xff] %v8364_v23  ;;  %v1233_v1 = vpop.f32.mrf.mxu0  ;;  %v8574_v16 = vpop.permute.xlu0 %1852 }
 0x2d6   : > { %6875 = vmatmul.mubr.msk.bf16.vlgmr.msra.gmra.mxu0 %vm1377_vm0, %v1648_v14  ;;  %v8414_v28 = vpack.c.bf16 %v1233_v1, %v1229_v17 }
 0x2d7   : > { %6878 = vmatprep.mubr.msk.bf16.mxu0 %vm1377_vm0, %v1650_v24  ;;  %6899 = vmatpush3.bf16.xpose.msra.mxu0 %v1981_v38  ;;  %v1235_v31 = vpop.f32.mrf.mxu0  ;;  %v8472_v24 = vld [vmem:[%s10960_s29 + $0x38] sm:$0xff] }
 0x2d8   : > { %7131 = vmatprep.subr.msk.bf16.mxu0 %vm1377_vm0, %v1956_v61  ;;  %v8381_v43 = vpack.c.bf16 %v1235_v31, %v1231_v20  ;;  %10957 = vst [vmem:[#allocation19_spill] sm:$0xff] %v8414_v28  ;;  %v8465_v61 = vld [vmem:[%s10960_s29 + $0x30] sm:$0xff]  ;;  %v8482_v31 = vld [vmem:[%s10960_s29 + $0x20] sm:$0xff] }
 0x2d9   : > { %v1239_v32 = vpop.f32.mrf.mxu0 }
 0x2da   : > { %10952 = vst [vmem:[#allocation14_spill] sm:$0xff] %v8381_v43  ;;  %v2611_v14 = vsel %vm1377_vm0, %v8381_v43, 0 }
 0x2db   : > { %v1241_v33 = vpop.f32.mrf.mxu0 }
 0x2dd   : > { %v1243_v40 = vpop.f32.mrf.mxu0 }
 0x2de   : > { %6879 = vmatmul.mubr.msk.bf16.gmra.mxu0 %vm1377_vm0, %v1652_v54  ;;  %v8420_v57 = vpack.c.bf16 %v1243_v40, %v1239_v32  ;;  %v8424_v54 = vpop.f32.mrf.mxu1  ;;  %v8487_v32 = vld [vmem:[%s10960_s29 + $0x28] sm:$0xff] }
 0x2df   : > { %6901 = vmatpush3.bf16.xpose.msra.mxu0 %v1978_v27  ;;  %6906 = vmatprep.mubr.msk.bf16.mxu0 %vm1377_vm0, %v1944_v3  ;;  %v1245_v39 = vpop.f32.mrf.mxu0  ;;  %10959 = vst [vmem:[#allocation21_spill] sm:$0xff] %v8424_v54 }
 0x2e0   : > { %7132 = vmatprep.subr.msk.bf16.mxu0 %vm1377_vm0, %v1954_v56  ;;  %v8376_v6 = vpack.c.bf16 %v1245_v39, %v1241_v33  ;;  %v2605_v56 = vsel %vm1377_vm0, %v8403_v18, 0  ;;  %10958 = vst [vmem:[#allocation20_spill] sm:$0xff] %v8420_v57 }
 0x2e2   : > { %10951 = vst [vmem:[#allocation13_spill] sm:$0xff] %v8376_v6  ;;  %v2614_v49 = vsel %vm1377_vm0, %v8376_v6, 0 }
 0x2e7   : > { %6903 = vmatpush3.bf16.xpose.msra.mxu0 %v1975_v34 }
 0x2e8   : > { %7133 = vmatprep.subr.msk.bf16.mxu0 %vm1377_vm0, %v1952_v36 }
 0x2ef   : > { %6905 = vmatpush3.bf16.xpose.msra.mxu0 %v1972_v7 }
 0x2f0   : > { %7138 = vmatprep.subr.msk.bf16.mxu0 %vm1377_vm0, %v8376_v6 }
 0x2f6   : > { %6907 = vmatmul.mubr.msk.bf16.vlgmr.msra.gmra.mxu0 %vm1377_vm0, %v1946_v42 }
 0x2f7   : > { %6910 = vmatprep.mubr.msk.bf16.mxu0 %vm1377_vm0, %v1948_v8  ;;  %6963 = vmatpush3.bf16.xpose.msra.mxu0 %v2614_v49  ;;  %v8452_v8 = vld [vmem:[%s10960_s29 + $0x8] sm:$0xff] }
 0x2f8   : > { %7139 = vmatprep.subr.msk.bf16.mxu0 %vm1377_vm0, %v8381_v43 }
 0x2fe   : > { %6911 = vmatmul.mubr.msk.bf16.gmra.mxu0 %vm1377_vm0, %v1950_v51 }
 0x2ff   : > { %6965 = vmatpush3.bf16.xpose.msra.mxu0 %v2611_v14  ;;  %6970 = vmatprep.mubr.msk.bf16.mxu0 %vm1377_vm0, %v8390_v52 }
 0x300   : > { %7140 = vmatprep.subr.msk.bf16.mxu0 %vm1377_vm0, %v8392_v53 }
 0x307   : > { %6967 = vmatpush3.bf16.xpose.msra.mxu0 %v2608_v47 }
 0x308   : > { %7141 = vmatprep.subr.msk.bf16.mxu0 %vm1377_vm0, %v8403_v18 }
 0x30f   : > { %6969 = vmatpush3.bf16.xpose.msra.mxu0 %v2605_v56 }
 0x316   : > { %6971 = vmatmul.mubr.msk.bf16.vlgmr.msra.gmra.mxu0 %vm1377_vm0, %v8412_v11 }
 0x317   : > { %6974 = vmatprep.mubr.msk.bf16.mxu0 %vm1377_vm0, %v8414_v28 }
 0x31e   : > { %6975 = vmatmul.mubr.msk.bf16.gmra.mxu0 %vm1377_vm0, %v8420_v57 }
 0x322   : > { %v6844_v12 = vpop.f32.mrf.mxu1 }
 0x323   : > { %v8437_v62 = vadd.f32 %v6844_v12, %v8429_v29 }
 0x324   : > { %v1436_v3 = vpop.f32.mrf.mxu1 }
 0x325   : > { %v8440_v4 = vadd.f32 %v1436_v3, %v8434_v58  ;;  %v1474_v5 = vsel %vm1467_vm1, %v8437_v62, -inf }
 0x326   : > { %1475 = vmax.xlane.f32.xlu0 %v1474_v5  ;;  %v6845_v50 = vpop.f32.mrf.mxu1 }
 0x327   : > { %v8455_v60 = vadd.f32 %v6845_v50, %v8447_v45  ;;  %v1468_v13 = vsel %vm1467_vm1, %v8440_v4, -inf }
 0x328   : > { %v1439_v59 = vpop.f32.mrf.mxu1 }
 0x329   : > { %v8458_v10 = vadd.f32 %v1439_v59, %v8452_v8  ;;  %v1477_v1 = vsel %vm1467_vm1, %v8455_v60, -inf }
 0x32a   : > { %v6848_v17 = vpop.f32.mrf.mxu1  ;;  %1469 = vmax.xlane.f32.xlu0 %v1468_v13 }
 0x32b   : > { %v1471_v19 = vsel %vm1467_vm1, %v8458_v10, -inf  ;;  %v8475_v38 = vadd.f32 %v6848_v17, %v8465_v61 }
 0x32c   : > { %v1452_v20 = vpop.f32.mrf.mxu1  ;;  %1472 = vmax.xlane.f32.xlu1 %v1471_v19 }
 0x32d   : > { %v8493_v36 = vadd.f32 %v1452_v20, %v8482_v31  ;;  %v1486_v7 = vsel %vm1467_vm1, %v8475_v38, -inf }
 0x32e   : > { %v6849_v27 = vpop.f32.mrf.mxu1  ;;  %1478 = vmax.xlane.f32.xlu0 %v1477_v1 }
 0x32f   : > { %v8490_v33 = vadd.f32 %v6849_v27, %v8472_v24  ;;  %v1480_v49 = vsel %vm1467_vm1, %v8493_v36, -inf }
 0x330   : > { %v1455_v34 = vpop.f32.mrf.mxu1 }
 0x331   : > { %v8496_v40 = vadd.f32 %v1455_v34, %v8487_v32  ;;  %v1489_v39 = vsel %vm1467_vm1, %v8490_v33, -inf }
 0x332   : > { %1490 = vmax.xlane.f32.xlu1 %v1489_v39  ;;  %1487 = vmax.xlane.f32.xlu0 %v1486_v7 }
 0x333   : > { %v1483_v42 = vsel %vm1467_vm1, %v8496_v40, -inf }
 0x336   : > { %1484 = vmax.xlane.f32.xlu1 %v1483_v42  ;;  %1481 = vmax.xlane.f32.xlu0 %v1480_v49 }
 0x396   : > { %v6876_v51 = vpop.f32.mrf.mxu0 }
 0x397   : > { %v8507_v14 = vadd.f32 %v6876_v51, %v8429_v29 }
 0x398   : > { %v1723_v47 = vpop.f32.mrf.mxu0 }
 0x399   : > { %v8510_v56 = vadd.f32 %v1723_v47, %v8434_v58  ;;  %v1760_v12 = vsel %vm1467_vm1, %v8507_v14, -inf }
 0x39a   : > { %1761 = vmax.xlane.f32.xlu0 %v1760_v12  ;;  %v6877_v3 = vpop.f32.mrf.mxu0 }
 0x39b   : > { %v8515_v5 = vadd.f32 %v6877_v3, %v8447_v45  ;;  %v1754_v17 = vsel %vm1467_vm1, %v8510_v56, -inf }
 0x39c   : > { %v1726_v50 = vpop.f32.mrf.mxu0 }
 0x39d   : > { %v8518_v59 = vadd.f32 %v1726_v50, %v8452_v8  ;;  %v1763_v13 = vsel %vm1467_vm1, %v8515_v5, -inf }
 0x39e   : > { %1764 = vmax.xlane.f32.xlu1 %v1763_v13  ;;  %1755 = vmax.xlane.f32.xlu0 %v1754_v17  ;;  %v6880_v19 = vpop.f32.mrf.mxu0 }
 0x39f   : > { %v8525_v20 = vadd.f32 %v6880_v19, %v8465_v61  ;;  %v1757_v34 = vsel %vm1467_vm1, %v8518_v59, -inf }
 0x3a0   : > { %v1739_v1 = vpop.f32.mrf.mxu0 }
 0x3a1   : > { %v8528_v27 = vadd.f32 %v1739_v1, %v8482_v31  ;;  %v1772_v39 = vsel %vm1467_vm1, %v8525_v20, -inf }
 0x3a2   : > { %1758 = vmax.xlane.f32.xlu1 %v1757_v34  ;;  %1773 = vmax.xlane.f32.xlu0 %v1772_v39  ;;  %v6881_v7 = vpop.f32.mrf.mxu0 }
 0x3a3   : > { %v8535_v42 = vadd.f32 %v6881_v7, %v8472_v24  ;;  %v1766_v12 = vsel %vm1467_vm1, %v8528_v27, -inf }
 0x3a4   : > { %v1742_v49 = vpop.f32.mrf.mxu0 }
 0x3a5   : > { %v8538_v51 = vadd.f32 %v1742_v49, %v8487_v32  ;;  %v1775_v47 = vsel %vm1467_vm1, %v8535_v42, -inf }
 0x3a6   : > { %1776 = vmax.xlane.f32.xlu1 %v1775_v47  ;;  %1767 = vmax.xlane.f32.xlu0 %v1766_v12 }
 0x3a7   : > { %v1769_v3 = vsel %vm1467_vm1, %v8538_v51, -inf }
 0x3aa   : > { %1770 = vmax.xlane.f32.xlu1 %v1769_v3 }
 0x3b6   : > { %v6908_v50 = vpop.f32.mrf.mxu0 }
 0x3b7   : > { %v8547_v13 = vadd.f32 %v6908_v50, %v8429_v29 }
 0x3b8   : > { %v2017_v17 = vpop.f32.mrf.mxu0 }
 0x3b9   : > { %v8550_v19 = vadd.f32 %v2017_v17, %v8434_v58  ;;  %v2054_v1 = vsel %vm1467_vm1, %v8547_v13, -inf }
 0x3ba   : > { %2055 = vmax.xlane.f32.xlu0 %v2054_v1  ;;  %v6909_v34 = vpop.f32.mrf.mxu0 }
 0x3bb   : > { %v8555_v39 = vadd.f32 %v6909_v34, %v8447_v45  ;;  %v2048_v12 = vsel %vm1467_vm1, %v8550_v19, -inf }
 0x3bc   : > { %v2020_v7 = vpop.f32.mrf.mxu0 }
 0x3bd   : > { %v8558_v49 = vadd.f32 %v2020_v7, %v8452_v8  ;;  %v2057_v47 = vsel %vm1467_vm1, %v8555_v39, -inf }
 0x3be   : > { %2058 = vmax.xlane.f32.xlu1 %v2057_v47  ;;  %2049 = vmax.xlane.f32.xlu0 %v2048_v12  ;;  %v6912_v3 = vpop.f32.mrf.mxu0 }
 0x3bf   : > { %v8565_v50 = vadd.f32 %v6912_v3, %v8465_v61  ;;  %v2051_v34 = vsel %vm1467_vm1, %v8558_v49, -inf }
 0x3c0   : > { %v2033_v17 = vpop.f32.mrf.mxu0 }
 0x3c1   : > { %v8568_v1 = vadd.f32 %v2033_v17, %v8482_v31  ;;  %v2066_v7 = vsel %vm1467_vm1, %v8565_v50, -inf }
 0x3c2   : > { %2052 = vmax.xlane.f32.xlu1 %v2051_v34  ;;  %2067 = vmax.xlane.f32.xlu0 %v2066_v7  ;;  %v6913_v22 = vpop.f32.mrf.mxu0  ;;  %v8586_v34 = vpop.permute.xlu0 %1850 }
 0x3c3   : > { %v8577_v47 = vadd.f32 %v6913_v22, %v8472_v24  ;;  %v2060_v0 = vsel %vm1467_vm1, %v8568_v1, -inf }
 0x3c4   : > { %v2036_v12 = vpop.f32.mrf.mxu0 }
 0x3c5   : > { %v8580_v3 = vadd.f32 %v2036_v12, %v8487_v32  ;;  %v2069_v17 = vsel %vm1467_vm1, %v8577_v47, -inf  ;;  %v8592_v12 = vpop.permute.xlu1 %1854 }
 0x3c6   : > { %2070 = vmax.xlane.f32.xlu1 %v2069_v17  ;;  %2061 = vmax.xlane.f32.xlu0 %v2060_v0  ;;  %v8590_v22 = vpop.permute.xlu0 %2146 }
 0x3c7   : > { %v2063_v7 = vsel %vm1467_vm1, %v8580_v3, -inf }
 0x3c9   : > { %v8598_v0 = vpop.permute.xlu1 %2144 }
 0x3ca   : > { %2064 = vmax.xlane.f32.xlu1 %v2063_v7  ;;  %v1476_v55 = vpop.xlane.xlu0 %1475 }
 0x3cb   : > { %v1494_v30 = vsub.f32 %v8437_v62, %v1476_v55 }
 0x3cd   : > { %v1473_v7 = vpop.xlane.xlu1 %1472  ;;  %v1504_v11 = vmul.f32 1.442695, %v1494_v30 }
 0x3ce   : > { %v1470_v54 = vpop.xlane.xlu0 %1469  ;;  %v1493_v43 = vsub.f32 %v8458_v10, %v1473_v7 }
 0x3cf   : > { %v1492_v23 = vsub.f32 %v8440_v4, %v1470_v54  ;;  %7335 = vpow2.f32 %v1504_v11 }
 0x3d1   : > { %v1500_v53 = vmul.f32 1.442695, %v1492_v23  ;;  %v1491_v28 = vpop.xlane.xlu1 %1490 }
 0x3d2   : > { %v1479_v17 = vpop.xlane.xlu0 %1478  ;;  %v1499_v55 = vsub.f32 %v8490_v33, %v1491_v28 }
 0x3d3   : > { %v1495_v18 = vsub.f32 %v8455_v60, %v1479_v17  ;;  %7337 = vpow2.f32 %v1500_v53 }
 0x3d4   : > { %v1514_v4 = vmul.f32 1.442695, %v1499_v55 }
 0x3d5   : > { %v1506_v52 = vmul.f32 1.442695, %v1495_v18  ;;  %v1485_v30 = vpop.xlane.xlu1 %1484 }
 0x3d6   : > { %v1488_v57 = vpop.xlane.xlu0 %1487  ;;  %v1497_v23 = vsub.f32 %v8496_v40, %v1485_v30 }
 0x3d7   : > { %v1498_v6 = vsub.f32 %v8475_v38, %v1488_v57  ;;  %7339 = vpow2.f32 %v1506_v52 }
 0x3d8   : > { %v1510_v18 = vmul.f32 1.442695, %v1497_v23 }
 0x3d9   : > { %v1512_v54 = vmul.f32 1.442695, %v1498_v6 }
 0x3da   : > { %v1482_v44 = vpop.xlane.xlu0 %1481 }
 0x3db   : > { %2140 = vrot.lane.b32.xlu1 %v8321_v63, %s7837_s24  ;;  %v1502_v63 = vmul.f32 1.442695, %v1493_v43  ;;  %v1496_v62 = vsub.f32 %v8493_v36, %v1482_v44 }
 0x3dc   : > { %2142 = vrot.lane.b32.xlu0 %v8310_v48, %s7837_s24  ;;  %v8608_v11 = vpop.eup %7335 }
 0x3dd   : > { %7341 = vpow2.f32 %v1502_v63  ;;  %v1508_v60 = vmul.f32 1.442695, %v1496_v62  ;;  %v1522_v6 = vsel %vm1467_vm1, %v8608_v11, 0.0 }
 0x3de   : > { %7343 = vpow2.f32 %v1512_v54 }
 0x3df   : > { %7345 = vpow2.f32 %v1514_v4 }
 0x3e0   : > { %7347 = vpow2.f32 %v1508_v60  ;;  %v8610_v53 = vpop.eup %7337 }
 0x3e1   : > { %7349 = vpow2.f32 %v1510_v18  ;;  %v1516_v63 = vsel %vm1467_vm1, %v8610_v53, 0.0 }
 0x3e4   : > { %v8614_v43 = vpop.eup %7339 }
 0x3e5   : > { %v1525_v52 = vsel %vm1467_vm1, %v8614_v43, 0.0 }
 0x3ea   : > { %v8616_v44 = vpop.eup %7341 }
 0x3eb   : > { %v8622_v28 = vpop.eup %7343  ;;  %v1519_v10 = vsel %vm1467_vm1, %v8616_v44, 0.0 }
 0x3ec   : > { %v8624_v57 = vpop.eup %7345  ;;  %v1534_v38 = vsel %vm1467_vm1, %v8622_v28, 0.0 }
 0x3ed   : > { %v8630_v33 = vpop.eup %7347  ;;  %v1537_v36 = vsel %vm1467_vm1, %v8624_v57, 0.0 }
 0x3ee   : > { %v1528_v40 = vsel %vm1467_vm1, %v8630_v33, 0.0  ;;  %v8636_v17 = vpop.eup %7349 }
 0x3ef   : > { %v1531_v7 = vsel %vm1467_vm1, %v8636_v17, 0.0 }
 0x3fb   : > { %1523 = vadd.xlane.f32.xlu0 %v1522_v6 }
 0x3ff   : > { %1517 = vadd.xlane.f32.xlu0 %v1516_v63  ;;  %1526 = vadd.xlane.f32.xlu1 %v1525_v52 }
 0x403   : > { %1520 = vadd.xlane.f32.xlu1 %v1519_v10  ;;  %1535 = vadd.xlane.f32.xlu0 %v1534_v38 }
 0x407   : > { %1538 = vadd.xlane.f32.xlu1 %v1537_v36  ;;  %1529 = vadd.xlane.f32.xlu0 %v1528_v40 }
 0x40b   : > { %1532 = vadd.xlane.f32.xlu1 %v1531_v7 }
 0x423   : > { %v1762_v55 = vpop.xlane.xlu0 %1761 }
 0x424   : > { %v1780_v54 = vsub.f32 %v8507_v14, %v1762_v55 }
 0x426   : > { %v1790_v62 = vmul.f32 1.442695, %v1780_v54 }
 0x427   : > { %v1765_v30 = vpop.xlane.xlu1 %1764  ;;  %v1756_v4 = vpop.xlane.xlu0 %1755 }
 0x428   : > { %7351 = vpow2.f32 %v1790_v62  ;;  %v1781_v23 = vsub.f32 %v8515_v5, %v1765_v30  ;;  %v1778_v60 = vsub.f32 %v8510_v56, %v1756_v4 }
 0x42a   : > { %v1792_v18 = vmul.f32 1.442695, %v1781_v23  ;;  %v1786_v6 = vmul.f32 1.442695, %v1778_v60 }
 0x42b   : > { %v1759_v63 = vpop.xlane.xlu1 %1758  ;;  %v1774_v52 = vpop.xlane.xlu0 %1773 }
 0x42c   : > { %7353 = vpow2.f32 %v1792_v18  ;;  %v1779_v10 = vsub.f32 %v8518_v59, %v1759_v63  ;;  %v1784_v38 = vsub.f32 %v8525_v20, %v1774_v52 }
 0x42d   : > { %7355 = vpow2.f32 %v1786_v6 }
 0x42e   : > { %v1788_v36 = vmul.f32 1.442695, %v1779_v10  ;;  %v1798_v14 = vmul.f32 1.442695, %v1784_v38 }
 0x42f   : > { %v1777_v40 = vpop.xlane.xlu1 %1776  ;;  %v1768_v7 = vpop.xlane.xlu0 %1767 }
 0x430   : > { %7357 = vpow2.f32 %v1788_v36  ;;  %v1785_v55 = vsub.f32 %v8535_v42, %v1777_v40  ;;  %v1782_v5 = vsub.f32 %v8528_v27, %v1768_v7 }
 0x431   : > { %7359 = vpow2.f32 %v1798_v14 }
 0x432   : > { %v1800_v56 = vmul.f32 1.442695, %v1785_v55  ;;  %v1794_v54 = vmul.f32 1.442695, %v1782_v5 }
 0x433   : > { %v1771_v62 = vpop.xlane.xlu1 %1770 }
 0x434   : > { %7361 = vpow2.f32 %v1800_v56  ;;  %v1783_v30 = vsub.f32 %v8538_v51, %v1771_v62 }
 0x435   : > { %v8648_v59 = vpop.eup %7351  ;;  %7363 = vpow2.f32 %v1794_v54 }
 0x436   : > { %v1796_v20 = vmul.f32 1.442695, %v1783_v30  ;;  %v1808_v4 = vsel %vm1467_vm1, %v8648_v59, 0.0 }
 0x437   : > { %1809 = vadd.xlane.f32.xlu0 %v1808_v4 }
 0x438   : > { %7365 = vpow2.f32 %v1796_v20 }
 0x439   : > { %v8652_v23 = vpop.eup %7353 }
 0x43a   : > { %v8654_v42 = vpop.eup %7355  ;;  %v1811_v27 = vsel %vm1467_vm1, %v8652_v23, 0.0 }
 0x43b   : > { %1812 = vadd.xlane.f32.xlu1 %v1811_v27  ;;  %v1802_v51 = vsel %vm1467_vm1, %v8654_v42, 0.0 }
 0x43c   : > { %1803 = vadd.xlane.f32.xlu0 %v1802_v51 }
 0x43d   : > { %v8660_v60 = vpop.eup %7357 }
 0x43e   : > { %v8662_v18 = vpop.eup %7359  ;;  %v1805_v6 = vsel %vm1467_vm1, %v8660_v60, 0.0 }
 0x43f   : > { %1806 = vadd.xlane.f32.xlu1 %v1805_v6  ;;  %v1820_v63 = vsel %vm1467_vm1, %v8662_v18, 0.0 }
 0x440   : > { %1821 = vadd.xlane.f32.xlu0 %v1820_v63 }
 0x441   : > { %v8668_v52 = vpop.eup %7361 }
 0x442   : > { %v8670_v10 = vpop.eup %7363  ;;  %v1823_v38 = vsel %vm1467_vm1, %v8668_v52, 0.0 }
 0x443   : > { %1824 = vadd.xlane.f32.xlu1 %v1823_v38  ;;  %v1814_v36 = vsel %vm1467_vm1, %v8670_v10, 0.0  ;;  %v2056_v14 = vpop.xlane.xlu0 %2055 }
 0x444   : > { %1815 = vadd.xlane.f32.xlu0 %v1814_v36  ;;  %v2074_v40 = vsub.f32 %v8547_v13, %v2056_v14 }
 0x445   : > { %v8677_v7 = vpop.eup %7365 }
 0x446   : > { %v2084_v55 = vmul.f32 1.442695, %v2074_v40  ;;  %v1817_v5 = vsel %vm1467_vm1, %v8677_v7, 0.0 }
 0x447   : > { %v2059_v56 = vpop.xlane.xlu1 %2058  ;;  %1818 = vadd.xlane.f32.xlu1 %v1817_v5  ;;  %v2050_v54 = vpop.xlane.xlu0 %2049 }
 0x448   : > { %7367 = vpow2.f32 %v2084_v55  ;;  %v2075_v62 = vsub.f32 %v8555_v39, %v2059_v56  ;;  %v2072_v30 = vsub.f32 %v8550_v19, %v2050_v54 }
 0x44a   : > { %v2080_v20 = vmul.f32 1.442695, %v2072_v30  ;;  %v2086_v4 = vmul.f32 1.442695, %v2075_v62 }
 0x44b   : > { %v2053_v27 = vpop.xlane.xlu1 %2052  ;;  %v2068_v51 = vpop.xlane.xlu0 %2067 }
 0x44c   : > { %v2073_v13 = vsub.f32 %v8558_v49, %v2053_v27  ;;  %v2078_v6 = vsub.f32 %v8565_v50, %v2068_v51  ;;  %7369 = vpow2.f32 %v2080_v20 }
 0x44d   : > { %7371 = vpow2.f32 %v2086_v4 }
 0x44e   : > { %v2092_v63 = vmul.f32 1.442695, %v2078_v6  ;;  %v2082_v38 = vmul.f32 1.442695, %v2073_v13 }
 0x44f   : > { %v2071_v36 = vpop.xlane.xlu1 %2070  ;;  %v2062_v14 = vpop.xlane.xlu0 %2061 }
 0x450   : > { %v2079_v40 = vsub.f32 %v8577_v47, %v2071_v36  ;;  %v2076_v39 = vsub.f32 %v8568_v1, %v2062_v14  ;;  %7373 = vpow2.f32 %v2092_v63 }
 0x451   : > { %7375 = vpow2.f32 %v2082_v38 }
 0x452   : > { %v2094_v19 = vmul.f32 1.442695, %v2079_v40  ;;  %v2088_v55 = vmul.f32 1.442695, %v2076_v39 }
 0x453   : > { %v2065_v5 = vpop.xlane.xlu1 %2064  ;;  %v8726_v14 = vpop.permute.xlu0 %2142 }
 0x454   : > { %7377 = vpow2.f32 %v2094_v19  ;;  %v2077_v49 = vsub.f32 %v8580_v3, %v2065_v5 }
 0x455   : > { %v8688_v56 = vpop.eup %7367  ;;  %7379 = vpow2.f32 %v2088_v55 }
 0x456   : > { %v2090_v50 = vmul.f32 1.442695, %v2077_v49  ;;  %v2102_v54 = vsel %vm1467_vm1, %v8688_v56, 0.0  ;;  %v8740_v49 = vpop.f32.mrf.mxu0 }
 0x457   : > { %2103 = vadd.xlane.f32.xlu1 %v2102_v54  ;;  %v8732_v40 = vpop.permute.xlu1 %2140 }
 0x458   : > { %7381 = vpow2.f32 %v2090_v50 }
 0x459   : > { %v8692_v47 = vpop.eup %7369 }
 0x45a   : > { %v2096_v1 = vsel %vm1467_vm1, %v8692_v47, 0.0  ;;  %v8696_v62 = vpop.eup %7371 }
 0x45b   : > { %2097 = vadd.xlane.f32.xlu1 %v2096_v1  ;;  %v2105_v3 = vsel %vm1467_vm1, %v8696_v62, 0.0 }
 0x45d   : > { %v8698_v30 = vpop.eup %7373 }
 0x45e   : > { %v2114_v20 = vsel %vm1467_vm1, %v8698_v30, 0.0  ;;  %v8704_v4 = vpop.eup %7375 }
 0x45f   : > { %2106 = vadd.xlane.f32.xlu1 %v2105_v3  ;;  %2115 = vadd.xlane.f32.xlu0 %v2114_v20  ;;  %v2099_v13 = vsel %vm1467_vm1, %v8704_v4, 0.0  ;;  %v2650_v20 = vpop.f32.mrf.mxu0 }
 0x461   : > { %v8706_v27 = vpop.eup %7377 }
 0x462   : > { %v2117_v51 = vsel %vm1467_vm1, %v8706_v27, 0.0  ;;  %v8712_v6 = vpop.eup %7379 }
 0x463   : > { %2100 = vadd.xlane.f32.xlu1 %v2099_v13  ;;  %2118 = vadd.xlane.f32.xlu0 %v2117_v51  ;;  %v2108_v36 = vsel %vm1467_vm1, %v8712_v6, 0.0 }
 0x465   : > { %v8714_v63 = vpop.eup %7381 }
 0x466   : > { %v2111_v38 = vsel %vm1467_vm1, %v8714_v63, 0.0 }
 0x467   : > { %2112 = vadd.xlane.f32.xlu0 %v2111_v38  ;;  %2109 = vadd.xlane.f32.xlu1 %v2108_v36 }
 0x478   : > { %2245 = vrot.lane.b32.xlu1 %v8239_v21, %s7838_s17 }
 0x47c   : > { %2243 = vrot.lane.b32.xlu1 %v8243_v25, %s7838_s17 }
 0x47d   : > { %2247 = vrot.lane.b32.xlu0 %v8249_v2, %s7838_s17 }
 0x480   : > { %2241 = vrot.lane.b32.xlu1 %v8247_v26, %s7838_s17 }
 0x481   : > { %2233 = vrot.lane.b32.xlu0 %v8235_v9, %s7838_s17 }
 0x484   : > { %v1524_v39 = vpop.xlane.xlu0 %1523  ;;  %2235 = vrot.lane.b32.xlu1 %v8265_v35, %s7838_s17 }
 0x485   : > { %2237 = vrot.lane.b32.xlu0 %v8273_v37, %s7838_s17 }
 0x488   : > { %v1527_v21 = vpop.xlane.xlu1 %1526  ;;  %v1518_v25 = vpop.xlane.xlu0 %1517  ;;  %2239 = vrot.lane.b32.xlu1 %v8281_v41, %s7838_s17 }
 0x489   : > { %7383 = vrcp.f32 %v1527_v21 }
 0x48a   : > { %7385 = vrcp.f32 %v1518_v25 }
 0x48b   : > { %7387 = vrcp.f32 %v1524_v39  ;;  %v8748_v39 = vadd.f32 %v2650_v20, %v8434_v58 }
 0x48c   : > { %v1521_v26 = vpop.xlane.xlu1 %1520  ;;  %v1536_v2 = vpop.xlane.xlu0 %1535 }
 0x48d   : > { %7389 = vrcp.f32 %v1521_v26  ;;  %v2681_v25 = vsel %vm1467_vm1, %v8748_v39, -inf }
 0x490   : > { %v1539_v9 = vpop.xlane.xlu1 %1538  ;;  %v1530_v19 = vpop.xlane.xlu0 %1529 }
 0x491   : > { %7391 = vrcp.f32 %v1539_v9 }
 0x492   : > { %7393 = vrcp.f32 %v1530_v19 }
 0x493   : > { %7395 = vrcp.f32 %v1536_v2 }
 0x494   : > { %v1533_v35 = vpop.xlane.xlu1 %1532 }
 0x495   : > { %7397 = vrcp.f32 %v1533_v35 }
 0x496   : > { %v7384_v55 = vpop.eup %7383 }
 0x497   : > { %v7386_v37 = vpop.eup %7385  ;;  %v1551_v41 = vmul.f32 %v7384_v55, %v8614_v43 }
 0x498   : > { %v7388_v5 = vpop.eup %7387  ;;  %v1548_v54 = vmul.f32 %v7386_v37, %v8610_v53 }
 0x499   : > { %v1550_v3 = vmul.f32 %v7388_v5, %v8608_v11 }
 0x49a   : > { %v7390_v50 = vpop.eup %7389 }
 0x49b   : > { %v1549_v1 = vmul.f32 %v7390_v50, %v8616_v44  ;;  %v1557_v13 = vpack.c.bf16 %v1551_v41, %v1550_v3 }
 0x49d   : > { %v1556_v51 = vpack.c.bf16 %v1549_v1, %v1548_v54 }
 0x49e   : > { %v7392_v38 = vpop.eup %7391 }
 0x49f   : > { %6858 = vmatprep.mubr.msk.bf16.mxu1 %vm1467_vm1, %v1556_v51  ;;  %v7394_v36 = vpop.eup %7393  ;;  %v1555_v11 = vmul.f32 %v7392_v38, %v8624_v57 }
 0x4a0   : > { %6859 = vmatmul.mubr.msk.bf16.vlgmr.msra.gmra.mxu1 %vm1467_vm1, %v1557_v13  ;;  %v7396_v21 = vpop.eup %7395  ;;  %v1552_v43 = vmul.f32 %v7394_v36, %v8630_v33 }
 0x4a1   : > { %6883 = vmatpush3.bf16.msra.mxu1 %v8361_v15  ;;  %v1554_v26 = vmul.f32 %v7396_v21, %v8622_v28 }
 0x4a2   : > { %v7398_v53 = vpop.eup %7397  ;;  %6884 = vmatprep.subr.bf16.mxu1 %v8592_v12 }
 0x4a3   : > { %v1553_v44 = vmul.f32 %v7398_v53, %v8636_v17  ;;  %v1559_v15 = vpack.c.bf16 %v1555_v11, %v1554_v26 }
 0x4a4   : > { %2682 = vmax.xlane.f32.xlu0 %v2681_v25 }
 0x4a5   : > { %6885 = vmatpush3.bf16.msra.mxu1 %v8592_v12  ;;  %v1558_v2 = vpack.c.bf16 %v1553_v44, %v1552_v43 }
 0x4a6   : > { %6886 = vmatprep.subr.bf16.mxu1 %v8574_v16 }
 0x4a7   : > { %6862 = vmatprep.mubr.msk.bf16.mxu1 %vm1467_vm1, %v1558_v2 }
 0x4a8   : > { %6863 = vmatmul.mubr.msk.bf16.gmra.mxu1 %vm1467_vm1, %v1559_v15 }
 0x4a9   : > { %6887 = vmatpush3.bf16.msra.mxu1 %v8574_v16 }
 0x4aa   : > { %6888 = vmatprep.subr.bf16.mxu1 %v8586_v34 }
 0x4ad   : > { %6889 = vmatpush3.bf16.msra.mxu1 %v8586_v34 }
 0x4ae   : > { %6914 = vmatprep.subr.bf16.mxu1 %v8590_v22 }
 0x4c0   : > { %v1810_v28 = vpop.xlane.xlu0 %1809 }
 0x4c4   : > { %v1813_v57 = vpop.xlane.xlu1 %1812 }
 0x4c5   : > { %v1804_v33 = vpop.xlane.xlu0 %1803  ;;  %7399 = vrcp.f32 %v1813_v57 }
 0x4c6   : > { %7401 = vrcp.f32 %v1804_v33 }
 0x4c7   : > { %7403 = vrcp.f32 %v1810_v28 }
 0x4c8   : > { %v1807_v12 = vpop.xlane.xlu1 %1806 }
 0x4c9   : > { %7405 = vrcp.f32 %v1807_v12  ;;  %v1822_v17 = vpop.xlane.xlu0 %1821 }
 0x4cc   : > { %v1825_v9 = vpop.xlane.xlu1 %1824 }
 0x4cd   : > { %v1816_v19 = vpop.xlane.xlu0 %1815  ;;  %7407 = vrcp.f32 %v1825_v9 }
 0x4ce   : > { %7409 = vrcp.f32 %v1816_v19 }
 0x4cf   : > { %7411 = vrcp.f32 %v1822_v17 }
 0x4d0   : > { %v1819_v16 = vpop.xlane.xlu1 %1818 }
 0x4d1   : > { %7413 = vrcp.f32 %v1819_v16 }
 0x4d2   : > { %v7400_v35 = vpop.eup %7399 }
 0x4d3   : > { %v7402_v34 = vpop.eup %7401  ;;  %v1837_v5 = vmul.f32 %v7400_v35, %v8652_v23 }
 0x4d4   : > { %v7404_v55 = vpop.eup %7403  ;;  %v1834_v50 = vmul.f32 %v7402_v34, %v8654_v42 }
 0x4d5   : > { %v1836_v54 = vmul.f32 %v7404_v55, %v8648_v59 }
 0x4d6   : > { %v7406_v37 = vpop.eup %7405 }
 0x4d7   : > { %v1835_v41 = vmul.f32 %v7406_v37, %v8660_v60  ;;  %v1843_v3 = vpack.c.bf16 %v1837_v5, %v1836_v54 }
 0x4d9   : > { %v1842_v1 = vpack.c.bf16 %v1835_v41, %v1834_v50 }
 0x4da   : > { %v7408_v20 = vpop.eup %7407 }
 0x4db   : > { %6890 = vmatprep.mubr.msk.bf16.mxu1 %vm1467_vm1, %v1842_v1  ;;  %v7410_v51 = vpop.eup %7409  ;;  %v1841_v23 = vmul.f32 %v7408_v20, %v8668_v52 }
 0x4dc   : > { %6891 = vmatmul.mubr.msk.bf16.vlgmr.msra.gmra.mxu1 %vm1467_vm1, %v1843_v3  ;;  %v7412_v13 = vpop.eup %7411  ;;  %v1838_v42 = vmul.f32 %v7410_v51, %v8670_v10 }
 0x4dd   : > { %6915 = vmatpush3.bf16.msra.mxu1 %v8590_v22  ;;  %v1840_v36 = vmul.f32 %v7412_v13, %v8662_v18 }
 0x4de   : > { %v7414_v38 = vpop.eup %7413  ;;  %6916 = vmatprep.subr.bf16.mxu1 %v8598_v0 }
 0x4df   : > { %v1839_v59 = vmul.f32 %v7414_v38, %v8677_v7  ;;  %v1845_v53 = vpack.c.bf16 %v1841_v23, %v1840_v36 }
 0x4e0   : > { %v2104_v60 = vpop.xlane.xlu1 %2103 }
 0x4e1   : > { %6917 = vmatpush3.bf16.msra.mxu1 %v8598_v0  ;;  %v1844_v21 = vpack.c.bf16 %v1839_v59, %v1838_v42 }
 0x4e2   : > { %6918 = vmatprep.subr.bf16.mxu1 %v8726_v14 }
 0x4e3   : > { %6894 = vmatprep.mubr.msk.bf16.mxu1 %vm1467_vm1, %v1844_v21 }
 0x4e4   : > { %6895 = vmatmul.mubr.msk.bf16.gmra.mxu1 %vm1467_vm1, %v1845_v53  ;;  %v2098_v22 = vpop.xlane.xlu1 %2097 }
 0x4e5   : > { %6919 = vmatpush3.bf16.msra.mxu1 %v8726_v14 }
 0x4e6   : > { %6920 = vmatprep.subr.bf16.mxu1 %v8732_v40 }
 0x4e8   : > { %v2107_v52 = vpop.xlane.xlu1 %2106  ;;  %v2116_v10 = vpop.xlane.xlu0 %2115 }
 0x4e9   : > { %6921 = vmatpush3.bf16.msra.mxu1 %v8732_v40  ;;  %7415 = vrcp.f32 %v2107_v52 }
 0x4ea   : > { %7417 = vrcp.f32 %v2098_v22 }
 0x4eb   : > { %7419 = vrcp.f32 %v2104_v60 }
 0x4ec   : > { %v2101_v0 = vpop.xlane.xlu1 %2100  ;;  %v2119_v18 = vpop.xlane.xlu0 %2118 }
 0x4ed   : > { %7421 = vrcp.f32 %v2101_v0 }
 0x4ee   : > { %7423 = vrcp.f32 %v2119_v18 }
 0x4f0   : > { %v2110_v7 = vpop.xlane.xlu1 %2109  ;;  %v2113_v11 = vpop.xlane.xlu0 %2112 }
 0x4f1   : > { %7425 = vrcp.f32 %v2110_v7 }
 0x4f2   : > { %7427 = vrcp.f32 %v2113_v11 }
 0x4f3   : > { %7429 = vrcp.f32 %v2116_v10 }
 0x4f4   : > { %v2248_v43 = vpop.permute.xlu0 %2247  ;;  %v2246_v35 = vpop.permute.xlu1 %2245 }
 0x4f5   : > { %7134 = vmatprep.subr.msk.bf16.mxu1 %vm1377_vm0, %v2248_v43  ;;  %v2271_v16 = vsel %vm1377_vm0, %v2248_v43, 0  ;;  %v2268_v37 = vsel %vm1377_vm0, %v2246_v35, 0 }
 0x4f6   : > { %v7416_v14 = vpop.eup %7415 }
 0x4f7   : > { %v7418_v44 = vpop.eup %7417  ;;  %v2131_v26 = vmul.f32 %v7416_v14, %v8696_v62 }
 0x4f8   : > { %v7420_v25 = vpop.eup %7419  ;;  %v2128_v2 = vmul.f32 %v7418_v44, %v8692_v47  ;;  %v2244_v5 = vpop.permute.xlu1 %2243 }
 0x4f9   : > { %v2130_v28 = vmul.f32 %v7420_v25, %v8688_v56 }
 0x4fa   : > { %v7422_v40 = vpop.eup %7421 }
 0x4fb   : > { %v2129_v15 = vmul.f32 %v7422_v40, %v8704_v4  ;;  %v7424_v57 = vpop.eup %7423  ;;  %v2137_v17 = vpack.c.bf16 %v2131_v26, %v2130_v28 }
 0x4fc   : > { %v2135_v4 = vmul.f32 %v7424_v57, %v8706_v27  ;;  %v2242_v50 = vpop.permute.xlu1 %2241 }
 0x4fd   : > { %v2136_v33 = vpack.c.bf16 %v2129_v15, %v2128_v2 }
 0x4fe   : > { %v7426_v12 = vpop.eup %7425 }
 0x4ff   : > { %v7428_v9 = vpop.eup %7427  ;;  %6922 = vmatprep.mubr.msk.bf16.mxu1 %vm1467_vm1, %v2136_v33  ;;  %v2132_v19 = vmul.f32 %v7426_v12, %v8712_v6  ;;  %v2234_v6 = vpop.permute.xlu0 %2233 }
 0x500   : > { %6923 = vmatmul.mubr.msk.bf16.vlgmr.msra.gmra.mxu1 %vm1467_vm1, %v2137_v17  ;;  %v2133_v62 = vmul.f32 %v7428_v9, %v8714_v63  ;;  %v7430_v47 = vpop.eup %7429  ;;  %v2265_v63 = vsel %vm1377_vm0, %v2244_v5, 0  ;;  %v2236_v27 = vpop.permute.xlu1 %2235 }
 0x501   : > { %6931 = vmatpush3.bf16.xpose.msra.mxu1 %v2271_v16  ;;  %v2134_v34 = vmul.f32 %v7430_v47, %v8698_v30  ;;  %v2262_v30 = vsel %vm1377_vm0, %v2242_v50, 0  ;;  %v6973_v16 = vpop.f32.mrf.mxu0 }
 0x502   : > { %7135 = vmatprep.subr.msk.bf16.mxu1 %vm1377_vm0, %v2246_v35  ;;  %v2138_v56 = vpack.c.bf16 %v2133_v62, %v2132_v19 }
 0x503   : > { %v2139_v55 = vpack.c.bf16 %v2135_v4, %v2134_v34  ;;  %v2238_v41 = vpop.permute.xlu0 %2237  ;;  %v2653_v4 = vpop.f32.mrf.mxu0 }
 0x504   : > { %6926 = vmatprep.mubr.msk.bf16.mxu1 %vm1467_vm1, %v2138_v56  ;;  %v2240_v54 = vpop.permute.xlu1 %2239 }
 0x508   : > { %6927 = vmatmul.mubr.msk.bf16.gmra.mxu1 %vm1467_vm1, %v2139_v55 }
 0x509   : > { %6933 = vmatpush3.bf16.xpose.msra.mxu1 %v2268_v37  ;;  %6938 = vmatprep.mubr.msk.bf16.mxu1 %vm1377_vm0, %v2234_v6 }
 0x50a   : > { %7136 = vmatprep.subr.msk.bf16.mxu1 %vm1377_vm0, %v2244_v5  ;;  %v6976_v5 = vpop.f32.mrf.mxu0 }
 0x511   : > { %6935 = vmatpush3.bf16.xpose.msra.mxu1 %v2265_v63 }
 0x512   : > { %7137 = vmatprep.subr.msk.bf16.mxu1 %vm1377_vm0, %v2242_v50 }
 0x519   : > { %6937 = vmatpush3.bf16.xpose.msra.mxu1 %v2262_v30 }
 0x520   : > { %6939 = vmatmul.mubr.msk.bf16.vlgmr.msra.gmra.mxu1 %vm1377_vm0, %v2236_v27 }
 0x521   : > { %6942 = vmatprep.mubr.msk.bf16.mxu1 %vm1377_vm0, %v2238_v41 }
 0x528   : > { %6943 = vmatmul.mubr.msk.bf16.gmra.mxu1 %vm1377_vm0, %v2240_v54 }
 0x52d   : > { %v2683_v6 = vpop.xlane.xlu0 %2682 }
 0x52e   : > { %v2705_v30 = vsub.f32 %v8748_v39, %v2683_v6 }
 0x560   : > { %v8810_v1 = vpop.f32.mrf.mxu1 }
 0x561   : > { %10961 = vst [vmem:[#allocation22_spill] sm:$0xff] %v8810_v1 }
 0x562   : > { %v8812_v3 = vpop.f32.mrf.mxu1 }
 0x563   : > { %10962 = vst [vmem:[#allocation23_spill] sm:$0xff] %v8812_v3 }
 0x564   : > { %v8814_v20 = vpop.f32.mrf.mxu1 }
 0x565   : > { %10963 = vst [vmem:[#allocation24_spill] sm:$0xff] %v8814_v20 }
 0x566   : > { %v8818_v13 = vpop.f32.mrf.mxu1 }
 0x567   : > { %10964 = vst [vmem:[#allocation25_spill] sm:$0xff] %v8818_v13 }
 0x568   : > { %v8820_v38 = vpop.f32.mrf.mxu1 }
 0x569   : > { %10965 = vst [vmem:[#allocation26_spill] sm:$0xff] %v8820_v38 }
 0x56a   : > { %v8822_v23 = vpop.f32.mrf.mxu1 }
 0x56b   : > { %10966 = vst [vmem:[#allocation27_spill] sm:$0xff] %v8822_v23 }
 0x56c   : > { %v8824_v42 = vpop.f32.mrf.mxu1 }
 0x56d   : > { %10967 = vst [vmem:[#allocation28_spill] sm:$0xff] %v8824_v42 }
 0x56e   : > { %v8828_v60 = vpop.f32.mrf.mxu1 }
 0x56f   : > { %10968 = vst [vmem:[#allocation29_spill] sm:$0xff] %v8828_v60 }
 0x59c   : > { %v8830_v36 = vpop.f32.mrf.mxu1 }
 0x59e   : > { %v8832_v21 = vpop.f32.mrf.mxu1 }
 0x5a0   : > { %v8834_v53 = vpop.f32.mrf.mxu1 }
 0x5a2   : > { %v8838_v52 = vpop.f32.mrf.mxu1 }
 0x5a4   : > { %v8840_v10 = vpop.f32.mrf.mxu1 }
 0x5a5   : > { %10969 = vst [vmem:[#allocation30_spill] sm:$0xff] %v8840_v10 }
 0x5a6   : > { %v8842_v0 = vpop.f32.mrf.mxu1 }
 0x5a8   : > { %v8844_v18 = vpop.f32.mrf.mxu1 }
 0x5a9   : > { %10970 = vst [vmem:[#allocation31_spill] sm:$0xff] %v8844_v18 }
 0x5aa   : > { %v8848_v11 = vpop.f32.mrf.mxu1 }
 0x5c0   : > { %v8850_v43 = vpop.f32.mrf.mxu1 }
 0x5c2   : > { %v8852_v14 = vpop.f32.mrf.mxu1 }
 0x5c4   : > { %v8854_v44 = vpop.f32.mrf.mxu1 }
 0x5c6   : > { %v8858_v40 = vpop.f32.mrf.mxu1 }
 0x5c8   : > { %v8860_v26 = vpop.f32.mrf.mxu1 }
 0x5c9   : > { %10971 = vst [vmem:[#allocation32_spill] sm:$0xff] %v8860_v26 }
 0x5ca   : > { %v8862_v2 = vpop.f32.mrf.mxu1 }
 0x5cc   : > { %v8864_v15 = vpop.f32.mrf.mxu1 }
 0x5cd   : > { %10972 = vst [vmem:[#allocation33_spill] sm:$0xff] %v8864_v15 }
 0x5ce   : > { %v8868_v57 = vpop.f32.mrf.mxu1 }
 0x5e0   : > { %v6940_v33 = vpop.f32.mrf.mxu1 }
 0x5e1   : > { %v8871_v12 = vadd.f32 %v6940_v33, %v8429_v29 }
 0x5e2   : > { %v2307_v17 = vpop.f32.mrf.mxu1 }
 0x5e3   : > { %v8874_v9 = vadd.f32 %v2307_v17, %v8434_v58  ;;  %v2344_v19 = vsel %vm1467_vm1, %v8871_v12, -inf  ;;  %v2666_v17 = vpop.f32.mrf.mxu0 }
 0x5e4   : > { %2345 = vmax.xlane.f32.xlu0 %v2344_v19  ;;  %v6941_v62 = vpop.f32.mrf.mxu1  ;;  %v8917_v19 = vadd.f32 %v2653_v4, %v8452_v8  ;;  %v8934_v4 = vadd.f32 %v2666_v17, %v8482_v31 }
 0x5e5   : > { %v8879_v35 = vadd.f32 %v6941_v62, %v8447_v45  ;;  %v2338_v29 = vsel %vm1467_vm1, %v8874_v9, -inf  ;;  %v2713_v62 = vmul.f32 1.442695, %v2705_v30 }
 0x5e6   : > { %v2310_v47 = vpop.f32.mrf.mxu1  ;;  %v2693_v30 = vsel %vm1467_vm1, %v8934_v4, -inf }
 0x5e7   : > { %v8882_v56 = vadd.f32 %v2310_v47, %v8452_v8  ;;  %v2347_v45 = vsel %vm1467_vm1, %v8879_v35, -inf  ;;  %7431 = vpow2.f32 %v2713_v62 }
 0x5e8   : > { %2339 = vmax.xlane.f32.xlu0 %v2338_v29  ;;  %v6944_v58 = vpop.f32.mrf.mxu1 }
 0x5e9   : > { %v2341_v34 = vsel %vm1467_vm1, %v8882_v56, -inf  ;;  %v8889_v37 = vadd.f32 %v6944_v58, %v8465_v61  ;;  %v6977_v58 = vpop.f32.mrf.mxu0 }
 0x5ea   : > { %2342 = vmax.xlane.f32.xlu1 %v2341_v34  ;;  %v2323_v55 = vpop.f32.mrf.mxu1 }
 0x5eb   : > { %v8898_v41 = vadd.f32 %v2323_v55, %v8482_v31  ;;  %v2356_v61 = vsel %vm1467_vm1, %v8889_v37, -inf  ;;  %v2684_v55 = vsel %vm1467_vm1, %v8917_v19, -inf  ;;  %v2669_v6 = vpop.f32.mrf.mxu0 }
 0x5ec   : > { %2348 = vmax.xlane.f32.xlu0 %v2347_v45  ;;  %v6945_v63 = vpop.f32.mrf.mxu1  ;;  %v8941_v45 = vld [vmem:[%s10960_s29 + $0x30] sm:$0xff] }
 0x5ed   : > { %v8894_v50 = vadd.f32 %v6945_v63, %v8472_v24  ;;  %v8910_v24 = vld [vmem:[%s10960_s29 + $0x10] sm:$0xff]  ;;  %v2350_v29 = vsel %vm1467_vm1, %v8898_v41, -inf  ;;  %v8944_v63 = vadd.f32 %v8941_v45, %v6976_v5 }
 0x5ee   : > { %v2326_v27 = vpop.f32.mrf.mxu1  ;;  %v8914_v39 = vadd.f32 %v8910_v24, %v8740_v49  ;;  %v8928_v49 = vld [vmem:[%s10960_s29 + $0x18] sm:$0xff] }
 0x5ef   : > { %v8901_v54 = vadd.f32 %v2326_v27, %v8487_v32  ;;  %v2359_v33 = vsel %vm1467_vm1, %v8894_v50, -inf  ;;  %v8931_v8 = vadd.f32 %v8928_v49, %v6973_v16  ;;  %v8947_v16 = vadd.f32 %v2669_v6, %v8487_v32  ;;  %v8956_v27 = vld [vmem:[%s10960_s29 + $0x38] sm:$0xff] }
 0x5f0   : > { %2357 = vmax.xlane.f32.xlu0 %v2356_v61  ;;  %2360 = vmax.xlane.f32.xlu1 %v2359_v33  ;;  %v2687_v34 = vsel %vm1467_vm1, %v8914_v39, -inf  ;;  %v8959_v61 = vadd.f32 %v8956_v27, %v6977_v58  ;;  %v2699_v5 = vsel %vm1467_vm1, %v8944_v63, -inf }
 0x5f1   : > { %v2353_v47 = vsel %vm1467_vm1, %v8901_v54, -inf  ;;  %v2690_v31 = vsel %vm1467_vm1, %v8931_v8, -inf  ;;  %v2696_v32 = vsel %vm1467_vm1, %v8947_v16, -inf }
 0x5f2   : > { %v2702_v33 = vsel %vm1467_vm1, %v8959_v61, -inf }
 0x5f4   : > { %2354 = vmax.xlane.f32.xlu1 %v2353_v47  ;;  %2351 = vmax.xlane.f32.xlu0 %v2350_v29  ;;  %v8967_v17 = vpop.eup %7431 }
 0x5f5   : > { %v2729_v62 = vsel %vm1467_vm1, %v8967_v17, 0.0 }
 0x5f8   : > { %2685 = vmax.xlane.f32.xlu1 %v2684_v55  ;;  %2688 = vmax.xlane.f32.xlu0 %v2687_v34 }
 0x5fc   : > { %2691 = vmax.xlane.f32.xlu1 %v2690_v31  ;;  %2694 = vmax.xlane.f32.xlu0 %v2693_v30 }
 0x600   : > { %2697 = vmax.xlane.f32.xlu1 %v2696_v32  ;;  %2700 = vmax.xlane.f32.xlu0 %v2699_v5 }
 0x604   : > { %2703 = vmax.xlane.f32.xlu1 %v2702_v33 }
 0x608   : > { %2730 = vadd.xlane.f32.xlu1 %v2729_v62 }
 0x616   : > { %2436 = vrot.lane.b32.xlu0 %v8295_v46, %s7838_s17 }
 0x66d   : > { %v2346_v47 = vpop.xlane.xlu0 %2345 }
 0x66e   : > { %v2364_v29 = vsub.f32 %v8871_v12, %v2346_v47 }
 0x670   : > { %v2374_v58 = vmul.f32 1.442695, %v2364_v29 }
 0x671   : > { %v2340_v34 = vpop.xlane.xlu0 %2339 }
 0x672   : > { %7433 = vpow2.f32 %v2374_v58  ;;  %v2362_v55 = vsub.f32 %v8874_v9, %v2340_v34 }
 0x673   : > { %v2343_v31 = vpop.xlane.xlu1 %2342 }
 0x674   : > { %v2370_v6 = vmul.f32 1.442695, %v2362_v55 }
 0x675   : > { %v2349_v30 = vpop.xlane.xlu0 %2348 }
 0x676   : > { %7435 = vpow2.f32 %v2370_v6 }
 0x679   : > { %v2361_v32 = vpop.xlane.xlu1 %2360  ;;  %v2358_v5 = vpop.xlane.xlu0 %2357 }
 0x67a   : > { %v2368_v33 = vsub.f32 %v8889_v37, %v2358_v5 }
 0x67c   : > { %v2382_v62 = vmul.f32 1.442695, %v2368_v33 }
 0x67d   : > { %v2355_v59 = vpop.xlane.xlu1 %2354  ;;  %v2352_v51 = vpop.xlane.xlu0 %2351 }
 0x67e   : > { %v2366_v46 = vsub.f32 %v8898_v41, %v2352_v51  ;;  %7437 = vpow2.f32 %v2382_v62  ;;  %v2365_v62 = vsub.f32 %v8879_v35, %v2349_v30  ;;  %v2369_v35 = vsub.f32 %v8894_v50, %v2361_v32 }
 0x67f   : > { %v8977_v28 = vpop.eup %7433 }
 0x680   : > { %v2378_v12 = vmul.f32 1.442695, %v2366_v46  ;;  %v2392_v9 = vsel %vm1467_vm1, %v8977_v28, 0.0 }
 0x681   : > { %v2686_v47 = vpop.xlane.xlu1 %2685  ;;  %2393 = vadd.xlane.f32.xlu0 %v2392_v9  ;;  %v2689_v29 = vpop.xlane.xlu0 %2688  ;;  %v2376_v9 = vmul.f32 1.442695, %v2365_v62 }
 0x682   : > { %v2706_v58 = vsub.f32 %v8917_v19, %v2686_v47  ;;  %v2707_v34 = vsub.f32 %v8914_v39, %v2689_v29  ;;  %7439 = vpow2.f32 %v2378_v12  ;;  %v2363_v12 = vsub.f32 %v8882_v56, %v2343_v31 }
 0x683   : > { %v8983_v37 = vpop.eup %7435  ;;  %v2384_v31 = vmul.f32 1.442695, %v2369_v35 }
 0x684   : > { %v2715_v55 = vmul.f32 1.442695, %v2706_v58  ;;  %v2717_v6 = vmul.f32 1.442695, %v2707_v34  ;;  %v2386_v51 = vsel %vm1467_vm1, %v8983_v37, 0.0  ;;  %v2367_v34 = vsub.f32 %v8901_v54, %v2355_v59 }
 0x685   : > { %v2692_v41 = vpop.xlane.xlu1 %2691  ;;  %2387 = vadd.xlane.f32.xlu0 %v2386_v51  ;;  %v2695_v5 = vpop.xlane.xlu0 %2694 }
 0x686   : > { %7441 = vpow2.f32 %v2715_v55  ;;  %v2708_v33 = vsub.f32 %v8931_v8, %v2692_v41  ;;  %v2372_v8 = vmul.f32 1.442695, %v2363_v12  ;;  %v2380_v51 = vmul.f32 1.442695, %v2367_v34 }
 0x687   : > { %7443 = vpow2.f32 %v2717_v6  ;;  %v2709_v35 = vsub.f32 %v8934_v4, %v2695_v5 }
 0x688   : > { %v2719_v19 = vmul.f32 1.442695, %v2708_v33 }
 0x689   : > { %v2701_v46 = vpop.xlane.xlu0 %2700 }
 0x68a   : > { %7445 = vpow2.f32 %v2719_v19 }
 0x68b   : > { %v8989_v39 = vpop.eup %7437  ;;  %7447 = vpow2.f32 %v2376_v9 }
 0x68c   : > { %v2404_v47 = vsel %vm1467_vm1, %v8989_v39, 0.0  ;;  %7449 = vpow2.f32 %v2372_v8  ;;  %v2698_v8 = vpop.xlane.xlu1 %2697 }
 0x68d   : > { %v2437_v29 = vpop.permute.xlu0 %2436  ;;  %2405 = vadd.xlane.f32.xlu0 %v2404_v47  ;;  %7451 = vpow2.f32 %v2384_v31  ;;  %v10973_v47 = vld [vmem:[#allocation7_spill] sm:$0xff]  ;;  %v2711_v31 = vsub.f32 %v8944_v63, %v2701_v46 }
 0x68e   : > { %6946 = vmatprep.subr.bf16.mxu1 %v2437_v29  ;;  %7453 = vpow2.f32 %v2380_v51 }
 0x68f   : > { %6947 = vmatpush3.bf16.msra.mxu1 %v2437_v29  ;;  %v8994_v58 = vpop.eup %7439  ;;  %v2725_v34 = vmul.f32 1.442695, %v2711_v31  ;;  %v10980_v31 = vld [vmem:[#allocation17_spill] sm:$0xff] }
 0x690   : > { %v2398_v30 = vsel %vm1467_vm1, %v8994_v58, 0.0 }
 0x691   : > { %2399 = vadd.xlane.f32.xlu0 %v2398_v30  ;;  %v2721_v30 = vmul.f32 1.442695, %v2709_v35  ;;  %v10978_v35 = vld [vmem:[#allocation14_spill] sm:$0xff] }
 0x693   : > { %v8999_v56 = vpop.eup %7441  ;;  %7455 = vpow2.f32 %v2721_v30  ;;  %v10979_v30 = vld [vmem:[#allocation16_spill] sm:$0xff] }
 0x694   : > { %v2732_v55 = vsel %vm1467_vm1, %v8999_v56, 0.0  ;;  %v9004_v6 = vpop.eup %7443  ;;  %7457 = vpow2.f32 %v2725_v34  ;;  %v10982_v34 = vld [vmem:[#allocation20_spill] sm:$0xff] }
 0x695   : > { %2733 = vadd.xlane.f32.xlu1 %v2732_v55  ;;  %v2735_v50 = vsel %vm1467_vm1, %v9004_v6, 0.0 }
 0x697   : > { %v9008_v32 = vpop.eup %7445 }
 0x698   : > { %v2738_v41 = vsel %vm1467_vm1, %v9008_v32, 0.0  ;;  %v9012_v33 = vpop.eup %7447 }
 0x699   : > { %2736 = vadd.xlane.f32.xlu1 %v2735_v50  ;;  %v2395_v59 = vsel %vm1467_vm1, %v9012_v33, 0.0  ;;  %v9016_v54 = vpop.eup %7449  ;;  %v10974_v50 = vld [vmem:[#allocation6_spill] sm:$0xff] }
 0x69a   : > { %v2389_v62 = vsel %vm1467_vm1, %v9016_v54, 0.0  ;;  %v9020_v19 = vpop.eup %7451 }
 0x69b   : > { %v2407_v12 = vsel %vm1467_vm1, %v9020_v19, 0.0  ;;  %v9026_v9 = vpop.eup %7453 }
 0x69c   : > { %v2401_v29 = vsel %vm1467_vm1, %v9026_v9, 0.0 }
 0x69d   : > { %2739 = vadd.xlane.f32.xlu1 %v2738_v41 }
 0x6a0   : > { %v9037_v41 = vpop.eup %7455 }
 0x6a1   : > { %2396 = vadd.xlane.f32.xlu1 %v2395_v59  ;;  %v2710_v59 = vsub.f32 %v8947_v16, %v2698_v8  ;;  %v2741_v4 = vsel %vm1467_vm1, %v9037_v41, 0.0  ;;  %v9042_v5 = vpop.eup %7457  ;;  %v10977_v8 = vld [vmem:[#allocation19_spill] sm:$0xff] }
 0x6a3   : > { %v2723_v63 = vmul.f32 1.442695, %v2710_v59 }
 0x6a5   : > { %2390 = vadd.xlane.f32.xlu1 %v2389_v62 }
 0x6a7   : > { %2432 = vrot.lane.b32.xlu0 %v8310_v48, %s7838_s17  ;;  %v2704_v48 = vpop.xlane.xlu1 %2703 }
 0x6a8   : > { %v2712_v55 = vsub.f32 %v8959_v61, %v2704_v48  ;;  %v2747_v61 = vsel %vm1467_vm1, %v9042_v5, 0.0  ;;  %v10981_v48 = vld [vmem:[#allocation18_spill] sm:$0xff] }
 0x6a9   : > { %2408 = vadd.xlane.f32.xlu1 %v2407_v12 }
 0x6aa   : > { %v2727_v51 = vmul.f32 1.442695, %v2712_v55 }
 0x6ab   : > { %2430 = vrot.lane.b32.xlu0 %v10973_v47, %s7838_s17  ;;  %v10975_v47 = vld [vmem:[#allocation13_spill] sm:$0xff]  ;;  %v2731_v55 = vpop.xlane.xlu1 %2730 }
 0x6ac   : > { %7459 = vpow2.f32 %v2727_v51 }
 0x6ad   : > { %2402 = vadd.xlane.f32.xlu1 %v2401_v29  ;;  %7461 = vpow2.f32 %v2723_v63  ;;  %v10976_v29 = vld [vmem:[#allocation15_spill] sm:$0xff] }
 0x6b9   : > { %v9046_v46 = vpop.eup %7459 }
 0x6ba   : > { %v2750_v62 = vsel %vm1467_vm1, %v9046_v46, 0.0  ;;  %v9050_v12 = vpop.eup %7461 }
 0x6bb   : > { %v2744_v16 = vsel %vm1467_vm1, %v9050_v12, 0.0 }
 0x6be   : > { %2434 = vrot.lane.b32.xlu1 %v10974_v50, %s7838_s17 }
 0x6ca   : > { %2742 = vadd.xlane.f32.xlu0 %v2741_v4 }
 0x6ce   : > { %2748 = vadd.xlane.f32.xlu0 %v2747_v61 }
 0x6d2   : > { %2751 = vadd.xlane.f32.xlu0 %v2750_v62 }
 0x6e2   : > { %2745 = vadd.xlane.f32.xlu1 %v2744_v16 }
 0x6e8   : > { %2876 = vrot.lane.b32.xlu0 %v10975_v47, %s7836_s21 }
 0x6ec   : > { %2858 = vrot.lane.b32.xlu0 %v10976_v29, %s7836_s21 }
 0x6f0   : > { %2862 = vrot.lane.b32.xlu0 %v10977_v8, %s7836_s21 }
 0x6f3   : > { %2874 = vrot.lane.b32.xlu1 %v10978_v35, %s7836_s21 }
 0x6f7   : > { %2872 = vrot.lane.b32.xlu1 %v10979_v30, %s7836_s21 }
 0x6fb   : > { %2870 = vrot.lane.b32.xlu1 %v10980_v31, %s7836_s21 }
 0x6ff   : > { %2860 = vrot.lane.b32.xlu1 %v10981_v48, %s7836_s21 }
 0x703   : > { %2864 = vrot.lane.b32.xlu1 %v10982_v34, %s7836_s21 }
 0x70a   : > { %v2394_v50 = vpop.xlane.xlu0 %2393 }
 0x70e   : > { %v2388_v63 = vpop.xlane.xlu0 %2387 }
 0x70f   : > { %7463 = vrcp.f32 %v2388_v63 }
 0x716   : > { %v2406_v62 = vpop.xlane.xlu0 %2405 }
 0x71a   : > { %v2400_v7 = vpop.xlane.xlu0 %2399 }
 0x71c   : > { %v7464_v38 = vpop.eup %7463 }
 0x71d   : > { %v2418_v63 = vmul.f32 %v7464_v38, %v8983_v37  ;;  %v10983_v38 = vld [vmem:[#allocation12_spill] sm:$0xff] }
 0x71e   : > { %v2734_v51 = vpop.xlane.xlu1 %2733  ;;  %v2433_v42 = vpop.permute.xlu0 %2432 }
 0x722   : > { %v2737_v59 = vpop.xlane.xlu1 %2736  ;;  %v2431_v60 = vpop.permute.xlu0 %2430 }
 0x726   : > { %v2740_v4 = vpop.xlane.xlu1 %2739 }
 0x72a   : > { %v2397_v61 = vpop.xlane.xlu1 %2396 }
 0x72e   : > { %v2391_v16 = vpop.xlane.xlu1 %2390 }
 0x72f   : > { %7465 = vrcp.f32 %v2391_v16 }
 0x730   : > { %7467 = vrcp.f32 %v2397_v61 }
 0x731   : > { %7469 = vrcp.f32 %v2394_v50 }
 0x732   : > { %v2409_v25 = vpop.xlane.xlu1 %2408  ;;  %7471 = vrcp.f32 %v2400_v7 }
 0x736   : > { %v2403_v22 = vpop.xlane.xlu1 %2402 }
 0x737   : > { %7473 = vrcp.f32 %v2403_v22 }
 0x738   : > { %7475 = vrcp.f32 %v2409_v25 }
 0x739   : > { %7477 = vrcp.f32 %v2734_v51 }
 0x73a   : > { %v2435_v1 = vpop.permute.xlu1 %2434  ;;  %7479 = vrcp.f32 %v2406_v62 }
 0x73b   : > { %6948 = vmatprep.subr.bf16.mxu1 %v2435_v1  ;;  %7481 = vrcp.f32 %v2731_v55 }
 0x73c   : > { %v7466_v20 = vpop.eup %7465  ;;  %6949 = vmatpush3.bf16.msra.mxu1 %v2435_v1  ;;  %7483 = vrcp.f32 %v2740_v4  ;;  %v10984_v4 = vld [vmem:[#allocation11_spill] sm:$0xff] }
 0x73d   : > { %6950 = vmatprep.subr.bf16.mxu1 %v2433_v42  ;;  %v2419_v61 = vmul.f32 %v7466_v20, %v9016_v54  ;;  %v7468_v16 = vpop.eup %7467  ;;  %7485 = vrcp.f32 %v2737_v59 }
 0x73e   : > { %v7470_v7 = vpop.eup %7469  ;;  %v2421_v22 = vmul.f32 %v7468_v16, %v9012_v33  ;;  %v10985_v33 = vld [vmem:[#allocation21_spill] sm:$0xff] }
 0x73f   : > { %v2426_v50 = vpack.c.bf16 %v2419_v61, %v2418_v63  ;;  %v7472_v25 = vpop.eup %7471  ;;  %v2420_v55 = vmul.f32 %v7470_v7, %v8977_v28  ;;  %v9080_v62 = vpack.c.bf16 %v10985_v33, %v10984_v4  ;;  %v10986_v16 = vld [vmem:[#allocation9_spill] sm:$0xff] }
 0x740   : > { %6951 = vmatpush3.bf16.msra.mxu1 %v2433_v42  ;;  %v2422_v37 = vmul.f32 %v7472_v25, %v8994_v58  ;;  %v10987_v25 = vld [vmem:[#allocation8_spill] sm:$0xff] }
 0x741   : > { %6952 = vmatprep.subr.bf16.mxu1 %v2431_v60  ;;  %6954 = vmatprep.mubr.msk.bf16.mxu1 %vm1467_vm1, %v2426_v50  ;;  %v2427_v20 = vpack.c.bf16 %v2421_v22, %v2420_v55  ;;  %v10988_v55 = vld [vmem:[#allocation10_spill] sm:$0xff] }
 0x744   : > { %v7474_v1 = vpop.eup %7473  ;;  %6953 = vmatpush3.bf16.msra.mxu1 %v2431_v60 }
 0x745   : > { %6978 = vmatprep.subr.bf16.mxu1 %v10983_v38  ;;  %v2423_v54 = vmul.f32 %v7474_v1, %v9026_v9  ;;  %v7476_v42 = vpop.eup %7475  ;;  %v9094_v1 = vpack.c.bf16 %v10988_v55, %v10987_v25 }
 0x746   : > { %v7478_v51 = vpop.eup %7477  ;;  %v2425_v58 = vmul.f32 %v7476_v42, %v9020_v19 }
 0x747   : > { %6955 = vmatmul.mubr.msk.bf16.vlgmr.msra.gmra.mxu1 %vm1467_vm1, %v2427_v20  ;;  %v2428_v63 = vpack.c.bf16 %v2423_v54, %v2422_v37  ;;  %v7480_v28 = vpop.eup %7479  ;;  %v2762_v9 = vmul.f32 %v7478_v51, %v8999_v56 }
 0x748   : > { %6979 = vmatpush3.bf16.msra.mxu1 %v10983_v38  ;;  %v7482_v60 = vpop.eup %7481  ;;  %v2424_v59 = vmul.f32 %v7480_v28, %v8989_v39 }
 0x749   : > { %6958 = vmatprep.mubr.msk.bf16.mxu1 %vm1467_vm1, %v2428_v63  ;;  %6980 = vmatprep.subr.bf16.mxu1 %v9080_v62  ;;  %v2761_v61 = vmul.f32 %v7482_v60, %v8967_v17  ;;  %v7484_v7 = vpop.eup %7483 }
 0x74a   : > { %v2429_v50 = vpack.c.bf16 %v2425_v58, %v2424_v59  ;;  %v7486_v19 = vpop.eup %7485  ;;  %v2764_v39 = vmul.f32 %v7484_v7, %v9008_v32 }
 0x74b   : > { %v2769_v22 = vpack.c.bf16 %v2762_v9, %v2761_v61  ;;  %v2763_v17 = vmul.f32 %v7486_v19, %v9004_v6 }
 0x74c   : > { %6981 = vmatpush3.bf16.msra.mxu1 %v9080_v62 }
 0x74d   : > { %6982 = vmatprep.subr.bf16.mxu1 %v10986_v16  ;;  %v2770_v20 = vpack.c.bf16 %v2764_v39, %v2763_v17 }
 0x74f   : > { %6959 = vmatmul.mubr.msk.bf16.gmra.mxu1 %vm1467_vm1, %v2429_v50 }
 0x750   : > { %6983 = vmatpush3.bf16.msra.mxu1 %v10986_v16  ;;  %6986 = vmatprep.mubr.msk.bf16.mxu1 %vm1467_vm1, %v2769_v22 }
 0x751   : > { %6984 = vmatprep.subr.bf16.mxu1 %v9094_v1 }
 0x753   : > { %v2743_v56 = vpop.xlane.xlu0 %2742 }
 0x754   : > { %6985 = vmatpush3.bf16.msra.mxu1 %v9094_v1 }
 0x757   : > { %6987 = vmatmul.mubr.msk.bf16.vlgmr.msra.gmra.mxu1 %vm1467_vm1, %v2770_v20  ;;  %v2749_v37 = vpop.xlane.xlu0 %2748 }
 0x75b   : > { %v2752_v54 = vpop.xlane.xlu0 %2751 }
 0x75c   : > { %7487 = vrcp.f32 %v2752_v54 }
 0x75d   : > { %7489 = vrcp.f32 %v2743_v56 }
 0x75e   : > { %7491 = vrcp.f32 %v2749_v37 }
 0x75f   : > { %v2877_v42 = vpop.permute.xlu0 %2876 }
 0x760   : > { %7142 = vmatprep.subr.msk.bf16.mxu1 %vm1377_vm0, %v2877_v42  ;;  %v2900_v51 = vsel %vm1377_vm0, %v2877_v42, 0 }
 0x761   : > { %6995 = vmatpush3.bf16.xpose.msra.mxu1 %v2900_v51 }
 0x763   : > { %v2859_v19 = vpop.permute.xlu0 %2858 }
 0x767   : > { %v2863_v17 = vpop.permute.xlu0 %2862 }
 0x769   : > { %v7488_v63 = vpop.eup %7487 }
 0x76a   : > { %v7490_v28 = vpop.eup %7489  ;;  %v2768_v61 = vmul.f32 %v7488_v63, %v9046_v46 }
 0x76b   : > { %v2746_v32 = vpop.xlane.xlu1 %2745  ;;  %v7492_v60 = vpop.eup %7491  ;;  %v2765_v50 = vmul.f32 %v7490_v28, %v9037_v41 }
 0x76c   : > { %7493 = vrcp.f32 %v2746_v32  ;;  %v2767_v22 = vmul.f32 %v7492_v60, %v9042_v5 }
 0x76e   : > { %v2772_v55 = vpack.c.bf16 %v2768_v61, %v2767_v22 }
 0x76f   : > { %v2875_v6 = vpop.permute.xlu1 %2874 }
 0x770   : > { %7143 = vmatprep.subr.msk.bf16.mxu1 %vm1377_vm0, %v2875_v6  ;;  %v2897_v4 = vsel %vm1377_vm0, %v2875_v6, 0 }
 0x771   : > { %6997 = vmatpush3.bf16.xpose.msra.mxu1 %v2897_v4 }
 0x773   : > { %v2873_v33 = vpop.permute.xlu1 %2872 }
 0x774   : > { %7144 = vmatprep.subr.msk.bf16.mxu1 %vm1377_vm0, %v2873_v33  ;;  %v2894_v58 = vsel %vm1377_vm0, %v2873_v33, 0 }
 0x777   : > { %v2871_v59 = vpop.permute.xlu1 %2870 }
 0x778   : > { %v2891_v39 = vsel %vm1377_vm0, %v2871_v59, 0 }
 0x779   : > { %v7494_v9 = vpop.eup %7493  ;;  %6999 = vmatpush3.bf16.xpose.msra.mxu1 %v2894_v58 }
 0x77a   : > { %7145 = vmatprep.subr.msk.bf16.mxu1 %vm1377_vm0, %v2871_v59  ;;  %v2766_v7 = vmul.f32 %v7494_v9, %v9050_v12 }
 0x77b   : > { %v2861_v46 = vpop.permute.xlu1 %2860 }
 0x77c   : > { %v2771_v25 = vpack.c.bf16 %v2766_v7, %v2765_v50 }
 0x77e   : > { %6990 = vmatprep.mubr.msk.bf16.mxu1 %vm1467_vm1, %v2771_v25 }
 0x77f   : > { %6991 = vmatmul.mubr.msk.bf16.gmra.mxu1 %vm1467_vm1, %v2772_v55  ;;  %v2865_v41 = vpop.permute.xlu1 %2864  ;;  %v9181_v55 = vld [vmem:[%s10960_s29 + $0x8] sm:$0xff] }
 0x780   : > { %7002 = vmatprep.mubr.msk.bf16.mxu1 %vm1377_vm0, %v2859_v19 }
 0x781   : > { %7001 = vmatpush3.bf16.xpose.msra.mxu1 %v2891_v39 }
 0x788   : > { %7003 = vmatmul.mubr.msk.bf16.vlgmr.msra.gmra.mxu1 %vm1377_vm0, %v2861_v46  ;;  %v9173_v46 = vld [vmem:[%s10960_s29] sm:$0xff] }
 0x789   : > { %7006 = vmatprep.mubr.msk.bf16.mxu1 %vm1377_vm0, %v2863_v17 }
 0x790   : > { %7007 = vmatmul.mubr.msk.bf16.gmra.mxu1 %vm1377_vm0, %v2865_v41 }
 0x807   : > { %v9122_v5 = vpop.f32.mrf.mxu1 }
 0x809   : > { %v9124_v12 = vpop.f32.mrf.mxu1 }
 0x80b   : > { %v9126_v56 = vpop.f32.mrf.mxu1 }
 0x80d   : > { %v9130_v37 = vpop.f32.mrf.mxu1 }
 0x80f   : > { %v9134_v42 = vpop.f32.mrf.mxu1 }
 0x810   : > { %10989 = vst [vmem:[#allocation7_spill] sm:$0xff] %v9134_v42 }
 0x811   : > { %v9136_v51 = vpop.f32.mrf.mxu1 }
 0x813   : > { %v9138_v32 = vpop.f32.mrf.mxu1 }
 0x814   : > { %10990 = vst [vmem:[#allocation6_spill] sm:$0xff] %v9138_v32 }
 0x815   : > { %v9142_v4 = vpop.f32.mrf.mxu1 }
 0x817   : > { %v9146_v63 = vpop.f32.mrf.mxu1 }
 0x818   : > { %10991 = vst [vmem:[#allocation13_spill] sm:$0xff] %v9146_v63 }
 0x819   : > { %v9148_v28 = vpop.f32.mrf.mxu1 }
 0x81a   : > { %10992 = vst [vmem:[#allocation15_spill] sm:$0xff] %v9148_v28 }
 0x81b   : > { %v9150_v60 = vpop.f32.mrf.mxu1 }
 0x81c   : > { %10993 = vst [vmem:[#allocation19_spill] sm:$0xff] %v9150_v60 }
 0x81d   : > { %v9154_v9 = vpop.f32.mrf.mxu1 }
 0x81e   : > { %10994 = vst [vmem:[#allocation14_spill] sm:$0xff] %v9154_v9 }
 0x83f   : > { %v9158_v61 = vpop.f32.mrf.mxu1 }
 0x840   : > { %10995 = vst [vmem:[#allocation16_spill] sm:$0xff] %v9158_v61 }
 0x841   : > { %v9160_v50 = vpop.f32.mrf.mxu1 }
 0x842   : > { %10996 = vst [vmem:[#allocation17_spill] sm:$0xff] %v9160_v50 }
 0x843   : > { %v9162_v7 = vpop.f32.mrf.mxu1 }
 0x844   : > { %10997 = vst [vmem:[#allocation18_spill] sm:$0xff] %v9162_v7 }
 0x845   : > { %v9166_v25 = vpop.f32.mrf.mxu1 }
 0x846   : > { %10998 = vst [vmem:[#allocation20_spill] sm:$0xff] %v9166_v25 }
 0x848   : > { %v7004_v19 = vpop.f32.mrf.mxu1 }
 0x849   : > { %v2945_v58 = vadd.f32 %v8910_v24, %v7004_v19 }
 0x84a   : > { %v2936_v39 = vpop.f32.mrf.mxu1 }
 0x84b   : > { %v2937_v17 = vadd.f32 %v9173_v46, %v2936_v39  ;;  %v2973_v39 = vsel %vm1467_vm1, %v2945_v58, -inf }
 0x84c   : > { %v7005_v41 = vpop.f32.mrf.mxu1 }
 0x84d   : > { %v2967_v59 = vsel %vm1467_vm1, %v2937_v17, -inf  ;;  %v2948_v20 = vadd.f32 %v8928_v49, %v7005_v41 }
 0x84e   : > { %v2939_v22 = vpop.f32.mrf.mxu1  ;;  %2968 = vmax.xlane.f32.xlu0 %v2967_v59 }
 0x84f   : > { %v2940_v6 = vadd.f32 %v9181_v55, %v2939_v22  ;;  %v2976_v50 = vsel %vm1467_vm1, %v2948_v20, -inf  ;;  %v9193_v22 = vld [vmem:[%s10960_s29 + $0x28] sm:$0xff] }
 0x850   : > { %v7008_v33 = vpop.f32.mrf.mxu1 }
 0x851   : > { %v2970_v54 = vsel %vm1467_vm1, %v2940_v6, -inf  ;;  %v2961_v59 = vadd.f32 %v8941_v45, %v7008_v33  ;;  %v9200_v33 = vld [vmem:[%s10960_s29 + $0x20] sm:$0xff] }
 0x852   : > { %2971 = vmax.xlane.f32.xlu1 %v2970_v54  ;;  %2974 = vmax.xlane.f32.xlu0 %v2973_v39  ;;  %v2952_v19 = vpop.f32.mrf.mxu1 }
 0x854   : > { %v7009_v61 = vpop.f32.mrf.mxu1 }
 0x855   : > { %v2964_v7 = vadd.f32 %v8956_v27, %v7009_v61  ;;  %v2953_v61 = vadd.f32 %v9200_v33, %v2952_v19 }
 0x856   : > { %2977 = vmax.xlane.f32.xlu0 %v2976_v50  ;;  %v2955_v25 = vpop.f32.mrf.mxu1  ;;  %v2985_v50 = vsel %vm1467_vm1, %v2961_v59, -inf }
 0x857   : > { %v2956_v41 = vadd.f32 %v9193_v22, %v2955_v25  ;;  %v2988_v54 = vsel %vm1467_vm1, %v2964_v7, -inf  ;;  %v2979_v63 = vsel %vm1467_vm1, %v2953_v61, -inf }
 0x858   : > { %2989 = vmax.xlane.f32.xlu1 %v2988_v54 }
 0x859   : > { %v2982_v39 = vsel %vm1467_vm1, %v2956_v41, -inf }
 0x85a   : > { %2986 = vmax.xlane.f32.xlu0 %v2985_v50 }
 0x85c   : > { %2983 = vmax.xlane.f32.xlu1 %v2982_v39 }
 0x85e   : > { %2980 = vmax.xlane.f32.xlu0 %v2979_v63 }
 0x86d   : > { %3067 = vrot.lane.b32.xlu1 %v9080_v62, %s7836_s21 }
 0x871   : > { %3065 = vrot.lane.b32.xlu1 %v10986_v16, %s7836_s21 }
 0x874   : > { %3069 = vrot.lane.b32.xlu0 %v10983_v38, %s7836_s21 }
 0x875   : > { %3063 = vrot.lane.b32.xlu1 %v9094_v1, %s7836_s21 }
 0x8d7   : > { %v2969_v25 = vpop.xlane.xlu0 %2968 }
 0x8d8   : > { %v2991_v19 = vsub.f32 %v2937_v17, %v2969_v25 }
 0x8da   : > { %v2999_v63 = vmul.f32 1.442695, %v2991_v19 }
 0x8db   : > { %v2972_v54 = vpop.xlane.xlu1 %2971  ;;  %v2975_v50 = vpop.xlane.xlu0 %2974 }
 0x8dc   : > { %v2993_v39 = vsub.f32 %v2945_v58, %v2975_v50  ;;  %v2992_v60 = vsub.f32 %v2940_v6, %v2972_v54 }
 0x8de   : > { %v3003_v28 = vmul.f32 1.442695, %v2993_v39  ;;  %v3001_v3 = vmul.f32 1.442695, %v2992_v60 }
 0x8df   : > { %v2978_v9 = vpop.xlane.xlu0 %2977 }
 0x8e0   : > { %v2994_v23 = vsub.f32 %v2948_v20, %v2978_v9  ;;  %7495 = vpow2.f32 %v3003_v28 }
 0x8e1   : > { %v2990_v13 = vpop.xlane.xlu1 %2989  ;;  %7497 = vpow2.f32 %v2999_v63 }
 0x8e2   : > { %v3005_v42 = vmul.f32 1.442695, %v2994_v23  ;;  %v2998_v32 = vsub.f32 %v2964_v7, %v2990_v13 }
 0x8e3   : > { %v2987_v26 = vpop.xlane.xlu0 %2986 }
 0x8e4   : > { %7499 = vpow2.f32 %v3005_v42  ;;  %v2997_v15 = vsub.f32 %v2961_v59, %v2987_v26  ;;  %v3013_v25 = vmul.f32 1.442695, %v2998_v32 }
 0x8e5   : > { %v2984_v10 = vpop.xlane.xlu1 %2983  ;;  %7501 = vpow2.f32 %v3001_v3 }
 0x8e6   : > { %v3011_v17 = vmul.f32 1.442695, %v2997_v15  ;;  %v2996_v18 = vsub.f32 %v2956_v41, %v2984_v10 }
 0x8e7   : > { %v2981_v58 = vpop.xlane.xlu0 %2980 }
 0x8e8   : > { %7503 = vpow2.f32 %v3011_v17  ;;  %v2995_v6 = vsub.f32 %v2953_v61, %v2981_v58  ;;  %v3009_v20 = vmul.f32 1.442695, %v2996_v18 }
 0x8e9   : > { %v3068_v19 = vpop.permute.xlu1 %3067  ;;  %7505 = vpow2.f32 %v3013_v25 }
 0x8ea   : > { %v3007_v54 = vmul.f32 1.442695, %v2995_v6 }
 0x8eb   : > { %v3070_v28 = vpop.permute.xlu0 %3069 }
 0x8ec   : > { %7507 = vpow2.f32 %v3007_v54  ;;  %7010 = vmatprep.subr.bf16.mxu0 %v3070_v28 }
 0x8ed   : > { %7011 = vmatpush3.bf16.msra.mxu0 %v3070_v28  ;;  %v9214_v13 = vpop.eup %7495  ;;  %7509 = vpow2.f32 %v3009_v20  ;;  %v3066_v23 = vpop.permute.xlu1 %3065 }
 0x8ee   : > { %7012 = vmatprep.subr.bf16.mxu0 %v3068_v19  ;;  %v3021_v3 = vsel %vm1467_vm1, %v9214_v13, 0.0  ;;  %v7498_v10 = vpop.eup %7497 }
 0x8ef   : > { %3022 = vadd.xlane.f32.xlu0 %v3021_v3  ;;  %v3015_v42 = vsel %vm1467_vm1, %v7498_v10, 0.0 }
 0x8f1   : > { %v7500_v26 = vpop.eup %7499  ;;  %7013 = vmatpush3.bf16.msra.mxu0 %v3068_v19  ;;  %v3064_v60 = vpop.permute.xlu1 %3063 }
 0x8f2   : > { %7014 = vmatprep.subr.bf16.mxu0 %v3066_v23  ;;  %v3024_v15 = vsel %vm1467_vm1, %v7500_v26, 0.0  ;;  %v7502_v18 = vpop.eup %7501 }
 0x8f3   : > { %3025 = vadd.xlane.f32.xlu1 %v3024_v15  ;;  %3016 = vadd.xlane.f32.xlu0 %v3015_v42  ;;  %v3018_v9 = vsel %vm1467_vm1, %v7502_v18, 0.0 }
 0x8f5   : > { %v9220_v32 = vpop.eup %7503  ;;  %7015 = vmatpush3.bf16.msra.mxu0 %v3066_v23 }
 0x8f6   : > { %7016 = vmatprep.subr.bf16.mxu0 %v3064_v60  ;;  %v3033_v7 = vsel %vm1467_vm1, %v9220_v32, 0.0  ;;  %v7506_v59 = vpop.eup %7505 }
 0x8f7   : > { %3019 = vadd.xlane.f32.xlu1 %v3018_v9  ;;  %3034 = vadd.xlane.f32.xlu0 %v3033_v7  ;;  %v3036_v50 = vsel %vm1467_vm1, %v7506_v59, 0.0 }
 0x8f9   : > { %v7508_v41 = vpop.eup %7507  ;;  %7017 = vmatpush3.bf16.msra.mxu0 %v3064_v60 }
 0x8fa   : > { %v3027_v61 = vsel %vm1467_vm1, %v7508_v41, 0.0  ;;  %v7510_v39 = vpop.eup %7509 }
 0x8fb   : > { %3028 = vadd.xlane.f32.xlu1 %v3027_v61  ;;  %3037 = vadd.xlane.f32.xlu0 %v3036_v50  ;;  %v3030_v63 = vsel %vm1467_vm1, %v7510_v39, 0.0 }
 0x8ff   : > { %3031 = vadd.xlane.f32.xlu0 %v3030_v63 }
 0x90c   : > { %3168 = vrot.lane.b32.xlu1 %v10978_v35, %s7837_s24 }
 0x910   : > { %3166 = vrot.lane.b32.xlu1 %v10979_v30, %s7837_s24 }
 0x914   : > { %3164 = vrot.lane.b32.xlu1 %v10980_v31, %s7837_s24 }
 0x915   : > { %3170 = vrot.lane.b32.xlu0 %v10975_v47, %s7837_s24 }
 0x918   : > { %3158 = vrot.lane.b32.xlu1 %v10981_v48, %s7837_s24 }
 0x919   : > { %3156 = vrot.lane.b32.xlu0 %v10976_v29, %s7837_s24 }
 0x91c   : > { %3162 = vrot.lane.b32.xlu1 %v10982_v34, %s7837_s24 }
 0x91d   : > { %3160 = vrot.lane.b32.xlu0 %v10977_v8, %s7837_s24 }
 0x978   : > { %v3023_v17 = vpop.xlane.xlu0 %3022 }
 0x97c   : > { %v3026_v25 = vpop.xlane.xlu1 %3025  ;;  %v3017_v58 = vpop.xlane.xlu0 %3016 }
 0x97d   : > { %7511 = vrcp.f32 %v3026_v25 }
 0x97e   : > { %7513 = vrcp.f32 %v3017_v58 }
 0x97f   : > { %7515 = vrcp.f32 %v3023_v17 }
 0x980   : > { %v3020_v6 = vpop.xlane.xlu1 %3019  ;;  %v3035_v19 = vpop.xlane.xlu0 %3034 }
 0x981   : > { %7517 = vrcp.f32 %v3020_v6 }
 0x984   : > { %v3029_v54 = vpop.xlane.xlu1 %3028  ;;  %v3038_v20 = vpop.xlane.xlu0 %3037 }
 0x985   : > { %7519 = vrcp.f32 %v3038_v20 }
 0x986   : > { %7521 = vrcp.f32 %v3029_v54 }
 0x987   : > { %7523 = vrcp.f32 %v3035_v19 }
 0x988   : > { %v3032_v28 = vpop.xlane.xlu0 %3031  ;;  %v3169_v19 = vpop.permute.xlu1 %3168 }
 0x989   : > { %7525 = vrcp.f32 %v3032_v28 }
 0x98a   : > { %v7512_v23 = vpop.eup %7511 }
 0x98b   : > { %v7514_v3 = vpop.eup %7513  ;;  %v3050_v9 = vmul.f32 %v7512_v23, %v7500_v26 }
 0x98c   : > { %v7516_v15 = vpop.eup %7515  ;;  %v3171_v42 = vpop.permute.xlu0 %3170  ;;  %v3047_v7 = vmul.f32 %v7514_v3, %v7498_v10 }
 0x98d   : > { %7146 = vmatprep.subr.msk.bf16.mxu0 %vm1377_vm0, %v3171_v42  ;;  %v3049_v50 = vmul.f32 %v7516_v15, %v9214_v13  ;;  %v3194_v58 = vsel %vm1377_vm0, %v3171_v42, 0  ;;  %v3191_v15 = vsel %vm1377_vm0, %v3169_v19, 0  ;;  %v3167_v42 = vpop.permute.xlu1 %3166 }
 0x98e   : > { %v7518_v60 = vpop.eup %7517 }
 0x98f   : > { %v3048_v61 = vmul.f32 %v7518_v60, %v7502_v18  ;;  %v3056_v17 = vpack.c.bf16 %v3050_v9, %v3049_v50 }
 0x990   : > { %v3157_v3 = vpop.permute.xlu0 %3156 }
 0x991   : > { %v3055_v63 = vpack.c.bf16 %v3048_v61, %v3047_v7 }
 0x992   : > { %v7520_v25 = vpop.eup %7519 }
 0x993   : > { %7018 = vmatprep.mubr.msk.bf16.mxu0 %vm1467_vm1, %v3055_v63  ;;  %v7522_v6 = vpop.eup %7521  ;;  %v3054_v10 = vmul.f32 %v7520_v25, %v7506_v59  ;;  %v3188_v59 = vsel %vm1377_vm0, %v3167_v42, 0 }
 0x994   : > { %7019 = vmatmul.mubr.msk.bf16.vlgmr.msra.gmra.mxu0 %vm1467_vm1, %v3056_v17  ;;  %v7524_v54 = vpop.eup %7523  ;;  %v3051_v18 = vmul.f32 %v7522_v6, %v7508_v41  ;;  %v3165_v41 = vpop.permute.xlu1 %3164 }
 0x995   : > { %7027 = vmatpush3.bf16.xpose.msra.mxu0 %v3194_v58  ;;  %v3053_v13 = vmul.f32 %v7524_v54, %v9220_v32  ;;  %v3185_v32 = vsel %vm1377_vm0, %v3165_v41, 0  ;;  %v3161_v60 = vpop.permute.xlu0 %3160 }
 0x996   : > { %7147 = vmatprep.subr.msk.bf16.mxu0 %vm1377_vm0, %v3169_v19  ;;  %v7526_v26 = vpop.eup %7525 }
 0x997   : > { %v3052_v20 = vmul.f32 %v7526_v26, %v7510_v39  ;;  %v3058_v23 = vpack.c.bf16 %v3054_v10, %v3053_v13 }
 0x998   : > { %v3159_v39 = vpop.permute.xlu1 %3158 }
 0x999   : > { %v3057_v28 = vpack.c.bf16 %v3052_v20, %v3051_v18 }
 0x99b   : > { %7022 = vmatprep.mubr.msk.bf16.mxu0 %vm1467_vm1, %v3057_v28 }
 0x99c   : > { %7023 = vmatmul.mubr.msk.bf16.gmra.mxu0 %vm1467_vm1, %v3058_v23  ;;  %v3163_v9 = vpop.permute.xlu1 %3162 }
 0x99d   : > { %7029 = vmatpush3.bf16.xpose.msra.mxu0 %v3191_v15  ;;  %7034 = vmatprep.mubr.msk.bf16.mxu0 %vm1377_vm0, %v3157_v3 }
 0x99e   : > { %7148 = vmatprep.subr.msk.bf16.mxu0 %vm1377_vm0, %v3167_v42 }
 0x9a5   : > { %7031 = vmatpush3.bf16.xpose.msra.mxu0 %v3188_v59 }
 0x9a6   : > { %7149 = vmatprep.subr.msk.bf16.mxu0 %vm1377_vm0, %v3165_v41 }
 0x9ad   : > { %7033 = vmatpush3.bf16.xpose.msra.mxu0 %v3185_v32 }
 0x9b4   : > { %7035 = vmatmul.mubr.msk.bf16.vlgmr.msra.gmra.mxu0 %vm1377_vm0, %v3159_v39 }
 0x9b5   : > { %7038 = vmatprep.mubr.msk.bf16.mxu0 %vm1377_vm0, %v3161_v60 }
 0x9bc   : > { %7039 = vmatmul.mubr.msk.bf16.gmra.mxu0 %vm1377_vm0, %v3163_v9 }
 0xa54   : > { %v9262_v7 = vpop.f32.mrf.mxu0 }
 0xa56   : > { %v9264_v61 = vpop.f32.mrf.mxu0 }
 0xa58   : > { %v9266_v50 = vpop.f32.mrf.mxu0 }
 0xa5a   : > { %v9270_v17 = vpop.f32.mrf.mxu0 }
 0xa5c   : > { %v9274_v58 = vpop.f32.mrf.mxu0 }
 0xa5d   : > { %10999 = vst [vmem:[#allocation12_spill] sm:$0xff] %v9274_v58 }
 0xa5e   : > { %v9276_v6 = vpop.f32.mrf.mxu0 }
 0xa5f   : > { %11000 = vst [vmem:[#allocation11_spill] sm:$0xff] %v9276_v6 }
 0xa60   : > { %v9278_v19 = vpop.f32.mrf.mxu0 }
 0xa61   : > { %11001 = vst [vmem:[#allocation21_spill] sm:$0xff] %v9278_v19 }
 0xa62   : > { %v9282_v26 = vpop.f32.mrf.mxu0 }
 0xa63   : > { %11002 = vst [vmem:[#allocation9_spill] sm:$0xff] %v9282_v26 }
 0xa74   : > { %v7036_v18 = vpop.f32.mrf.mxu0 }
 0xa75   : > { %v3239_v23 = vadd.f32 %v8910_v24, %v7036_v18 }
 0xa76   : > { %v3230_v20 = vpop.f32.mrf.mxu0 }
 0xa77   : > { %v3231_v13 = vadd.f32 %v9173_v46, %v3230_v20  ;;  %v3267_v39 = vsel %vm1467_vm1, %v3239_v23, -inf }
 0xa78   : > { %v7037_v28 = vpop.f32.mrf.mxu0 }
 0xa79   : > { %v3261_v3 = vsel %vm1467_vm1, %v3231_v13, -inf  ;;  %v3242_v41 = vadd.f32 %v8928_v49, %v7037_v28 }
 0xa7a   : > { %v3233_v15 = vpop.f32.mrf.mxu0  ;;  %3262 = vmax.xlane.f32.xlu0 %v3261_v3 }
 0xa7b   : > { %v3234_v42 = vadd.f32 %v9181_v55, %v3233_v15  ;;  %v3270_v18 = vsel %vm1467_vm1, %v3242_v41, -inf }
 0xa7c   : > { %v7040_v59 = vpop.f32.mrf.mxu0 }
 0xa7d   : > { %v3264_v32 = vsel %vm1467_vm1, %v3234_v42, -inf  ;;  %v3255_v20 = vadd.f32 %v8941_v45, %v7040_v59 }
 0xa7e   : > { %3265 = vmax.xlane.f32.xlu1 %v3264_v32  ;;  %3268 = vmax.xlane.f32.xlu0 %v3267_v39  ;;  %v3246_v60 = vpop.f32.mrf.mxu0 }
 0xa7f   : > { %v3247_v28 = vadd.f32 %v9200_v33, %v3246_v60  ;;  %v3279_v32 = vsel %vm1467_vm1, %v3255_v20, -inf }
 0xa80   : > { %v7041_v9 = vpop.f32.mrf.mxu0 }
 0xa81   : > { %v3258_v24 = vadd.f32 %v8956_v27, %v7041_v9  ;;  %v3273_v45 = vsel %vm1467_vm1, %v3247_v28, -inf }
 0xa82   : > { %3271 = vmax.xlane.f32.xlu0 %v3270_v18  ;;  %v3249_v3 = vpop.f32.mrf.mxu0 }
 0xa83   : > { %v3250_v15 = vadd.f32 %v9193_v22, %v3249_v3  ;;  %v3282_v49 = vsel %vm1467_vm1, %v3258_v24, -inf }
 0xa84   : > { %3283 = vmax.xlane.f32.xlu1 %v3282_v49 }
 0xa85   : > { %v3276_v39 = vsel %vm1467_vm1, %v3250_v15, -inf }
 0xa86   : > { %3280 = vmax.xlane.f32.xlu0 %v3279_v32 }
 0xa88   : > { %3277 = vmax.xlane.f32.xlu1 %v3276_v39 }
 0xa8a   : > { %3274 = vmax.xlane.f32.xlu0 %v3273_v45 }
 0xa99   : > { %3357 = vrot.lane.b32.xlu1 %v9080_v62, %s7837_s24 }
 0xa9d   : > { %3355 = vrot.lane.b32.xlu1 %v10986_v16, %s7837_s24 }
 0xaa0   : > { %3359 = vrot.lane.b32.xlu0 %v10983_v38, %s7837_s24 }
 0xaa1   : > { %3353 = vrot.lane.b32.xlu1 %v9094_v1, %s7837_s24 }
 0xb03   : > { %v3263_v27 = vpop.xlane.xlu0 %3262 }
 0xb04   : > { %v3285_v59 = vsub.f32 %v3231_v13, %v3263_v27 }
 0xb06   : > { %v3293_v32 = vmul.f32 1.442695, %v3285_v59 }
 0xb07   : > { %v3266_v60 = vpop.xlane.xlu1 %3265  ;;  %v3269_v9 = vpop.xlane.xlu0 %3268 }
 0xb08   : > { %v3287_v18 = vsub.f32 %v3239_v23, %v3269_v9  ;;  %v3286_v3 = vsub.f32 %v3234_v42, %v3266_v60 }
 0xb0a   : > { %v3297_v49 = vmul.f32 1.442695, %v3287_v18  ;;  %v3295_v54 = vmul.f32 1.442695, %v3286_v3 }
 0xb0b   : > { %v3272_v39 = vpop.xlane.xlu0 %3271 }
 0xb0c   : > { %v3288_v45 = vsub.f32 %v3242_v41, %v3272_v39  ;;  %7527 = vpow2.f32 %v3297_v49 }
 0xb0d   : > { %v3284_v10 = vpop.xlane.xlu1 %3283  ;;  %7529 = vpow2.f32 %v3293_v32 }
 0xb0e   : > { %v3299_v63 = vmul.f32 1.442695, %v3288_v45  ;;  %v3292_v25 = vsub.f32 %v3258_v24, %v3284_v10 }
 0xb0f   : > { %v3281_v6 = vpop.xlane.xlu0 %3280 }
 0xb10   : > { %7531 = vpow2.f32 %v3299_v63  ;;  %v3291_v26 = vsub.f32 %v3255_v20, %v3281_v6  ;;  %v3307_v27 = vmul.f32 1.442695, %v3292_v25 }
 0xb11   : > { %v3278_v58 = vpop.xlane.xlu1 %3277  ;;  %7533 = vpow2.f32 %v3295_v54 }
 0xb12   : > { %v3305_v13 = vmul.f32 1.442695, %v3291_v26  ;;  %v3290_v19 = vsub.f32 %v3250_v15, %v3278_v58 }
 0xb13   : > { %v3275_v23 = vpop.xlane.xlu0 %3274 }
 0xb14   : > { %7535 = vpow2.f32 %v3305_v13  ;;  %v3289_v42 = vsub.f32 %v3247_v28, %v3275_v23  ;;  %v3303_v41 = vmul.f32 1.442695, %v3290_v19 }
 0xb15   : > { %v3358_v59 = vpop.permute.xlu1 %3357  ;;  %7537 = vpow2.f32 %v3307_v27 }
 0xb16   : > { %v3301_v60 = vmul.f32 1.442695, %v3289_v42 }
 0xb17   : > { %v3360_v9 = vpop.permute.xlu0 %3359 }
 0xb18   : > { %7539 = vpow2.f32 %v3301_v60  ;;  %7042 = vmatprep.subr.bf16.mxu1 %v3360_v9 }
 0xb19   : > { %7043 = vmatpush3.bf16.msra.mxu1 %v3360_v9  ;;  %v9310_v10 = vpop.eup %7527  ;;  %7541 = vpow2.f32 %v3303_v41  ;;  %v3356_v63 = vpop.permute.xlu1 %3355 }
 0xb1a   : > { %7044 = vmatprep.subr.bf16.mxu1 %v3358_v59  ;;  %v3315_v25 = vsel %vm1467_vm1, %v9310_v10, 0.0  ;;  %v7530_v58 = vpop.eup %7529 }
 0xb1b   : > { %3316 = vadd.xlane.f32.xlu0 %v3315_v25  ;;  %v3309_v26 = vsel %vm1467_vm1, %v7530_v58, 0.0 }
 0xb1d   : > { %v7532_v6 = vpop.eup %7531  ;;  %7045 = vmatpush3.bf16.msra.mxu1 %v3358_v59  ;;  %v3354_v24 = vpop.permute.xlu1 %3353 }
 0xb1e   : > { %7046 = vmatprep.subr.bf16.mxu1 %v3356_v63  ;;  %v3318_v54 = vsel %vm1467_vm1, %v7532_v6, 0.0  ;;  %v7534_v19 = vpop.eup %7533 }
 0xb1f   : > { %3319 = vadd.xlane.f32.xlu1 %v3318_v54  ;;  %3310 = vadd.xlane.f32.xlu0 %v3309_v26  ;;  %v3312_v15 = vsel %vm1467_vm1, %v7534_v19, 0.0 }
 0xb21   : > { %v9316_v20 = vpop.eup %7535  ;;  %7047 = vmatpush3.bf16.msra.mxu1 %v3356_v63 }
 0xb22   : > { %7048 = vmatprep.subr.bf16.mxu1 %v3354_v24  ;;  %v3327_v28 = vsel %vm1467_vm1, %v9316_v20, 0.0  ;;  %v7538_v18 = vpop.eup %7537 }
 0xb23   : > { %3313 = vadd.xlane.f32.xlu1 %v3312_v15  ;;  %3328 = vadd.xlane.f32.xlu0 %v3327_v28  ;;  %v3330_v32 = vsel %vm1467_vm1, %v7538_v18, 0.0 }
 0xb25   : > { %v7540_v3 = vpop.eup %7539  ;;  %7049 = vmatpush3.bf16.msra.mxu1 %v3354_v24 }
 0xb26   : > { %v3321_v49 = vsel %vm1467_vm1, %v7540_v3, 0.0  ;;  %v7542_v39 = vpop.eup %7541 }
 0xb27   : > { %3322 = vadd.xlane.f32.xlu1 %v3321_v49  ;;  %3331 = vadd.xlane.f32.xlu0 %v3330_v32  ;;  %v3324_v45 = vsel %vm1467_vm1, %v7542_v39, 0.0 }
 0xb2b   : > { %3325 = vadd.xlane.f32.xlu0 %v3324_v45 }
 0xb38   : > { %3458 = vrot.lane.b32.xlu1 %v10978_v35, %s7838_s17 }
 0xb3c   : > { %3456 = vrot.lane.b32.xlu1 %v10979_v30, %s7838_s17 }
 0xb40   : > { %3454 = vrot.lane.b32.xlu1 %v10980_v31, %s7838_s17 }
 0xb41   : > { %3460 = vrot.lane.b32.xlu0 %v10975_v47, %s7838_s17 }
 0xb44   : > { %3448 = vrot.lane.b32.xlu1 %v10981_v48, %s7838_s17 }
 0xb45   : > { %3446 = vrot.lane.b32.xlu0 %v10976_v29, %s7838_s17 }
 0xb48   : > { %3452 = vrot.lane.b32.xlu1 %v10982_v34, %s7838_s17 }
 0xb49   : > { %3450 = vrot.lane.b32.xlu0 %v10977_v8, %s7838_s17 }
 0xba4   : > { %v3317_v35 = vpop.xlane.xlu0 %3316 }
 0xba8   : > { %v3320_v30 = vpop.xlane.xlu1 %3319  ;;  %v3311_v13 = vpop.xlane.xlu0 %3310 }
 0xba9   : > { %7543 = vrcp.f32 %v3320_v30 }
 0xbaa   : > { %7545 = vrcp.f32 %v3311_v13 }
 0xbab   : > { %7547 = vrcp.f32 %v3317_v35 }
 0xbac   : > { %v3314_v31 = vpop.xlane.xlu1 %3313  ;;  %v3329_v47 = vpop.xlane.xlu0 %3328 }
 0xbad   : > { %7549 = vrcp.f32 %v3314_v31 }
 0xbb0   : > { %v3323_v27 = vpop.xlane.xlu1 %3322  ;;  %v3332_v48 = vpop.xlane.xlu0 %3331 }
 0xbb1   : > { %7551 = vrcp.f32 %v3332_v48  ;;  %v11003_v48 = vmov 0  }
 0xbb2   : > { %7553 = vrcp.f32 %v3323_v27 }
 0xbb3   : > { %7555 = vrcp.f32 %v3329_v47 }
 0xbb4   : > { %v3326_v29 = vpop.xlane.xlu0 %3325  ;;  %v3459_v28 = vpop.permute.xlu1 %3458 }
 0xbb5   : > { %7557 = vrcp.f32 %v3326_v29  ;;  %v3481_v30 = vsel %vm1377_vm0, %v3459_v28, 0 }
 0xbb6   : > { %v7544_v34 = vpop.eup %7543 }
 0xbb7   : > { %v7546_v23 = vpop.eup %7545  ;;  %v3344_v60 = vmul.f32 %v7544_v34, %v7532_v6 }
 0xbb8   : > { %v7548_v42 = vpop.eup %7547  ;;  %v3461_v8 = vpop.permute.xlu0 %3460  ;;  %v3341_v41 = vmul.f32 %v7546_v23, %v7530_v58 }
 0xbb9   : > { %7150 = vmatprep.subr.msk.bf16.mxu1 %vm1377_vm0, %v3461_v8  ;;  %v3343_v63 = vmul.f32 %v7548_v42, %v9310_v10  ;;  %v3484_v24 = vsel %vm1377_vm0, %v3461_v8, 0  ;;  %v3457_v31 = vpop.permute.xlu1 %3456 }
 0xbba   : > { %v7550_v59 = vpop.eup %7549 }
 0xbbb   : > { %v3342_v9 = vmul.f32 %v7550_v59, %v7534_v19  ;;  %v3350_v54 = vpack.c.bf16 %v3344_v60, %v3343_v63 }
 0xbbc   : > { %v3447_v13 = vpop.permute.xlu0 %3446 }
 0xbbd   : > { %v3349_v25 = vpack.c.bf16 %v3342_v9, %v3341_v41 }
 0xbbe   : > { %v7552_v26 = vpop.eup %7551 }
 0xbbf   : > { %7050 = vmatprep.mubr.msk.bf16.mxu1 %vm1467_vm1, %v3349_v25  ;;  %v7554_v15 = vpop.eup %7553  ;;  %v3348_v58 = vmul.f32 %v7552_v26, %v7538_v18  ;;  %v3478_v18 = vsel %vm1377_vm0, %v3457_v31, 0 }
 0xbc0   : > { %7051 = vmatmul.mubr.msk.bf16.vlgmr.msra.gmra.mxu1 %vm1467_vm1, %v3350_v54  ;;  %v7556_v49 = vpop.eup %7555  ;;  %v3345_v19 = vmul.f32 %v7554_v15, %v7540_v3  ;;  %v3455_v3 = vpop.permute.xlu1 %3454 }
 0xbc1   : > { %7059 = vmatpush3.bf16.xpose.msra.mxu1 %v3484_v24  ;;  %v3347_v10 = vmul.f32 %v7556_v49, %v9316_v20  ;;  %v3475_v20 = vsel %vm1377_vm0, %v3455_v3, 0  ;;  %v3451_v47 = vpop.permute.xlu0 %3450  ;;  %v7759_v49 = vld [vmem:[%s10960_s29 + $0x10] sm:$0xff] }
 0xbc2   : > { %7151 = vmatprep.subr.msk.bf16.mxu1 %vm1377_vm0, %v3459_v28  ;;  %v7558_v6 = vpop.eup %7557 }
 0xbc3   : > { %v3346_v32 = vmul.f32 %v7558_v6, %v7542_v39  ;;  %v3352_v35 = vpack.c.bf16 %v3348_v58, %v3347_v10 }
 0xbc4   : > { %v3449_v39 = vpop.permute.xlu1 %3448 }
 0xbc5   : > { %v3351_v45 = vpack.c.bf16 %v3346_v32, %v3345_v19 }
 0xbc7   : > { %7054 = vmatprep.mubr.msk.bf16.mxu1 %vm1467_vm1, %v3351_v45  ;;  %v7760_v45 = vld [vmem:[%s10960_s29 + $0x18] sm:$0xff] }
 0xbc8   : > { %7055 = vmatmul.mubr.msk.bf16.gmra.mxu1 %vm1467_vm1, %v3352_v35  ;;  %v3453_v27 = vpop.permute.xlu1 %3452 }
 0xbc9   : > { %7061 = vmatpush3.bf16.xpose.msra.mxu1 %v3481_v30  ;;  %7066 = vmatprep.mubr.msk.bf16.mxu1 %vm1377_vm0, %v3447_v13 }
 0xbca   : > { %7152 = vmatprep.subr.msk.bf16.mxu1 %vm1377_vm0, %v3457_v31 }
 0xbd1   : > { %7063 = vmatpush3.bf16.xpose.msra.mxu1 %v3478_v18 }
 0xbd2   : > { %7153 = vmatprep.subr.msk.bf16.mxu1 %vm1377_vm0, %v3455_v3 }
 0xbd9   : > { %7065 = vmatpush3.bf16.xpose.msra.mxu1 %v3475_v20 }
 0xbe0   : > { %7067 = vmatmul.mubr.msk.bf16.vlgmr.msra.gmra.mxu1 %vm1377_vm0, %v3449_v39  ;;  %v7761_v39 = vld [vmem:[%s10960_s29 + $0x30] sm:$0xff] }
 0xbe1   : > { %7070 = vmatprep.mubr.msk.bf16.mxu1 %vm1377_vm0, %v3451_v47 }
 0xbe8   : > { %7071 = vmatmul.mubr.msk.bf16.gmra.mxu1 %vm1377_vm0, %v3453_v27  ;;  %v7762_v27 = vld [vmem:[%s10960_s29 + $0x38] sm:$0xff] }
 0xbe9   : > { %4464 = vmatprep.mubr.bf16.mxu1 %v11003_v48 }
 0xc80   : > { %v9359_v29 = vpop.f32.mrf.mxu1 }
 0xc82   : > { %v9361_v34 = vpop.f32.mrf.mxu1 }
 0xc84   : > { %v9363_v23 = vpop.f32.mrf.mxu1 }
 0xc85   : > { %v3443_v42 = vpack.c.bf16 %v9363_v23, %v9359_v29 }
 0xc86   : > { %v9367_v8 = vpop.f32.mrf.mxu1 }
 0xc87   : > { %v3442_v59 = vpack.c.bf16 %v9367_v8, %v9361_v34 }
 0xc88   : > { %v9371_v60 = vpop.f32.mrf.mxu1 }
 0xc8a   : > { %v9373_v41 = vpop.f32.mrf.mxu1 }
 0xc8c   : > { %v9375_v9 = vpop.f32.mrf.mxu1 }
 0xc8d   : > { %v3445_v63 = vpack.c.bf16 %v9375_v9, %v9371_v60  ;;  %v9566_v60 = vld [vmem:[%s11036_s19] ss:$0 sm:$0xff] }
 0xc8e   : > { %v9379_v25 = vpop.f32.mrf.mxu1 }
 0xc8f   : > { %v3444_v54 = vpack.c.bf16 %v9379_v25, %v9373_v41 }
 0xca0   : > { %v7068_v26 = vpop.f32.mrf.mxu1 }
 0xca1   : > { %v3529_v6 = vadd.f32 %v7759_v49, %v7068_v26 }
 0xca2   : > { %v3520_v24 = vpop.f32.mrf.mxu1 }
 0xca3   : > { %v3521_v15 = vadd.f32 %v9173_v46, %v3520_v24  ;;  %v3557_v30 = vsel %vm1467_vm1, %v3529_v6, -inf }
 0xca4   : > { %v7069_v28 = vpop.f32.mrf.mxu1 }
 0xca5   : > { %v3551_v58 = vsel %vm1467_vm1, %v3521_v15, -inf  ;;  %v3532_v35 = vadd.f32 %v7760_v45, %v7069_v28 }
 0xca6   : > { %v3523_v19 = vpop.f32.mrf.mxu1  ;;  %3552 = vmax.xlane.f32.xlu0 %v3551_v58 }
 0xca7   : > { %v3524_v32 = vadd.f32 %v9181_v55, %v3523_v19  ;;  %v3560_v3 = vsel %vm1467_vm1, %v3532_v35, -inf }
 0xca8   : > { %v7072_v10 = vpop.f32.mrf.mxu1 }
 0xca9   : > { %v3554_v46 = vsel %vm1467_vm1, %v3524_v32, -inf  ;;  %v3545_v47 = vadd.f32 %v7761_v39, %v7072_v10 }
 0xcaa   : > { %3555 = vmax.xlane.f32.xlu1 %v3554_v46  ;;  %3558 = vmax.xlane.f32.xlu0 %v3557_v30  ;;  %v3536_v13 = vpop.f32.mrf.mxu1 }
 0xcab   : > { %v3537_v18 = vadd.f32 %v9200_v33, %v3536_v13 }
 0xcac   : > { %v7073_v31 = vpop.f32.mrf.mxu1 }
 0xcad   : > { %v3548_v26 = vadd.f32 %v7762_v27, %v7073_v31  ;;  %v3563_v33 = vsel %vm1467_vm1, %v3537_v18, -inf }
 0xcae   : > { %3561 = vmax.xlane.f32.xlu0 %v3560_v3  ;;  %v3539_v55 = vpop.f32.mrf.mxu1 }
 0xcaf   : > { %v3540_v20 = vadd.f32 %v9193_v22, %v3539_v55  ;;  %v3572_v28 = vsel %vm1467_vm1, %v3548_v26, -inf  ;;  %v3569_v22 = vsel %vm1467_vm1, %v3545_v47, -inf }
 0xcb1   : > { %v3566_v24 = vsel %vm1467_vm1, %v3540_v20, -inf }
 0xcb2   : > { %3567 = vmax.xlane.f32.xlu1 %v3566_v24  ;;  %3564 = vmax.xlane.f32.xlu0 %v3563_v33 }
 0xcb6   : > { %3573 = vmax.xlane.f32.xlu1 %v3572_v28  ;;  %3570 = vmax.xlane.f32.xlu0 %v3569_v22 }
 0xccc   : > { %3649 = vrot.lane.b32.xlu0 %v10983_v38, %s7838_s17 }
 0xd2f   : > { %v3553_v49 = vpop.xlane.xlu0 %3552 }
 0xd30   : > { %v3575_v58 = vsub.f32 %v3521_v15, %v3553_v49 }
 0xd32   : > { %v3583_v13 = vmul.f32 1.442695, %v3575_v58 }
 0xd33   : > { %v3556_v19 = vpop.xlane.xlu1 %3555  ;;  %v3559_v10 = vpop.xlane.xlu0 %3558 }
 0xd34   : > { %v3577_v45 = vsub.f32 %v3529_v6, %v3559_v10  ;;  %v3576_v46 = vsub.f32 %v3524_v32, %v3556_v19 }
 0xd36   : > { %v3587_v30 = vmul.f32 1.442695, %v3577_v45  ;;  %v3585_v55 = vmul.f32 1.442695, %v3576_v46 }
 0xd37   : > { %v3562_v31 = vpop.xlane.xlu0 %3561 }
 0xd38   : > { %v3578_v3 = vsub.f32 %v3532_v35, %v3562_v31  ;;  %7559 = vpow2.f32 %v3587_v30 }
 0xd39   : > { %7561 = vpow2.f32 %v3583_v13 }
 0xd3a   : > { %v3589_v39 = vmul.f32 1.442695, %v3578_v3 }
 0xd3b   : > { %v3568_v27 = vpop.xlane.xlu1 %3567  ;;  %v3565_v24 = vpop.xlane.xlu0 %3564 }
 0xd3c   : > { %7563 = vpow2.f32 %v3589_v39  ;;  %v3579_v33 = vsub.f32 %v3537_v18, %v3565_v24  ;;  %v3580_v58 = vsub.f32 %v3540_v20, %v3568_v27 }
 0xd3d   : > { %7565 = vpow2.f32 %v3585_v55 }
 0xd3e   : > { %v3591_v49 = vmul.f32 1.442695, %v3579_v33  ;;  %v3593_v46 = vmul.f32 1.442695, %v3580_v58 }
 0xd3f   : > { %v3571_v38 = vpop.xlane.xlu0 %3570  ;;  %v3574_v28 = vpop.xlane.xlu1 %3573 }
 0xd40   : > { %v3581_v15 = vsub.f32 %v3545_v47, %v3571_v38  ;;  %v3582_v6 = vsub.f32 %v3548_v26, %v3574_v28  ;;  %v1939_v38 = vpack.c.bf16 %v8838_v52, %v8832_v21  ;;  %v2229_v28 = vpack.c.bf16 %v8858_v40, %v8852_v14 }
 0xd41   : > { %v11005_v21 = vpack.c.bf16 %v8834_v53, %v8830_v36  ;;  %v2231_v52 = vpack.c.bf16 %v8868_v57, %v8862_v2  ;;  %v11006_v14 = vpack.c.bf16 %v8854_v44, %v8850_v43  ;;  %v11008_v36 = vpack.c.bf16 %v9142_v4, %v9136_v51  ;;  %v11009_v53 = vld [vmem:[#allocation31_spill] sm:$0xff]  ;;  %v11013_v44 = vld [vmem:[#allocation33_spill] sm:$0xff]  ;;  %v11014_v2 = vld [vmem:[#allocation32_spill] sm:$0xff] }
 0xd42   : > { %v3595_v22 = vmul.f32 1.442695, %v3581_v15  ;;  %v3597_v19 = vmul.f32 1.442695, %v3582_v6  ;;  %v11012_v43 = vpack.c.bf16 %v9270_v17, %v9264_v61  ;;  %v11015_v57 = vpack.c.bf16 %v11013_v44, %v11014_v2  ;;  %v7221_v44 = vld [vmem:[%s7956_s23 + $0x8] sm:$0xff]   ;;  %v7222_v2 = vld [vmem:[%s7956_s23] sm:$0xff]  }
 0xd43   : > { %v3650_v32 = vpop.permute.xlu0 %3649 }
 0xd44   : > { %7074 = vmatprep.subr.bf16.mxu0 %v3650_v32  ;;  %7567 = vpow2.f32 %v3595_v22 }
 0xd45   : > { %7075 = vmatpush3.bf16.msra.mxu0 %v3650_v32  ;;  %v9409_v35 = vpop.eup %7559  ;;  %7569 = vpow2.f32 %v3591_v49 }
 0xd46   : > { %v3605_v10 = vsel %vm1467_vm1, %v9409_v35, 0.0  ;;  %v7562_v45 = vpop.eup %7561  ;;  %7571 = vpow2.f32 %v3597_v19 }
 0xd47   : > { %3606 = vadd.xlane.f32.xlu0 %v3605_v10  ;;  %v3599_v30 = vsel %vm1467_vm1, %v7562_v45, 0.0  ;;  %7573 = vpow2.f32 %v3593_v46  ;;  %v7215_v10 = vld [vmem:[%s7956_s23 + $0x38] sm:$0xff]  }
 0xd49   : > { %v9413_v18 = vpop.eup %7563 }
 0xd4a   : > { %v3608_v47 = vsel %vm1467_vm1, %v9413_v18, 0.0  ;;  %v7566_v26 = vpop.eup %7565 }
 0xd4b   : > { %3609 = vadd.xlane.f32.xlu1 %v3608_v47  ;;  %3600 = vadd.xlane.f32.xlu0 %v3599_v30  ;;  %v3602_v20 = vsel %vm1467_vm1, %v7566_v26, 0.0 }
 0xd4f   : > { %3603 = vadd.xlane.f32.xlu1 %v3602_v20 }
 0xd51   : > { %v9419_v13 = vpop.eup %7567 }
 0xd52   : > { %v3617_v31 = vsel %vm1467_vm1, %v9419_v13, 0.0  ;;  %v9423_v3 = vpop.eup %7569 }
 0xd53   : > { %3618 = vadd.xlane.f32.xlu1 %v3617_v31  ;;  %v3611_v55 = vsel %vm1467_vm1, %v9423_v3, 0.0  ;;  %v9427_v39 = vpop.eup %7571  ;;  %v7216_v31 = vld [vmem:[%s7956_s23 + $0x30] sm:$0xff]  }
 0xd54   : > { %v3620_v27 = vsel %vm1467_vm1, %v9427_v39, 0.0  ;;  %v9431_v24 = vpop.eup %7573 }
 0xd55   : > { %v3614_v33 = vsel %vm1467_vm1, %v9431_v24, 0.0 }
 0xd57   : > { %3612 = vadd.xlane.f32.xlu1 %v3611_v55 }
 0xd5b   : > { %3621 = vadd.xlane.f32.xlu1 %v3620_v27 }
 0xd5f   : > { %3615 = vadd.xlane.f32.xlu1 %v3614_v33 }
 0xd61   : > { %3645 = vrot.lane.b32.xlu0 %v10986_v16, %s7838_s17  ;;  %v11004_v16 = vpack.c.bf16 %v9130_v37, %v9124_v12 }
 0xd65   : > { %3643 = vrot.lane.b32.xlu0 %v9094_v1, %s7838_s17  ;;  %v1941_v1 = vpack.c.bf16 %v8848_v11, %v8842_v0  ;;  %v11007_v0 = vpack.c.bf16 %v9126_v56, %v9122_v5  ;;  %v11010_v11 = vld [vmem:[#allocation30_spill] sm:$0xff]  ;;  %v11017_v5 = vld [vmem:[#allocation7_spill] sm:$0xff]  ;;  %v11019_v56 = vpack.c.bf16 %v9266_v50, %v9262_v7 }
 0xd66   : > { %v11011_v40 = vpack.c.bf16 %v11009_v53, %v11010_v11  ;;  %v7220_v11 = vld [vmem:[%s7956_s23 + $0x10] sm:$0xff]  }
 0xd69   : > { %2527 = vrot.lane.b32.xlu0 %v1939_v38, %s7838_s17  ;;  %v7217_v38 = vld [vmem:[%s7956_s23 + $0x28] sm:$0xff]  }
 0xd6d   : > { %2539 = vrot.lane.b32.xlu0 %v2229_v28, %s7837_s24  ;;  %v11020_v28 = vld [vmem:[#allocation23_spill] sm:$0xff] }
 0xd70   : > { %3647 = vrot.lane.b32.xlu1 %v9080_v62, %s7838_s17  ;;  %v11016_v62 = vld [vmem:[#allocation6_spill] sm:$0xff] }
 0xd71   : > { %2551 = vrot.lane.b32.xlu0 %v11004_v16, %s7836_s21  ;;  %v11018_v12 = vpack.c.bf16 %v11016_v62, %v11017_v5  ;;  %v11021_v16 = vld [vmem:[#allocation25_spill] sm:$0xff]  ;;  %v11022_v5 = vld [vmem:[#allocation27_spill] sm:$0xff] }
 0xd74   : > { %2529 = vrot.lane.b32.xlu1 %v11005_v21, %s7838_s17 }
 0xd75   : > { %2531 = vrot.lane.b32.xlu0 %v1941_v1, %s7838_s17 }
 0xd78   : > { %2541 = vrot.lane.b32.xlu1 %v11006_v14, %s7837_s24 }
 0xd79   : > { %2543 = vrot.lane.b32.xlu0 %v2231_v52, %s7837_s24 }
 0xd7c   : > { %2553 = vrot.lane.b32.xlu1 %v11007_v0, %s7836_s21  ;;  %v7218_v0 = vld [vmem:[%s7956_s23 + $0x20] sm:$0xff]  }
 0xd7d   : > { %2555 = vrot.lane.b32.xlu0 %v11008_v36, %s7836_s21 }
 0xd80   : > { %2533 = vrot.lane.b32.xlu1 %v11011_v40, %s7838_s17 }
 0xd81   : > { %3740 = vrot.lane.b32.xlu0 %v11012_v43, %s7838_s17 }
 0xd84   : > { %2545 = vrot.lane.b32.xlu1 %v11015_v57, %s7837_s24 }
 0xd85   : > { %3752 = vrot.lane.b32.xlu0 %v3442_v59, %s7837_s24 }
 0xd88   : > { %2557 = vrot.lane.b32.xlu1 %v11018_v12, %s7836_s21  ;;  %v11023_v12 = vld [vmem:[#allocation29_spill] sm:$0xff] }
 0xd8c   : > { %3742 = vrot.lane.b32.xlu1 %v11019_v56, %s7838_s17  ;;  %v1639_v56 = vpack.c.bf16 %v11023_v12, %v11022_v5 }
 0xd90   : > { %3754 = vrot.lane.b32.xlu1 %v3443_v42, %s7837_s24 }
 0xdd0   : > { %v3607_v37 = vpop.xlane.xlu0 %3606 }
 0xdd4   : > { %v3610_v51 = vpop.xlane.xlu1 %3609  ;;  %v3601_v4 = vpop.xlane.xlu0 %3600 }
 0xdd5   : > { %7575 = vrcp.f32 %v3601_v4 }
 0xdd8   : > { %v3604_v61 = vpop.xlane.xlu1 %3603  ;;  %v3646_v7 = vpop.permute.xlu0 %3645 }
 0xdd9   : > { %7577 = vrcp.f32 %v3604_v61 }
 0xdda   : > { %7579 = vrcp.f32 %v3610_v51  ;;  %v11025_v51 = vld [vmem:[#allocation22_spill] sm:$0xff] }
 0xddb   : > { %7581 = vrcp.f32 %v3607_v37  ;;  %v11024_v37 = vld [vmem:[#allocation24_spill] sm:$0xff] }
 0xddc   : > { %v3619_v17 = vpop.xlane.xlu1 %3618  ;;  %v3644_v23 = vpop.permute.xlu0 %3643  ;;  %v11026_v4 = vpack.c.bf16 %v11024_v37, %v11025_v51 }
 0xde0   : > { %v3613_v34 = vpop.xlane.xlu1 %3612  ;;  %v2528_v58 = vpop.permute.xlu0 %2527 }
 0xde1   : > { %7583 = vrcp.f32 %v3613_v34 }
 0xde2   : > { %v7576_v8 = vpop.eup %7575 }
 0xde3   : > { %v3631_v50 = vmul.f32 %v7576_v8, %v7562_v45 }
 0xde4   : > { %v3622_v59 = vpop.xlane.xlu1 %3621  ;;  %v2540_v27 = vpop.permute.xlu0 %2539 }
 0xde6   : > { %v7578_v15 = vpop.eup %7577 }
 0xde7   : > { %v3632_v22 = vmul.f32 %v7578_v15, %v7566_v26  ;;  %v7580_v6 = vpop.eup %7579 }
 0xde8   : > { %v3616_v49 = vpop.xlane.xlu1 %3615  ;;  %v7582_v32 = vpop.eup %7581  ;;  %v3634_v19 = vmul.f32 %v7580_v6, %v9413_v18 }
 0xde9   : > { %v3639_v29 = vpack.c.bf16 %v3632_v22, %v3631_v50  ;;  %7585 = vrcp.f32 %v3616_v49  ;;  %v3633_v47 = vmul.f32 %v7582_v32, %v9409_v35  ;;  %v2552_v1 = vpop.permute.xlu0 %2551  ;;  %v11027_v49 = vld [vmem:[#allocation28_spill] sm:$0xff] }
 0xdea   : > { %7587 = vrcp.f32 %v3622_v59 }
 0xdeb   : > { %7082 = vmatprep.mubr.msk.bf16.mxu0 %vm1467_vm1, %v3639_v29  ;;  %7589 = vrcp.f32 %v3619_v17  ;;  %v3640_v46 = vpack.c.bf16 %v3634_v19, %v3633_v47  ;;  %v11028_v29 = vld [vmem:[#allocation26_spill] sm:$0xff] }
 0xdec   : > { %v3648_v42 = vpop.permute.xlu1 %3647 }
 0xded   : > { %7076 = vmatprep.subr.bf16.mxu0 %v3648_v42  ;;  %v2532_v40 = vpop.permute.xlu0 %2531 }
 0xdee   : > { %7077 = vmatpush3.bf16.msra.mxu0 %v3648_v42  ;;  %v7584_v45 = vpop.eup %7583  ;;  %v2567_v34 = vsel %vm1377_vm0, %v1639_v56, %v2532_v40  ;;  %v7768_v56 = vld [vmem:[#allocation2 + $0x48] sm:$0xff] }
 0xdef   : > { %7078 = vmatprep.subr.bf16.mxu0 %v3646_v7  ;;  %v3635_v30 = vmul.f32 %v7584_v45, %v9423_v3  ;;  %v1637_v3 = vpack.c.bf16 %v11021_v16, %v11020_v28 }
 0xdf0   : > { %v2530_v52 = vpop.permute.xlu1 %2529 }
 0xdf1   : > { %v2561_v21 = vsel %vm1377_vm0, %v1637_v3, %v2528_v58  ;;  %v2544_v57 = vpop.permute.xlu0 %2543  ;;  %v2564_v61 = vsel %vm1377_vm0, %v11026_v4, %v2530_v52  ;;  %v7769_v4 = vld [vmem:[#allocation2 + $0x50] sm:$0xff] }
 0xdf2   : > { %7079 = vmatpush3.bf16.msra.mxu0 %v3646_v7  ;;  %v2576_v15 = vsel %vm1467_vm1, %v2567_v34, %v2544_v57 }
 0xdf3   : > { %7080 = vmatprep.subr.bf16.mxu0 %v3644_v23 }
 0xdf4   : > { %v2542_v53 = vpop.permute.xlu1 %2541 }
 0xdf5   : > { %v2556_v17 = vpop.permute.xlu0 %2555  ;;  %v2574_v8 = vsel %vm1467_vm1, %v2564_v61, %v2542_v53 }
 0xdf6   : > { %v7586_v26 = vpop.eup %7585  ;;  %7081 = vmatpush3.bf16.msra.mxu0 %v3644_v23  ;;  %v2587_v50 = vsel %vm2579_vm2, %v2576_v15, %v2556_v17  ;;  %v11029_v23 = vpack.c.bf16 %v11027_v49, %v11028_v29  ;;  %v7770_v17 = vld [vmem:[#allocation2 + $0x8] sm:$0xff] }
 0xdf7   : > { %7090 = vmatprep.subr.bf16.mxu0 %v7215_v10  ;;  %v3636_v20 = vmul.f32 %v7586_v26, %v9431_v24  ;;  %v7588_v55 = vpop.eup %7587  ;;  %v11046_v49 = vld [vmem:[#allocation15_spill] sm:$0xff] }
 0xdf8   : > { %v7590_v33 = vpop.eup %7589  ;;  %v3638_v35 = vmul.f32 %v7588_v55, %v9427_v39  ;;  %v2572_v39 = vsel %vm1467_vm1, %v2561_v21, %v2540_v27  ;;  %v2554_v43 = vpop.permute.xlu1 %2553 }
 0xdf9   : > { %7083 = vmatmul.mubr.msk.bf16.vlgmr.msra.gmra.mxu0 %vm1467_vm1, %v3640_v46  ;;  %v3641_v18 = vpack.c.bf16 %v3636_v20, %v3635_v30  ;;  %v3637_v24 = vmul.f32 %v7590_v33, %v9419_v13  ;;  %v2581_v36 = vsel %vm2579_vm2, %v2572_v39, %v2552_v1  ;;  %v7219_v13 = vld [vmem:[%s7956_s23 + $0x18] sm:$0xff]   ;;  %v2584_v7 = vsel %vm2579_vm2, %v2574_v8, %v2554_v43  ;;  %v11034_v33 = vld [vmem:[#allocation11_spill] sm:$0xff] }
 0xdfa   : > { %7091 = vmatpush3.bf16.msra.mxu0 %v7215_v10  ;;  %v11030_v20 = vld [vmem:[#allocation21_spill] sm:$0xff] }
 0xdfb   : > { %7086 = vmatprep.mubr.msk.bf16.mxu0 %vm1467_vm1, %v3641_v18  ;;  %7092 = vmatprep.subr.bf16.mxu0 %v7216_v31  ;;  %v3642_v14 = vpack.c.bf16 %v3638_v35, %v3637_v24  ;;  %v11033_v18 = vld [vmem:[#allocation9_spill] sm:$0xff] }
 0xdfc   : > { %v2534_v62 = vpop.permute.xlu1 %2533  ;;  %v11035_v35 = vpack.c.bf16 %v11033_v18, %v11034_v33 }
 0xdfd   : > { %v2570_v42 = vsel %vm1377_vm0, %v11029_v23, %v2534_v62  ;;  %v7767_v62 = vld [vmem:[#allocation2 + $0x18] sm:$0xff] }
 0xdfe   : > { %7093 = vmatpush3.bf16.msra.mxu0 %v7216_v31  ;;  %v11031_v31 = vld [vmem:[#allocation12_spill] sm:$0xff] }
 0xdff   : > { %7094 = vmatprep.subr.bf16.mxu0 %v7217_v38  ;;  %v11032_v55 = vpack.c.bf16 %v11030_v20, %v11031_v31 }
 0xe00   : > { %v2546_v59 = vpop.permute.xlu1 %2545 }
 0xe01   : > { %7087 = vmatmul.mubr.msk.bf16.gmra.mxu0 %vm1467_vm1, %v3642_v14  ;;  %v2578_v6 = vsel %vm1467_vm1, %v2570_v42, %v2546_v59  ;;  %v3741_v59 = vpop.permute.xlu0 %3740 }
 0xe02   : > { %7095 = vmatpush3.bf16.msra.mxu0 %v7217_v38  ;;  %7106 = vmatprep.mubr.bf16.mxu0 %v2581_v36  ;;  %v7764_v36 = vld [vmem:[#allocation2] sm:$0xff] }
 0xe03   : > { %7096 = vmatprep.subr.bf16.mxu0 %v7218_v0 }
 0xe04   : > { %v2558_v22 = vpop.permute.xlu1 %2557 }
 0xe05   : > { %v2590_v32 = vsel %vm2579_vm2, %v2578_v6, %v2558_v22  ;;  %v11045_v22 = vld [vmem:[#allocation14_spill] sm:$0xff]  ;;  %v11048_v6 = vld [vmem:[#allocation19_spill] sm:$0xff] }
 0xe06   : > { %7097 = vmatpush3.bf16.msra.mxu0 %v7218_v0  ;;  %v11047_v29 = vpack.c.bf16 %v11045_v22, %v11046_v49 }
 0xe07   : > { %7098 = vmatprep.subr.bf16.mxu0 %v7219_v13 }
 0xe08   : > { %v3743_v8 = vpop.permute.xlu1 %3742  ;;  %v3774_v23 = vsel %vm1377_vm0, %v11047_v29, %v3741_v59 }
 0xe0a   : > { %7099 = vmatpush3.bf16.msra.mxu0 %v7219_v13 }
 0xe0b   : > { %7100 = vmatprep.subr.bf16.mxu0 %v7220_v11 }
 0xe0c   : > { %v3755_v15 = vpop.permute.xlu1 %3754 }
 0xe0e   : > { %7101 = vmatpush3.bf16.msra.mxu0 %v7220_v11  ;;  %v7765_v11 = vld [vmem:[#allocation2 + $0x58] sm:$0xff] }
 0xe0f   : > { %7102 = vmatprep.subr.bf16.mxu0 %v7221_v44 }
 0xe12   : > { %7103 = vmatpush3.bf16.msra.mxu0 %v7221_v44 }
 0xe13   : > { %7104 = vmatprep.subr.bf16.mxu0 %v7222_v2 }
 0xe16   : > { %7105 = vmatpush3.bf16.msra.mxu0 %v7222_v2  ;;  %v7766_v2 = vld [vmem:[#allocation2 + $0x68] sm:$0xff] }
 0xe19   : > { %7107 = vmatmul.mubr.bf16.vlgmr.msra.gmra.mxu0 %v2584_v7  ;;  %v3753_v7 = vpop.permute.xlu0 %3752 }
 0xe1a   : > { %7110 = vmatprep.mubr.bf16.mxu0 %v2587_v50  ;;  %v3785_v42 = vsel %vm1467_vm1, %v3774_v23, %v3753_v7  ;;  %v7775_v23 = vld [vmem:[#allocation2 + $0x60] sm:$0xff] }
 0xe21   : > { %7111 = vmatmul.mubr.bf16.gmra.mxu0 %v2590_v32  ;;  %v11049_v32 = vld [vmem:[#allocation13_spill] sm:$0xff] }
 0xeb9   : > { %v7084_v58 = vpop.f32.mrf.mxu0 }
 0xebb   : > { %v3701_v19 = vpop.f32.mrf.mxu0 }
 0xebd   : > { %v7085_v10 = vpop.f32.mrf.mxu0 }
 0xebe   : > { %v3733_v45 = vpack.c.bf16 %v7085_v10, %v7084_v58  ;;  %v11050_v58 = vpack.c.bf16 %v11048_v6, %v11049_v32 }
 0xebf   : > { %v3704_v47 = vpop.f32.mrf.mxu0 }
 0xec0   : > { %v3732_v26 = vpack.c.bf16 %v3704_v47, %v3701_v19  ;;  %3766 = vrot.lane.b32.xlu1 %v3733_v45, %s7836_s21  ;;  %v3777_v19 = vsel %vm1377_vm0, %v11050_v58, %v3743_v8 }
 0xec1   : > { %v7088_v46 = vpop.f32.mrf.mxu0  ;;  %v3787_v45 = vsel %vm1467_vm1, %v3777_v19, %v3755_v15 }
 0xec2   : > { %3764 = vrot.lane.b32.xlu0 %v3732_v26, %s7836_s21 }
 0xec3   : > { %v3717_v30 = vpop.f32.mrf.mxu0 }
 0xec4   : > { %3746 = vrot.lane.b32.xlu1 %v11032_v55, %s7838_s17  ;;  %v11051_v55 = vld [vmem:[#allocation20_spill] sm:$0xff] }
 0xec5   : > { %v7089_v27 = vpop.f32.mrf.mxu0 }
 0xec6   : > { %3744 = vrot.lane.b32.xlu0 %v11035_v35, %s7838_s17  ;;  %v3735_v28 = vpack.c.bf16 %v7089_v27, %v7088_v46  ;;  %v11052_v27 = vld [vmem:[#allocation17_spill] sm:$0xff] }
 0xec7   : > { %v3720_v38 = vpop.f32.mrf.mxu0  ;;  %v11053_v18 = vpack.c.bf16 %v11051_v55, %v11052_v27 }
 0xec8   : > { %3758 = vrot.lane.b32.xlu1 %v3445_v63, %s7837_s24  ;;  %v3734_v16 = vpack.c.bf16 %v3720_v38, %v3717_v30  ;;  %v11054_v38 = vld [vmem:[#allocation18_spill] sm:$0xff] }
 0xeca   : > { %3756 = vrot.lane.b32.xlu0 %v3444_v54, %s7837_s24  ;;  %v7763_v54 = vld [vmem:[#allocation2 + $0x30] sm:$0xff] }
 0xecc   : > { %3770 = vrot.lane.b32.xlu1 %v3735_v28, %s7836_s21  ;;  %v11055_v28 = vld [vmem:[#allocation16_spill] sm:$0xff] }
 0xece   : > { %3768 = vrot.lane.b32.xlu0 %v3734_v16, %s7836_s21  ;;  %v11056_v16 = vpack.c.bf16 %v11054_v38, %v11055_v28 }
 0xed9   : > { %v7108_v3 = vpop.f32.mrf.mxu0 }
 0xeda   : > { %v3918_v25 = vadd.f32 %v7108_v3, %v9566_v60 }
 0xedb   : > { %v3909_v24 = vpop.f32.mrf.mxu0 }
 0xedc   : > { %v3910_v41 = vadd.f32 %v9566_v60, %v3909_v24  ;;  %v9577_v40 = vadd.f32 %v7765_v11, %v3918_v25 }
 0xedd   : > { %v7109_v1 = vpop.f32.mrf.mxu0 }
 0xede   : > { %v9571_v0 = vadd.f32 %v7763_v54, %v3910_v41  ;;  %11039 = vst [vmem:[#allocation31_spill] sm:$0xff] %v9577_v40  ;;  %v3921_v43 = vadd.f32 %v7109_v1, %v9566_v60 }
 0xedf   : > { %v3912_v21 = vpop.f32.mrf.mxu0 }
 0xee0   : > { %v3913_v63 = vadd.f32 %v9566_v60, %v3912_v21  ;;  %11037 = vst [vmem:[#allocation8_spill] sm:$0xff] %v9571_v0  ;;  %v9585_v5 = vadd.f32 %v7767_v62, %v3921_v43 }
 0xee1   : > { %v7112_v52 = vpop.f32.mrf.mxu0 }
 0xee2   : > { %v9574_v13 = vadd.f32 %v7764_v36, %v3913_v63  ;;  %11041 = vst [vmem:[#allocation33_spill] sm:$0xff] %v9585_v5  ;;  %v3934_v51 = vadd.f32 %v7112_v52, %v9566_v60  ;;  %v7771_v36 = vld [vmem:[#allocation2 + $0x40] sm:$0xff] }
 0xee3   : > { %v3925_v14 = vpop.f32.mrf.mxu0 }
 0xee4   : > { %11038 = vst [vmem:[#allocation10_spill] sm:$0xff] %v9574_v13  ;;  %v3926_v12 = vadd.f32 %v9566_v60, %v3925_v14  ;;  %v9597_v34 = vadd.f32 %v7770_v17, %v3934_v51  ;;  %v7774_v17 = vld [vmem:[#allocation2 + $0x38] sm:$0xff] }
 0xee5   : > { %v7113_v9 = vpop.f32.mrf.mxu0 }
 0xee6   : > { %v3937_v44 = vadd.f32 %v7113_v9, %v9566_v60  ;;  %v9593_v61 = vadd.f32 %v7769_v4, %v3926_v12  ;;  %11044 = vst [vmem:[#allocation7_spill] sm:$0xff] %v9597_v34 }
 0xee7   : > { %v3928_v39 = vpop.f32.mrf.mxu0 }
 0xee8   : > { %v3929_v53 = vadd.f32 %v9566_v60, %v3928_v39  ;;  %v9590_v37 = vadd.f32 %v7768_v56, %v3937_v44  ;;  %11043 = vst [vmem:[#allocation6_spill] sm:$0xff] %v9593_v61  ;;  %v7773_v56 = vld [vmem:[#allocation2 + $0x20] sm:$0xff] }
 0xeea   : > { %v9583_v57 = vadd.f32 %v7766_v2, %v3929_v53  ;;  %11042 = vst [vmem:[#allocation32_spill] sm:$0xff] %v9590_v37  ;;  %v7772_v2 = vld [vmem:[#allocation2 + $0x10] sm:$0xff] }
 0xeec   : > { %11040 = vst [vmem:[#allocation30_spill] sm:$0xff] %v9583_v57 }
 0xeed   : > { %3990 = vadd.xlane.f32.xlu0 %v9571_v0 }
 0xef0   : > { %3992 = vadd.xlane.f32.xlu1 %v9574_v13 }
 0xef1   : > { %3994 = vadd.xlane.f32.xlu0 %v9577_v40 }
 0xef4   : > { %4000 = vadd.xlane.f32.xlu1 %v9583_v57 }
 0xef5   : > { %3996 = vadd.xlane.f32.xlu0 %v9585_v5 }
 0xef8   : > { %4004 = vadd.xlane.f32.xlu1 %v9590_v37 }
 0xef9   : > { %3998 = vadd.xlane.f32.xlu0 %v9593_v61 }
 0xefd   : > { %4002 = vadd.xlane.f32.xlu0 %v9597_v34 }
 0xf32   : > { %v3767_v50 = vpop.permute.xlu1 %3766 }
 0xf33   : > { %v3796_v46 = vsel %vm2579_vm2, %v3787_v45, %v3767_v50 }
 0xf34   : > { %v3765_v10 = vpop.permute.xlu0 %3764 }
 0xf35   : > { %v3793_v47 = vsel %vm2579_vm2, %v3785_v42, %v3765_v10 }
 0xf36   : > { %v3747_v26 = vpop.permute.xlu1 %3746  ;;  %7114 = vmatprep.mubr.bf16.mxu0 %v3793_v47  ;;  %v7776_v47 = vld [vmem:[#allocation2 + $0x78] sm:$0xff] }
 0xf37   : > { %7115 = vmatmul.mubr.bf16.gmra.mxu0 %v3796_v46  ;;  %v3783_v3 = vsel %vm1377_vm0, %v11056_v16, %v3747_v26 }
 0xf38   : > { %v3745_v30 = vpop.permute.xlu0 %3744 }
 0xf39   : > { %v3780_v33 = vsel %vm1377_vm0, %v11053_v18, %v3745_v30  ;;  %v7777_v30 = vld [vmem:[#allocation2 + $0x70] sm:$0xff] }
 0xf3a   : > { %v3759_v20 = vpop.permute.xlu1 %3758 }
 0xf3b   : > { %v3791_v21 = vsel %vm1467_vm1, %v3783_v3, %v3759_v20 }
 0xf3c   : > { %v3757_v31 = vpop.permute.xlu0 %3756 }
 0xf3d   : > { %v3789_v24 = vsel %vm1467_vm1, %v3780_v33, %v3757_v31 }
 0xf3e   : > { %v3771_v35 = vpop.permute.xlu1 %3770 }
 0xf3f   : > { %v3802_v14 = vsel %vm2579_vm2, %v3791_v21, %v3771_v35 }
 0xf40   : > { %v3769_v1 = vpop.permute.xlu0 %3768 }
 0xf41   : > { %v3799_v52 = vsel %vm2579_vm2, %v3789_v24, %v3769_v1 }
 0xf42   : > { %7118 = vmatprep.mubr.bf16.mxu0 %v3799_v52 }
 0xf43   : > { %7119 = vmatmul.mubr.bf16.gmra.mxu0 %v3802_v14 }
 0xf44   : > { %4577 = vmatprep.mubr.bf16.mxu0 %v11003_v48 }
 0xf76   : > { %v3991_v9 = vpop.xlane.xlu0 %3990 }
 0xf77   : > { %v4022_v50 = vmul.f32 0.0078125, %v3991_v9 }
 0xf79   : > { %v3993_v49 = vpop.xlane.xlu1 %3992  ;;  %v9648_v58 = vsub.f32 %v9571_v0, %v4022_v50  ;;  %v7240_v50 = vld [vmem:[%s7979_s5 + $0xac] ss:$16 sps:$4 sm:$0xff]  }
 0xf7a   : > { %v3995_v44 = vpop.xlane.xlu0 %3994  ;;  %v4023_v19 = vmul.f32 0.0078125, %v3993_v49  ;;  %v7238_v49 = vld [vmem:[%s7979_s5 + $0xa8] ss:$16 sps:$4 sm:$0xff]  }
 0xf7b   : > { %v4024_v45 = vmul.f32 0.0078125, %v3995_v44  ;;  %v4054_v27 = vmul.f32 %v9648_v58, %v9648_v58 }
 0xf7c   : > { %v9658_v31 = vsub.f32 %v9574_v13, %v4023_v19  ;;  %v7249_v19 = vld [vmem:[%s7979_s5 + $0x64] ss:$16 sps:$4 sm:$0xff]  }
 0xf7d   : > { %v4001_v55 = vpop.xlane.xlu1 %4000  ;;  %v9663_v18 = vsub.f32 %v9577_v40, %v4024_v45  ;;  %v7247_v45 = vld [vmem:[%s7979_s5 + $0x60] ss:$16 sps:$4 sm:$0xff]  }
 0xf7e   : > { %v3997_v59 = vpop.xlane.xlu0 %3996  ;;  %v4027_v16 = vmul.f32 0.0078125, %v4001_v55  ;;  %v4055_v3 = vmul.f32 %v9658_v31, %v9658_v31  ;;  %v7253_v55 = vld [vmem:[%s7979_s5 + $0x40] ss:$16 sps:$4 sm:$0xff]  }
 0xf7f   : > { %v4025_v33 = vmul.f32 0.0078125, %v3997_v59  ;;  %v4056_v52 = vmul.f32 %v9663_v18, %v9663_v18  ;;  %v7232_v59 = vld [vmem:[%s7979_s5 + $0xc8] ss:$16 sps:$4 sm:$0xff]  }
 0xf81   : > { %v9671_v24 = vsub.f32 %v9585_v5, %v4025_v33  ;;  %v4005_v14 = vpop.xlane.xlu1 %4004  ;;  %v7261_v33 = vld [vmem:[%s7979_s5 + $0x24] ss:$16 sps:$4 sm:$0xff]  }
 0xf82   : > { %v3999_v10 = vpop.xlane.xlu0 %3998  ;;  %v4029_v9 = vmul.f32 0.0078125, %v4005_v14 }
 0xf83   : > { %v4026_v35 = vmul.f32 0.0078125, %v3999_v10  ;;  %v7252_v10 = vld [vmem:[%s7979_s5 + $0x6c] ss:$16 sps:$4 sm:$0xff]  }
 0xf84   : > { %v9693_v44 = vsub.f32 %v9590_v37, %v4029_v9 }
 0xf85   : > { %v9674_v1 = vsub.f32 %v9593_v61, %v4026_v35  ;;  %v7264_v35 = vld [vmem:[%s7979_s5 + $0x2c] ss:$16 sps:$4 sm:$0xff]  }
 0xf86   : > { %v4003_v28 = vpop.xlane.xlu0 %4002 }
 0xf87   : > { %v4028_v21 = vmul.f32 0.0078125, %v4003_v28  ;;  %v7262_v28 = vld [vmem:[%s7979_s5 + $0x28] ss:$16 sps:$4 sm:$0xff]  }
 0xff7   : > { %v7116_v41 = vpop.f32.mrf.mxu0 }
 0xff8   : > { %v3950_v39 = vadd.f32 %v7116_v41, %v9566_v60  ;;  %v9679_v41 = vsub.f32 %v9583_v57, %v4027_v16  ;;  %v7267_v16 = vld [vmem:[%s7979_s5 + $0x4] ss:$16 sps:$4 sm:$0xff]  }
 0xff9   : > { %v3941_v63 = vpop.f32.mrf.mxu0 }
 0xffa   : > { %v3942_v25 = vadd.f32 %v9566_v60, %v3941_v63  ;;  %v9631_v62 = vadd.f32 %v7772_v2, %v3950_v39  ;;  %v9682_v63 = vsub.f32 %v9597_v34, %v4028_v21  ;;  %v7225_v39 = vld [vmem:[%s7979_s5 + $0xe4] ss:$16 sps:$4 sm:$0xff]   ;;  %v4059_v2 = vmul.f32 %v9679_v41, %v9679_v41  ;;  %v7265_v21 = vld [vmem:[%s7979_s5] ss:$16 sps:$4 sm:$0xff]  }
 0xffb   : > { %v7117_v54 = vpop.f32.mrf.mxu0  ;;  %4432 = vmatprep.subr.bf16.mxu1 %v7225_v39 }
 0xffc   : > { %v9627_v53 = vadd.f32 %v7771_v36, %v3942_v25  ;;  %11058 = vst [vmem:[#allocation25_spill] sm:$0xff] %v9631_v62  ;;  %v3953_v12 = vadd.f32 %v7117_v54, %v9566_v60  ;;  %v4057_v25 = vmul.f32 %v9671_v24, %v9671_v24  ;;  %v4058_v54 = vmul.f32 %v9674_v1, %v9674_v1  ;;  %v7228_v36 = vld [vmem:[%s7979_s5 + $0xec] ss:$16 sps:$4 sm:$0xff]  }
 0xffd   : > { %v3944_v11 = vpop.f32.mrf.mxu0  ;;  %4545 = vmatprep.subr.bf16.mxu0 %v7228_v36 }
 0xffe   : > { %11057 = vst [vmem:[#allocation23_spill] sm:$0xff] %v9627_v53  ;;  %v3945_v43 = vadd.f32 %v9566_v60, %v3944_v11  ;;  %4006 = vadd.xlane.f32.xlu0 %v9627_v53  ;;  %v9638_v8 = vadd.f32 %v7774_v17, %v3953_v12  ;;  %v7223_v11 = vld [vmem:[%s7979_s5 + $0xe0] ss:$16 sps:$4 sm:$0xff]   ;;  %v4060_v12 = vmul.f32 %v9682_v63, %v9682_v63 }
 0xfff   : > { %4433 = vmatpush1.bf16.msra.mxu1 %v7223_v11  ;;  %v7229_v17 = vld [vmem:[%s7979_s5 + $0xc0] ss:$16 sps:$4 sm:$0xff]  }
0x1000   : > { %v9634_v51 = vadd.f32 %v7773_v56, %v3945_v43  ;;  %11060 = vst [vmem:[#allocation29_spill] sm:$0xff] %v9638_v8  ;;  %v7226_v43 = vld [vmem:[%s7979_s5 + $0xe8] ss:$16 sps:$4 sm:$0xff]   ;;  %v7231_v56 = vld [vmem:[%s7979_s5 + $0xc4] ss:$16 sps:$4 sm:$0xff]  }
0x1001   : > { %4546 = vmatpush1.bf16.msra.mxu0 %v7226_v43  ;;  %4434 = vmatprep.subr.bf16.mxu1 %v7231_v56 }
0x1002   : > { %11059 = vst [vmem:[#allocation27_spill] sm:$0xff] %v9634_v51  ;;  %4008 = vadd.xlane.f32.xlu1 %v9634_v51  ;;  %4010 = vadd.xlane.f32.xlu0 %v9631_v62 }
0x1003   : > { %v7120_v4 = vpop.f32.mrf.mxu0  ;;  %4435 = vmatpush1.bf16.msra.mxu1 %v7229_v17 }
0x1004   : > { %v3966_v29 = vadd.f32 %v7120_v4, %v9566_v60  ;;  %v7234_v4 = vld [vmem:[%s7979_s5 + $0xcc] ss:$16 sps:$4 sm:$0xff]  }
0x1005   : > { %v3957_v15 = vpop.f32.mrf.mxu0  ;;  %4547 = vmatprep.subr.bf16.mxu0 %v7234_v4 }
0x1006   : > { %v3958_v7 = vadd.f32 %v9566_v60, %v3957_v15  ;;  %4012 = vadd.xlane.f32.xlu1 %v9638_v8  ;;  %v9650_v26 = vadd.f32 %v7776_v47, %v3966_v29  ;;  %v4061_v15 = vmul.f32 %v9693_v44, %v9693_v44  ;;  %4548 = vmatpush1.bf16.msra.mxu0 %v7232_v59  ;;  %v7243_v29 = vld [vmem:[%s7979_s5 + $0x84] ss:$16 sps:$4 sm:$0xff]   ;;  %v7250_v47 = vld [vmem:[%s7979_s5 + $0x68] ss:$16 sps:$4 sm:$0xff]  }
0x1007   : > { %v7121_v22 = vpop.f32.mrf.mxu0  ;;  %4549 = vmatprep.subr.bf16.mxu0 %v7240_v50 }
0x1008   : > { %v9643_v42 = vadd.f32 %v7775_v23, %v3958_v7  ;;  %11062 = vst [vmem:[#allocation22_spill] sm:$0xff] %v9650_v26  ;;  %v3969_v46 = vadd.f32 %v7121_v22, %v9566_v60  ;;  %v7237_v7 = vld [vmem:[%s7979_s5 + $0xa4] ss:$16 sps:$4 sm:$0xff]   ;;  %v7235_v22 = vld [vmem:[%s7979_s5 + $0xa0] ss:$16 sps:$4 sm:$0xff]  }
0x1009   : > { %v3960_v6 = vpop.f32.mrf.mxu0  ;;  %4436 = vmatprep.subr.bf16.mxu1 %v7237_v7  ;;  %v7246_v23 = vld [vmem:[%s7979_s5 + $0x8c] ss:$16 sps:$4 sm:$0xff]  }
0x100a   : > { %11061 = vst [vmem:[#allocation24_spill] sm:$0xff] %v9643_v42  ;;  %v3961_v32 = vadd.f32 %v9566_v60, %v3960_v6  ;;  %4014 = vadd.xlane.f32.xlu0 %v9643_v42  ;;  %v7778_v60 = vld [vmem:[#allocation2 + $0x28] sm:$0xff]  ;;  %4437 = vmatpush1.bf16.msra.mxu1 %v7235_v22  ;;  %v7241_v6 = vld [vmem:[%s7979_s5 + $0x80] ss:$16 sps:$4 sm:$0xff]  }
0x100b   : > { %v9665_v38 = vadd.f32 %v7778_v60, %v3969_v46  ;;  %4550 = vmatpush1.bf16.msra.mxu0 %v7238_v49  ;;  %4438 = vmatprep.subr.bf16.mxu1 %v7243_v29  ;;  %v7255_v46 = vld [vmem:[%s7979_s5 + $0x44] ss:$16 sps:$4 sm:$0xff]   ;;  %v7259_v60 = vld [vmem:[%s7979_s5 + $0x20] ss:$16 sps:$4 sm:$0xff]  }
0x100c   : > { %v9653_v20 = vadd.f32 %v7777_v30, %v3961_v32  ;;  %v7244_v32 = vld [vmem:[%s7979_s5 + $0x88] ss:$16 sps:$4 sm:$0xff]   ;;  %4551 = vmatprep.subr.bf16.mxu0 %v7246_v23  ;;  %v7258_v30 = vld [vmem:[%s7979_s5 + $0x4c] ss:$16 sps:$4 sm:$0xff]  }
0x100d   : > { %11064 = vst [vmem:[#allocation26_spill] sm:$0xff] %v9665_v38 }
0x100e   : > { %11063 = vst [vmem:[#allocation28_spill] sm:$0xff] %v9653_v20  ;;  %4016 = vadd.xlane.f32.xlu1 %v9653_v20  ;;  %4018 = vadd.xlane.f32.xlu0 %v9650_v26 }
0x100f   : > { %4439 = vmatpush1.bf16.msra.mxu1 %v7241_v6  ;;  %4552 = vmatpush1.bf16.msra.mxu0 %v7244_v32 }
0x1010   : > { %4440 = vmatprep.subr.bf16.mxu1 %v7249_v19  ;;  %4553 = vmatprep.subr.bf16.mxu0 %v7252_v10 }
0x1012   : > { %4020 = vadd.xlane.f32.xlu1 %v9665_v38  ;;  %4070 = vadd.xlane.f32.xlu0 %v4054_v27  ;;  %v7256_v27 = vld [vmem:[%s7979_s5 + $0x48] ss:$16 sps:$4 sm:$0xff]  }
0x1013   : > { %4441 = vmatpush1.bf16.msra.mxu1 %v7247_v45  ;;  %4554 = vmatpush1.bf16.msra.mxu0 %v7250_v47 }
0x1014   : > { %4442 = vmatprep.subr.bf16.mxu1 %v7255_v46  ;;  %4555 = vmatprep.subr.bf16.mxu0 %v7258_v30 }
0x1016   : > { %4072 = vadd.xlane.f32.xlu1 %v4055_v3  ;;  %4074 = vadd.xlane.f32.xlu0 %v4056_v52  ;;  %v7270_v3 = vld [vmem:[%s7979_s5 + $0xc] ss:$16 sps:$4 sm:$0xff]   ;;  %v7268_v52 = vld [vmem:[%s7979_s5 + $0x8] ss:$16 sps:$4 sm:$0xff]  }
0x1017   : > { %4443 = vmatpush1.bf16.msra.mxu1 %v7253_v55  ;;  %4556 = vmatpush1.bf16.msra.mxu0 %v7256_v27 }
0x1018   : > { %4444 = vmatprep.subr.bf16.mxu1 %v7261_v33  ;;  %4557 = vmatprep.subr.bf16.mxu0 %v7264_v35 }
0x101a   : > { %4076 = vadd.xlane.f32.xlu1 %v4057_v25  ;;  %4078 = vadd.xlane.f32.xlu0 %v4058_v54 }
0x101b   : > { %4445 = vmatpush1.bf16.msra.mxu1 %v7259_v60  ;;  %4558 = vmatpush1.bf16.msra.mxu0 %v7262_v28 }
0x101c   : > { %4446 = vmatprep.subr.bf16.mxu1 %v7267_v16  ;;  %4559 = vmatprep.subr.bf16.mxu0 %v7270_v3 }
0x101e   : > { %4080 = vadd.xlane.f32.xlu1 %v4059_v2  ;;  %4082 = vadd.xlane.f32.xlu0 %v4060_v12 }
0x101f   : > { %4447 = vmatpush1.bf16.msra.mxu1 %v7265_v21  ;;  %4560 = vmatpush1.bf16.msra.mxu0 %v7268_v52 }
0x1022   : > { %4084 = vadd.xlane.f32.xlu1 %v4061_v15 }
0x1087   : > { %v4007_v14 = vpop.xlane.xlu0 %4006 }
0x1088   : > { %v4030_v9 = vmul.f32 0.0078125, %v4007_v14 }
0x108a   : > { %v9730_v25 = vsub.f32 %v9627_v53, %v4030_v9 }
0x108b   : > { %v4009_v54 = vpop.xlane.xlu1 %4008  ;;  %v4011_v39 = vpop.xlane.xlu0 %4010 }
0x108c   : > { %v4031_v36 = vmul.f32 0.0078125, %v4009_v54  ;;  %v4032_v11 = vmul.f32 0.0078125, %v4011_v39  ;;  %v4062_v43 = vmul.f32 %v9730_v25, %v9730_v25 }
0x108e   : > { %v9735_v2 = vsub.f32 %v9634_v51, %v4031_v36  ;;  %v9738_v12 = vsub.f32 %v9631_v62, %v4032_v11  ;;  %4086 = vadd.xlane.f32.xlu0 %v4062_v43 }
0x108f   : > { %v4013_v56 = vpop.xlane.xlu1 %4012 }
0x1090   : > { %v4033_v4 = vmul.f32 0.0078125, %v4013_v56  ;;  %v4063_v17 = vmul.f32 %v9735_v2, %v9735_v2  ;;  %v4064_v59 = vmul.f32 %v9738_v12, %v9738_v12 }
0x1092   : > { %v9745_v15 = vsub.f32 %v9638_v8, %v4033_v4  ;;  %4088 = vadd.xlane.f32.xlu1 %v4063_v17  ;;  %4090 = vadd.xlane.f32.xlu0 %v4064_v59 }
0x1093   : > { %v4015_v7 = vpop.xlane.xlu0 %4014 }
0x1094   : > { %v4034_v50 = vmul.f32 0.0078125, %v4015_v7  ;;  %v4065_v22 = vmul.f32 %v9745_v15, %v9745_v15 }
0x1096   : > { %v9750_v49 = vsub.f32 %v9643_v42, %v4034_v50  ;;  %4092 = vadd.xlane.f32.xlu1 %v4065_v22 }
0x1097   : > { %v4017_v29 = vpop.xlane.xlu1 %4016  ;;  %v4019_v23 = vpop.xlane.xlu0 %4018 }
0x1098   : > { %v4035_v6 = vmul.f32 0.0078125, %v4017_v29  ;;  %v4036_v32 = vmul.f32 0.0078125, %v4019_v23  ;;  %v4066_v19 = vmul.f32 %v9750_v49, %v9750_v49 }
0x109a   : > { %v9755_v10 = vsub.f32 %v9653_v20, %v4035_v6  ;;  %v9758_v45 = vsub.f32 %v9650_v26, %v4036_v32  ;;  %4094 = vadd.xlane.f32.xlu0 %v4066_v19  ;;  %v9775_v32 = vld [vmem:[%s664_s26] ss:$0 sm:$0xff] }
0x109b   : > { %v4021_v47 = vpop.xlane.xlu1 %4020  ;;  %v4071_v46 = vpop.xlane.xlu0 %4070 }
0x109c   : > { %v4037_v30 = vmul.f32 0.0078125, %v4021_v47  ;;  %v4102_v55 = vmul.f32 0.0078125, %v4071_v46  ;;  %v4067_v27 = vmul.f32 %v9755_v10, %v9755_v10  ;;  %v4068_v33 = vmul.f32 %v9758_v45, %v9758_v45 }
0x109e   : > { %v9765_v35 = vsub.f32 %v9665_v38, %v4037_v30  ;;  %v4118_v60 = vadd.f32 1e-05, %v4102_v55  ;;  %4096 = vadd.xlane.f32.xlu1 %v4067_v27  ;;  %4098 = vadd.xlane.f32.xlu0 %v4068_v33 }
0x109f   : > { %v4073_v28 = vpop.xlane.xlu1 %4072  ;;  %v4075_v16 = vpop.xlane.xlu0 %4074 }
0x10a0   : > { %7591 = vrsqrt.f32 %v4118_v60  ;;  %v4103_v3 = vmul.f32 0.0078125, %v4073_v28  ;;  %v4104_v21 = vmul.f32 0.0078125, %v4075_v16  ;;  %v4069_v52 = vmul.f32 %v9765_v35, %v9765_v35 }
0x10a2   : > { %v4119_v14 = vadd.f32 1e-05, %v4103_v3  ;;  %v4120_v9 = vadd.f32 1e-05, %v4104_v21  ;;  %4100 = vadd.xlane.f32.xlu1 %v4069_v52 }
0x10a3   : > { %v4077_v54 = vpop.xlane.xlu1 %4076  ;;  %v4079_v39 = vpop.xlane.xlu0 %4078 }
0x10a4   : > { %7593 = vrsqrt.f32 %v4119_v14  ;;  %v4105_v36 = vmul.f32 0.0078125, %v4077_v54  ;;  %v4106_v43 = vmul.f32 0.0078125, %v4079_v39 }
0x10a5   : > { %7595 = vrsqrt.f32 %v4120_v9 }
0x10a6   : > { %v4121_v11 = vadd.f32 1e-05, %v4105_v36  ;;  %v4122_v17 = vadd.f32 1e-05, %v4106_v43 }
0x10a7   : > { %v4081_v56 = vpop.xlane.xlu1 %4080  ;;  %v4083_v7 = vpop.xlane.xlu0 %4082 }
0x10a8   : > { %7597 = vrsqrt.f32 %v4121_v11  ;;  %v4107_v4 = vmul.f32 0.0078125, %v4081_v56  ;;  %v4108_v23 = vmul.f32 0.0078125, %v4083_v7 }
0x10aa   : > { %v4123_v59 = vadd.f32 1e-05, %v4107_v4  ;;  %v4124_v46 = vadd.f32 1e-05, %v4108_v23 }
0x10ab   : > { %v4085_v50 = vpop.xlane.xlu1 %4084 }
0x10ac   : > { %7599 = vrsqrt.f32 %v4123_v59  ;;  %v4109_v22 = vmul.f32 0.0078125, %v4085_v50 }
0x10ad   : > { %v7592_v29 = vpop.eup %7591  ;;  %7601 = vrsqrt.f32 %v4122_v17 }
0x10ae   : > { %v4150_v6 = vmul.f32 %v7592_v29, %v9648_v58  ;;  %v4125_v19 = vadd.f32 1e-05, %v4109_v22  ;;  %v9784_v58 = vld [vmem:[%s11065_s20] ss:$0 sm:$0xff] }
0x10b0   : > { %v4172_v55 = vmul.f32 %v9775_v32, %v4150_v6  ;;  %7603 = vrsqrt.f32 %v4125_v19  ;;  %v7271_v6 = vld [vmem:[%s7990_s13 + $0x78] sm:$0xff]  }
0x10b1   : > { %v7594_v47 = vpop.eup %7593  ;;  %7605 = vrsqrt.f32 %v4124_v46  ;;  %v7272_v19 = vld [vmem:[%s7990_s13 + $0xf8] sm:$0xff]   ;;  %6674 = vmatprep.subr.bf16.mxu1 %v7271_v6 }
0x10b2   : > { %v4151_v30 = vmul.f32 %v7594_v47, %v9658_v31  ;;  %v7596_v27 = vpop.eup %7595  ;;  %v4194_v28 = vadd.f32 %v9784_v58, %v4172_v55  ;;  %v7273_v47 = vld [vmem:[%s7990_s13 + $0x38] sm:$0xff]   ;;  %6738 = vmatprep.subr.bf16.mxu0 %v7272_v19  ;;  %v7276_v55 = vld [vmem:[%s7990_s13 + $0xf0] sm:$0xff]  }
0x10b3   : > { %v4152_v31 = vmul.f32 %v7596_v27, %v9663_v18  ;;  %v7274_v46 = vld [vmem:[%s7990_s13 + $0xb8] sm:$0xff]   ;;  %v7277_v27 = vld [vmem:[%s7990_s13 + $0x30] sm:$0xff]  }
0x10b4   : > { %v4173_v33 = vmul.f32 %v9775_v32, %v4151_v30  ;;  %v7275_v30 = vld [vmem:[%s7990_s13 + $0x70] sm:$0xff]  }
0x10b5   : > { %v7598_v60 = vpop.eup %7597  ;;  %v4174_v9 = vmul.f32 %v9775_v32, %v4152_v31  ;;  %v7282_v31 = vld [vmem:[%s7990_s13 + $0xa8] sm:$0xff]  }
0x10b6   : > { %v4195_v16 = vadd.f32 %v9784_v58, %v4173_v33  ;;  %v4153_v3 = vmul.f32 %v7598_v60, %v9671_v24  ;;  %v7278_v33 = vld [vmem:[%s7990_s13 + $0xb0] sm:$0xff]   ;;  %v7279_v60 = vld [vmem:[%s7990_s13 + $0x68] sm:$0xff]  }
0x10b7   : > { %v4196_v18 = vadd.f32 %v9784_v58, %v4174_v9  ;;  %v7285_v9 = vld [vmem:[%s7990_s13 + $0x20] sm:$0xff]  }
0x10b8   : > { %v4210_v21 = vpack.c.bf16 %v4195_v16, %v4194_v28  ;;  %v4175_v52 = vmul.f32 %v9775_v32, %v4153_v3  ;;  %v7280_v28 = vld [vmem:[%s7990_s13 + $0xe8] sm:$0xff]  }
0x10b9   : > { %v7600_v14 = vpop.eup %7599  ;;  %v7281_v16 = vld [vmem:[%s7990_s13 + $0x28] sm:$0xff]  }
0x10ba   : > { %4465 = vmatmul.mubr.bf16.vlgmr.msra.gmra.mxu1 %v4210_v21  ;;  %4578 = vmatmul.mubr.bf16.vlgmr.msra.gmra.mxu0 %v4210_v21  ;;  %v7602_v54 = vpop.eup %7601  ;;  %v4197_v39 = vadd.f32 %v9784_v58, %v4175_v52  ;;  %v4155_v36 = vmul.f32 %v7600_v14, %v9679_v41  ;;  %v7283_v21 = vld [vmem:[%s7990_s13 + $0x60] sm:$0xff]  }
0x10bb   : > { %4474 = vmatprep.mubr.bf16.mxu1 %v11003_v48  ;;  %4587 = vmatprep.mubr.bf16.mxu0 %v11003_v48  ;;  %v4154_v24 = vmul.f32 %v7602_v54, %v9674_v1  ;;  %v7284_v52 = vld [vmem:[%s7990_s13 + $0xe0] sm:$0xff]  }
0x10bc   : > { %v4211_v11 = vpack.c.bf16 %v4197_v39, %v4196_v18  ;;  %v4177_v43 = vmul.f32 %v9775_v32, %v4155_v36  ;;  %6675 = vmatpush3.bf16.msra.mxu1 %v7273_v47  ;;  %6739 = vmatpush3.bf16.msra.mxu0 %v7274_v46  ;;  %v7286_v54 = vld [vmem:[%s7990_s13 + $0xa0] sm:$0xff]  }
0x10bd   : > { %v7604_v56 = vpop.eup %7603  ;;  %v4176_v17 = vmul.f32 %v9775_v32, %v4154_v24  ;;  %6676 = vmatprep.subr.bf16.mxu1 %v7275_v30  ;;  %6740 = vmatprep.subr.bf16.mxu0 %v7276_v55  ;;  %v7295_v30 = vld [vmem:[%s7990_s13 + $0x48] sm:$0xff]  }
0x10be   : > { %v7606_v4 = vpop.eup %7605  ;;  %v4199_v59 = vadd.f32 %v9784_v58, %v4177_v43  ;;  %v4157_v41 = vmul.f32 %v7604_v56, %v9693_v44  ;;  %v7287_v43 = vld [vmem:[%s7990_s13 + $0x58] sm:$0xff]   ;;  %v7296_v55 = vld [vmem:[%s7990_s13 + $0xc8] sm:$0xff]  }
0x10bf   : > { %v4198_v7 = vadd.f32 %v9784_v58, %v4176_v17  ;;  %v4156_v1 = vmul.f32 %v7606_v4, %v9682_v63  ;;  %v7288_v56 = vld [vmem:[%s7990_s13 + $0xd8] sm:$0xff]  }
0x10c0   : > { %v4179_v22 = vmul.f32 %v9775_v32, %v4157_v41  ;;  %6677 = vmatpush3.bf16.msra.mxu1 %v7277_v27  ;;  %6741 = vmatpush3.bf16.msra.mxu0 %v7278_v33  ;;  %v7289_v4 = vld [vmem:[%s7990_s13 + $0x18] sm:$0xff]   ;;  %v7297_v33 = vld [vmem:[%s7990_s13 + $0x8] sm:$0xff]  }
0x10c1   : > { %v4212_v50 = vpack.c.bf16 %v4199_v59, %v4198_v7  ;;  %v4178_v29 = vmul.f32 %v9775_v32, %v4156_v1  ;;  %6678 = vmatprep.subr.bf16.mxu1 %v7279_v60  ;;  %6742 = vmatprep.subr.bf16.mxu0 %v7280_v28  ;;  %v7290_v17 = vld [vmem:[%s7990_s13 + $0x98] sm:$0xff]   ;;  %v7298_v60 = vld [vmem:[%s7990_s13 + $0x88] sm:$0xff]  }
0x10c2   : > { %4475 = vmatmul.mubr.bf16.gmra.mxu1 %v4211_v11  ;;  %4588 = vmatmul.mubr.bf16.gmra.mxu0 %v4211_v11  ;;  %v4201_v44 = vadd.f32 %v9784_v58, %v4179_v22  ;;  %v7291_v22 = vld [vmem:[%s7990_s13 + $0x50] sm:$0xff]  }
0x10c3   : > { %4484 = vmatprep.mubr.bf16.mxu1 %v11003_v48  ;;  %4597 = vmatprep.mubr.bf16.mxu0 %v11003_v48  ;;  %v4200_v63 = vadd.f32 %v9784_v58, %v4178_v29  ;;  %v7292_v29 = vld [vmem:[%s7990_s13 + $0xd0] sm:$0xff]  }
0x10c4   : > { %6679 = vmatpush3.bf16.msra.mxu1 %v7281_v16  ;;  %6743 = vmatpush3.bf16.msra.mxu0 %v7282_v31 }
0x10c5   : > { %v4213_v23 = vpack.c.bf16 %v4201_v44, %v4200_v63  ;;  %6680 = vmatprep.subr.bf16.mxu1 %v7283_v21  ;;  %6744 = vmatprep.subr.bf16.mxu0 %v7284_v52  ;;  %v7293_v63 = vld [vmem:[%s7990_s13 + $0x10] sm:$0xff]   ;;  %v7299_v52 = vld [vmem:[%s7990_s13 + $0x40] sm:$0xff]  }
0x10c8   : > { %6681 = vmatpush3.bf16.msra.mxu1 %v7285_v9  ;;  %6745 = vmatpush3.bf16.msra.mxu0 %v7286_v54  ;;  %v7301_v54 = vld [vmem:[%s7990_s13] sm:$0xff]  }
0x10c9   : > { %6682 = vmatprep.subr.bf16.mxu1 %v7287_v43  ;;  %6746 = vmatprep.subr.bf16.mxu0 %v7288_v56 }
0x10ca   : > { %4485 = vmatmul.mubr.bf16.gmra.mxu1 %v4212_v50  ;;  %4598 = vmatmul.mubr.bf16.gmra.mxu0 %v4212_v50 }
0x10cb   : > { %4494 = vmatprep.mubr.bf16.mxu1 %v11003_v48  ;;  %4607 = vmatprep.mubr.bf16.mxu0 %v11003_v48 }
0x10cc   : > { %6683 = vmatpush3.bf16.msra.mxu1 %v7289_v4  ;;  %6747 = vmatpush3.bf16.msra.mxu0 %v7290_v17 }
0x10cd   : > { %6684 = vmatprep.subr.bf16.mxu1 %v7291_v22  ;;  %6748 = vmatprep.subr.bf16.mxu0 %v7292_v29 }
0x10d0   : > { %6685 = vmatpush3.bf16.msra.mxu1 %v7293_v63 }
0x10d1   : > { %6686 = vmatprep.subr.bf16.mxu1 %v7295_v30 }
0x10d2   : > { %4495 = vmatmul.mubr.bf16.gmra.mxu1 %v4213_v23  ;;  %4608 = vmatmul.mubr.bf16.gmra.mxu0 %v4213_v23  ;;  %v7294_v23 = vld [vmem:[%s7990_s13 + $0x90] sm:$0xff]  }
0x10d3   : > { %4504 = vmatprep.mubr.bf16.mxu1 %v11003_v48  ;;  %4617 = vmatprep.mubr.bf16.mxu0 %v11003_v48 }
0x10d4   : > { %6749 = vmatpush3.bf16.msra.mxu0 %v7294_v23  ;;  %6687 = vmatpush3.bf16.msra.mxu1 %v7297_v33 }
0x10d5   : > { %6750 = vmatprep.subr.bf16.mxu0 %v7296_v55  ;;  %6688 = vmatprep.subr.bf16.mxu1 %v7299_v52  ;;  %v4250_v52 = vld [vmem:[%s7985_s15] sm:$0xf] }
0x10d8   : > { %6751 = vmatpush3.bf16.msra.mxu0 %v7298_v60  ;;  %6689 = vmatpush3.bf16.msra.mxu1 %v7301_v54 }
0x1117   : > { %v4087_v3 = vpop.xlane.xlu0 %4086 }
0x1118   : > { %v4110_v14 = vmul.f32 0.0078125, %v4087_v3 }
0x111a   : > { %v4126_v39 = vadd.f32 1e-05, %v4110_v14  ;;  %v7300_v14 = vld [vmem:[%s7990_s13 + $0xc0] sm:$0xff]  }
0x111b   : > { %v4089_v36 = vpop.xlane.xlu1 %4088  ;;  %v4091_v18 = vpop.xlane.xlu0 %4090  ;;  %6752 = vmatprep.subr.bf16.mxu0 %v7300_v14 }
0x111c   : > { %7607 = vrsqrt.f32 %v4126_v39  ;;  %v4111_v24 = vmul.f32 0.0078125, %v4089_v36  ;;  %v4112_v11 = vmul.f32 0.0078125, %v4091_v18  ;;  %v7302_v39 = vld [vmem:[%s7990_s13 + $0x80] sm:$0xff]  }
0x111d   : > { %6753 = vmatpush3.bf16.msra.mxu0 %v7302_v39 }
0x111e   : > { %v4127_v59 = vadd.f32 1e-05, %v4111_v24  ;;  %v4128_v41 = vadd.f32 1e-05, %v4112_v11 }
0x111f   : > { %v4093_v7 = vpop.xlane.xlu1 %4092 }
0x1120   : > { %7609 = vrsqrt.f32 %v4127_v59  ;;  %v4113_v1 = vmul.f32 0.0078125, %v4093_v7 }
0x1121   : > { %7611 = vrsqrt.f32 %v4128_v41 }
0x1122   : > { %v4129_v50 = vadd.f32 1e-05, %v4113_v1 }
0x1123   : > { %v4095_v44 = vpop.xlane.xlu0 %4094 }
0x1124   : > { %7613 = vrsqrt.f32 %v4129_v50  ;;  %v4114_v6 = vmul.f32 0.0078125, %v4095_v44 }
0x1126   : > { %v4130_v19 = vadd.f32 1e-05, %v4114_v6 }
0x1127   : > { %v4097_v47 = vpop.xlane.xlu1 %4096  ;;  %v4099_v46 = vpop.xlane.xlu0 %4098 }
0x1128   : > { %v4115_v27 = vmul.f32 0.0078125, %v4097_v47  ;;  %v4116_v16 = vmul.f32 0.0078125, %v4099_v46  ;;  %7615 = vrsqrt.f32 %v4130_v19 }
0x1129   : > { %v7608_v28 = vpop.eup %7607 }
0x112a   : > { %v4131_v31 = vadd.f32 1e-05, %v4115_v27  ;;  %v4158_v3 = vmul.f32 %v7608_v28, %v9730_v25  ;;  %v4132_v18 = vadd.f32 1e-05, %v4116_v16 }
0x112b   : > { %v4101_v21 = vpop.xlane.xlu1 %4100 }
0x112c   : > { %7617 = vrsqrt.f32 %v4131_v31  ;;  %v4117_v9 = vmul.f32 0.0078125, %v4101_v21  ;;  %v4180_v43 = vmul.f32 %v9775_v32, %v4158_v3 }
0x112d   : > { %v7610_v36 = vpop.eup %7609 }
0x112e   : > { %v4133_v24 = vadd.f32 1e-05, %v4117_v9  ;;  %v4159_v11 = vmul.f32 %v7610_v36, %v9735_v2  ;;  %v7612_v25 = vpop.eup %7611  ;;  %v4202_v17 = vadd.f32 %v9784_v58, %v4180_v43 }
0x112f   : > { %v4160_v41 = vmul.f32 %v7612_v25, %v9738_v12 }
0x1130   : > { %7619 = vrsqrt.f32 %v4133_v24  ;;  %v4181_v56 = vmul.f32 %v9775_v32, %v4159_v11 }
0x1131   : > { %v7614_v4 = vpop.eup %7613  ;;  %7621 = vrsqrt.f32 %v4132_v18  ;;  %v4182_v50 = vmul.f32 %v9775_v32, %v4160_v41 }
0x1132   : > { %v4203_v59 = vadd.f32 %v9784_v58, %v4181_v56  ;;  %v4161_v7 = vmul.f32 %v7614_v4, %v9745_v15 }
0x1133   : > { %v4204_v63 = vadd.f32 %v9784_v58, %v4182_v50 }
0x1134   : > { %v4214_v1 = vpack.c.bf16 %v4203_v59, %v4202_v17  ;;  %v4183_v2 = vmul.f32 %v9775_v32, %v4161_v7 }
0x1135   : > { %v7616_v22 = vpop.eup %7615 }
0x1136   : > { %4505 = vmatmul.mubr.bf16.gmra.mxu1 %v4214_v1  ;;  %4618 = vmatmul.mubr.bf16.gmra.mxu0 %v4214_v1  ;;  %v4205_v29 = vadd.f32 %v9784_v58, %v4183_v2  ;;  %v4162_v12 = vmul.f32 %v7616_v22, %v9750_v49 }
0x1137   : > { %4514 = vmatprep.mubr.bf16.mxu1 %v11003_v48  ;;  %4627 = vmatprep.mubr.bf16.mxu0 %v11003_v48 }
0x1138   : > { %v4215_v23 = vpack.c.bf16 %v4205_v29, %v4204_v63  ;;  %v4184_v46 = vmul.f32 %v9775_v32, %v4162_v12 }
0x1139   : > { %v7618_v44 = vpop.eup %7617 }
0x113a   : > { %v4163_v15 = vmul.f32 %v7618_v44, %v9755_v10  ;;  %v4206_v49 = vadd.f32 %v9784_v58, %v4184_v46 }
0x113c   : > { %v4185_v6 = vmul.f32 %v9775_v32, %v4163_v15 }
0x113d   : > { %v7620_v19 = vpop.eup %7619 }
0x113e   : > { %v7622_v47 = vpop.eup %7621  ;;  %4515 = vmatmul.mubr.bf16.gmra.mxu1 %v4215_v23  ;;  %4628 = vmatmul.mubr.bf16.gmra.mxu0 %v4215_v23  ;;  %v4207_v30 = vadd.f32 %v9784_v58, %v4185_v6  ;;  %v4165_v55 = vmul.f32 %v7620_v19, %v9765_v35 }
0x113f   : > { %4524 = vmatprep.mubr.bf16.mxu1 %v11003_v48  ;;  %4637 = vmatprep.mubr.bf16.mxu0 %v11003_v48  ;;  %v4164_v10 = vmul.f32 %v7622_v47, %v9758_v45  ;;  %v4252_v45 = vlaneseq }
0x1140   : > { %v4216_v27 = vpack.c.bf16 %v4207_v30, %v4206_v49  ;;  %v4187_v33 = vmul.f32 %v9775_v32, %v4165_v55 }
0x1141   : > { %v4186_v60 = vmul.f32 %v9775_v32, %v4164_v10  ;;  %v4253_v31 = vshrl.u32 %v4252_v45, 7 }
0x1142   : > { %v4209_v28 = vadd.f32 %v9784_v58, %v4187_v33 }
0x1143   : > { %v4208_v35 = vadd.f32 %v9784_v58, %v4186_v60  ;;  %v4254_v3 = vsub.s32 0, %v4253_v31  ;;  %v4262_v21 = vsub.s32 2, %v4253_v31  ;;  %v4258_v11 = vsub.s32 1, %v4253_v31 }
0x1144   : > { %v4266_v43 = vsub.s32 3, %v4253_v31 }
0x1145   : > { %v4217_v16 = vpack.c.bf16 %v4209_v28, %v4208_v35  ;;  %v9878_v14 = vrot.slane %v4250_v52, %v4254_v3  ;;  %v9880_v9 = vrot.slane %v4250_v52, %v4262_v21  ;;  %v9889_v12 = vrot.slane %v4250_v52, %v4258_v11 }
0x1146   : > { %4525 = vmatmul.mubr.bf16.gmra.mxu1 %v4216_v27  ;;  %4638 = vmatmul.mubr.bf16.gmra.mxu0 %v4216_v27  ;;  %v9891_v15 = vrot.slane %v4250_v52, %v4266_v43 }
0x1147   : > { %4534 = vmatprep.mubr.bf16.mxu1 %v11003_v48  ;;  %4647 = vmatprep.mubr.bf16.mxu0 %v11003_v48  ;;  %11066 = vst [vmem:[#allocation21_spill] sm:$0xff] %v9878_v14  ;;  %11067 = vst [vmem:[#allocation12_spill] sm:$0xff] %v9880_v9 }
0x114e   : > { %4535 = vmatmul.mubr.bf16.gmra.mxu1 %v4217_v16  ;;  %4648 = vmatmul.mubr.bf16.gmra.mxu0 %v4217_v16 }
0x117a   : > { %v4466_v32 = vpop.f32.mrf.mxu1  ;;  %v4579_v54 = vpop.f32.mrf.mxu0 }
0x117b   : > { %v4467_v48 = vadd.f32 %v4466_v32, %v9878_v14  ;;  %v4580_v39 = vadd.f32 %v4579_v54, %v9880_v9 }
0x117c   : > { %v4468_v36 = vpop.f32.mrf.mxu1  ;;  %v4581_v58 = vpop.f32.mrf.mxu0 }
0x117d   : > { %v4722_v18 = vmul.f32 0.044715, %v4467_v48  ;;  %v4724_v24 = vmul.f32 0.044715, %v4580_v39  ;;  %v9901_v60 = vadd.f32 %v4468_v36, %v9889_v12  ;;  %v9904_v28 = vadd.f32 %v4581_v58, %v9891_v15 }
0x117e   : > { %v4470_v25 = vpop.f32.mrf.mxu1  ;;  %v4583_v56 = vpop.f32.mrf.mxu0  ;;  %v9909_v52 = vmul.f32 0.5, %v4467_v48  ;;  %v9911_v32 = vmul.f32 0.5, %v4580_v39 }
0x117f   : > { %v4786_v4 = vmul.f32 %v4722_v18, %v4467_v48  ;;  %v4788_v17 = vmul.f32 %v4724_v24, %v4580_v39  ;;  %v4471_v59 = vadd.f32 %v4470_v25, %v9878_v14  ;;  %v9886_v41 = vadd.f32 %v4583_v56, %v9880_v9 }
0x1180   : > { %v4472_v7 = vpop.f32.mrf.mxu1  ;;  %v4585_v1 = vpop.f32.mrf.mxu0  ;;  %v4723_v24 = vmul.f32 0.044715, %v9901_v60  ;;  %v4725_v58 = vmul.f32 0.044715, %v9904_v28 }
0x1181   : > { %v4850_v2 = vmul.f32 %v4786_v4, %v4467_v48  ;;  %v4726_v50 = vmul.f32 0.044715, %v4471_v59  ;;  %v4852_v22 = vmul.f32 %v4788_v17, %v4580_v39  ;;  %v4728_v29 = vmul.f32 0.044715, %v9886_v41 }
0x1182   : > { %v4476_v44 = vpop.f32.mrf.mxu1  ;;  %v4589_v63 = vpop.f32.mrf.mxu0  ;;  %v9920_v25 = vadd.f32 %v4472_v7, %v9889_v12 }
0x1183   : > { %v4790_v23 = vmul.f32 %v4726_v50, %v4471_v59  ;;  %v4914_v47 = vadd.f32 %v4850_v2, %v4467_v48  ;;  %v4792_v46 = vmul.f32 %v4728_v29, %v9886_v41  ;;  %v4916_v30 = vadd.f32 %v4852_v22, %v4580_v39 }
0x1184   : > { %v4478_v6 = vpop.f32.mrf.mxu1  ;;  %v4591_v19 = vpop.f32.mrf.mxu0  ;;  %v9895_v49 = vadd.f32 %v4476_v44, %v9878_v14  ;;  %v9898_v10 = vadd.f32 %v4589_v63, %v9880_v9  ;;  %v9923_v48 = vadd.f32 %v4585_v1, %v9891_v15  ;;  %v9938_v29 = vmul.f32 0.5, %v9901_v60 }
0x1185   : > { %v4854_v55 = vmul.f32 %v4790_v23, %v4471_v59  ;;  %v4978_v31 = vmul.f32 0.7978846, %v4914_v47  ;;  %v4856_v3 = vmul.f32 %v4792_v46, %v9886_v41  ;;  %v4980_v54 = vmul.f32 0.7978846, %v4916_v30 }
0x1186   : > { %v4480_v27 = vpop.f32.mrf.mxu1  ;;  %v4593_v33 = vpop.f32.mrf.mxu0  ;;  %v4730_v35 = vmul.f32 0.044715, %v9895_v49  ;;  %v4732_v21 = vmul.f32 0.044715, %v9898_v10  ;;  %v9931_v2 = vadd.f32 %v4478_v6, %v9889_v12  ;;  %v9934_v50 = vadd.f32 %v4591_v19, %v9891_v15 }
0x1187   : > { %v4918_v18 = vadd.f32 %v4854_v55, %v4471_v59  ;;  %v9917_v43 = vadd.f32 %v4480_v27, %v9878_v14  ;;  %v9927_v56 = vadd.f32 %v4593_v33, %v9880_v9  ;;  %7623 = vtanh.f32 %v4978_v31 }
0x1188   : > { %v4482_v16 = vpop.f32.mrf.mxu1  ;;  %v4595_v45 = vpop.f32.mrf.mxu0  ;;  %v4794_v11 = vmul.f32 %v4730_v35, %v9895_v49  ;;  %v4796_v39 = vmul.f32 %v4732_v21, %v9898_v10  ;;  %v4920_v17 = vadd.f32 %v4856_v3, %v9886_v41  ;;  %7625 = vtanh.f32 %v4980_v54 }
0x1189   : > { %v4982_v22 = vmul.f32 0.7978846, %v4918_v18  ;;  %v4734_v1 = vmul.f32 0.044715, %v9917_v43  ;;  %v9940_v44 = vmul.f32 0.5, %v4471_v59  ;;  %v9945_v6 = vmul.f32 0.5, %v9904_v28 }
0x118a   : > { %v4486_v36 = vpop.f32.mrf.mxu1  ;;  %v4599_v4 = vpop.f32.mrf.mxu0  ;;  %v4858_v63 = vmul.f32 %v4794_v11, %v9895_v49  ;;  %v4736_v23 = vmul.f32 0.044715, %v9927_v56  ;;  %v4727_v19 = vmul.f32 0.044715, %v9920_v25  ;;  %v4729_v47 = vmul.f32 0.044715, %v9923_v48 }
0x118b   : > { %v4860_v46 = vmul.f32 %v4796_v39, %v9898_v10  ;;  %v9951_v30 = vadd.f32 %v4486_v36, %v9878_v14  ;;  %v4984_v27 = vmul.f32 0.7978846, %v4920_v17  ;;  %v4731_v59 = vmul.f32 0.044715, %v9931_v2 }
0x118c   : > { %v4488_v7 = vpop.f32.mrf.mxu1  ;;  %v4601_v55 = vpop.f32.mrf.mxu0  ;;  %v4733_v33 = vmul.f32 0.044715, %v9934_v50  ;;  %v4787_v31 = vmul.f32 %v4723_v24, %v9901_v60  ;;  %7627 = vtanh.f32 %v4982_v22  ;;  %v4798_v3 = vmul.f32 %v4734_v1, %v9917_v43 }
0x118d   : > { %v9958_v21 = vadd.f32 %v4482_v16, %v9889_v12  ;;  %v4789_v54 = vmul.f32 %v4725_v58, %v9904_v28  ;;  %v4922_v18 = vadd.f32 %v4858_v63, %v9895_v49  ;;  %v4800_v36 = vmul.f32 %v4736_v23, %v9927_v56 }
0x118e   : > { %v4490_v35 = vpop.f32.mrf.mxu1  ;;  %v9964_v11 = vadd.f32 %v4599_v4, %v9880_v9  ;;  %v4791_v39 = vmul.f32 %v4727_v19, %v9920_v25  ;;  %v4924_v17 = vadd.f32 %v4860_v46, %v9898_v10  ;;  %v9969_v24 = vadd.f32 %v4595_v45, %v9891_v15  ;;  %v4603_v16 = vpop.f32.mrf.mxu0 }
0x118f   : > { %v4738_v22 = vmul.f32 0.044715, %v9951_v30  ;;  %7629 = vtanh.f32 %v4984_v27  ;;  %v4793_v58 = vmul.f32 %v4729_v47, %v9923_v48  ;;  %v4795_v1 = vmul.f32 %v4731_v59, %v9931_v2 }
0x1190   : > { %v4797_v63 = vmul.f32 %v4733_v33, %v9934_v50  ;;  %v4492_v23 = vpop.f32.mrf.mxu1  ;;  %v9976_v4 = vmul.f32 %v4787_v31, %v9901_v60  ;;  %v9979_v19 = vmul.f32 0.5, %v9886_v41  ;;  %v4862_v45 = vmul.f32 %v4798_v3, %v9917_v43  ;;  %v4605_v20 = vpop.f32.mrf.mxu0 }
0x1191   : > { %v4735_v46 = vmul.f32 0.044715, %v9958_v21  ;;  %v9984_v38 = vmul.f32 %v4789_v54, %v9904_v28  ;;  %v4986_v27 = vmul.f32 0.7978846, %v4922_v18  ;;  %v4864_v47 = vmul.f32 %v4800_v36, %v9927_v56 }
0x1192   : > { %v4740_v59 = vmul.f32 0.044715, %v9964_v11  ;;  %v9989_v33 = vmul.f32 %v4791_v39, %v9920_v25  ;;  %v4988_v31 = vmul.f32 0.7978846, %v4924_v17  ;;  %v4737_v26 = vmul.f32 0.044715, %v9969_v24  ;;  %v4496_v39 = vpop.f32.mrf.mxu1 }
0x1193   : > { %v4802_v41 = vmul.f32 %v4738_v22, %v9951_v30  ;;  %v9994_v3 = vmul.f32 %v4793_v58, %v9923_v48  ;;  %v9997_v54 = vmul.f32 %v4795_v1, %v9931_v2  ;;  %v10000_v18 = vmul.f32 %v4797_v63, %v9934_v50 }
0x1194   : > { %v10003_v36 = vadd.f32 %v4490_v35, %v9878_v14  ;;  %v7624_v42 = vpop.eup %7623  ;;  %v4926_v17 = vadd.f32 %v4862_v45, %v9917_v43  ;;  %v4799_v8 = vmul.f32 %v4735_v46, %v9958_v21  ;;  %v10008_v22 = vadd.f32 %v4488_v7, %v9889_v12  ;;  %v4609_v7 = vpop.f32.mrf.mxu0 }
0x1195   : > { %v10011_v58 = vadd.f32 %v4603_v16, %v9880_v9  ;;  %v7626_v1 = vpop.eup %7625  ;;  %7631 = vtanh.f32 %v4986_v27  ;;  %v4928_v63 = vadd.f32 %v4864_v47, %v9927_v56  ;;  %v4804_v62 = vmul.f32 %v4740_v59, %v9964_v11  ;;  %v4498_v59 = vpop.f32.mrf.mxu1 }
0x1196   : > { %v4742_v35 = vmul.f32 0.044715, %v10003_v36  ;;  %7633 = vtanh.f32 %v4988_v31  ;;  %v4801_v51 = vmul.f32 %v4737_v26, %v9969_v24  ;;  %v4866_v45 = vmul.f32 %v4802_v41, %v9951_v30  ;;  %v4611_v61 = vpop.f32.mrf.mxu0 }
0x1197   : > { %v4744_v46 = vmul.f32 0.044715, %v10011_v58  ;;  %v5106_v53 = vadd.f32 1.0, %v7624_v42  ;;  %v10020_v16 = vadd.f32 %v4601_v55, %v9891_v15  ;;  %v10024_v47 = vadd.f32 %v4496_v39, %v9878_v14  ;;  %v4500_v40 = vpop.f32.mrf.mxu1 }
0x1198   : > { %v4806_v27 = vmul.f32 %v4742_v35, %v10003_v36  ;;  %v5108_v37 = vadd.f32 1.0, %v7626_v1  ;;  %v4990_v34 = vmul.f32 0.7978846, %v4926_v17  ;;  %v10027_v31 = vmul.f32 %v4799_v8, %v9958_v21 }
0x1199   : > { %11068 = vst [vmem:[#allocation9_spill] sm:$0xff] %v10024_v47  ;;  %v4739_v26 = vmul.f32 0.044715, %v10008_v22  ;;  %v7628_v41 = vpop.eup %7627  ;;  %v4992_v57 = vmul.f32 0.7978846, %v4928_v63  ;;  %v4868_v42 = vmul.f32 %v4804_v62, %v9964_v11  ;;  %v10032_v55 = vadd.f32 %v4492_v23, %v9889_v12 }
0x119a   : > { %v4746_v35 = vmul.f32 0.044715, %v10024_v47  ;;  %v10036_v39 = vmul.f32 %v4801_v51, %v9969_v24  ;;  %v4930_v1 = vadd.f32 %v4866_v45, %v9951_v30  ;;  %v4808_v17 = vmul.f32 %v4744_v46, %v10011_v58 }
0x119b   : > { %v10041_v8 = vadd.f32 %v4609_v7, %v9880_v9  ;;  %v10044_v63 = vmul.f32 %v5106_v53, %v9909_v52  ;;  %v4741_v62 = vmul.f32 0.044715, %v10020_v16  ;;  %v4870_v23 = vmul.f32 %v4806_v27, %v10003_v36 }
0x119c   : > { %v4810_v5 = vmul.f32 %v4746_v35, %v10024_v47  ;;  %v7630_v51 = vpop.eup %7629  ;;  %v10050_v13 = vmul.f32 %v5108_v37, %v9911_v32  ;;  %v5110_v45 = vadd.f32 1.0, %v7628_v41  ;;  %7635 = vtanh.f32 %v4990_v34  ;;  %v4613_v32 = vpop.f32.mrf.mxu0 }
0x119d   : > { %v4803_v46 = vmul.f32 %v4739_v26, %v10008_v22  ;;  %7637 = vtanh.f32 %v4992_v57  ;;  %v4932_v7 = vadd.f32 %v4868_v42, %v9964_v11  ;;  %v4743_v53 = vmul.f32 0.044715, %v10032_v55 }
0x119e   : > { %v10056_v52 = vadd.f32 %v4605_v20, %v9891_v15  ;;  %v4994_v27 = vmul.f32 0.7978846, %v4930_v1  ;;  %v4872_v35 = vmul.f32 %v4808_v17, %v10011_v58  ;;  %v4748_v0 = vmul.f32 0.044715, %v10041_v8 }
0x119f   : > { %v10061_v37 = vadd.f32 %v4500_v40, %v9878_v14  ;;  %v5112_v34 = vadd.f32 1.0, %v7630_v51  ;;  %v10064_v26 = vmul.f32 %v4741_v62, %v10020_v16  ;;  %v4934_v57 = vadd.f32 %v4870_v23, %v10003_v36 }
0x11a0   : > { %v4874_v41 = vmul.f32 %v4810_v5, %v10024_v47  ;;  %v10069_v20 = vmul.f32 %v5110_v45, %v9940_v44  ;;  %v10072_v42 = vmul.f32 %v4803_v46, %v10008_v22  ;;  %v10075_v1 = vadd.f32 %v4498_v59, %v9889_v12 }
0x11a1   : > { %v4750_v40 = vmul.f32 0.044715, %v10061_v37  ;;  %v4996_v17 = vmul.f32 0.7978846, %v4932_v7  ;;  %v4807_v51 = vmul.f32 %v4743_v53, %v10032_v55  ;;  %v4745_v62 = vmul.f32 0.044715, %v10056_v52 }
0x11a2   : > { %v10081_v23 = vadd.f32 %v4613_v32, %v9880_v9  ;;  %v10083_v5 = vpop.eup %7631  ;;  %7639 = vtanh.f32 %v4994_v27  ;;  %v4936_v44 = vadd.f32 %v4872_v35, %v10011_v58  ;;  %v4812_v45 = vmul.f32 %v4748_v0, %v10041_v8 }
0x11a3   : > { %v4915_v59 = vadd.f32 %v9976_v4, %v9901_v60  ;;  %v10089_v46 = vpop.eup %7633  ;;  %v10092_v7 = vmul.f32 %v5112_v34, %v9979_v19  ;;  %v4998_v53 = vmul.f32 0.7978846, %v4934_v57  ;;  %v4938_v14 = vadd.f32 %v4874_v41, %v10024_v47  ;;  %v4502_v47 = vpop.f32.mrf.mxu1 }
0x11a4   : > { %v10096_v32 = vadd.f32 %v4611_v61, %v9891_v15  ;;  %v4747_v27 = vmul.f32 0.044715, %v10075_v1  ;;  %v4814_v35 = vmul.f32 %v4750_v40, %v10061_v37  ;;  %v4919_v0 = vadd.f32 %v9989_v33, %v9920_v25 }
0x11a5   : > { %v4979_v9 = vmul.f32 0.7978846, %v4915_v59  ;;  %7641 = vtanh.f32 %v4996_v17  ;;  %v4871_v60 = vmul.f32 %v4807_v51, %v10032_v55  ;;  %v4809_v4 = vmul.f32 %v4745_v62, %v10056_v52 }
0x11a6   : > { %v4752_v19 = vmul.f32 0.044715, %v10081_v23  ;;  %v5000_v34 = vmul.f32 0.7978846, %v4936_v44  ;;  %v4876_v57 = vmul.f32 %v4812_v45, %v10041_v8  ;;  %v4983_v61 = vmul.f32 0.7978846, %v4919_v0  ;;  %v4615_v44 = vpop.f32.mrf.mxu0 }
0x11a7   : > { %7643 = vtanh.f32 %v4979_v9  ;;  %v5002_v41 = vmul.f32 0.7978846, %v4938_v14  ;;  %v4917_v40 = vadd.f32 %v9984_v38, %v9904_v28  ;;  %v4921_v33 = vadd.f32 %v9994_v3, %v9923_v48 }
0x11a8   : > { %7645 = vtanh.f32 %v4998_v53  ;;  %v4811_v17 = vmul.f32 %v4747_v27, %v10075_v1  ;;  %v4749_v51 = vmul.f32 0.044715, %v10096_v32  ;;  %v4878_v62 = vmul.f32 %v4814_v35, %v10061_v37 }
0x11a9   : > { %7647 = vtanh.f32 %v4983_v61  ;;  %v10113_v45 = vpop.eup %7635  ;;  %v4816_v9 = vmul.f32 %v4752_v19, %v10081_v23  ;;  %v4981_v14 = vmul.f32 0.7978846, %v4917_v40  ;;  %v4985_v59 = vmul.f32 0.7978846, %v4921_v33 }
0x11aa   : > { %v4923_v38 = vadd.f32 %v9997_v54, %v9931_v2  ;;  %v10118_v28 = vpop.eup %7637  ;;  %7649 = vtanh.f32 %v5000_v34  ;;  %v4940_v3 = vadd.f32 %v4876_v57, %v10041_v8  ;;  %v10122_v53 = vadd.f32 %v4502_v47, %v9889_v12 }
0x11ab   : > { %v4927_v27 = vadd.f32 %v10027_v31, %v9958_v21  ;;  %7651 = vtanh.f32 %v5002_v41  ;;  %v10127_v35 = vadd.f32 %v4615_v44, %v9891_v15  ;;  %v4925_v19 = vadd.f32 %v10000_v18, %v9934_v50 }
0x11ac   : > { %v4987_v0 = vmul.f32 0.7978846, %v4923_v38  ;;  %v4942_v54 = vadd.f32 %v4878_v62, %v10061_v37  ;;  %7653 = vtanh.f32 %v4981_v14  ;;  %v4929_v57 = vadd.f32 %v10036_v39, %v9969_v24 }
0x11ad   : > { %v4991_v34 = vmul.f32 0.7978846, %v4927_v27  ;;  %v4813_v47 = vmul.f32 %v4749_v51, %v10096_v32  ;;  %v4880_v61 = vmul.f32 %v4816_v9, %v10081_v23  ;;  %7655 = vtanh.f32 %v4985_v59 }
0x11ae   : > { %v4989_v31 = vmul.f32 0.7978846, %v4925_v19  ;;  %v5004_v41 = vmul.f32 0.7978846, %v4940_v3  ;;  %v4751_v40 = vmul.f32 0.044715, %v10122_v53  ;;  %7657 = vtanh.f32 %v4987_v0 }
0x11af   : > { %v4993_v33 = vmul.f32 0.7978846, %v4929_v57  ;;  %v10137_v44 = vpop.eup %7639  ;;  %v4869_v18 = vmul.f32 %v10064_v26, %v10020_v16  ;;  %v4873_v62 = vmul.f32 %v4809_v4, %v10056_v52  ;;  %v4753_v39 = vmul.f32 0.044715, %v10127_v35 }
0x11b0   : > { %7659 = vtanh.f32 %v4991_v34  ;;  %v5234_v51 = vpack.c.bf16 %v10069_v20, %v10044_v63  ;;  %v5006_v14 = vmul.f32 0.7978846, %v4942_v54  ;;  %v4875_v59 = vmul.f32 %v4811_v17, %v10075_v1 }
0x11b1   : > { %7661 = vtanh.f32 %v4989_v31  ;;  %v4944_v38 = vadd.f32 %v4880_v61, %v10081_v23  ;;  %v4931_v26 = vadd.f32 %v10072_v42, %v10008_v22  ;;  %v10154_v3 = vmul.f32 %v4813_v47, %v10096_v32 }
0x11b2   : > { %7663 = vtanh.f32 %v4993_v33  ;;  %v10151_v4 = vpop.eup %7641  ;;  %v4815_v27 = vmul.f32 %v4751_v40, %v10122_v53  ;;  %v4935_v0 = vadd.f32 %v4871_v60, %v10032_v55  ;;  %v4817_v54 = vmul.f32 %v4753_v39, %v10127_v35 }
0x11b3   : > { %7665 = vtanh.f32 %v5004_v41  ;;  %v4995_v17 = vmul.f32 0.7978846, %v4931_v26  ;;  %v4933_v34 = vadd.f32 %v4869_v18, %v10020_v16  ;;  %v4937_v57 = vadd.f32 %v4873_v62, %v10056_v52 }
0x11b4   : > { %v7644_v19 = vpop.eup %7643  ;;  %7667 = vtanh.f32 %v5006_v14  ;;  %v4663_v42 = vmul.f32 0.5, %v9920_v25  ;;  %v4999_v47 = vmul.f32 0.7978846, %v4935_v0  ;;  %v5008_v33 = vmul.f32 0.7978846, %v4944_v38 }
0x11b5   : > { %v10161_v61 = vpop.eup %7645  ;;  %v5107_v31 = vadd.f32 1.0, %v7644_v19  ;;  %7669 = vtanh.f32 %v4995_v17  ;;  %v4997_v40 = vmul.f32 0.7978846, %v4933_v34  ;;  %v5001_v60 = vmul.f32 0.7978846, %v4937_v57 }
0x11b6   : > { %v7648_v41 = vpop.eup %7647  ;;  %v4879_v9 = vmul.f32 %v4815_v27, %v10122_v53  ;;  %v4665_v26 = vmul.f32 0.5, %v9923_v48  ;;  %7671 = vtanh.f32 %v4999_v47  ;;  %v4881_v62 = vmul.f32 %v4817_v54, %v10127_v35 }
0x11b7   : > { %v5111_v39 = vadd.f32 1.0, %v7648_v41  ;;  %v10166_v18 = vpop.eup %7649  ;;  %v4667_v14 = vmul.f32 0.5, %v9931_v2  ;;  %v4671_v25 = vmul.f32 0.5, %v9958_v21  ;;  %7673 = vtanh.f32 %v4997_v40 }
0x11b8   : > { %v10171_v0 = vpop.eup %7651  ;;  %v5171_v38 = vmul.f32 %v5107_v31, %v9938_v29  ;;  %v5118_v27 = vadd.f32 1.0, %v10113_v45  ;;  %7675 = vtanh.f32 %v5001_v60  ;;  %v4669_v48 = vmul.f32 0.5, %v9934_v50 }
0x11b9   : > { %v5175_v19 = vmul.f32 %v5111_v39, %v4663_v42  ;;  %v7654_v17 = vpop.eup %7653  ;;  %7677 = vtanh.f32 %v5008_v33  ;;  %v4673_v34 = vmul.f32 0.5, %v9969_v24  ;;  %v4666_v54 = vmul.f32 0.5, %v9895_v49 }
0x11ba   : > { %v7656_v2 = vpop.eup %7655  ;;  %v5109_v21 = vadd.f32 1.0, %v7654_v17  ;;  %v4670_v47 = vmul.f32 0.5, %v9917_v43  ;;  %v4939_v41 = vadd.f32 %v4875_v59, %v10075_v1  ;;  %v5114_v45 = vadd.f32 1.0, %v10083_v5 }
0x11bb   : > { %v5235_v57 = vpack.c.bf16 %v5175_v19, %v5171_v38  ;;  %v7658_v29 = vpop.eup %7657  ;;  %v5113_v42 = vadd.f32 1.0, %v7656_v2  ;;  %v4668_v31 = vmul.f32 0.5, %v9898_v10  ;;  %v4943_v33 = vadd.f32 %v4879_v9, %v10122_v53 }
0x11bc   : > { %v5115_v24 = vadd.f32 1.0, %v7658_v29  ;;  %v5182_v40 = vmul.f32 %v5118_v27, %v4670_v47  ;;  %v5116_v49 = vadd.f32 1.0, %v10089_v46  ;;  %v5003_v60 = vmul.f32 0.7978846, %v4939_v41 }
0x11bd   : > { %v7660_v50 = vpop.eup %7659  ;;  %5561 = vmatprep.mubr.bf16.mxu1 %v5235_v57  ;;  %v5173_v43 = vmul.f32 %v5109_v21, %v9945_v6  ;;  %v5177_v38 = vmul.f32 %v5113_v42, %v4665_v26  ;;  %v5007_v59 = vmul.f32 0.7978846, %v4943_v33  ;;  %v5120_v17 = vadd.f32 1.0, %v10118_v28 }
0x11be   : > { %v7662_v39 = vpop.eup %7661  ;;  %5562 = vmatmul.mubr.bf16.vlgmr.msra.gmra.mxu1 %v5234_v51  ;;  %v5119_v5 = vadd.f32 1.0, %v7660_v50  ;;  %v5179_v19 = vmul.f32 %v5115_v24, %v4667_v14  ;;  %7679 = vtanh.f32 %v5003_v60  ;;  %v5178_v6 = vmul.f32 %v5114_v45, %v4666_v54 }
0x11bf   : > { %v7664_v10 = vpop.eup %7663  ;;  %v5117_v9 = vadd.f32 1.0, %v7662_v39  ;;  %v5237_v46 = vpack.c.bf16 %v5177_v38, %v5173_v43  ;;  %7681 = vtanh.f32 %v5007_v59  ;;  %v4672_v26 = vmul.f32 0.5, %v9927_v56 }
0x11c0   : > { %v10189_v27 = vpop.eup %7665  ;;  %v5183_v2 = vmul.f32 %v5119_v5, %v4671_v25  ;;  %v5121_v57 = vadd.f32 1.0, %v7664_v10  ;;  %v4941_v63 = vadd.f32 %v10154_v3, %v10096_v32  ;;  %v4945_v20 = vadd.f32 %v4881_v62, %v10127_v35 }
0x11c1   : > { %v7668_v51 = vpop.eup %7667  ;;  %5658 = vmatprep.mubr.bf16.mxu0 %v5237_v46  ;;  %v5181_v21 = vmul.f32 %v5117_v9, %v4669_v48  ;;  %v4675_v47 = vmul.f32 0.5, %v10008_v22  ;;  %v11069_v25 = vpack.c.bf16 %v10092_v7, %v10050_v13  ;;  %v5238_v54 = vpack.c.bf16 %v5182_v40, %v5178_v6 }
0x11c2   : > { %v5239_v14 = vpack.c.bf16 %v5183_v2, %v5179_v19  ;;  %v5185_v28 = vmul.f32 %v5121_v57, %v4673_v34  ;;  %v7670_v41 = vpop.eup %7669  ;;  %v5180_v29 = vmul.f32 %v5116_v49, %v4668_v31  ;;  %v5005_v56 = vmul.f32 0.7978846, %v4941_v63 }
0x11c3   : > { %5659 = vmatmul.mubr.bf16.vlgmr.msra.gmra.mxu0 %v11069_v25  ;;  %v5009_v42 = vmul.f32 0.7978846, %v4945_v20  ;;  %v7672_v45 = vpop.eup %7671  ;;  %v5184_v62 = vmul.f32 %v5120_v17, %v4672_v26  ;;  %v5123_v33 = vadd.f32 1.0, %v7670_v41  ;;  %v5126_v50 = vadd.f32 1.0, %v10161_v61 }
0x11c4   : > { %5569 = vmatprep.mubr.bf16.mxu1 %v5239_v14  ;;  %v5241_v3 = vpack.c.bf16 %v5185_v28, %v5181_v21  ;;  %v7674_v48 = vpop.eup %7673  ;;  %v4679_v34 = vmul.f32 0.5, %v10032_v55  ;;  %v5127_v22 = vadd.f32 1.0, %v7672_v45  ;;  %v4677_v24 = vmul.f32 0.5, %v10020_v16 }
0x11c5   : > { %7683 = vtanh.f32 %v5005_v56  ;;  %v7676_v13 = vpop.eup %7675  ;;  %v5125_v7 = vadd.f32 1.0, %v7674_v48  ;;  %v4678_v31 = vmul.f32 0.5, %v10003_v36  ;;  %v5122_v40 = vadd.f32 1.0, %v10137_v44 }
0x11c6   : > { %5666 = vmatprep.mubr.bf16.mxu0 %v5241_v3  ;;  %5570 = vmatmul.mubr.bf16.gmra.mxu1 %v5238_v54  ;;  %7685 = vtanh.f32 %v5009_v42  ;;  %v7678_v49 = vpop.eup %7677  ;;  %v5187_v60 = vmul.f32 %v5123_v33, %v4675_v47  ;;  %v5191_v39 = vmul.f32 %v5127_v22, %v4679_v34  ;;  %v4681_v61 = vmul.f32 0.5, %v10056_v52 }
0x11c7   : > { %v5129_v43 = vadd.f32 1.0, %v7676_v13  ;;  %v5240_v55 = vpack.c.bf16 %v5184_v62, %v5180_v29  ;;  %v4674_v38 = vmul.f32 0.5, %v9951_v30  ;;  %v5190_v16 = vmul.f32 %v5126_v50, %v4678_v31 }
0x11c8   : > { %v5243_v5 = vpack.c.bf16 %v5191_v39, %v5187_v60  ;;  %v5189_v59 = vmul.f32 %v5125_v7, %v4677_v24  ;;  %v5128_v19 = vadd.f32 1.0, %v10166_v18  ;;  %v4680_v44 = vmul.f32 0.5, %v10011_v58  ;;  %v11071_v7 = vld [vmem:[#allocation21_spill] sm:$0xff] }
0x11c9   : > { %v5193_v10 = vmul.f32 %v5129_v43, %v4681_v61  ;;  %v5186_v9 = vmul.f32 %v5122_v40, %v4674_v38  ;;  %v5124_v17 = vadd.f32 1.0, %v10151_v4  ;;  %v5134_v2 = vadd.f32 1.0, %v7668_v51  ;;  %v11070_v51 = vld [vmem:[#allocation9_spill] sm:$0xff] }
0x11ca   : > { %5577 = vmatprep.mubr.bf16.mxu1 %v5243_v5  ;;  %v4676_v30 = vmul.f32 0.5, %v9964_v11  ;;  %v5192_v6 = vmul.f32 %v5128_v19, %v4680_v44  ;;  %v4683_v26 = vmul.f32 0.5, %v10075_v1  ;;  %v4687_v18 = vmul.f32 0.5, %v10122_v53 }
0x11cb   : > { %5667 = vmatmul.mubr.bf16.gmra.mxu0 %v5240_v55  ;;  %v5245_v36 = vpack.c.bf16 %v5193_v10, %v5189_v59  ;;  %v7680_v46 = vpop.eup %7679  ;;  %v5242_v52 = vpack.c.bf16 %v5190_v16, %v5186_v9  ;;  %v4686_v14 = vmul.f32 0.5, %v10061_v37  ;;  %v5130_v58 = vadd.f32 1.0, %v10171_v0 }
0x11cc   : > { %v7682_v57 = vpop.eup %7681  ;;  %v5131_v63 = vadd.f32 1.0, %v7680_v46  ;;  %v5188_v4 = vmul.f32 %v5124_v17, %v4676_v30  ;;  %v4682_v47 = vmul.f32 0.5, %v11070_v51  ;;  %v5136_v11 = vadd.f32 1.0, %v7678_v49 }
0x11cd   : > { %5674 = vmatprep.mubr.bf16.mxu0 %v5245_v36  ;;  %v5135_v20 = vadd.f32 1.0, %v7682_v57  ;;  %v5198_v41 = vmul.f32 %v5134_v2, %v4686_v14  ;;  %v4688_v53 = vmul.f32 0.5, %v10081_v23  ;;  %v5132_v37 = vadd.f32 1.0, %v10189_v27 }
0x11ce   : > { %5578 = vmatmul.mubr.bf16.gmra.mxu1 %v5242_v52  ;;  %v5195_v21 = vmul.f32 %v5131_v63, %v4683_v26  ;;  %v5244_v25 = vpack.c.bf16 %v5192_v6, %v5188_v4  ;;  %v5194_v1 = vmul.f32 %v5130_v58, %v4682_v47  ;;  %v4685_v0 = vmul.f32 0.5, %v10096_v32  ;;  %v11072_v32 = vld [vmem:[#allocation12_spill] sm:$0xff] }
0x11cf   : > { %v5199_v28 = vmul.f32 %v5135_v20, %v4687_v18  ;;  %v4689_v45 = vmul.f32 0.5, %v10127_v35  ;;  %v4684_v33 = vmul.f32 0.5, %v10041_v8  ;;  %v5200_v50 = vmul.f32 %v5136_v11, %v4688_v53 }
0x11d0   : > { %v5246_v62 = vpack.c.bf16 %v5198_v41, %v5194_v1 }
0x11d1   : > { %v5247_v29 = vpack.c.bf16 %v5199_v28, %v5195_v21  ;;  %v5196_v22 = vmul.f32 %v5132_v37, %v4684_v33 }
0x11d2   : > { %v7684_v54 = vpop.eup %7683 }
0x11d3   : > { %v7686_v56 = vpop.eup %7685  ;;  %5675 = vmatmul.mubr.bf16.gmra.mxu0 %v5244_v25  ;;  %v5133_v42 = vadd.f32 1.0, %v7684_v54  ;;  %5585 = vmatprep.mubr.bf16.mxu1 %v5247_v29  ;;  %v5248_v13 = vpack.c.bf16 %v5200_v50, %v5196_v22 }
0x11d4   : > { %v5137_v3 = vadd.f32 1.0, %v7686_v56 }
0x11d5   : > { %v5197_v48 = vmul.f32 %v5133_v42, %v4685_v0 }
0x11d6   : > { %v5201_v34 = vmul.f32 %v5137_v3, %v4689_v45  ;;  %5586 = vmatmul.mubr.bf16.gmra.mxu1 %v5246_v62 }
0x11d8   : > { %v5249_v24 = vpack.c.bf16 %v5201_v34, %v5197_v48 }
0x11da   : > { %5682 = vmatprep.mubr.bf16.mxu0 %v5249_v24 }
0x11db   : > { %5683 = vmatmul.mubr.bf16.gmra.mxu0 %v5248_v13 }
0x11f6   : > { %v4506_v23 = vpop.f32.mrf.mxu1  ;;  %v4619_v27 = vpop.f32.mrf.mxu0 }
0x11f7   : > { %v4507_v31 = vadd.f32 %v4506_v23, %v11071_v7  ;;  %v4620_v40 = vadd.f32 %v4619_v27, %v11072_v32 }
0x11f8   : > { %v4508_v35 = vpop.f32.mrf.mxu1  ;;  %v4621_v49 = vpop.f32.mrf.mxu0 }
0x11f9   : > { %v4754_v60 = vmul.f32 0.044715, %v4507_v31  ;;  %v4756_v39 = vmul.f32 0.044715, %v4620_v40  ;;  %v10229_v59 = vadd.f32 %v4508_v35, %v9889_v12  ;;  %v10235_v57 = vadd.f32 %v4621_v49, %v9891_v15 }
0x11fa   : > { %v4510_v8 = vpop.f32.mrf.mxu1  ;;  %v4623_v61 = vpop.f32.mrf.mxu0  ;;  %v10254_v41 = vmul.f32 0.5, %v4507_v31  ;;  %v10259_v29 = vmul.f32 0.5, %v4620_v40 }
0x11fb   : > { %v4818_v43 = vmul.f32 %v4754_v60, %v4507_v31  ;;  %v10223_v55 = vadd.f32 %v4510_v8, %v11071_v7  ;;  %v10226_v38 = vadd.f32 %v4623_v61, %v11072_v32  ;;  %v4820_v10 = vmul.f32 %v4756_v39, %v4620_v40 }
0x11fc   : > { %v4512_v16 = vpop.f32.mrf.mxu1  ;;  %v4625_v5 = vpop.f32.mrf.mxu0  ;;  %v4755_v2 = vmul.f32 0.044715, %v10229_v59  ;;  %v4757_v11 = vmul.f32 0.044715, %v10235_v57  ;;  %v10271_v33 = vmul.f32 0.5, %v10229_v59 }
0x11fd   : > { %v4882_v36 = vmul.f32 %v4818_v43, %v4507_v31  ;;  %v4758_v44 = vmul.f32 0.044715, %v10223_v55  ;;  %v4760_v17 = vmul.f32 0.044715, %v10226_v38  ;;  %v4884_v26 = vmul.f32 %v4820_v10, %v4620_v40 }
0x11fe   : > { %v4516_v19 = vpop.f32.mrf.mxu1  ;;  %v4629_v9 = vpop.f32.mrf.mxu0  ;;  %v10244_v63 = vadd.f32 %v4512_v16, %v9889_v12  ;;  %v10247_v18 = vadd.f32 %v4625_v5, %v9891_v15  ;;  %v4819_v25 = vmul.f32 %v4755_v2, %v10229_v59  ;;  %v4821_v23 = vmul.f32 %v4757_v11, %v10235_v57 }
0x11ff   : > { %v10238_v30 = vadd.f32 %v4516_v19, %v11071_v7  ;;  %v10241_v6 = vadd.f32 %v4629_v9, %v11072_v32  ;;  %v4946_v58 = vadd.f32 %v4882_v36, %v4507_v31  ;;  %v4822_v4 = vmul.f32 %v4758_v44, %v10223_v55 }
0x1200   : > { %v4518_v46 = vpop.f32.mrf.mxu1  ;;  %v4631_v52 = vpop.f32.mrf.mxu0  ;;  %v4824_v21 = vmul.f32 %v4760_v17, %v10226_v38  ;;  %v4948_v1 = vadd.f32 %v4884_v26, %v4620_v40  ;;  %v4759_v56 = vmul.f32 0.044715, %v10244_v63  ;;  %v4761_v42 = vmul.f32 0.044715, %v10247_v18 }
0x1201   : > { %v4762_v28 = vmul.f32 0.044715, %v10238_v30  ;;  %v4764_v54 = vmul.f32 0.044715, %v10241_v6  ;;  %v5010_v45 = vmul.f32 0.7978846, %v4946_v58  ;;  %v4886_v3 = vmul.f32 %v4822_v4, %v10223_v55 }
0x1202   : > { %v4520_v20 = vpop.f32.mrf.mxu1  ;;  %v4633_v14 = vpop.f32.mrf.mxu0  ;;  %v4888_v50 = vmul.f32 %v4824_v21, %v10226_v38  ;;  %v10276_v34 = vadd.f32 %v4518_v46, %v9889_v12  ;;  %v10284_v31 = vadd.f32 %v4631_v52, %v9891_v15  ;;  %v10287_v40 = vmul.f32 0.5, %v10235_v57 }
0x1203   : > { %v10264_v53 = vadd.f32 %v4520_v20, %v11071_v7  ;;  %v10268_v62 = vadd.f32 %v4633_v14, %v11072_v32  ;;  %v4826_v48 = vmul.f32 %v4762_v28, %v10238_v30  ;;  %v4828_v27 = vmul.f32 %v4764_v54, %v10241_v6 }
0x1204   : > { %v4522_v51 = vpop.f32.mrf.mxu1  ;;  %v10252_v47 = vpop.f32.mrf.mxu0  ;;  %v5012_v35 = vmul.f32 0.7978846, %v4948_v1  ;;  %v10290_v49 = vmul.f32 %v4819_v25, %v10229_v59  ;;  %v4823_v60 = vmul.f32 %v4759_v56, %v10244_v63  ;;  %v4825_v39 = vmul.f32 %v4761_v42, %v10247_v18 }
0x1205   : > { %v4766_v22 = vmul.f32 0.044715, %v10264_v53  ;;  %v4950_v61 = vadd.f32 %v4886_v3, %v10223_v55  ;;  %v4768_v16 = vmul.f32 0.044715, %v10268_v62  ;;  %7687 = vtanh.f32 %v5010_v45 }
0x1206   : > { %v4526_v37 = vpop.f32.mrf.mxu1  ;;  %v4639_v0 = vpop.f32.mrf.mxu0  ;;  %v4952_v19 = vadd.f32 %v4888_v50, %v10226_v38  ;;  %v4890_v9 = vmul.f32 %v4826_v48, %v10238_v30  ;;  %v4763_v36 = vmul.f32 0.044715, %v10276_v34  ;;  %v4892_v44 = vmul.f32 %v4828_v27, %v10241_v6 }
0x1207   : > { %v4830_v43 = vmul.f32 %v4766_v22, %v10264_v53  ;;  %v10298_v5 = vadd.f32 %v4526_v37, %v11071_v7  ;;  %v4765_v17 = vmul.f32 0.044715, %v10284_v31  ;;  %v10307_v52 = vadd.f32 %v4639_v0, %v11072_v32 }
0x1208   : > { %v4528_v24 = vpop.f32.mrf.mxu1  ;;  %v10279_v13 = vpop.f32.mrf.mxu0  ;;  %7689 = vtanh.f32 %v5012_v35  ;;  %v10310_v26 = vmul.f32 %v4821_v23, %v10235_v57  ;;  %v10313_v20 = vmul.f32 %v4823_v60, %v10244_v63  ;;  %v10316_v14 = vadd.f32 %v4522_v51, %v9889_v12 }
0x1209   : > { %11073 = vst [vmem:[#allocation11_spill] sm:$0xff] %v10298_v5  ;;  %v4770_v46 = vmul.f32 0.044715, %v10298_v5  ;;  %11074 = vst [vmem:[#allocation14_spill] sm:$0xff] %v10307_v52  ;;  %v5014_v58 = vmul.f32 0.7978846, %v4950_v61  ;;  %v4894_v4 = vmul.f32 %v4830_v43, %v10264_v53  ;;  %v4832_v21 = vmul.f32 %v4768_v16, %v10268_v62 }
0x120a   : > { %v4530_v8 = vpop.f32.mrf.mxu1  ;;  %v4643_v10 = vpop.f32.mrf.mxu0  ;;  %v4772_v28 = vmul.f32 0.044715, %v10307_v52  ;;  %v5016_v11 = vmul.f32 0.7978846, %v4952_v19  ;;  %v10324_v54 = vmul.f32 %v4825_v39, %v10247_v18  ;;  %v4827_v1 = vmul.f32 %v4763_v36, %v10276_v34 }
0x120b   : > { %v10328_v56 = vadd.f32 %v4530_v8, %v11071_v7  ;;  %v4954_v51 = vadd.f32 %v4890_v9, %v10238_v30  ;;  %v4956_v42 = vadd.f32 %v4892_v44, %v10241_v6  ;;  %v4829_v37 = vmul.f32 %v4765_v17, %v10284_v31 }
0x120c   : > { %v4532_v2 = vpop.f32.mrf.mxu1  ;;  %v10321_v25 = vpop.f32.mrf.mxu0  ;;  %v4834_v0 = vmul.f32 %v4770_v46, %v10298_v5  ;;  %v4767_v3 = vmul.f32 0.044715, %v10316_v14  ;;  %v10337_v50 = vadd.f32 %v10252_v47, %v9891_v15  ;;  %v4836_v48 = vmul.f32 %v4772_v28, %v10307_v52 }
0x120d   : > { %11075 = vst [vmem:[#allocation15_spill] sm:$0xff] %v10328_v56  ;;  %v4774_v22 = vmul.f32 0.044715, %v10328_v56  ;;  %7691 = vtanh.f32 %v5014_v58  ;;  %v4958_v23 = vadd.f32 %v4894_v4, %v10264_v53  ;;  %v4896_v27 = vmul.f32 %v4832_v21, %v10268_v62 }
0x120e   : > { %v4536_v45 = vpop.f32.mrf.mxu1  ;;  %v10344_v35 = vadd.f32 %v4643_v10, %v11072_v32  ;;  %v4649_v60 = vpop.f32.mrf.mxu0  ;;  %7693 = vtanh.f32 %v5016_v11  ;;  %v10347_v39 = vmul.f32 %v4827_v1, %v10276_v34  ;;  %v10350_v47 = vadd.f32 %v4528_v24, %v9889_v12 }
0x120f   : > { %v4838_v8 = vmul.f32 %v4774_v22, %v10328_v56  ;;  %v5018_v61 = vmul.f32 0.7978846, %v4954_v51  ;;  %v5020_v43 = vmul.f32 0.7978846, %v4956_v42  ;;  %v4898_v16 = vmul.f32 %v4834_v0, %v10298_v5 }
0x1210   : > { %11076 = vst [vmem:[#allocation19_spill] sm:$0xff] %v10344_v35  ;;  %v4776_v19 = vmul.f32 0.044715, %v10344_v35  ;;  %v4538_v9 = vpop.f32.mrf.mxu1  ;;  %v10356_v10 = vmul.f32 %v4829_v37, %v10284_v31  ;;  %v4831_v36 = vmul.f32 %v4767_v3, %v10316_v14  ;;  %v4769_v44 = vmul.f32 0.044715, %v10337_v50  ;;  %v4651_v21 = vpop.f32.mrf.mxu0 }
0x1211   : > { %v4900_v17 = vmul.f32 %v4836_v48, %v10307_v52  ;;  %v5022_v24 = vmul.f32 0.7978846, %v4958_v23  ;;  %v4960_v46 = vadd.f32 %v4896_v27, %v10268_v62  ;;  %v10364_v58 = vadd.f32 %v10279_v13, %v9891_v15 }
0x1212   : > { %v10367_v4 = vadd.f32 %v4536_v45, %v11071_v7  ;;  %v4771_v28 = vmul.f32 0.044715, %v10350_v47  ;;  %v4902_v11 = vmul.f32 %v4838_v8, %v10328_v56  ;;  %v4840_v1 = vmul.f32 %v4776_v19, %v10344_v35  ;;  %v10375_v42 = vpop.eup %7687  ;;  %v4540_v45 = vpop.f32.mrf.mxu1 }
0x1213   : > { %v10373_v51 = vadd.f32 %v4649_v60, %v11072_v32  ;;  %7695 = vtanh.f32 %v5018_v61  ;;  %v4962_v37 = vadd.f32 %v4898_v16, %v10298_v5  ;;  %v10379_v13 = vadd.f32 %v4532_v2, %v9889_v12  ;;  %v4653_v2 = vpop.f32.mrf.mxu0 }
0x1214   : > { %11077 = vst [vmem:[#allocation13_spill] sm:$0xff] %v10367_v4  ;;  %v4778_v0 = vmul.f32 0.044715, %v10367_v4  ;;  %7697 = vtanh.f32 %v5020_v43  ;;  %v4833_v3 = vmul.f32 %v4769_v44, %v10337_v50  ;;  %v4964_v48 = vadd.f32 %v4900_v17, %v10307_v52 }
0x1215   : > { %v4780_v22 = vmul.f32 0.044715, %v10373_v51  ;;  %v10385_v23 = vpop.eup %7689  ;;  %7699 = vtanh.f32 %v5022_v24  ;;  %v5024_v27 = vmul.f32 0.7978846, %v4960_v46  ;;  %v4773_v60 = vmul.f32 0.044715, %v10364_v58 }
0x1216   : > { %v4842_v8 = vmul.f32 %v4778_v0, %v10367_v4  ;;  %v4835_v61 = vmul.f32 %v4771_v28, %v10350_v47  ;;  %v4966_v16 = vadd.f32 %v4902_v11, %v10328_v56  ;;  %v4904_v43 = vmul.f32 %v4840_v1, %v10344_v35 }
0x1217   : > { %v10393_v19 = vadd.f32 %v4540_v45, %v11071_v7  ;;  %v5026_v44 = vmul.f32 0.7978846, %v4962_v37  ;;  %v4775_v17 = vmul.f32 0.044715, %v10379_v13  ;;  %v10398_v24 = vadd.f32 %v10321_v25, %v9891_v15 }
0x1218   : > { %v4844_v46 = vmul.f32 %v4780_v22, %v10373_v51  ;;  %v5028_v0 = vmul.f32 0.7978846, %v4964_v48  ;;  %v4906_v52 = vmul.f32 %v4842_v8, %v10367_v4  ;;  %v10404_v11 = vadd.f32 %v4653_v2, %v11072_v32 }
0x1219   : > { %v4782_v28 = vmul.f32 0.044715, %v10393_v19  ;;  %7701 = vtanh.f32 %v5024_v27  ;;  %v4895_v7 = vmul.f32 %v4831_v36, %v10316_v14  ;;  %v10408_v1 = vmul.f32 %v4833_v3, %v10337_v50 }
0x121a   : > { %v4837_v37 = vmul.f32 %v4773_v60, %v10364_v58  ;;  %v10411_v25 = vpop.eup %7691  ;;  %v5030_v45 = vmul.f32 0.7978846, %v4966_v16  ;;  %v4968_v48 = vadd.f32 %v4904_v43, %v10344_v35  ;;  %v10415_v22 = vadd.f32 %v4538_v9, %v9889_v12  ;;  %v4542_v60 = vpop.f32.mrf.mxu1 }
0x121b   : > { %v4784_v8 = vmul.f32 0.044715, %v10404_v11  ;;  %v10418_v32 = vpop.eup %7693  ;;  %7703 = vtanh.f32 %v5026_v44  ;;  %v10421_v36 = vmul.f32 %v4835_v61, %v10350_v47  ;;  %v4908_v3 = vmul.f32 %v4844_v46, %v10373_v51  ;;  %v4655_v35 = vpop.f32.mrf.mxu0 }
0x121c   : > { %v4846_v27 = vmul.f32 %v4782_v28, %v10393_v19  ;;  %7705 = vtanh.f32 %v5028_v0  ;;  %v4839_v2 = vmul.f32 %v4775_v17, %v10379_v13  ;;  %v4777_v16 = vmul.f32 0.044715, %v10398_v24 }
0x121d   : > { %v4970_v9 = vadd.f32 %v4906_v52, %v10367_v4  ;;  %v10429_v43 = vadd.f32 %v4651_v21, %v9891_v15  ;;  %v4848_v44 = vmul.f32 %v4784_v8, %v10404_v11  ;;  %v4947_v61 = vadd.f32 %v10290_v49, %v10229_v59 }
0x121e   : > { %v4951_v46 = vadd.f32 %v10313_v20, %v10244_v63  ;;  %7707 = vtanh.f32 %v5030_v45  ;;  %v5032_v0 = vmul.f32 0.7978846, %v4968_v48  ;;  %v4779_v17 = vmul.f32 0.044715, %v10415_v22 }
0x121f   : > { %v10438_v28 = vadd.f32 %v4542_v60, %v9889_v12  ;;  %v4972_v52 = vadd.f32 %v4908_v3, %v10373_v51  ;;  %v4910_v21 = vmul.f32 %v4846_v27, %v10393_v19  ;;  %v5011_v4 = vmul.f32 0.7978846, %v4947_v61 }
0x1220   : > { %v5015_v8 = vmul.f32 0.7978846, %v4951_v46  ;;  %v10442_v5 = vpop.eup %7695  ;;  %v5034_v56 = vmul.f32 0.7978846, %v4970_v9  ;;  %v10445_v59 = vadd.f32 %v4655_v35, %v9891_v15  ;;  %v4949_v49 = vadd.f32 %v10310_v26, %v10235_v57 }
0x1221   : > { %v4953_v20 = vadd.f32 %v10324_v54, %v10247_v18  ;;  %v10451_v12 = vpop.eup %7697  ;;  %v4841_v45 = vmul.f32 %v4777_v16, %v10398_v24  ;;  %v4781_v48 = vmul.f32 0.044715, %v10429_v43  ;;  %v4912_v3 = vmul.f32 %v4848_v44, %v10404_v11 }
0x1222   : > { %7709 = vtanh.f32 %v5011_v4  ;;  %v10456_v27 = vpop.eup %7699  ;;  %v4843_v15 = vmul.f32 %v4779_v17, %v10415_v22  ;;  %v5013_v35 = vmul.f32 0.7978846, %v4949_v49  ;;  %v5036_v57 = vmul.f32 0.7978846, %v4972_v52 }
0x1223   : > { %7711 = vtanh.f32 %v5032_v0  ;;  %v5017_v60 = vmul.f32 0.7978846, %v4953_v20  ;;  %v4974_v26 = vadd.f32 %v4910_v21, %v10393_v19  ;;  %v4783_v54 = vmul.f32 0.044715, %v10438_v28 }
0x1224   : > { %7713 = vtanh.f32 %v5015_v8  ;;  %v4901_v16 = vmul.f32 %v4837_v37, %v10364_v58  ;;  %v4903_v9 = vmul.f32 %v4839_v2, %v10379_v13  ;;  %v4785_v4 = vmul.f32 0.044715, %v10445_v59 }
0x1225   : > { %7715 = vtanh.f32 %v5034_v56  ;;  %v4845_v44 = vmul.f32 %v4781_v48, %v10429_v43  ;;  %v4976_v61 = vadd.f32 %v4912_v3, %v10404_v11  ;;  %v4955_v46 = vadd.f32 %v10347_v39, %v10276_v34 }
0x1226   : > { %7717 = vtanh.f32 %v5013_v35  ;;  %v10468_v0 = vpop.eup %7701  ;;  %v4905_v17 = vmul.f32 %v4841_v45, %v10398_v24  ;;  %v10472_v52 = vmul.f32 %v4843_v15, %v10415_v22  ;;  %v4959_v56 = vadd.f32 %v4895_v7, %v10316_v14 }
0x1227   : > { %7719 = vtanh.f32 %v5017_v60  ;;  %v5038_v37 = vmul.f32 0.7978846, %v4974_v26  ;;  %v4847_v2 = vmul.f32 %v4783_v54, %v10438_v28  ;;  %v5019_v21 = vmul.f32 0.7978846, %v4955_v46 }
0x1228   : > { %7721 = vtanh.f32 %v5036_v57  ;;  %v10476_v8 = vpop.eup %7703  ;;  %v4849_v49 = vmul.f32 %v4785_v4, %v10445_v59  ;;  %v5023_v39 = vmul.f32 0.7978846, %v4959_v56  ;;  %v4957_v20 = vadd.f32 %v10356_v10, %v10284_v31 }
0x1229   : > { %v4961_v45 = vadd.f32 %v10408_v1, %v10337_v50  ;;  %v10483_v48 = vpop.eup %7705  ;;  %v10486_v7 = vmul.f32 %v4845_v44, %v10429_v43  ;;  %v5040_v3 = vmul.f32 0.7978846, %v4976_v61  ;;  %v5138_v15 = vadd.f32 1.0, %v10375_v42 }
0x122a   : > { %7723 = vtanh.f32 %v5019_v21  ;;  %v5142_v35 = vadd.f32 1.0, %v10411_v25  ;;  %v5021_v60 = vmul.f32 0.7978846, %v4957_v20  ;;  %v10493_v10 = vmul.f32 %v4847_v2, %v10438_v28 }
0x122b   : > { %7725 = vtanh.f32 %v5023_v39  ;;  %v5025_v57 = vmul.f32 0.7978846, %v4961_v45  ;;  %v10490_v26 = vpop.eup %7707  ;;  %v4695_v1 = vmul.f32 0.5, %v10244_v63  ;;  %v4697_v54 = vmul.f32 0.5, %v10247_v18 }
0x122c   : > { %7727 = vtanh.f32 %v5038_v37  ;;  %v10498_v4 = vmul.f32 %v4849_v49, %v10445_v59  ;;  %v4694_v42 = vmul.f32 0.5, %v10223_v55  ;;  %v5140_v25 = vadd.f32 1.0, %v10385_v23 }
0x122d   : > { %7729 = vtanh.f32 %v5021_v60  ;;  %v5202_v44 = vmul.f32 %v5138_v15, %v10254_v41  ;;  %v5144_v61 = vadd.f32 1.0, %v10418_v32  ;;  %v4963_v46 = vadd.f32 %v10421_v36, %v10350_v47 }
0x122e   : > { %7731 = vtanh.f32 %v5025_v57  ;;  %v5206_v63 = vmul.f32 %v5142_v35, %v4694_v42  ;;  %v4696_v18 = vmul.f32 0.5, %v10226_v38  ;;  %v4967_v37 = vadd.f32 %v4903_v9, %v10379_v13 }
0x122f   : > { %v7710_v56 = vpop.eup %7709  ;;  %7733 = vtanh.f32 %v5040_v3  ;;  %v4699_v23 = vmul.f32 0.5, %v10276_v34  ;;  %v5027_v21 = vmul.f32 0.7978846, %v4963_v46  ;;  %v4965_v41 = vadd.f32 %v4901_v16, %v10364_v58 }
0x1230   : > { %v10508_v2 = vpop.eup %7711  ;;  %v5139_v55 = vadd.f32 1.0, %v7710_v56  ;;  %v5204_v49 = vmul.f32 %v5140_v25, %v10259_v29  ;;  %v4703_v36 = vmul.f32 0.5, %v10316_v14  ;;  %v5031_v39 = vmul.f32 0.7978846, %v4967_v37 }
0x1231   : > { %v7714_v32 = vpop.eup %7713  ;;  %v4969_v20 = vadd.f32 %v4905_v17, %v10398_v24  ;;  %v5208_v9 = vmul.f32 %v5144_v61, %v4696_v18  ;;  %7735 = vtanh.f32 %v5027_v21  ;;  %v5029_v3 = vmul.f32 0.7978846, %v4965_v41 }
0x1232   : > { %v10515_v45 = vpop.eup %7715  ;;  %v5143_v38 = vadd.f32 1.0, %v7714_v32  ;;  %v5250_v35 = vpack.c.bf16 %v5206_v63, %v5202_v44  ;;  %v5146_v34 = vadd.f32 1.0, %v10442_v5  ;;  %7737 = vtanh.f32 %v5031_v39 }
0x1233   : > { %v7718_v15 = vpop.eup %7717  ;;  %v5033_v16 = vmul.f32 0.7978846, %v4969_v20  ;;  %v5203_v29 = vmul.f32 %v5139_v55, %v10271_v33  ;;  %7739 = vtanh.f32 %v5029_v3  ;;  %v4701_v25 = vmul.f32 0.5, %v10284_v31 }
0x1234   : > { %v7720_v60 = vpop.eup %7719  ;;  %v5207_v57 = vmul.f32 %v5143_v38, %v4695_v1  ;;  %v5141_v14 = vadd.f32 1.0, %v7718_v15  ;;  %v4705_v61 = vmul.f32 0.5, %v10337_v50  ;;  %v5252_v44 = vpack.c.bf16 %v5208_v9, %v5204_v49 }
0x1235   : > { %v10519_v42 = vpop.eup %7721  ;;  %v5145_v17 = vadd.f32 1.0, %v7720_v60  ;;  %7741 = vtanh.f32 %v5033_v16  ;;  %v4698_v5 = vmul.f32 0.5, %v10238_v30  ;;  %v5150_v56 = vadd.f32 1.0, %v10456_v27 }
0x1236   : > { %v5251_v46 = vpack.c.bf16 %v5207_v57, %v5203_v29  ;;  %v5205_v33 = vmul.f32 %v5141_v14, %v10287_v40  ;;  %v4702_v18 = vmul.f32 0.5, %v10264_v53  ;;  %v5148_v37 = vadd.f32 1.0, %v10451_v12 }
0x1237   : > { %v7724_v63 = vpop.eup %7723  ;;  %v5209_v1 = vmul.f32 %v5145_v17, %v4697_v54  ;;  %v5210_v21 = vmul.f32 %v5146_v34, %v4698_v5  ;;  %v4700_v50 = vmul.f32 0.5, %v10241_v6  ;;  %v4971_v41 = vadd.f32 %v10472_v52, %v10415_v22 }
0x1238   : > { %v7726_v55 = vpop.eup %7725  ;;  %5593 = vmatprep.mubr.bf16.mxu1 %v5251_v46  ;;  %v5147_v31 = vadd.f32 1.0, %v7724_v63  ;;  %v4704_v40 = vmul.f32 0.5, %v10268_v62  ;;  %v5152_v53 = vadd.f32 1.0, %v10468_v0  ;;  %v5214_v12 = vmul.f32 %v5150_v56, %v4702_v18 }
0x1239   : > { %v10531_v30 = vpop.eup %7727  ;;  %v5253_v27 = vpack.c.bf16 %v5209_v1, %v5205_v33  ;;  %5594 = vmatmul.mubr.bf16.gmra.mxu1 %v5250_v35  ;;  %v5151_v32 = vadd.f32 1.0, %v7726_v55  ;;  %v4707_v49 = vmul.f32 0.5, %v10350_v47  ;;  %v4975_v39 = vadd.f32 %v10493_v10, %v10438_v28 }
0x123a   : > { %v7730_v54 = vpop.eup %7729  ;;  %v5035_v6 = vmul.f32 0.7978846, %v4971_v41  ;;  %v5211_v52 = vmul.f32 %v5147_v31, %v4699_v23  ;;  %v5212_v3 = vmul.f32 %v5148_v37, %v4700_v50  ;;  %v4973_v0 = vadd.f32 %v10486_v7, %v10429_v43  ;;  %v11080_v50 = vld [vmem:[#allocation19_spill] sm:$0xff] }
0x123b   : > { %v7732_v20 = vpop.eup %7731  ;;  %5690 = vmatprep.mubr.bf16.mxu0 %v5253_v27  ;;  %v5215_v38 = vmul.f32 %v5151_v32, %v4703_v36  ;;  %v5149_v9 = vadd.f32 1.0, %v7730_v54  ;;  %v5039_v35 = vmul.f32 0.7978846, %v4975_v39  ;;  %v5216_v34 = vmul.f32 %v5152_v53, %v4704_v40  ;;  %v11081_v54 = vld [vmem:[#allocation14_spill] sm:$0xff] }
0x123c   : > { %v10538_v15 = vpop.eup %7733  ;;  %5691 = vmatmul.mubr.bf16.gmra.mxu0 %v5252_v44  ;;  %v5153_v62 = vadd.f32 1.0, %v7732_v20  ;;  %7743 = vtanh.f32 %v5035_v6  ;;  %v4711_v10 = vmul.f32 0.5, %v10379_v13  ;;  %v4977_v16 = vadd.f32 %v10498_v4, %v10445_v59 }
0x123d   : > { %v5255_v47 = vpack.c.bf16 %v5215_v38, %v5211_v52  ;;  %v5213_v23 = vmul.f32 %v5149_v9, %v4701_v25  ;;  %7745 = vtanh.f32 %v5039_v35  ;;  %v5037_v60 = vmul.f32 0.7978846, %v4973_v0  ;;  %v11078_v25 = vld [vmem:[#allocation15_spill] sm:$0xff] }
0x123e   : > { %v5217_v36 = vmul.f32 %v5153_v62, %v4705_v61  ;;  %v7736_v29 = vpop.eup %7735  ;;  %v5254_v57 = vpack.c.bf16 %v5214_v12, %v5210_v21  ;;  %v4709_v14 = vmul.f32 0.5, %v10364_v58  ;;  %v5158_v17 = vadd.f32 1.0, %v10490_v26  ;;  %v11079_v26 = vld [vmem:[#allocation11_spill] sm:$0xff] }
0x123f   : > { %5601 = vmatprep.mubr.bf16.mxu1 %v5255_v47  ;;  %v5041_v46 = vmul.f32 0.7978846, %v4977_v16  ;;  %v7738_v7 = vpop.eup %7737  ;;  %v5155_v5 = vadd.f32 1.0, %v7736_v29  ;;  %v4713_v13 = vmul.f32 0.5, %v10398_v24  ;;  %7747 = vtanh.f32 %v5037_v60  ;;  %v11082_v16 = vld [vmem:[#allocation13_spill] sm:$0xff] }
0x1240   : > { %v5257_v44 = vpack.c.bf16 %v5217_v36, %v5213_v23  ;;  %v7740_v56 = vpop.eup %7739  ;;  %v5159_v4 = vadd.f32 1.0, %v7738_v7  ;;  %v4710_v61 = vmul.f32 0.5, %v11078_v25  ;;  %v5154_v63 = vadd.f32 1.0, %v10476_v8 }
0x1241   : > { %5602 = vmatmul.mubr.bf16.gmra.mxu1 %v5254_v57  ;;  %7749 = vtanh.f32 %v5041_v46  ;;  %v5256_v58 = vpack.c.bf16 %v5216_v34, %v5212_v3  ;;  %v5157_v1 = vadd.f32 1.0, %v7740_v56  ;;  %v4706_v18 = vmul.f32 0.5, %v11079_v26 }
0x1242   : > { %v7742_v33 = vpop.eup %7741  ;;  %5698 = vmatprep.mubr.bf16.mxu0 %v5257_v44  ;;  %v5160_v37 = vadd.f32 1.0, %v10508_v2  ;;  %v5219_v55 = vmul.f32 %v5155_v5, %v4707_v49  ;;  %v5223_v31 = vmul.f32 %v5159_v4, %v4711_v10  ;;  %v5222_v21 = vmul.f32 %v5158_v17, %v4710_v61 }
0x1243   : > { %v5161_v24 = vadd.f32 1.0, %v7742_v33  ;;  %v4712_v41 = vmul.f32 0.5, %v11080_v50  ;;  %v5156_v27 = vadd.f32 1.0, %v10483_v48  ;;  %v5221_v8 = vmul.f32 %v5157_v1, %v4709_v14 }
0x1244   : > { %5699 = vmatmul.mubr.bf16.gmra.mxu0 %v5256_v58  ;;  %v5259_v32 = vpack.c.bf16 %v5223_v31, %v5219_v55  ;;  %v5218_v53 = vmul.f32 %v5154_v63, %v4706_v18  ;;  %v4708_v12 = vmul.f32 0.5, %v11081_v54  ;;  %v5166_v52 = vadd.f32 1.0, %v10531_v30 }
0x1245   : > { %v5225_v40 = vmul.f32 %v5161_v24, %v4713_v13  ;;  %v5224_v39 = vmul.f32 %v5160_v37, %v4712_v41  ;;  %v4718_v48 = vmul.f32 0.5, %v10393_v19  ;;  %v5162_v62 = vadd.f32 1.0, %v10515_v45  ;;  %v11083_v41 = vld [vmem:[#allocation8_spill] sm:$0xff] }
0x1246   : > { %5609 = vmatprep.mubr.bf16.mxu1 %v5259_v32  ;;  %v5258_v20 = vpack.c.bf16 %v5222_v21, %v5218_v53  ;;  %v5220_v2 = vmul.f32 %v5156_v27, %v4708_v12  ;;  %v4715_v35 = vmul.f32 0.5, %v10415_v22  ;;  %v4719_v0 = vmul.f32 0.5, %v10438_v28 }
0x1247   : > { %v5261_v6 = vpack.c.bf16 %v5225_v40, %v5221_v8  ;;  %v5168_v34 = vadd.f32 1.0, %v10538_v15  ;;  %v4714_v23 = vmul.f32 0.5, %v11082_v16  ;;  %v5230_v36 = vmul.f32 %v5166_v52, %v4718_v48 }
0x1248   : > { %v5260_v38 = vpack.c.bf16 %v5224_v39, %v5220_v2  ;;  %v4720_v30 = vmul.f32 0.5, %v10404_v11  ;;  %v5164_v45 = vadd.f32 1.0, %v10519_v42  ;;  %v4717_v14 = vmul.f32 0.5, %v10429_v43 }
0x1249   : > { %v7744_v49 = vpop.eup %7743  ;;  %5706 = vmatprep.mubr.bf16.mxu0 %v5261_v6  ;;  %5610 = vmatmul.mubr.bf16.gmra.mxu1 %v5258_v20  ;;  %v4721_v22 = vmul.f32 0.5, %v10445_v59  ;;  %v5226_v17 = vmul.f32 %v5162_v62, %v4714_v23  ;;  %v4716_v46 = vmul.f32 0.5, %v10373_v51  ;;  %v10572_v59 = vld [vmem:[%s684_s27] ss:$0 sm:$0xff] }
0x124a   : > { %v5163_v9 = vadd.f32 1.0, %v7744_v49  ;;  %v7746_v3 = vpop.eup %7745  ;;  %v5232_v7 = vmul.f32 %v5168_v34, %v4720_v30  ;;  %v11084_v20 = vld [vmem:[#allocation10_spill] sm:$0xff] }
0x124b   : > { %v5167_v47 = vadd.f32 1.0, %v7746_v3  ;;  %v5262_v11 = vpack.c.bf16 %v5230_v36, %v5226_v17  ;;  %v5228_v13 = vmul.f32 %v5164_v45, %v4716_v46 }
0x124c   : > { %5707 = vmatmul.mubr.bf16.gmra.mxu0 %v5260_v38  ;;  %v7748_v10 = vpop.eup %7747  ;;  %v5227_v29 = vmul.f32 %v5163_v9, %v4715_v35 }
0x124d   : > { %v5231_v57 = vmul.f32 %v5167_v47, %v4719_v0  ;;  %v5165_v19 = vadd.f32 1.0, %v7748_v10  ;;  %v5264_v4 = vpack.c.bf16 %v5232_v7, %v5228_v13  ;;  %v11085_v0 = vld [vmem:[#allocation31_spill] sm:$0xff] }
0x124e   : > { %v7750_v60 = vpop.eup %7749 }
0x124f   : > { %v5169_v28 = vadd.f32 1.0, %v7750_v60  ;;  %v5263_v15 = vpack.c.bf16 %v5231_v57, %v5227_v29  ;;  %v5229_v44 = vmul.f32 %v5165_v19, %v4717_v14  ;;  %v11086_v57 = vld [vmem:[#allocation33_spill] sm:$0xff] }
0x1251   : > { %v5233_v5 = vmul.f32 %v5169_v28, %v4721_v22  ;;  %5617 = vmatprep.mubr.bf16.mxu1 %v5263_v15 }
0x1252   : > { %5618 = vmatmul.mubr.bf16.gmra.mxu1 %v5262_v11 }
0x1253   : > { %v5265_v56 = vpack.c.bf16 %v5233_v5, %v5229_v44  ;;  %v11087_v44 = vld [vmem:[#allocation6_spill] sm:$0xff] }
0x1255   : > { %5714 = vmatprep.mubr.bf16.mxu0 %v5265_v56 }
0x1256   : > { %5715 = vmatmul.mubr.bf16.gmra.mxu0 %v5264_v4 }
0x127e   : > { %v6690_v43 = vpop.f32.mrf.mxu1 }
0x1280   : > { %v6691_v42 = vpop.f32.mrf.mxu1 }
0x1281   : > { %v6692_v51 = vadd.f32 %v6691_v42, %v6690_v43 }
0x1282   : > { %v6693_v25 = vpop.f32.mrf.mxu1 }
0x1283   : > { %v6754_v61 = vpop.f32.mrf.mxu0  ;;  %v5564_v63 = vadd.f32 %v6692_v51, %v10572_v59 }
0x1284   : > { %v6694_v33 = vpop.f32.mrf.mxu1 }
0x1285   : > { %v6755_v58 = vpop.f32.mrf.mxu0  ;;  %v6695_v1 = vadd.f32 %v6694_v33, %v6693_v25 }
0x1286   : > { %v6756_v26 = vadd.f32 %v6755_v58, %v6754_v61  ;;  %v6696_v18 = vpop.f32.mrf.mxu1  ;;  %v11088_v61 = vld [vmem:[#allocation30_spill] sm:$0xff] }
0x1287   : > { %v6757_v37 = vpop.f32.mrf.mxu0  ;;  %v5567_v31 = vadd.f32 %v6695_v1, %v10572_v59 }
0x1288   : > { %v5661_v55 = vadd.f32 %v6756_v26, %v5564_v63  ;;  %v6697_v24 = vpop.f32.mrf.mxu1 }
0x1289   : > { %v6758_v21 = vpop.f32.mrf.mxu0  ;;  %v6698_v50 = vadd.f32 %v6697_v24, %v6696_v18 }
0x128a   : > { %v10577_v27 = vadd.f32 %v5661_v55, %v11083_v41  ;;  %v6759_v32 = vadd.f32 %v6758_v21, %v6757_v37  ;;  %v6699_v8 = vpop.f32.mrf.mxu1  ;;  %v11089_v37 = vld [vmem:[#allocation7_spill] sm:$0xff]  ;;  %v11090_v21 = vld [vmem:[#allocation32_spill] sm:$0xff] }
0x128b   : > { %v6760_v40 = vpop.f32.mrf.mxu0  ;;  %v5572_v54 = vadd.f32 %v6698_v50, %v10572_v59 }
0x128c   : > { %v5664_v53 = vadd.f32 %v6759_v32, %v5567_v31  ;;  %v6700_v12 = vpop.f32.mrf.mxu1 }
0x128d   : > { %v6761_v39 = vpop.f32.mrf.mxu0  ;;  %v6701_v6 = vadd.f32 %v6700_v12, %v6699_v8 }
0x128e   : > { %v10581_v2 = vadd.f32 %v5664_v53, %v11084_v20  ;;  %v6762_v49 = vadd.f32 %v6761_v39, %v6760_v40  ;;  %v6702_v52 = vpop.f32.mrf.mxu1 }
0x128f   : > { %v6763_v38 = vpop.f32.mrf.mxu0  ;;  %v5575_v3 = vadd.f32 %v6701_v6, %v10572_v59 }
0x1290   : > { %v5669_v9 = vadd.f32 %v6762_v49, %v5572_v54  ;;  %v6703_v48 = vpop.f32.mrf.mxu1 }
0x1291   : > { %v6764_v62 = vpop.f32.mrf.mxu0  ;;  %v6704_v35 = vadd.f32 %v6703_v48, %v6702_v52  ;;  %v11091_v48 = vld [vmem:[#allocation23_spill] sm:$0xff] }
0x1292   : > { %v10585_v47 = vadd.f32 %v5669_v9, %v11085_v0  ;;  %v6765_v34 = vadd.f32 %v6764_v62, %v6763_v38  ;;  %v6705_v10 = vpop.f32.mrf.mxu1 }
0x1293   : > { %v6766_v16 = vpop.f32.mrf.mxu0  ;;  %v5580_v36 = vadd.f32 %v6704_v35, %v10572_v59 }
0x1294   : > { %v5672_v23 = vadd.f32 %v6765_v34, %v5575_v3  ;;  %v6706_v30 = vpop.f32.mrf.mxu1 }
0x1295   : > { %v6767_v60 = vpop.f32.mrf.mxu0  ;;  %v6707_v29 = vadd.f32 %v6706_v30, %v6705_v10 }
0x1296   : > { %v10589_v19 = vadd.f32 %v5672_v23, %v11086_v57  ;;  %v6768_v45 = vadd.f32 %v6767_v60, %v6766_v16  ;;  %v6708_v14 = vpop.f32.mrf.mxu1  ;;  %v11092_v60 = vld [vmem:[#allocation27_spill] sm:$0xff] }
0x1297   : > { %v6769_v22 = vpop.f32.mrf.mxu0  ;;  %v5583_v17 = vadd.f32 %v6707_v29, %v10572_v59 }
0x1298   : > { %v5677_v28 = vadd.f32 %v6768_v45, %v5580_v36  ;;  %v6709_v15 = vpop.f32.mrf.mxu1 }
0x1299   : > { %v6770_v46 = vpop.f32.mrf.mxu0  ;;  %v6710_v7 = vadd.f32 %v6709_v15, %v6708_v14 }
0x129a   : > { %v10593_v5 = vadd.f32 %v5677_v28, %v11087_v44  ;;  %v6771_v11 = vadd.f32 %v6770_v46, %v6769_v22  ;;  %v6711_v13 = vpop.f32.mrf.mxu1 }
0x129b   : > { %v6772_v56 = vpop.f32.mrf.mxu0  ;;  %v5588_v43 = vadd.f32 %v6710_v7, %v10572_v59  ;;  %v11093_v7 = vld [vmem:[#allocation25_spill] sm:$0xff] }
0x129c   : > { %v5680_v4 = vadd.f32 %v6771_v11, %v5583_v17  ;;  %v6712_v42 = vpop.f32.mrf.mxu1 }
0x129d   : > { %v6773_v51 = vpop.f32.mrf.mxu0  ;;  %v6713_v25 = vadd.f32 %v6712_v42, %v6711_v13 }
0x129e   : > { %v10597_v63 = vadd.f32 %v5680_v4, %v11088_v61  ;;  %v6774_v33 = vadd.f32 %v6773_v51, %v6772_v56  ;;  %v11094_v61 = vld [vmem:[#allocation29_spill] sm:$0xff] }
0x129f   : > { %v6775_v58 = vpop.f32.mrf.mxu0  ;;  %v5591_v26 = vadd.f32 %v6713_v25, %v10572_v59 }
0x12a0   : > { %v5685_v1 = vadd.f32 %v6774_v33, %v5588_v43 }
0x12a1   : > { %v6776_v18 = vpop.f32.mrf.mxu0 }
0x12a2   : > { %v10601_v55 = vadd.f32 %v5685_v1, %v11089_v37  ;;  %v6777_v31 = vadd.f32 %v6776_v18, %v6775_v58 }
0x12a4   : > { %v5688_v24 = vadd.f32 %v6777_v31, %v5591_v26 }
0x12a6   : > { %v10604_v50 = vadd.f32 %v5688_v24, %v11090_v21  ;;  %v11095_v21 = vld [vmem:[#allocation24_spill] sm:$0xff] }
0x12f9   : > { %v6714_v41 = vpop.f32.mrf.mxu1 }
0x12fb   : > { %v6715_v32 = vpop.f32.mrf.mxu1 }
0x12fc   : > { %v6778_v8 = vpop.f32.mrf.mxu0  ;;  %v6716_v40 = vadd.f32 %v6715_v32, %v6714_v41 }
0x12fd   : > { %v6717_v53 = vpop.f32.mrf.mxu1 }
0x12fe   : > { %v5596_v54 = vadd.f32 %v6716_v40, %v10572_v59  ;;  %v6779_v12 = vpop.f32.mrf.mxu0 }
0x12ff   : > { %v6780_v39 = vadd.f32 %v6779_v12, %v6778_v8  ;;  %v6718_v6 = vpop.f32.mrf.mxu1 }
0x1300   : > { %v6781_v20 = vpop.f32.mrf.mxu0  ;;  %v6719_v49 = vadd.f32 %v6718_v6, %v6717_v53 }
0x1301   : > { %v5693_v52 = vadd.f32 %v6780_v39, %v5596_v54  ;;  %v6720_v38 = vpop.f32.mrf.mxu1  ;;  %v11096_v39 = vld [vmem:[#allocation28_spill] sm:$0xff] }
0x1302   : > { %v5599_v9 = vadd.f32 %v6719_v49, %v10572_v59  ;;  %v6782_v3 = vpop.f32.mrf.mxu0 }
0x1303   : > { %v10609_v62 = vadd.f32 %v5693_v52, %v11091_v48  ;;  %v6783_v35 = vadd.f32 %v6782_v3, %v6781_v20  ;;  %v6721_v0 = vpop.f32.mrf.mxu1 }
0x1304   : > { %v6784_v34 = vpop.f32.mrf.mxu0  ;;  %v6722_v10 = vadd.f32 %v6721_v0, %v6720_v38 }
0x1305   : > { %v5696_v16 = vadd.f32 %v6783_v35, %v5599_v9  ;;  %v6723_v23 = vpop.f32.mrf.mxu1 }
0x1306   : > { %v5604_v36 = vadd.f32 %v6722_v10, %v10572_v59  ;;  %v6785_v30 = vpop.f32.mrf.mxu0  ;;  %v11097_v10 = vld [vmem:[#allocation22_spill] sm:$0xff] }
0x1307   : > { %v10613_v29 = vadd.f32 %v5696_v16, %v11092_v60  ;;  %v6786_v57 = vadd.f32 %v6785_v30, %v6784_v34  ;;  %v6724_v45 = vpop.f32.mrf.mxu1  ;;  %v11098_v30 = vld [vmem:[#allocation26_spill] sm:$0xff] }
0x1308   : > { %v6787_v14 = vpop.f32.mrf.mxu0  ;;  %v6725_v22 = vadd.f32 %v6724_v45, %v6723_v23 }
0x1309   : > { %v5701_v28 = vadd.f32 %v6786_v57, %v5604_v36  ;;  %v6726_v17 = vpop.f32.mrf.mxu1 }
0x130a   : > { %v5607_v15 = vadd.f32 %v6725_v22, %v10572_v59  ;;  %v6788_v46 = vpop.f32.mrf.mxu0 }
0x130b   : > { %v10617_v44 = vadd.f32 %v5701_v28, %v11093_v7  ;;  %v6789_v11 = vadd.f32 %v6788_v46, %v6787_v14  ;;  %v6727_v13 = vpop.f32.mrf.mxu1 }
0x130c   : > { %v6790_v56 = vpop.f32.mrf.mxu0  ;;  %v6728_v4 = vadd.f32 %v6727_v13, %v6726_v17 }
0x130d   : > { %v5704_v43 = vadd.f32 %v6789_v11, %v5607_v15  ;;  %v6729_v42 = vpop.f32.mrf.mxu1 }
0x130e   : > { %v5612_v51 = vadd.f32 %v6728_v4, %v10572_v59  ;;  %v6791_v25 = vpop.f32.mrf.mxu0 }
0x130f   : > { %v10621_v33 = vadd.f32 %v5704_v43, %v11094_v61  ;;  %v6792_v58 = vadd.f32 %v6791_v25, %v6790_v56  ;;  %v6730_v1 = vpop.f32.mrf.mxu1 }
0x1310   : > { %v6793_v26 = vpop.f32.mrf.mxu0  ;;  %v6731_v18 = vadd.f32 %v6730_v1, %v6729_v42 }
0x1311   : > { %v5709_v37 = vadd.f32 %v6792_v58, %v5612_v51 }
0x1312   : > { %v5615_v31 = vadd.f32 %v6731_v18, %v10572_v59  ;;  %v6794_v24 = vpop.f32.mrf.mxu0  ;;  %v6732_v8 = vpop.f32.mrf.mxu1 }
0x1313   : > { %v10625_v41 = vadd.f32 %v5709_v37, %v11095_v21  ;;  %v6795_v32 = vadd.f32 %v6794_v24, %v6793_v26 }
0x1314   : > { %v6733_v53 = vpop.f32.mrf.mxu1 }
0x1315   : > { %v5712_v40 = vadd.f32 %v6795_v32, %v5615_v31  ;;  %v6734_v12 = vadd.f32 %v6733_v53, %v6732_v8 }
0x1316   : > { %v6796_v54 = vpop.f32.mrf.mxu0  ;;  %v6735_v20 = vpop.f32.mrf.mxu1 }
0x1317   : > { %v10628_v6 = vadd.f32 %v5712_v40, %v11096_v39  ;;  %v5620_v49 = vadd.f32 %v6734_v12, %v10572_v59 }
0x1318   : > { %v6797_v52 = vpop.f32.mrf.mxu0  ;;  %v6736_v9 = vpop.f32.mrf.mxu1 }
0x1319   : > { %v6798_v38 = vadd.f32 %v6797_v52, %v6796_v54  ;;  %v6737_v48 = vadd.f32 %v6736_v9, %v6735_v20 }
0x131a   : > { %v6799_v3 = vpop.f32.mrf.mxu0 }
0x131b   : > { %v5717_v35 = vadd.f32 %v6798_v38, %v5620_v49  ;;  %v5623_v0 = vadd.f32 %v6737_v48, %v10572_v59 }
0x131c   : > { %v6800_v34 = vpop.f32.mrf.mxu0 }
0x131d   : > { %v10633_v16 = vadd.f32 %v5717_v35, %v11097_v10  ;;  %v6801_v23 = vadd.f32 %v6800_v34, %v6799_v3  ;;  %5742 = sbr.rel (%p6424_p6) target bundleno = 4906 (0x132a), region = 88 }
0x131f   : > { %v5720_v36 = vadd.f32 %v6801_v23, %v5623_v0 }
0x1321   : > { %v10636_v60 = vadd.f32 %v5720_v36, %v11098_v30 }
0x1322   : > { %5743 = vst [vmem:[#allocation2 + $0x30] sm:$0xff] %v10577_v27  ;;  %5744 = vst [vmem:[#allocation2] sm:$0xff] %v10581_v2 }
0x1323   : > { %5745 = vst [vmem:[#allocation2 + $0x58] sm:$0xff] %v10585_v47  ;;  %5746 = vst [vmem:[#allocation2 + $0x18] sm:$0xff] %v10589_v19 }
0x1324   : > { %5747 = vst [vmem:[#allocation2 + $0x50] sm:$0xff] %v10593_v5  ;;  %5748 = vst [vmem:[#allocation2 + $0x68] sm:$0xff] %v10597_v63 }
0x1325   : > { %5749 = vst [vmem:[#allocation2 + $0x8] sm:$0xff] %v10601_v55  ;;  %5750 = vst [vmem:[#allocation2 + $0x48] sm:$0xff] %v10604_v50 }
0x1326   : > { %5751 = vst [vmem:[#allocation2 + $0x40] sm:$0xff] %v10609_v62  ;;  %5752 = vst [vmem:[#allocation2 + $0x20] sm:$0xff] %v10613_v29 }
0x1327   : > { %5753 = vst [vmem:[#allocation2 + $0x10] sm:$0xff] %v10617_v44  ;;  %5754 = vst [vmem:[#allocation2 + $0x38] sm:$0xff] %v10621_v33 }
0x1328   : > { %5755 = vst [vmem:[#allocation2 + $0x60] sm:$0xff] %v10625_v41  ;;  %5756 = vst [vmem:[#allocation2 + $0x70] sm:$0xff] %v10628_v6 }
0x1329   : > { %5757 = vst [vmem:[#allocation2 + $0x78] sm:$0xff] %v10633_v16  ;;  %5758 = vst [vmem:[#allocation2 + $0x28] sm:$0xff] %v10636_v60 }
0x132a PF: > { %p6425_p7 = scmp.ne.s32.totalorder %s7825_s18, 1 }
0x132b   : > { %s11099_s13 = sld [smem:[#allocation36_spill]] (!%p6425_p7) }
0x132c   : > { %5762 = sbr.rel (%p6425_p7) target bundleno = 5254 (0x1486), region = 92  ;;  %s11100_s14 = sld [smem:[#allocation37_spill]] (!%p6425_p7) }
0x132d   : > { %s11101_s1 = sld [smem:[#allocation38_spill]] (!%p6425_p7) }
0x1331   : > { %5765 = vadd.xlane.f32.xlu0 %v10577_v27  ;;  %5769 = vadd.xlane.f32.xlu1 %v10585_v47 }
0x1335   : > { %5767 = vadd.xlane.f32.xlu0 %v10581_v2  ;;  %5771 = vadd.xlane.f32.xlu1 %v10589_v19 }
0x1339   : > { %5773 = vadd.xlane.f32.xlu0 %v10593_v5  ;;  %5775 = vadd.xlane.f32.xlu1 %v10597_v63 }
0x133d   : > { %5777 = vadd.xlane.f32.xlu0 %v10601_v55  ;;  %5779 = vadd.xlane.f32.xlu1 %v10604_v50 }
0x1341   : > { %5781 = vadd.xlane.f32.xlu0 %v10609_v62  ;;  %5783 = vadd.xlane.f32.xlu1 %v10613_v29 }
0x1345   : > { %5785 = vadd.xlane.f32.xlu0 %v10617_v44  ;;  %5787 = vadd.xlane.f32.xlu1 %v10621_v33 }
0x1349   : > { %5789 = vadd.xlane.f32.xlu0 %v10625_v41  ;;  %5791 = vadd.xlane.f32.xlu1 %v10628_v6 }
0x134d   : > { %5793 = vadd.xlane.f32.xlu0 %v10633_v16  ;;  %5795 = vadd.xlane.f32.xlu1 %v10636_v60 }
0x13ba   : > { %v5766_v59 = vpop.xlane.xlu0 %5765  ;;  %v5770_v57 = vpop.xlane.xlu1 %5769 }
0x13bb   : > { %v5797_v45 = vmul.f32 0.0078125, %v5766_v59  ;;  %v5799_v14 = vmul.f32 0.0078125, %v5770_v57 }
0x13bd   : > { %v10673_v22 = vsub.f32 %v10577_v27, %v5797_v45  ;;  %v10676_v28 = vsub.f32 %v10585_v47, %v5799_v14 }
0x13be   : > { %v5768_v17 = vpop.xlane.xlu0 %5767  ;;  %v5772_v15 = vpop.xlane.xlu1 %5771 }
0x13bf   : > { %v5798_v46 = vmul.f32 0.0078125, %v5768_v17  ;;  %v5829_v7 = vmul.f32 %v10673_v22, %v10673_v22  ;;  %v5800_v11 = vmul.f32 0.0078125, %v5772_v15  ;;  %v5831_v27 = vmul.f32 %v10676_v28, %v10676_v28 }
0x13c1   : > { %v10681_v13 = vsub.f32 %v10581_v2, %v5798_v46  ;;  %5845 = vadd.xlane.f32.xlu0 %v5829_v7  ;;  %v10684_v56 = vsub.f32 %v10589_v19, %v5800_v11 }
0x13c2   : > { %v5774_v4 = vpop.xlane.xlu0 %5773  ;;  %v5776_v47 = vpop.xlane.xlu1 %5775 }
0x13c3   : > { %v5801_v43 = vmul.f32 0.0078125, %v5774_v4  ;;  %v5830_v42 = vmul.f32 %v10681_v13, %v10681_v13  ;;  %v5802_v51 = vmul.f32 0.0078125, %v5776_v47  ;;  %v5832_v19 = vmul.f32 %v10684_v56, %v10684_v56 }
0x13c5   : > { %v10691_v25 = vsub.f32 %v10593_v5, %v5801_v43  ;;  %5849 = vadd.xlane.f32.xlu0 %v5831_v27  ;;  %5847 = vadd.xlane.f32.xlu1 %v5830_v42  ;;  %v10694_v2 = vsub.f32 %v10597_v63, %v5802_v51 }
0x13c6   : > { %v5778_v61 = vpop.xlane.xlu0 %5777  ;;  %v5780_v58 = vpop.xlane.xlu1 %5779 }
0x13c7   : > { %v5803_v1 = vmul.f32 0.0078125, %v5778_v61  ;;  %v5833_v26 = vmul.f32 %v10691_v25, %v10691_v25  ;;  %v5804_v18 = vmul.f32 0.0078125, %v5780_v58  ;;  %v5834_v63 = vmul.f32 %v10694_v2, %v10694_v2 }
0x13c9   : > { %v10701_v37 = vsub.f32 %v10601_v55, %v5803_v1  ;;  %5851 = vadd.xlane.f32.xlu1 %v5832_v19  ;;  %5853 = vadd.xlane.f32.xlu0 %v5833_v26  ;;  %v10704_v5 = vsub.f32 %v10604_v50, %v5804_v18 }
0x13ca   : > { %v5782_v31 = vpop.xlane.xlu0 %5781  ;;  %v5784_v24 = vpop.xlane.xlu1 %5783 }
0x13cb   : > { %v5805_v21 = vmul.f32 0.0078125, %v5782_v31  ;;  %v5835_v32 = vmul.f32 %v10701_v37, %v10701_v37  ;;  %v5806_v8 = vmul.f32 0.0078125, %v5784_v24  ;;  %v5836_v50 = vmul.f32 %v10704_v5, %v10704_v5 }
0x13cd   : > { %v10711_v40 = vsub.f32 %v10609_v62, %v5805_v21  ;;  %5855 = vadd.xlane.f32.xlu1 %v5834_v63  ;;  %5857 = vadd.xlane.f32.xlu0 %v5835_v32  ;;  %v10714_v55 = vsub.f32 %v10613_v29, %v5806_v8  ;;  %v10755_v8 = vld [vmem:[%s11099_s13] ss:$0 sm:$0xff] }
0x13ce   : > { %v5786_v53 = vpop.xlane.xlu0 %5785  ;;  %v5788_v54 = vpop.xlane.xlu1 %5787 }
0x13cf   : > { %v5807_v12 = vmul.f32 0.0078125, %v5786_v53  ;;  %v5837_v39 = vmul.f32 %v10711_v40, %v10711_v40  ;;  %v5808_v20 = vmul.f32 0.0078125, %v5788_v54  ;;  %v5838_v29 = vmul.f32 %v10714_v55, %v10714_v55 }
0x13d1   : > { %v10721_v49 = vsub.f32 %v10617_v44, %v5807_v12  ;;  %5859 = vadd.xlane.f32.xlu1 %v5836_v50  ;;  %5861 = vadd.xlane.f32.xlu0 %v5837_v39  ;;  %v10724_v62 = vsub.f32 %v10621_v33, %v5808_v20 }
0x13d2   : > { %v5790_v52 = vpop.xlane.xlu0 %5789  ;;  %v5792_v38 = vpop.xlane.xlu1 %5791 }
0x13d3   : > { %v5809_v9 = vmul.f32 0.0078125, %v5790_v52  ;;  %v5839_v3 = vmul.f32 %v10721_v49, %v10721_v49  ;;  %v5810_v48 = vmul.f32 0.0078125, %v5792_v38  ;;  %v5840_v33 = vmul.f32 %v10724_v62, %v10724_v62 }
0x13d5   : > { %v10731_v35 = vsub.f32 %v10625_v41, %v5809_v9  ;;  %5863 = vadd.xlane.f32.xlu1 %v5838_v29  ;;  %5865 = vadd.xlane.f32.xlu0 %v5839_v3  ;;  %v10734_v44 = vsub.f32 %v10628_v6, %v5810_v48  ;;  %v10762_v3 = vld [vmem:[%s11100_s14] ss:$0 sm:$0xff] }
0x13d6   : > { %v5794_v0 = vpop.xlane.xlu0 %5793  ;;  %v5796_v34 = vpop.xlane.xlu1 %5795 }
0x13d7   : > { %v5811_v10 = vmul.f32 0.0078125, %v5794_v0  ;;  %v5841_v23 = vmul.f32 %v10731_v35, %v10731_v35  ;;  %v5812_v36 = vmul.f32 0.0078125, %v5796_v34  ;;  %v5842_v6 = vmul.f32 %v10734_v44, %v10734_v44 }
0x13d9   : > { %v10741_v30 = vsub.f32 %v10633_v16, %v5811_v10  ;;  %5867 = vadd.xlane.f32.xlu1 %v5840_v33  ;;  %5869 = vadd.xlane.f32.xlu0 %v5841_v23  ;;  %v10744_v41 = vsub.f32 %v10636_v60, %v5812_v36 }
0x13db   : > { %v5843_v59 = vmul.f32 %v10741_v30, %v10741_v30  ;;  %v5844_v57 = vmul.f32 %v10744_v41, %v10744_v41 }
0x13dd   : > { %5871 = vadd.xlane.f32.xlu1 %v5842_v6  ;;  %5873 = vadd.xlane.f32.xlu0 %v5843_v59 }
0x13e1   : > { %5875 = vadd.xlane.f32.xlu1 %v5844_v57 }
0x144a   : > { %v5846_v45 = vpop.xlane.xlu0 %5845 }
0x144b   : > { %v5877_v16 = vmul.f32 0.0078125, %v5846_v45 }
0x144d   : > { %v5893_v14 = vadd.f32 1e-05, %v5877_v16 }
0x144e   : > { %v5848_v17 = vpop.xlane.xlu1 %5847  ;;  %v5850_v15 = vpop.xlane.xlu0 %5849 }
0x144f   : > { %7779 = vrsqrt.f32 %v5893_v14  ;;  %v5878_v60 = vmul.f32 0.0078125, %v5848_v17  ;;  %v5879_v46 = vmul.f32 0.0078125, %v5850_v15 }
0x1451   : > { %v5894_v7 = vadd.f32 1e-05, %v5878_v60  ;;  %v5895_v11 = vadd.f32 1e-05, %v5879_v46 }
0x1452   : > { %v5852_v27 = vpop.xlane.xlu1 %5851  ;;  %v5854_v4 = vpop.xlane.xlu0 %5853 }
0x1453   : > { %7781 = vrsqrt.f32 %v5894_v7  ;;  %v5880_v47 = vmul.f32 0.0078125, %v5852_v27  ;;  %v5881_v43 = vmul.f32 0.0078125, %v5854_v4 }
0x1454   : > { %7783 = vrsqrt.f32 %v5895_v11 }
0x1455   : > { %v5896_v42 = vadd.f32 1e-05, %v5880_v47  ;;  %v5897_v51 = vadd.f32 1e-05, %v5881_v43 }
0x1456   : > { %v5856_v19 = vpop.xlane.xlu1 %5855  ;;  %v5858_v61 = vpop.xlane.xlu0 %5857 }
0x1457   : > { %7785 = vrsqrt.f32 %v5896_v42  ;;  %v5882_v58 = vmul.f32 0.0078125, %v5856_v19  ;;  %v5883_v1 = vmul.f32 0.0078125, %v5858_v61 }
0x1458   : > { %7787 = vrsqrt.f32 %v5897_v51 }
0x1459   : > { %v5898_v26 = vadd.f32 1e-05, %v5882_v58  ;;  %v5899_v18 = vadd.f32 1e-05, %v5883_v1 }
0x145a   : > { %v5860_v63 = vpop.xlane.xlu1 %5859  ;;  %v5862_v31 = vpop.xlane.xlu0 %5861 }
0x145b   : > { %7789 = vrsqrt.f32 %v5898_v26  ;;  %v5884_v24 = vmul.f32 0.0078125, %v5860_v63  ;;  %v5885_v21 = vmul.f32 0.0078125, %v5862_v31 }
0x145c   : > { %v7780_v32 = vpop.eup %7779  ;;  %7791 = vrsqrt.f32 %v5899_v18 }
0x145d   : > { %v5925_v50 = vmul.f32 %v7780_v32, %v10673_v22  ;;  %v5900_v53 = vadd.f32 1e-05, %v5884_v24  ;;  %v5901_v54 = vadd.f32 1e-05, %v5885_v21 }
0x145e   : > { %v5864_v12 = vpop.xlane.xlu1 %5863  ;;  %v5866_v39 = vpop.xlane.xlu0 %5865 }
0x145f   : > { %7793 = vrsqrt.f32 %v5900_v53  ;;  %v5886_v20 = vmul.f32 0.0078125, %v5864_v12  ;;  %v5887_v29 = vmul.f32 0.0078125, %v5866_v39  ;;  %v5947_v38 = vmul.f32 %v10755_v8, %v5925_v50 }
0x1460   : > { %v7782_v52 = vpop.eup %7781  ;;  %7795 = vrsqrt.f32 %v5901_v54 }
0x1461   : > { %v7784_v9 = vpop.eup %7783  ;;  %v5926_v48 = vmul.f32 %v7782_v52, %v10681_v13  ;;  %v5902_v22 = vadd.f32 1e-05, %v5886_v20  ;;  %v5903_v33 = vadd.f32 1e-05, %v5887_v29  ;;  %v5969_v57 = vadd.f32 %v10762_v3, %v5947_v38 }
0x1462   : > { %v5927_v0 = vmul.f32 %v7784_v9, %v10676_v28  ;;  %v5868_v34 = vpop.xlane.xlu1 %5867  ;;  %v5870_v10 = vpop.xlane.xlu0 %5869 }
0x1463   : > { %v5948_v23 = vmul.f32 %v10755_v8, %v5926_v48  ;;  %7797 = vrsqrt.f32 %v5902_v22  ;;  %v5888_v36 = vmul.f32 0.0078125, %v5868_v34  ;;  %v5889_v6 = vmul.f32 0.0078125, %v5870_v10 }
0x1464   : > { %v7786_v59 = vpop.eup %7785  ;;  %v5949_v45 = vmul.f32 %v10755_v8, %v5927_v0  ;;  %7799 = vrsqrt.f32 %v5903_v33 }
0x1465   : > { %v7788_v16 = vpop.eup %7787  ;;  %v5970_v13 = vadd.f32 %v10762_v3, %v5948_v23  ;;  %v5928_v14 = vmul.f32 %v7786_v59, %v10684_v56  ;;  %v5904_v17 = vadd.f32 1e-05, %v5888_v36  ;;  %v5905_v28 = vadd.f32 1e-05, %v5889_v6 }
0x1466   : > { %v5929_v15 = vmul.f32 %v7788_v16, %v10691_v25  ;;  %v5872_v60 = vpop.xlane.xlu1 %5871  ;;  %v5874_v46 = vpop.xlane.xlu0 %5873  ;;  %v5971_v56 = vadd.f32 %v10762_v3, %v5949_v45 }
0x1467   : > { %v6470_v7 = vpack.c.bf16 %v5970_v13, %v5969_v57  ;;  %v5950_v11 = vmul.f32 %v10755_v8, %v5928_v14  ;;  %7801 = vrsqrt.f32 %v5904_v17  ;;  %v5890_v27 = vmul.f32 0.0078125, %v5872_v60 }
0x1468   : > { %v7790_v4 = vpop.eup %7789  ;;  %v5951_v47 = vmul.f32 %v10755_v8, %v5929_v15  ;;  %7803 = vrsqrt.f32 %v5905_v28  ;;  %v5891_v43 = vmul.f32 0.0078125, %v5874_v46 }
0x1469   : > { %v7792_v42 = vpop.eup %7791  ;;  %6471 = vst [vmem:[%s11101_s1] sm:$0xff] %v6470_v7   ;;  %v5972_v25 = vadd.f32 %v10762_v3, %v5950_v11  ;;  %v5930_v51 = vmul.f32 %v7790_v4, %v10694_v2  ;;  %v5906_v19 = vadd.f32 1e-05, %v5890_v27 }
0x146a   : > { %v5931_v61 = vmul.f32 %v7792_v42, %v10701_v37  ;;  %v5907_v58 = vadd.f32 1e-05, %v5891_v43  ;;  %v5876_v1 = vpop.xlane.xlu1 %5875  ;;  %v5973_v24 = vadd.f32 %v10762_v3, %v5951_v47 }
0x146b   : > { %v6475_v26 = vpack.c.bf16 %v5972_v25, %v5971_v56  ;;  %v5952_v18 = vmul.f32 %v10755_v8, %v5930_v51  ;;  %7805 = vrsqrt.f32 %v5906_v19  ;;  %v5892_v63 = vmul.f32 0.0078125, %v5876_v1 }
0x146c   : > { %v7794_v31 = vpop.eup %7793  ;;  %7807 = vrsqrt.f32 %v5907_v58  ;;  %v5953_v37 = vmul.f32 %v10755_v8, %v5931_v61 }
0x146d   : > { %v7796_v21 = vpop.eup %7795  ;;  %6507 = vst [vmem:[%s11101_s1 + $0x8] sm:$0xff] %v6475_v26   ;;  %v5974_v2 = vadd.f32 %v10762_v3, %v5952_v18  ;;  %v5932_v32 = vmul.f32 %v7794_v31, %v10704_v5  ;;  %v5908_v50 = vadd.f32 1e-05, %v5892_v63 }
0x146e   : > { %v5933_v53 = vmul.f32 %v7796_v21, %v10711_v40  ;;  %v5975_v29 = vadd.f32 %v10762_v3, %v5953_v37 }
0x146f   : > { %v6480_v54 = vpack.c.bf16 %v5974_v2, %v5973_v24  ;;  %v5954_v12 = vmul.f32 %v10755_v8, %v5932_v32  ;;  %7809 = vrsqrt.f32 %v5908_v50 }
0x1470   : > { %v7798_v39 = vpop.eup %7797  ;;  %v5955_v38 = vmul.f32 %v10755_v8, %v5933_v53 }
0x1471   : > { %v7800_v20 = vpop.eup %7799  ;;  %6508 = vst [vmem:[%s11101_s1 + $0x10] sm:$0xff] %v6480_v54   ;;  %v5976_v52 = vadd.f32 %v10762_v3, %v5954_v12  ;;  %v5934_v5 = vmul.f32 %v7798_v39, %v10714_v55 }
0x1472   : > { %v5935_v40 = vmul.f32 %v7800_v20, %v10721_v49  ;;  %v5977_v0 = vadd.f32 %v10762_v3, %v5955_v38 }
0x1473   : > { %v6485_v9 = vpack.c.bf16 %v5976_v52, %v5975_v29  ;;  %v5956_v48 = vmul.f32 %v10755_v8, %v5934_v5 }
0x1474   : > { %v7802_v22 = vpop.eup %7801  ;;  %v5957_v10 = vmul.f32 %v10755_v8, %v5935_v40 }
0x1475   : > { %v7804_v33 = vpop.eup %7803  ;;  %6509 = vst [vmem:[%s11101_s1 + $0x18] sm:$0xff] %v6485_v9   ;;  %v5978_v34 = vadd.f32 %v10762_v3, %v5956_v48  ;;  %v5936_v23 = vmul.f32 %v7802_v22, %v10724_v62 }
0x1476   : > { %v5937_v55 = vmul.f32 %v7804_v33, %v10731_v35  ;;  %v5979_v57 = vadd.f32 %v10762_v3, %v5957_v10 }
0x1477   : > { %v6490_v49 = vpack.c.bf16 %v5978_v34, %v5977_v0  ;;  %v5958_v36 = vmul.f32 %v10755_v8, %v5936_v23 }
0x1478   : > { %v7806_v6 = vpop.eup %7805  ;;  %v5959_v16 = vmul.f32 %v10755_v8, %v5937_v55 }
0x1479   : > { %v7808_v59 = vpop.eup %7807  ;;  %6510 = vst [vmem:[%s11101_s1 + $0x20] sm:$0xff] %v6490_v49   ;;  %v5980_v45 = vadd.f32 %v10762_v3, %v5958_v36  ;;  %v5938_v13 = vmul.f32 %v7806_v6, %v10734_v44 }
0x147a   : > { %v5939_v62 = vmul.f32 %v7808_v59, %v10741_v30  ;;  %v5981_v28 = vadd.f32 %v10762_v3, %v5959_v16 }
0x147b   : > { %v6495_v35 = vpack.c.bf16 %v5980_v45, %v5979_v57  ;;  %v5960_v14 = vmul.f32 %v10755_v8, %v5938_v13 }
0x147c   : > { %v7810_v17 = vpop.eup %7809  ;;  %v5961_v60 = vmul.f32 %v10755_v8, %v5939_v62 }
0x147d   : > { %6511 = vst [vmem:[%s11101_s1 + $0x28] sm:$0xff] %v6495_v35   ;;  %v5982_v15 = vadd.f32 %v10762_v3, %v5960_v14  ;;  %v5940_v46 = vmul.f32 %v7810_v17, %v10744_v41 }
0x147e   : > { %v5983_v30 = vadd.f32 %v10762_v3, %v5961_v60 }
0x147f   : > { %v6500_v7 = vpack.c.bf16 %v5982_v15, %v5981_v28  ;;  %v5962_v44 = vmul.f32 %v10755_v8, %v5940_v46 }
0x1481   : > { %6512 = vst [vmem:[%s11101_s1 + $0x30] sm:$0xff] %v6500_v7   ;;  %v5984_v11 = vadd.f32 %v10762_v3, %v5962_v44 }
0x1483   : > { %v6505_v27 = vpack.c.bf16 %v5984_v11, %v5983_v30 }
0x1485   : > { %6513 = vst [vmem:[%s11101_s1 + $0x38] sm:$0xff] %v6505_v27  }
0x1486 PF: > { %s11102_s25 = sld [smem:[#allocation4_spill]] }
0x1487   : > { %s11103_s18 = sld [smem:[#allocation3_spill]] }
0x1488   : > { %s11104_s19 = sld [smem:[#allocation5_spill]] }
0x148c   : > { %s25_s20 = sadd.s32 1, %s11102_s25  }
0x148d   : > { %p22_p8 = scmp.ge.s32.totalorder %s25_s20, 4  }
0x148f   :  { %24 = sbr.rel (!%p22_p8) target bundleno = 6 (0x6), region = 155 }

</bundles_post_ra>
